<compile_context>
chip_gen: v7x
topology: tpu7x:2x2x1
jax: 0.10.0
libtpu: 0.0.40
codegen_flags: <defaults>
</compile_context>

<pallas_src>
import math
from functools import partial

import jax
import jax.numpy as jnp
from jax.experimental import pallas as pl
from jax.experimental.pallas import tpu as pltpu

NF = 64  # num_filter in BasicBlock


# ----------------------------------------------------------------------------
# Pallas kernel: one image per grid step.
#   x_D        = conv_D(x_input)                       (single K=9 matmul)
#   x_forward  = conv2_f(relu(conv1_f(x_D)))
#   s          = soft_threshold(x_forward, soft_thr)
#   x_backward = conv2_b(relu(conv1_b(s)))
#   x_G        = conv_G(x_backward)                    (VPU MAC + lane reduce)
#   x_pred     = x_input + x_G
# All 3x3 / padding=1 convs run over a flat zero-haloed scratch pbuf of shape
# (Lbuf, 64): slab position q covers padded rows 1..H, ALL Wp=W+2 columns, so
# every tap read is a contiguous row slice; border-column outputs are masked
# to zero before being written back (that is the conv zero padding).
# ----------------------------------------------------------------------------
def _block_kernel(H, W, xcols_ref, mask_ref, wD_ref, w1f_ref, w2f_ref,
                  w1b_ref, w2b_ref, wG_ref, thr_ref, xpred_ref, pbuf):
    Wp = W + 2
    HWp = H * Wp
    Lbuf = pbuf.shape[0]

    # Zero only the halo rows (top pad row + 1 offset element, bottom pad row
    # + rounding slack).  The interior rows are fully rewritten below.
    pbuf[0:Wp + 1, :] = jnp.zeros((Wp + 1, NF), jnp.float32)
    pbuf[Wp + 1 + HWp:Lbuf, :] = jnp.zeros((Lbuf - (Wp + 1 + HWp), NF),
                                           jnp.float32)

    mask = mask_ref[...]  # (HWp, 1): 0 at padded border columns, 1 elsewhere

    def write_interior(val):
        # val is computed over all HWp slab positions; masking the border
        # columns keeps correct zero padding for the next conv.
        pbuf[Wp + 1:Wp + 1 + HWp, :] = val * mask

    def conv3x3(w_ref):
        # tap (dy, dx) of the 3x3 kernel starts at flat offset dy*Wp + dx:
        # contiguous row slices -> MXU matmuls, accumulated in f32.
        acc = jnp.dot(pbuf[0:HWp, :], w_ref[0],
                      preferred_element_type=jnp.float32)
        for t in range(1, 9):
            dy, dx = divmod(t, 3)
            off = dy * Wp + dx
            acc = acc + jnp.dot(pbuf[off:off + HWp, :], w_ref[t],
                                preferred_element_type=jnp.float32)
        return acc

    xcols = xcols_ref[0]  # (HWp, 9) im2col of the padded x_input
    # conv_D (1 -> 64) as a single (HWp, 9) @ (9, 64) matmul.
    x_D = jnp.dot(xcols, wD_ref[...], preferred_element_type=jnp.float32)

    write_interior(x_D)
    write_interior(jnp.maximum(conv3x3(w1f_ref), 0.0))
    x_forward = conv3x3(w2f_ref)

    # soft threshold: sign(x) * relu(|x| - thr)   (thr is an SMEM scalar)
    thr = thr_ref[0]
    sgn = jnp.where(x_forward > 0.0, 1.0,
                    jnp.where(x_forward < 0.0, -1.0, 0.0))
    s = sgn * jnp.maximum(jnp.abs(x_forward) - thr, 0.0)

    write_interior(s)
    write_interior(jnp.maximum(conv3x3(w1b_ref), 0.0))
    x_backward = conv3x3(w2b_ref)
    write_interior(x_backward)

    # conv_G (64 -> 1): 9 VPU broadcast-MACs + one lane reduction.
    accG = pbuf[0:HWp, :] * wG_ref[0:1]
    for t in range(1, 9):
        dy, dx = divmod(t, 3)
        off = dy * Wp + dx
        accG = accG + pbuf[off:off + HWp, :] * wG_ref[t:t + 1]
    x_G = jnp.sum(accG, axis=-1, keepdims=True)          # (HWp, 1)

    # x_pred over the slab (border columns are cropped by the wrapper).
    xpred_ref[0] = xcols[:, 4:5] + x_G

    # NOTE: the symmetry branch (x_D_est - x_D) of the reference BasicBlock is
    # intentionally dropped: ISTANetPlus.forward discards it.


def basic_block_convs(x_nhw, wD9, w1f, w2f, w1b, w2b, wG9, soft_thr):
    """x_nhw: (N, H, W) f32 -> x_pred (N, H, W) f32."""
    N, H, W = x_nhw.shape
    Wp = W + 2
    HWp = H * Wp
    Lbuf = ((H + 2) * Wp + 2 + 7) // 8 * 8  # flat padded scratch rows

    # im2col of the zero-padded input over the compute slab (rows 1..H, all Wp
    # columns).  Column t=4 (centre tap) is exactly x_input on that slab.
    xpad2 = jnp.pad(x_nhw, ((0, 0), (1, 1), (2, 2)))      # (N, H+2, W+4)
    taps = [xpad2[:, dy:dy + H, dx:dx + Wp]
            for dy in range(3) for dx in range(3)]        # each (N, H, Wp)
    xcols = jnp.stack(taps, axis=-1).reshape(N, HWp, 9)

    # border-column mask for the slab.
    col = jnp.arange(HWp, dtype=jnp.int32) % Wp
    mask = jnp.where((col == 0) | (col == Wp - 1), 0.0, 1.0)
    mask = mask.astype(jnp.float32).reshape(HWp, 1)

    kernel = partial(_block_kernel, H, W)
    xpred = pl.pallas_call(
        kernel,
        grid=(N,),
        in_specs=[
            pl.BlockSpec((1, HWp, 9), lambda n: (n, 0, 0)),
            pl.BlockSpec((HWp, 1), lambda n: (0, 0)),
            pl.BlockSpec((9, NF), lambda n: (0, 0)),
            pl.BlockSpec((9, NF, NF), lambda n: (0, 0, 0)),
            pl.BlockSpec((9, NF, NF), lambda n: (0, 0, 0)),
            pl.BlockSpec((9, NF, NF), lambda n: (0, 0, 0)),
            pl.BlockSpec((9, NF, NF), lambda n: (0, 0, 0)),
            pl.BlockSpec((9, NF), lambda n: (0, 0)),
            pl.BlockSpec(memory_space=pltpu.MemorySpace.SMEM),
        ],
        out_specs=pl.BlockSpec((1, HWp, 1), lambda n: (n, 0, 0)),
        out_shape=jax.ShapeDtypeStruct((N, HWp, 1), jnp.float32),
        scratch_shapes=[pltpu.VMEM((Lbuf, NF), jnp.float32)],
        compiler_params=pltpu.CompilerParams(
            dimension_semantics=("parallel",),
            vmem_limit_bytes=64 * 1024 * 1024),
    )(xcols, mask, wD9, w1f, w2f, w1b, w2b, wG9, soft_thr)

    # crop the padded border columns (done once, in XLA).
    return xpred.reshape(N, H, Wp)[:, :, 1:1 + W]


# ----------------------------------------------------------------------------
# FFT-based pieces (plain JAX glue), reproducing torch semantics exactly.
# Channel dim (size 1) is dropped: fftshift over all dims of (N,H,W) is
# element-for-element identical to torch's (N,1,H,W) behaviour because rolling
# a size-1 axis is a no-op.
# ----------------------------------------------------------------------------
def _forward_operation(img, mask, norm):
    k = jnp.fft.fftshift(jnp.fft.fft2(img, norm=norm))  # shift ALL dims (torch default)
    return k * mask


def _back_operation(k, mask):
    k = mask * k
    return jnp.abs(jnp.fft.ifft2(jnp.fft.ifftshift(k, axes=(-2, -1))))


def update_operation(f_1, k, mask, lambda_step, norm):
    h_1 = k - _forward_operation(f_1, mask, norm)
    return f_1 + lambda_step * _back_operation(h_1, mask)


def dc_layer(x_rec, x_under, mask):
    k_temp = jnp.fft.fftshift(jnp.fft.fft2(x_rec))  # default ('backward') norm
    k_rec_dc = (1.0 - mask) * k_temp + x_under
    return jnp.abs(jnp.fft.ifft2(jnp.fft.ifftshift(k_rec_dc, axes=(-2, -1))))


def ista_net_plus_forward(x, k, m, blocks, norm="ortho"):
    """x: (N,1,H,W) f32, k: (N,1,H,W) complex64, m: (N,1,H,W) f32 -> (N,1,H,W)."""
    N, C, H, W = x.shape
    x = x.reshape(N, H, W)
    k = k.reshape(N, H, W)
    m = m.reshape(N, H, W)
    for blk in blocks:
        x = update_operation(x, k, m, blk["lambda_step"], norm)
        x_input = dc_layer(x, k, m)                     # (N, H, W) f32
        x = basic_block_convs(
            x_input,
            blk["conv_D"], blk["conv1_forward"], blk["conv2_forward"],
            blk["conv1_backward"], blk["conv2_backward"], blk["conv_G"],
            blk["soft_thr"])
    return x.reshape(N, C, H, W)


# ----------------------------------------------------------------------------
# Deterministic parameter construction (xavier_normal).  Weights are stored
# tap-major: (9, Cin, Cout) / (9, Cout).  If real PyTorch checkpoints
# (Cout, Cin, 3, 3) are ever loaded, permute to this layout (no kernel flip —
# torch conv2d is cross-correlation).
# ----------------------------------------------------------------------------
def make_params(key, n_iter):
    def xav(kk, cout, cin):
        fan_in, fan_out = cin * 9, cout * 9
        std = math.sqrt(2.0 / (fan_in + fan_out))
        return (std * jax.random.normal(kk, (9, cin, cout))).astype(jnp.float32)

    blocks = []
    for _ in range(n_iter):
        key, *ks = jax.random.split(key, 7)
        blocks.append(dict(
            lambda_step=jnp.float32(0.5),
            soft_thr=jnp.full((1,), 0.01, jnp.float32),
            conv_D=xav(ks[0], NF, 1).reshape(9, NF),
            conv1_forward=xav(ks[1], NF, NF),
            conv2_forward=xav(ks[2], NF, NF),
            conv1_backward=xav(ks[3], NF, NF),
            conv2_backward=xav(ks[4], NF, NF),
            conv_G=xav(ks[5], 1, NF).reshape(9, NF),
        ))
    return blocks


if __name__ == "__main__":
    N, C, H, W = 2, 1, 16, 16
    n_iter = 8

    key = jax.random.PRNGKey(0)
    k_gt, k_mask, k_par = jax.random.split(key, 3)

    gt = jax.random.normal(k_gt, (N, C, H, W), jnp.float32)
    m = (jax.random.uniform(k_mask, (N, C, H, W)) < 0.35).astype(jnp.float32)
    k_full = jnp.fft.fftshift(jnp.fft.fft2(gt))
    k_under = (m * k_full).astype(jnp.complex64)
    x0 = jnp.abs(jnp.fft.ifft2(jnp.fft.ifftshift(k_under, axes=(-2, -1)))).astype(jnp.float32)

    blocks = make_params(k_par, n_iter)

    fwd = jax.jit(ista_net_plus_forward, static_argnames=("norm",))
    out = fwd(x0, k_under, m, blocks)
    jax.block_until_ready(out)

    assert out.shape == (N, C, H, W), out.shape
    assert bool(jnp.isfinite(out).all())
    print("KERNEL_OK")
</pallas_src>

<mosaic_0001>
module attributes {stable_mosaic.version = 11 : i64} {
  func.func @_block_kernel(%arg0: i32, %arg1: memref<1x288x9xf32, #tpu.memory_space<vmem>>, %arg2: memref<288x1xf32, #tpu.memory_space<vmem>>, %arg3: memref<9x64xf32, #tpu.memory_space<vmem>>, %arg4: memref<9x64x64xf32, #tpu.memory_space<vmem>>, %arg5: memref<9x64x64xf32, #tpu.memory_space<vmem>>, %arg6: memref<9x64x64xf32, #tpu.memory_space<vmem>>, %arg7: memref<9x64x64xf32, #tpu.memory_space<vmem>>, %arg8: memref<9x64xf32, #tpu.memory_space<vmem>>, %arg9: memref<1xf32, #tpu.memory_space<smem>>, %arg10: memref<1x288x1xf32, #tpu.memory_space<vmem>>, %arg11: memref<328x64xf32, #tpu.memory_space<vmem>>) attributes {dimension_semantics = [#tpu.dimension_semantics<parallel>], iteration_bounds = array<i64: 2>, scalar_prefetch = 0 : i64, scratch_operands = 1 : i64, tpu.core_type = #tpu.core_type<tc>, window_params = [{transform_indices = @transform_0, window_bounds = array<i64: 1, 288, 9>}, {pipeline_mode = #tpu.pipeline_mode<synchronous>, transform_indices = @transform_1, window_bounds = array<i64: 288, 1>}, {pipeline_mode = #tpu.pipeline_mode<synchronous>, transform_indices = @transform_2, window_bounds = array<i64: 9, 64>}, {pipeline_mode = #tpu.pipeline_mode<synchronous>, transform_indices = @transform_3, window_bounds = array<i64: 9, 64, 64>}, {pipeline_mode = #tpu.pipeline_mode<synchronous>, transform_indices = @transform_4, window_bounds = array<i64: 9, 64, 64>}, {pipeline_mode = #tpu.pipeline_mode<synchronous>, transform_indices = @transform_5, window_bounds = array<i64: 9, 64, 64>}, {pipeline_mode = #tpu.pipeline_mode<synchronous>, transform_indices = @transform_6, window_bounds = array<i64: 9, 64, 64>}, {pipeline_mode = #tpu.pipeline_mode<synchronous>, transform_indices = @transform_7, window_bounds = array<i64: 9, 64>}, {transform_indices = @transform_8, window_bounds = array<i64: 1>}, {transform_indices = @transform_9, window_bounds = array<i64: 1, 288, 1>}]} {
    %cst = arith.constant 0.000000e+00 : f32
    %0 = vector.broadcast %cst : f32 to vector<19x64xf32>
    %c0 = arith.constant 0 : index
    %c0_0 = arith.constant 0 : index
    %1 = vector.load %arg11[%c0, %c0_0] : memref<328x64xf32, #tpu.memory_space<vmem>>, vector<19x64xf32>
    tpu.vector_store %arg11[%c0, %c0_0], %0 {strides = array<i32>} : memref<328x64xf32, #tpu.memory_space<vmem>>, vector<19x64xf32>,
    %cst_1 = arith.constant 0.000000e+00 : f32
    %2 = vector.broadcast %cst_1 : f32 to vector<21x64xf32>
    %c307 = arith.constant 307 : index
    %c0_2 = arith.constant 0 : index
    %3 = vector.load %arg11[%c307, %c0_2] : memref<328x64xf32, #tpu.memory_space<vmem>>, vector<21x64xf32>
    tpu.vector_store %arg11[%c307, %c0_2], %2 {strides = array<i32>} : memref<328x64xf32, #tpu.memory_space<vmem>>, vector<21x64xf32>,
    %c0_3 = arith.constant 0 : index
    %c0_4 = arith.constant 0 : index
    %4 = vector.load %arg2[%c0_3, %c0_4] : memref<288x1xf32, #tpu.memory_space<vmem>>, vector<288x1xf32>
    %c0_5 = arith.constant 0 : index
    %c0_6 = arith.constant 0 : index
    %c0_7 = arith.constant 0 : index
    %5 = vector.load %arg1[%c0_5, %c0_6, %c0_7] : memref<1x288x9xf32, #tpu.memory_space<vmem>>, vector<1x288x9xf32>
    %6 = vector.shape_cast %5 : vector<1x288x9xf32> to vector<288x9xf32>
    %c0_8 = arith.constant 0 : index
    %c0_9 = arith.constant 0 : index
    %7 = vector.load %arg3[%c0_8, %c0_9] : memref<9x64xf32, #tpu.memory_space<vmem>>, vector<9x64xf32>
    %cst_10 = arith.constant dense<0.000000e+00> : vector<288x64xf32>
    %8 = tpu.matmul %6, %7, %cst_10 {dimension_numbers = #tpu.dot_dimension_numbers<[1], [0], [0], [1], [0, 0, 1, 1], [], []>} : vector<288x9xf32>, vector<9x64xf32>, vector<288x64xf32> -> vector<288x64xf32>
    %9 = vector.broadcast %4 : vector<288x1xf32> to vector<288x64xf32>
    %10 = arith.mulf %8, %9 : vector<288x64xf32>
    %c19 = arith.constant 19 : index
    %c0_11 = arith.constant 0 : index
    %11 = vector.load %arg11[%c19, %c0_11] : memref<328x64xf32, #tpu.memory_space<vmem>>, vector<288x64xf32>
    tpu.vector_store %arg11[%c19, %c0_11], %10 {strides = array<i32>} : memref<328x64xf32, #tpu.memory_space<vmem>>, vector<288x64xf32>,
    %c0_12 = arith.constant 0 : index
    %c0_13 = arith.constant 0 : index
    %12 = vector.load %arg11[%c0_12, %c0_13] : memref<328x64xf32, #tpu.memory_space<vmem>>, vector<288x64xf32>
    %c0_14 = arith.constant 0 : index
    %c0_15 = arith.constant 0 : index
    %c0_16 = arith.constant 0 : index
    %13 = vector.load %arg4[%c0_14, %c0_15, %c0_16] : memref<9x64x64xf32, #tpu.memory_space<vmem>>, vector<1x64x64xf32>
    %14 = vector.shape_cast %13 : vector<1x64x64xf32> to vector<64x64xf32>
    %cst_17 = arith.constant dense<0.000000e+00> : vector<288x64xf32>
    %15 = tpu.matmul %12, %14, %cst_17 {dimension_numbers = #tpu.dot_dimension_numbers<[1], [0], [0], [1], [0, 0, 1, 1], [], []>} : vector<288x64xf32>, vector<64x64xf32>, vector<288x64xf32> -> vector<288x64xf32>
    %c1 = arith.constant 1 : index
    %c0_18 = arith.constant 0 : index
    %16 = vector.load %arg11[%c1, %c0_18] : memref<328x64xf32, #tpu.memory_space<vmem>>, vector<288x64xf32>
    %c1_19 = arith.constant 1 : index
    %c0_20 = arith.constant 0 : index
    %c0_21 = arith.constant 0 : index
    %17 = vector.load %arg4[%c1_19, %c0_20, %c0_21] : memref<9x64x64xf32, #tpu.memory_space<vmem>>, vector<1x64x64xf32>
    %18 = vector.shape_cast %17 : vector<1x64x64xf32> to vector<64x64xf32>
    %cst_22 = arith.constant dense<0.000000e+00> : vector<288x64xf32>
    %19 = tpu.matmul %16, %18, %cst_22 {dimension_numbers = #tpu.dot_dimension_numbers<[1], [0], [0], [1], [0, 0, 1, 1], [], []>} : vector<288x64xf32>, vector<64x64xf32>, vector<288x64xf32> -> vector<288x64xf32>
    %20 = arith.addf %15, %19 : vector<288x64xf32>
    %c2 = arith.constant 2 : index
    %c0_23 = arith.constant 0 : index
    %21 = vector.load %arg11[%c2, %c0_23] : memref<328x64xf32, #tpu.memory_space<vmem>>, vector<288x64xf32>
    %c2_24 = arith.constant 2 : index
    %c0_25 = arith.constant 0 : index
    %c0_26 = arith.constant 0 : index
    %22 = vector.load %arg4[%c2_24, %c0_25, %c0_26] : memref<9x64x64xf32, #tpu.memory_space<vmem>>, vector<1x64x64xf32>
    %23 = vector.shape_cast %22 : vector<1x64x64xf32> to vector<64x64xf32>
    %cst_27 = arith.constant dense<0.000000e+00> : vector<288x64xf32>
    %24 = tpu.matmul %21, %23, %cst_27 {dimension_numbers = #tpu.dot_dimension_numbers<[1], [0], [0], [1], [0, 0, 1, 1], [], []>} : vector<288x64xf32>, vector<64x64xf32>, vector<288x64xf32> -> vector<288x64xf32>
    %25 = arith.addf %20, %24 : vector<288x64xf32>
    %c18 = arith.constant 18 : index
    %c0_28 = arith.constant 0 : index
    %26 = vector.load %arg11[%c18, %c0_28] : memref<328x64xf32, #tpu.memory_space<vmem>>, vector<288x64xf32>
    %c3 = arith.constant 3 : index
    %c0_29 = arith.constant 0 : index
    %c0_30 = arith.constant 0 : index
    %27 = vector.load %arg4[%c3, %c0_29, %c0_30] : memref<9x64x64xf32, #tpu.memory_space<vmem>>, vector<1x64x64xf32>
    %28 = vector.shape_cast %27 : vector<1x64x64xf32> to vector<64x64xf32>
    %cst_31 = arith.constant dense<0.000000e+00> : vector<288x64xf32>
    %29 = tpu.matmul %26, %28, %cst_31 {dimension_numbers = #tpu.dot_dimension_numbers<[1], [0], [0], [1], [0, 0, 1, 1], [], []>} : vector<288x64xf32>, vector<64x64xf32>, vector<288x64xf32> -> vector<288x64xf32>
    %30 = arith.addf %25, %29 : vector<288x64xf32>
    %c19_32 = arith.constant 19 : index
    %c0_33 = arith.constant 0 : index
    %31 = vector.load %arg11[%c19_32, %c0_33] : memref<328x64xf32, #tpu.memory_space<vmem>>, vector<288x64xf32>
    %c4 = arith.constant 4 : index
    %c0_34 = arith.constant 0 : index
    %c0_35 = arith.constant 0 : index
    %32 = vector.load %arg4[%c4, %c0_34, %c0_35] : memref<9x64x64xf32, #tpu.memory_space<vmem>>, vector<1x64x64xf32>
    %33 = vector.shape_cast %32 : vector<1x64x64xf32> to vector<64x64xf32>
    %cst_36 = arith.constant dense<0.000000e+00> : vector<288x64xf32>
    %34 = tpu.matmul %31, %33, %cst_36 {dimension_numbers = #tpu.dot_dimension_numbers<[1], [0], [0], [1], [0, 0, 1, 1], [], []>} : vector<288x64xf32>, vector<64x64xf32>, vector<288x64xf32> -> vector<288x64xf32>
    %35 = arith.addf %30, %34 : vector<288x64xf32>
    %c20 = arith.constant 20 : index
    %c0_37 = arith.constant 0 : index
    %36 = vector.load %arg11[%c20, %c0_37] : memref<328x64xf32, #tpu.memory_space<vmem>>, vector<288x64xf32>
    %c5 = arith.constant 5 : index
    %c0_38 = arith.constant 0 : index
    %c0_39 = arith.constant 0 : index
    %37 = vector.load %arg4[%c5, %c0_38, %c0_39] : memref<9x64x64xf32, #tpu.memory_space<vmem>>, vector<1x64x64xf32>
    %38 = vector.shape_cast %37 : vector<1x64x64xf32> to vector<64x64xf32>
    %cst_40 = arith.constant dense<0.000000e+00> : vector<288x64xf32>
    %39 = tpu.matmul %36, %38, %cst_40 {dimension_numbers = #tpu.dot_dimension_numbers<[1], [0], [0], [1], [0, 0, 1, 1], [], []>} : vector<288x64xf32>, vector<64x64xf32>, vector<288x64xf32> -> vector<288x64xf32>
    %40 = arith.addf %35, %39 : vector<288x64xf32>
    %c36 = arith.constant 36 : index
    %c0_41 = arith.constant 0 : index
    %41 = vector.load %arg11[%c36, %c0_41] : memref<328x64xf32, #tpu.memory_space<vmem>>, vector<288x64xf32>
    %c6 = arith.constant 6 : index
    %c0_42 = arith.constant 0 : index
    %c0_43 = arith.constant 0 : index
    %42 = vector.load %arg4[%c6, %c0_42, %c0_43] : memref<9x64x64xf32, #tpu.memory_space<vmem>>, vector<1x64x64xf32>
    %43 = vector.shape_cast %42 : vector<1x64x64xf32> to vector<64x64xf32>
    %cst_44 = arith.constant dense<0.000000e+00> : vector<288x64xf32>
    %44 = tpu.matmul %41, %43, %cst_44 {dimension_numbers = #tpu.dot_dimension_numbers<[1], [0], [0], [1], [0, 0, 1, 1], [], []>} : vector<288x64xf32>, vector<64x64xf32>, vector<288x64xf32> -> vector<288x64xf32>
    %45 = arith.addf %40, %44 : vector<288x64xf32>
    %c37 = arith.constant 37 : index
    %c0_45 = arith.constant 0 : index
    %46 = vector.load %arg11[%c37, %c0_45] : memref<328x64xf32, #tpu.memory_space<vmem>>, vector<288x64xf32>
    %c7 = arith.constant 7 : index
    %c0_46 = arith.constant 0 : index
    %c0_47 = arith.constant 0 : index
    %47 = vector.load %arg4[%c7, %c0_46, %c0_47] : memref<9x64x64xf32, #tpu.memory_space<vmem>>, vector<1x64x64xf32>
    %48 = vector.shape_cast %47 : vector<1x64x64xf32> to vector<64x64xf32>
    %cst_48 = arith.constant dense<0.000000e+00> : vector<288x64xf32>
    %49 = tpu.matmul %46, %48, %cst_48 {dimension_numbers = #tpu.dot_dimension_numbers<[1], [0], [0], [1], [0, 0, 1, 1], [], []>} : vector<288x64xf32>, vector<64x64xf32>, vector<288x64xf32> -> vector<288x64xf32>
    %50 = arith.addf %45, %49 : vector<288x64xf32>
    %c38 = arith.constant 38 : index
    %c0_49 = arith.constant 0 : index
    %51 = vector.load %arg11[%c38, %c0_49] : memref<328x64xf32, #tpu.memory_space<vmem>>, vector<288x64xf32>
    %c8 = arith.constant 8 : index
    %c0_50 = arith.constant 0 : index
    %c0_51 = arith.constant 0 : index
    %52 = vector.load %arg4[%c8, %c0_50, %c0_51] : memref<9x64x64xf32, #tpu.memory_space<vmem>>, vector<1x64x64xf32>
    %53 = vector.shape_cast %52 : vector<1x64x64xf32> to vector<64x64xf32>
    %cst_52 = arith.constant dense<0.000000e+00> : vector<288x64xf32>
    %54 = tpu.matmul %51, %53, %cst_52 {dimension_numbers = #tpu.dot_dimension_numbers<[1], [0], [0], [1], [0, 0, 1, 1], [], []>} : vector<288x64xf32>, vector<64x64xf32>, vector<288x64xf32> -> vector<288x64xf32>
    %55 = arith.addf %50, %54 : vector<288x64xf32>
    %cst_53 = arith.constant 0.000000e+00 : f32
    %56 = vector.broadcast %cst_53 : f32 to vector<288x64xf32>
    %57 = arith.maximumf %55, %56 : vector<288x64xf32>
    %58 = vector.broadcast %4 : vector<288x1xf32> to vector<288x64xf32>
    %59 = arith.mulf %57, %58 : vector<288x64xf32>
    %c19_54 = arith.constant 19 : index
    %c0_55 = arith.constant 0 : index
    %60 = vector.load %arg11[%c19_54, %c0_55] : memref<328x64xf32, #tpu.memory_space<vmem>>, vector<288x64xf32>
    tpu.vector_store %arg11[%c19_54, %c0_55], %59 {strides = array<i32>} : memref<328x64xf32, #tpu.memory_space<vmem>>, vector<288x64xf32>,
    %c0_56 = arith.constant 0 : index
    %c0_57 = arith.constant 0 : index
    %61 = vector.load %arg11[%c0_56, %c0_57] : memref<328x64xf32, #tpu.memory_space<vmem>>, vector<288x64xf32>
    %c0_58 = arith.constant 0 : index
    %c0_59 = arith.constant 0 : index
    %c0_60 = arith.constant 0 : index
    %62 = vector.load %arg5[%c0_58, %c0_59, %c0_60] : memref<9x64x64xf32, #tpu.memory_space<vmem>>, vector<1x64x64xf32>
    %63 = vector.shape_cast %62 : vector<1x64x64xf32> to vector<64x64xf32>
    %cst_61 = arith.constant dense<0.000000e+00> : vector<288x64xf32>
    %64 = tpu.matmul %61, %63, %cst_61 {dimension_numbers = #tpu.dot_dimension_numbers<[1], [0], [0], [1], [0, 0, 1, 1], [], []>} : vector<288x64xf32>, vector<64x64xf32>, vector<288x64xf32> -> vector<288x64xf32>
    %c1_62 = arith.constant 1 : index
    %c0_63 = arith.constant 0 : index
    %65 = vector.load %arg11[%c1_62, %c0_63] : memref<328x64xf32, #tpu.memory_space<vmem>>, vector<288x64xf32>
    %c1_64 = arith.constant 1 : index
    %c0_65 = arith.constant 0 : index
    %c0_66 = arith.constant 0 : index
    %66 = vector.load %arg5[%c1_64, %c0_65, %c0_66] : memref<9x64x64xf32, #tpu.memory_space<vmem>>, vector<1x64x64xf32>
    %67 = vector.shape_cast %66 : vector<1x64x64xf32> to vector<64x64xf32>
    %cst_67 = arith.constant dense<0.000000e+00> : vector<288x64xf32>
    %68 = tpu.matmul %65, %67, %cst_67 {dimension_numbers = #tpu.dot_dimension_numbers<[1], [0], [0], [1], [0, 0, 1, 1], [], []>} : vector<288x64xf32>, vector<64x64xf32>, vector<288x64xf32> -> vector<288x64xf32>
    %69 = arith.addf %64, %68 : vector<288x64xf32>
    %c2_68 = arith.constant 2 : index
    %c0_69 = arith.constant 0 : index
    %70 = vector.load %arg11[%c2_68, %c0_69] : memref<328x64xf32, #tpu.memory_space<vmem>>, vector<288x64xf32>
    %c2_70 = arith.constant 2 : index
    %c0_71 = arith.constant 0 : index
    %c0_72 = arith.constant 0 : index
    %71 = vector.load %arg5[%c2_70, %c0_71, %c0_72] : memref<9x64x64xf32, #tpu.memory_space<vmem>>, vector<1x64x64xf32>
    %72 = vector.shape_cast %71 : vector<1x64x64xf32> to vector<64x64xf32>
    %cst_73 = arith.constant dense<0.000000e+00> : vector<288x64xf32>
    %73 = tpu.matmul %70, %72, %cst_73 {dimension_numbers = #tpu.dot_dimension_numbers<[1], [0], [0], [1], [0, 0, 1, 1], [], []>} : vector<288x64xf32>, vector<64x64xf32>, vector<288x64xf32> -> vector<288x64xf32>
    %74 = arith.addf %69, %73 : vector<288x64xf32>
    %c18_74 = arith.constant 18 : index
    %c0_75 = arith.constant 0 : index
    %75 = vector.load %arg11[%c18_74, %c0_75] : memref<328x64xf32, #tpu.memory_space<vmem>>, vector<288x64xf32>
    %c3_76 = arith.constant 3 : index
    %c0_77 = arith.constant 0 : index
    %c0_78 = arith.constant 0 : index
    %76 = vector.load %arg5[%c3_76, %c0_77, %c0_78] : memref<9x64x64xf32, #tpu.memory_space<vmem>>, vector<1x64x64xf32>
    %77 = vector.shape_cast %76 : vector<1x64x64xf32> to vector<64x64xf32>
    %cst_79 = arith.constant dense<0.000000e+00> : vector<288x64xf32>
    %78 = tpu.matmul %75, %77, %cst_79 {dimension_numbers = #tpu.dot_dimension_numbers<[1], [0], [0], [1], [0, 0, 1, 1], [], []>} : vector<288x64xf32>, vector<64x64xf32>, vector<288x64xf32> -> vector<288x64xf32>
    %79 = arith.addf %74, %78 : vector<288x64xf32>
    %c19_80 = arith.constant 19 : index
    %c0_81 = arith.constant 0 : index
    %80 = vector.load %arg11[%c19_80, %c0_81] : memref<328x64xf32, #tpu.memory_space<vmem>>, vector<288x64xf32>
    %c4_82 = arith.constant 4 : index
    %c0_83 = arith.constant 0 : index
    %c0_84 = arith.constant 0 : index
    %81 = vector.load %arg5[%c4_82, %c0_83, %c0_84] : memref<9x64x64xf32, #tpu.memory_space<vmem>>, vector<1x64x64xf32>
    %82 = vector.shape_cast %81 : vector<1x64x64xf32> to vector<64x64xf32>
    %cst_85 = arith.constant dense<0.000000e+00> : vector<288x64xf32>
    %83 = tpu.matmul %80, %82, %cst_85 {dimension_numbers = #tpu.dot_dimension_numbers<[1], [0], [0], [1], [0, 0, 1, 1], [], []>} : vector<288x64xf32>, vector<64x64xf32>, vector<288x64xf32> -> vector<288x64xf32>
    %84 = arith.addf %79, %83 : vector<288x64xf32>
    %c20_86 = arith.constant 20 : index
    %c0_87 = arith.constant 0 : index
    %85 = vector.load %arg11[%c20_86, %c0_87] : memref<328x64xf32, #tpu.memory_space<vmem>>, vector<288x64xf32>
    %c5_88 = arith.constant 5 : index
    %c0_89 = arith.constant 0 : index
    %c0_90 = arith.constant 0 : index
    %86 = vector.load %arg5[%c5_88, %c0_89, %c0_90] : memref<9x64x64xf32, #tpu.memory_space<vmem>>, vector<1x64x64xf32>
    %87 = vector.shape_cast %86 : vector<1x64x64xf32> to vector<64x64xf32>
    %cst_91 = arith.constant dense<0.000000e+00> : vector<288x64xf32>
    %88 = tpu.matmul %85, %87, %cst_91 {dimension_numbers = #tpu.dot_dimension_numbers<[1], [0], [0], [1], [0, 0, 1, 1], [], []>} : vector<288x64xf32>, vector<64x64xf32>, vector<288x64xf32> -> vector<288x64xf32>
    %89 = arith.addf %84, %88 : vector<288x64xf32>
    %c36_92 = arith.constant 36 : index
    %c0_93 = arith.constant 0 : index
    %90 = vector.load %arg11[%c36_92, %c0_93] : memref<328x64xf32, #tpu.memory_space<vmem>>, vector<288x64xf32>
    %c6_94 = arith.constant 6 : index
    %c0_95 = arith.constant 0 : index
    %c0_96 = arith.constant 0 : index
    %91 = vector.load %arg5[%c6_94, %c0_95, %c0_96] : memref<9x64x64xf32, #tpu.memory_space<vmem>>, vector<1x64x64xf32>
    %92 = vector.shape_cast %91 : vector<1x64x64xf32> to vector<64x64xf32>
    %cst_97 = arith.constant dense<0.000000e+00> : vector<288x64xf32>
    %93 = tpu.matmul %90, %92, %cst_97 {dimension_numbers = #tpu.dot_dimension_numbers<[1], [0], [0], [1], [0, 0, 1, 1], [], []>} : vector<288x64xf32>, vector<64x64xf32>, vector<288x64xf32> -> vector<288x64xf32>
    %94 = arith.addf %89, %93 : vector<288x64xf32>
    %c37_98 = arith.constant 37 : index
    %c0_99 = arith.constant 0 : index
    %95 = vector.load %arg11[%c37_98, %c0_99] : memref<328x64xf32, #tpu.memory_space<vmem>>, vector<288x64xf32>
    %c7_100 = arith.constant 7 : index
    %c0_101 = arith.constant 0 : index
    %c0_102 = arith.constant 0 : index
    %96 = vector.load %arg5[%c7_100, %c0_101, %c0_102] : memref<9x64x64xf32, #tpu.memory_space<vmem>>, vector<1x64x64xf32>
    %97 = vector.shape_cast %96 : vector<1x64x64xf32> to vector<64x64xf32>
    %cst_103 = arith.constant dense<0.000000e+00> : vector<288x64xf32>
    %98 = tpu.matmul %95, %97, %cst_103 {dimension_numbers = #tpu.dot_dimension_numbers<[1], [0], [0], [1], [0, 0, 1, 1], [], []>} : vector<288x64xf32>, vector<64x64xf32>, vector<288x64xf32> -> vector<288x64xf32>
    %99 = arith.addf %94, %98 : vector<288x64xf32>
    %c38_104 = arith.constant 38 : index
    %c0_105 = arith.constant 0 : index
    %100 = vector.load %arg11[%c38_104, %c0_105] : memref<328x64xf32, #tpu.memory_space<vmem>>, vector<288x64xf32>
    %c8_106 = arith.constant 8 : index
    %c0_107 = arith.constant 0 : index
    %c0_108 = arith.constant 0 : index
    %101 = vector.load %arg5[%c8_106, %c0_107, %c0_108] : memref<9x64x64xf32, #tpu.memory_space<vmem>>, vector<1x64x64xf32>
    %102 = vector.shape_cast %101 : vector<1x64x64xf32> to vector<64x64xf32>
    %cst_109 = arith.constant dense<0.000000e+00> : vector<288x64xf32>
    %103 = tpu.matmul %100, %102, %cst_109 {dimension_numbers = #tpu.dot_dimension_numbers<[1], [0], [0], [1], [0, 0, 1, 1], [], []>} : vector<288x64xf32>, vector<64x64xf32>, vector<288x64xf32> -> vector<288x64xf32>
    %104 = arith.addf %99, %103 : vector<288x64xf32>
    %c0_110 = arith.constant 0 : index
    %105 = memref.load %arg9[%c0_110] : memref<1xf32, #tpu.memory_space<smem>>
    %cst_111 = arith.constant 0.000000e+00 : f32
    %106 = vector.broadcast %cst_111 : f32 to vector<288x64xf32>
    %107 = arith.cmpf ogt, %104, %106 : vector<288x64xf32>
    %cst_112 = arith.constant 0.000000e+00 : f32
    %108 = vector.broadcast %cst_112 : f32 to vector<288x64xf32>
    %109 = arith.cmpf olt, %104, %108 : vector<288x64xf32>
    %cst_113 = arith.constant -1.000000e+00 : f32
    %cst_114 = arith.constant 0.000000e+00 : f32
    %110 = vector.broadcast %cst_113 : f32 to vector<288x64xf32>
    %111 = vector.broadcast %cst_114 : f32 to vector<288x64xf32>
    %112 = arith.select %109, %110, %111 : vector<288x64xi1>, vector<288x64xf32>
    %cst_115 = arith.constant 1.000000e+00 : f32
    %113 = vector.broadcast %cst_115 : f32 to vector<288x64xf32>
    %114 = arith.select %107, %113, %112 : vector<288x64xi1>, vector<288x64xf32>
    %115 = math.absf %104 : vector<288x64xf32>
    %116 = vector.broadcast %105 : f32 to vector<288x64xf32>
    %117 = arith.subf %115, %116 : vector<288x64xf32>
    %cst_116 = arith.constant 0.000000e+00 : f32
    %118 = vector.broadcast %cst_116 : f32 to vector<288x64xf32>
    %119 = arith.maximumf %117, %118 : vector<288x64xf32>
    %120 = arith.mulf %114, %119 : vector<288x64xf32>
    %121 = vector.broadcast %4 : vector<288x1xf32> to vector<288x64xf32>
    %122 = arith.mulf %120, %121 : vector<288x64xf32>
    %c19_117 = arith.constant 19 : index
    %c0_118 = arith.constant 0 : index
    %123 = vector.load %arg11[%c19_117, %c0_118] : memref<328x64xf32, #tpu.memory_space<vmem>>, vector<288x64xf32>
    tpu.vector_store %arg11[%c19_117, %c0_118], %122 {strides = array<i32>} : memref<328x64xf32, #tpu.memory_space<vmem>>, vector<288x64xf32>,
    %c0_119 = arith.constant 0 : index
    %c0_120 = arith.constant 0 : index
    %124 = vector.load %arg11[%c0_119, %c0_120] : memref<328x64xf32, #tpu.memory_space<vmem>>, vector<288x64xf32>
    %c0_121 = arith.constant 0 : index
    %c0_122 = arith.constant 0 : index
    %c0_123 = arith.constant 0 : index
    %125 = vector.load %arg6[%c0_121, %c0_122, %c0_123] : memref<9x64x64xf32, #tpu.memory_space<vmem>>, vector<1x64x64xf32>
    %126 = vector.shape_cast %125 : vector<1x64x64xf32> to vector<64x64xf32>
    %cst_124 = arith.constant dense<0.000000e+00> : vector<288x64xf32>
    %127 = tpu.matmul %124, %126, %cst_124 {dimension_numbers = #tpu.dot_dimension_numbers<[1], [0], [0], [1], [0, 0, 1, 1], [], []>} : vector<288x64xf32>, vector<64x64xf32>, vector<288x64xf32> -> vector<288x64xf32>
    %c1_125 = arith.constant 1 : index
    %c0_126 = arith.constant 0 : index
    %128 = vector.load %arg11[%c1_125, %c0_126] : memref<328x64xf32, #tpu.memory_space<vmem>>, vector<288x64xf32>
    %c1_127 = arith.constant 1 : index
    %c0_128 = arith.constant 0 : index
    %c0_129 = arith.constant 0 : index
    %129 = vector.load %arg6[%c1_127, %c0_128, %c0_129] : memref<9x64x64xf32, #tpu.memory_space<vmem>>, vector<1x64x64xf32>
    %130 = vector.shape_cast %129 : vector<1x64x64xf32> to vector<64x64xf32>
    %cst_130 = arith.constant dense<0.000000e+00> : vector<288x64xf32>
    %131 = tpu.matmul %128, %130, %cst_130 {dimension_numbers = #tpu.dot_dimension_numbers<[1], [0], [0], [1], [0, 0, 1, 1], [], []>} : vector<288x64xf32>, vector<64x64xf32>, vector<288x64xf32> -> vector<288x64xf32>
    %132 = arith.addf %127, %131 : vector<288x64xf32>
    %c2_131 = arith.constant 2 : index
    %c0_132 = arith.constant 0 : index
    %133 = vector.load %arg11[%c2_131, %c0_132] : memref<328x64xf32, #tpu.memory_space<vmem>>, vector<288x64xf32>
    %c2_133 = arith.constant 2 : index
    %c0_134 = arith.constant 0 : index
    %c0_135 = arith.constant 0 : index
    %134 = vector.load %arg6[%c2_133, %c0_134, %c0_135] : memref<9x64x64xf32, #tpu.memory_space<vmem>>, vector<1x64x64xf32>
    %135 = vector.shape_cast %134 : vector<1x64x64xf32> to vector<64x64xf32>
    %cst_136 = arith.constant dense<0.000000e+00> : vector<288x64xf32>
    %136 = tpu.matmul %133, %135, %cst_136 {dimension_numbers = #tpu.dot_dimension_numbers<[1], [0], [0], [1], [0, 0, 1, 1], [], []>} : vector<288x64xf32>, vector<64x64xf32>, vector<288x64xf32> -> vector<288x64xf32>
    %137 = arith.addf %132, %136 : vector<288x64xf32>
    %c18_137 = arith.constant 18 : index
    %c0_138 = arith.constant 0 : index
    %138 = vector.load %arg11[%c18_137, %c0_138] : memref<328x64xf32, #tpu.memory_space<vmem>>, vector<288x64xf32>
    %c3_139 = arith.constant 3 : index
    %c0_140 = arith.constant 0 : index
    %c0_141 = arith.constant 0 : index
    %139 = vector.load %arg6[%c3_139, %c0_140, %c0_141] : memref<9x64x64xf32, #tpu.memory_space<vmem>>, vector<1x64x64xf32>
    %140 = vector.shape_cast %139 : vector<1x64x64xf32> to vector<64x64xf32>
    %cst_142 = arith.constant dense<0.000000e+00> : vector<288x64xf32>
    %141 = tpu.matmul %138, %140, %cst_142 {dimension_numbers = #tpu.dot_dimension_numbers<[1], [0], [0], [1], [0, 0, 1, 1], [], []>} : vector<288x64xf32>, vector<64x64xf32>, vector<288x64xf32> -> vector<288x64xf32>
    %142 = arith.addf %137, %141 : vector<288x64xf32>
    %c19_143 = arith.constant 19 : index
    %c0_144 = arith.constant 0 : index
    %143 = vector.load %arg11[%c19_143, %c0_144] : memref<328x64xf32, #tpu.memory_space<vmem>>, vector<288x64xf32>
    %c4_145 = arith.constant 4 : index
    %c0_146 = arith.constant 0 : index
    %c0_147 = arith.constant 0 : index
    %144 = vector.load %arg6[%c4_145, %c0_146, %c0_147] : memref<9x64x64xf32, #tpu.memory_space<vmem>>, vector<1x64x64xf32>
    %145 = vector.shape_cast %144 : vector<1x64x64xf32> to vector<64x64xf32>
    %cst_148 = arith.constant dense<0.000000e+00> : vector<288x64xf32>
    %146 = tpu.matmul %143, %145, %cst_148 {dimension_numbers = #tpu.dot_dimension_numbers<[1], [0], [0], [1], [0, 0, 1, 1], [], []>} : vector<288x64xf32>, vector<64x64xf32>, vector<288x64xf32> -> vector<288x64xf32>
    %147 = arith.addf %142, %146 : vector<288x64xf32>
    %c20_149 = arith.constant 20 : index
    %c0_150 = arith.constant 0 : index
    %148 = vector.load %arg11[%c20_149, %c0_150] : memref<328x64xf32, #tpu.memory_space<vmem>>, vector<288x64xf32>
    %c5_151 = arith.constant 5 : index
    %c0_152 = arith.constant 0 : index
    %c0_153 = arith.constant 0 : index
    %149 = vector.load %arg6[%c5_151, %c0_152, %c0_153] : memref<9x64x64xf32, #tpu.memory_space<vmem>>, vector<1x64x64xf32>
    %150 = vector.shape_cast %149 : vector<1x64x64xf32> to vector<64x64xf32>
    %cst_154 = arith.constant dense<0.000000e+00> : vector<288x64xf32>
    %151 = tpu.matmul %148, %150, %cst_154 {dimension_numbers = #tpu.dot_dimension_numbers<[1], [0], [0], [1], [0, 0, 1, 1], [], []>} : vector<288x64xf32>, vector<64x64xf32>, vector<288x64xf32> -> vector<288x64xf32>
    %152 = arith.addf %147, %151 : vector<288x64xf32>
    %c36_155 = arith.constant 36 : index
    %c0_156 = arith.constant 0 : index
    %153 = vector.load %arg11[%c36_155, %c0_156] : memref<328x64xf32, #tpu.memory_space<vmem>>, vector<288x64xf32>
    %c6_157 = arith.constant 6 : index
    %c0_158 = arith.constant 0 : index
    %c0_159 = arith.constant 0 : index
    %154 = vector.load %arg6[%c6_157, %c0_158, %c0_159] : memref<9x64x64xf32, #tpu.memory_space<vmem>>, vector<1x64x64xf32>
    %155 = vector.shape_cast %154 : vector<1x64x64xf32> to vector<64x64xf32>
    %cst_160 = arith.constant dense<0.000000e+00> : vector<288x64xf32>
    %156 = tpu.matmul %153, %155, %cst_160 {dimension_numbers = #tpu.dot_dimension_numbers<[1], [0], [0], [1], [0, 0, 1, 1], [], []>} : vector<288x64xf32>, vector<64x64xf32>, vector<288x64xf32> -> vector<288x64xf32>
    %157 = arith.addf %152, %156 : vector<288x64xf32>
    %c37_161 = arith.constant 37 : index
    %c0_162 = arith.constant 0 : index
    %158 = vector.load %arg11[%c37_161, %c0_162] : memref<328x64xf32, #tpu.memory_space<vmem>>, vector<288x64xf32>
    %c7_163 = arith.constant 7 : index
    %c0_164 = arith.constant 0 : index
    %c0_165 = arith.constant 0 : index
    %159 = vector.load %arg6[%c7_163, %c0_164, %c0_165] : memref<9x64x64xf32, #tpu.memory_space<vmem>>, vector<1x64x64xf32>
    %160 = vector.shape_cast %159 : vector<1x64x64xf32> to vector<64x64xf32>
    %cst_166 = arith.constant dense<0.000000e+00> : vector<288x64xf32>
    %161 = tpu.matmul %158, %160, %cst_166 {dimension_numbers = #tpu.dot_dimension_numbers<[1], [0], [0], [1], [0, 0, 1, 1], [], []>} : vector<288x64xf32>, vector<64x64xf32>, vector<288x64xf32> -> vector<288x64xf32>
    %162 = arith.addf %157, %161 : vector<288x64xf32>
    %c38_167 = arith.constant 38 : index
    %c0_168 = arith.constant 0 : index
    %163 = vector.load %arg11[%c38_167, %c0_168] : memref<328x64xf32, #tpu.memory_space<vmem>>, vector<288x64xf32>
    %c8_169 = arith.constant 8 : index
    %c0_170 = arith.constant 0 : index
    %c0_171 = arith.constant 0 : index
    %164 = vector.load %arg6[%c8_169, %c0_170, %c0_171] : memref<9x64x64xf32, #tpu.memory_space<vmem>>, vector<1x64x64xf32>
    %165 = vector.shape_cast %164 : vector<1x64x64xf32> to vector<64x64xf32>
    %cst_172 = arith.constant dense<0.000000e+00> : vector<288x64xf32>
    %166 = tpu.matmul %163, %165, %cst_172 {dimension_numbers = #tpu.dot_dimension_numbers<[1], [0], [0], [1], [0, 0, 1, 1], [], []>} : vector<288x64xf32>, vector<64x64xf32>, vector<288x64xf32> -> vector<288x64xf32>
    %167 = arith.addf %162, %166 : vector<288x64xf32>
    %cst_173 = arith.constant 0.000000e+00 : f32
    %168 = vector.broadcast %cst_173 : f32 to vector<288x64xf32>
    %169 = arith.maximumf %167, %168 : vector<288x64xf32>
    %170 = vector.broadcast %4 : vector<288x1xf32> to vector<288x64xf32>
    %171 = arith.mulf %169, %170 : vector<288x64xf32>
    %c19_174 = arith.constant 19 : index
    %c0_175 = arith.constant 0 : index
    %172 = vector.load %arg11[%c19_174, %c0_175] : memref<328x64xf32, #tpu.memory_space<vmem>>, vector<288x64xf32>
    tpu.vector_store %arg11[%c19_174, %c0_175], %171 {strides = array<i32>} : memref<328x64xf32, #tpu.memory_space<vmem>>, vector<288x64xf32>,
    %c0_176 = arith.constant 0 : index
    %c0_177 = arith.constant 0 : index
    %173 = vector.load %arg11[%c0_176, %c0_177] : memref<328x64xf32, #tpu.memory_space<vmem>>, vector<288x64xf32>
    %c0_178 = arith.constant 0 : index
    %c0_179 = arith.constant 0 : index
    %c0_180 = arith.constant 0 : index
    %174 = vector.load %arg7[%c0_178, %c0_179, %c0_180] : memref<9x64x64xf32, #tpu.memory_space<vmem>>, vector<1x64x64xf32>
    %175 = vector.shape_cast %174 : vector<1x64x64xf32> to vector<64x64xf32>
    %cst_181 = arith.constant dense<0.000000e+00> : vector<288x64xf32>
    %176 = tpu.matmul %173, %175, %cst_181 {dimension_numbers = #tpu.dot_dimension_numbers<[1], [0], [0], [1], [0, 0, 1, 1], [], []>} : vector<288x64xf32>, vector<64x64xf32>, vector<288x64xf32> -> vector<288x64xf32>
    %c1_182 = arith.constant 1 : index
    %c0_183 = arith.constant 0 : index
    %177 = vector.load %arg11[%c1_182, %c0_183] : memref<328x64xf32, #tpu.memory_space<vmem>>, vector<288x64xf32>
    %c1_184 = arith.constant 1 : index
    %c0_185 = arith.constant 0 : index
    %c0_186 = arith.constant 0 : index
    %178 = vector.load %arg7[%c1_184, %c0_185, %c0_186] : memref<9x64x64xf32, #tpu.memory_space<vmem>>, vector<1x64x64xf32>
    %179 = vector.shape_cast %178 : vector<1x64x64xf32> to vector<64x64xf32>
    %cst_187 = arith.constant dense<0.000000e+00> : vector<288x64xf32>
    %180 = tpu.matmul %177, %179, %cst_187 {dimension_numbers = #tpu.dot_dimension_numbers<[1], [0], [0], [1], [0, 0, 1, 1], [], []>} : vector<288x64xf32>, vector<64x64xf32>, vector<288x64xf32> -> vector<288x64xf32>
    %181 = arith.addf %176, %180 : vector<288x64xf32>
    %c2_188 = arith.constant 2 : index
    %c0_189 = arith.constant 0 : index
    %182 = vector.load %arg11[%c2_188, %c0_189] : memref<328x64xf32, #tpu.memory_space<vmem>>, vector<288x64xf32>
    %c2_190 = arith.constant 2 : index
    %c0_191 = arith.constant 0 : index
    %c0_192 = arith.constant 0 : index
    %183 = vector.load %arg7[%c2_190, %c0_191, %c0_192] : memref<9x64x64xf32, #tpu.memory_space<vmem>>, vector<1x64x64xf32>
    %184 = vector.shape_cast %183 : vector<1x64x64xf32> to vector<64x64xf32>
    %cst_193 = arith.constant dense<0.000000e+00> : vector<288x64xf32>
    %185 = tpu.matmul %182, %184, %cst_193 {dimension_numbers = #tpu.dot_dimension_numbers<[1], [0], [0], [1], [0, 0, 1, 1], [], []>} : vector<288x64xf32>, vector<64x64xf32>, vector<288x64xf32> -> vector<288x64xf32>
    %186 = arith.addf %181, %185 : vector<288x64xf32>
    %c18_194 = arith.constant 18 : index
    %c0_195 = arith.constant 0 : index
    %187 = vector.load %arg11[%c18_194, %c0_195] : memref<328x64xf32, #tpu.memory_space<vmem>>, vector<288x64xf32>
    %c3_196 = arith.constant 3 : index
    %c0_197 = arith.constant 0 : index
    %c0_198 = arith.constant 0 : index
    %188 = vector.load %arg7[%c3_196, %c0_197, %c0_198] : memref<9x64x64xf32, #tpu.memory_space<vmem>>, vector<1x64x64xf32>
    %189 = vector.shape_cast %188 : vector<1x64x64xf32> to vector<64x64xf32>
    %cst_199 = arith.constant dense<0.000000e+00> : vector<288x64xf32>
    %190 = tpu.matmul %187, %189, %cst_199 {dimension_numbers = #tpu.dot_dimension_numbers<[1], [0], [0], [1], [0, 0, 1, 1], [], []>} : vector<288x64xf32>, vector<64x64xf32>, vector<288x64xf32> -> vector<288x64xf32>
    %191 = arith.addf %186, %190 : vector<288x64xf32>
    %c19_200 = arith.constant 19 : index
    %c0_201 = arith.constant 0 : index
    %192 = vector.load %arg11[%c19_200, %c0_201] : memref<328x64xf32, #tpu.memory_space<vmem>>, vector<288x64xf32>
    %c4_202 = arith.constant 4 : index
    %c0_203 = arith.constant 0 : index
    %c0_204 = arith.constant 0 : index
    %193 = vector.load %arg7[%c4_202, %c0_203, %c0_204] : memref<9x64x64xf32, #tpu.memory_space<vmem>>, vector<1x64x64xf32>
    %194 = vector.shape_cast %193 : vector<1x64x64xf32> to vector<64x64xf32>
    %cst_205 = arith.constant dense<0.000000e+00> : vector<288x64xf32>
    %195 = tpu.matmul %192, %194, %cst_205 {dimension_numbers = #tpu.dot_dimension_numbers<[1], [0], [0], [1], [0, 0, 1, 1], [], []>} : vector<288x64xf32>, vector<64x64xf32>, vector<288x64xf32> -> vector<288x64xf32>
    %196 = arith.addf %191, %195 : vector<288x64xf32>
    %c20_206 = arith.constant 20 : index
    %c0_207 = arith.constant 0 : index
    %197 = vector.load %arg11[%c20_206, %c0_207] : memref<328x64xf32, #tpu.memory_space<vmem>>, vector<288x64xf32>
    %c5_208 = arith.constant 5 : index
    %c0_209 = arith.constant 0 : index
    %c0_210 = arith.constant 0 : index
    %198 = vector.load %arg7[%c5_208, %c0_209, %c0_210] : memref<9x64x64xf32, #tpu.memory_space<vmem>>, vector<1x64x64xf32>
    %199 = vector.shape_cast %198 : vector<1x64x64xf32> to vector<64x64xf32>
    %cst_211 = arith.constant dense<0.000000e+00> : vector<288x64xf32>
    %200 = tpu.matmul %197, %199, %cst_211 {dimension_numbers = #tpu.dot_dimension_numbers<[1], [0], [0], [1], [0, 0, 1, 1], [], []>} : vector<288x64xf32>, vector<64x64xf32>, vector<288x64xf32> -> vector<288x64xf32>
    %201 = arith.addf %196, %200 : vector<288x64xf32>
    %c36_212 = arith.constant 36 : index
    %c0_213 = arith.constant 0 : index
    %202 = vector.load %arg11[%c36_212, %c0_213] : memref<328x64xf32, #tpu.memory_space<vmem>>, vector<288x64xf32>
    %c6_214 = arith.constant 6 : index
    %c0_215 = arith.constant 0 : index
    %c0_216 = arith.constant 0 : index
    %203 = vector.load %arg7[%c6_214, %c0_215, %c0_216] : memref<9x64x64xf32, #tpu.memory_space<vmem>>, vector<1x64x64xf32>
    %204 = vector.shape_cast %203 : vector<1x64x64xf32> to vector<64x64xf32>
    %cst_217 = arith.constant dense<0.000000e+00> : vector<288x64xf32>
    %205 = tpu.matmul %202, %204, %cst_217 {dimension_numbers = #tpu.dot_dimension_numbers<[1], [0], [0], [1], [0, 0, 1, 1], [], []>} : vector<288x64xf32>, vector<64x64xf32>, vector<288x64xf32> -> vector<288x64xf32>
    %206 = arith.addf %201, %205 : vector<288x64xf32>
    %c37_218 = arith.constant 37 : index
    %c0_219 = arith.constant 0 : index
    %207 = vector.load %arg11[%c37_218, %c0_219] : memref<328x64xf32, #tpu.memory_space<vmem>>, vector<288x64xf32>
    %c7_220 = arith.constant 7 : index
    %c0_221 = arith.constant 0 : index
    %c0_222 = arith.constant 0 : index
    %208 = vector.load %arg7[%c7_220, %c0_221, %c0_222] : memref<9x64x64xf32, #tpu.memory_space<vmem>>, vector<1x64x64xf32>
    %209 = vector.shape_cast %208 : vector<1x64x64xf32> to vector<64x64xf32>
    %cst_223 = arith.constant dense<0.000000e+00> : vector<288x64xf32>
    %210 = tpu.matmul %207, %209, %cst_223 {dimension_numbers = #tpu.dot_dimension_numbers<[1], [0], [0], [1], [0, 0, 1, 1], [], []>} : vector<288x64xf32>, vector<64x64xf32>, vector<288x64xf32> -> vector<288x64xf32>
    %211 = arith.addf %206, %210 : vector<288x64xf32>
    %c38_224 = arith.constant 38 : index
    %c0_225 = arith.constant 0 : index
    %212 = vector.load %arg11[%c38_224, %c0_225] : memref<328x64xf32, #tpu.memory_space<vmem>>, vector<288x64xf32>
    %c8_226 = arith.constant 8 : index
    %c0_227 = arith.constant 0 : index
    %c0_228 = arith.constant 0 : index
    %213 = vector.load %arg7[%c8_226, %c0_227, %c0_228] : memref<9x64x64xf32, #tpu.memory_space<vmem>>, vector<1x64x64xf32>
    %214 = vector.shape_cast %213 : vector<1x64x64xf32> to vector<64x64xf32>
    %cst_229 = arith.constant dense<0.000000e+00> : vector<288x64xf32>
    %215 = tpu.matmul %212, %214, %cst_229 {dimension_numbers = #tpu.dot_dimension_numbers<[1], [0], [0], [1], [0, 0, 1, 1], [], []>} : vector<288x64xf32>, vector<64x64xf32>, vector<288x64xf32> -> vector<288x64xf32>
    %216 = arith.addf %211, %215 : vector<288x64xf32>
    %217 = vector.broadcast %4 : vector<288x1xf32> to vector<288x64xf32>
    %218 = arith.mulf %216, %217 : vector<288x64xf32>
    %c19_230 = arith.constant 19 : index
    %c0_231 = arith.constant 0 : index
    %219 = vector.load %arg11[%c19_230, %c0_231] : memref<328x64xf32, #tpu.memory_space<vmem>>, vector<288x64xf32>
    tpu.vector_store %arg11[%c19_230, %c0_231], %218 {strides = array<i32>} : memref<328x64xf32, #tpu.memory_space<vmem>>, vector<288x64xf32>,
    %c0_232 = arith.constant 0 : index
    %c0_233 = arith.constant 0 : index
    %220 = vector.load %arg11[%c0_232, %c0_233] : memref<328x64xf32, #tpu.memory_space<vmem>>, vector<288x64xf32>
    %c0_234 = arith.constant 0 : index
    %c0_235 = arith.constant 0 : index
    %221 = vector.load %arg8[%c0_234, %c0_235] : memref<9x64xf32, #tpu.memory_space<vmem>>, vector<1x64xf32>
    %222 = vector.broadcast %221 : vector<1x64xf32> to vector<288x64xf32>
    %223 = arith.mulf %220, %222 : vector<288x64xf32>
    %c1_236 = arith.constant 1 : index
    %c0_237 = arith.constant 0 : index
    %224 = vector.load %arg11[%c1_236, %c0_237] : memref<328x64xf32, #tpu.memory_space<vmem>>, vector<288x64xf32>
    %c1_238 = arith.constant 1 : index
    %c0_239 = arith.constant 0 : index
    %225 = vector.load %arg8[%c1_238, %c0_239] : memref<9x64xf32, #tpu.memory_space<vmem>>, vector<1x64xf32>
    %226 = vector.broadcast %225 : vector<1x64xf32> to vector<288x64xf32>
    %227 = arith.mulf %224, %226 : vector<288x64xf32>
    %228 = arith.addf %223, %227 : vector<288x64xf32>
    %c2_240 = arith.constant 2 : index
    %c0_241 = arith.constant 0 : index
    %229 = vector.load %arg11[%c2_240, %c0_241] : memref<328x64xf32, #tpu.memory_space<vmem>>, vector<288x64xf32>
    %c2_242 = arith.constant 2 : index
    %c0_243 = arith.constant 0 : index
    %230 = vector.load %arg8[%c2_242, %c0_243] : memref<9x64xf32, #tpu.memory_space<vmem>>, vector<1x64xf32>
    %231 = vector.broadcast %230 : vector<1x64xf32> to vector<288x64xf32>
    %232 = arith.mulf %229, %231 : vector<288x64xf32>
    %233 = arith.addf %228, %232 : vector<288x64xf32>
    %c18_244 = arith.constant 18 : index
    %c0_245 = arith.constant 0 : index
    %234 = vector.load %arg11[%c18_244, %c0_245] : memref<328x64xf32, #tpu.memory_space<vmem>>, vector<288x64xf32>
    %c3_246 = arith.constant 3 : index
    %c0_247 = arith.constant 0 : index
    %235 = vector.load %arg8[%c3_246, %c0_247] : memref<9x64xf32, #tpu.memory_space<vmem>>, vector<1x64xf32>
    %236 = vector.broadcast %235 : vector<1x64xf32> to vector<288x64xf32>
    %237 = arith.mulf %234, %236 : vector<288x64xf32>
    %238 = arith.addf %233, %237 : vector<288x64xf32>
    %c19_248 = arith.constant 19 : index
    %c0_249 = arith.constant 0 : index
    %239 = vector.load %arg11[%c19_248, %c0_249] : memref<328x64xf32, #tpu.memory_space<vmem>>, vector<288x64xf32>
    %c4_250 = arith.constant 4 : index
    %c0_251 = arith.constant 0 : index
    %240 = vector.load %arg8[%c4_250, %c0_251] : memref<9x64xf32, #tpu.memory_space<vmem>>, vector<1x64xf32>
    %241 = vector.broadcast %240 : vector<1x64xf32> to vector<288x64xf32>
    %242 = arith.mulf %239, %241 : vector<288x64xf32>
    %243 = arith.addf %238, %242 : vector<288x64xf32>
    %c20_252 = arith.constant 20 : index
    %c0_253 = arith.constant 0 : index
    %244 = vector.load %arg11[%c20_252, %c0_253] : memref<328x64xf32, #tpu.memory_space<vmem>>, vector<288x64xf32>
    %c5_254 = arith.constant 5 : index
    %c0_255 = arith.constant 0 : index
    %245 = vector.load %arg8[%c5_254, %c0_255] : memref<9x64xf32, #tpu.memory_space<vmem>>, vector<1x64xf32>
    %246 = vector.broadcast %245 : vector<1x64xf32> to vector<288x64xf32>
    %247 = arith.mulf %244, %246 : vector<288x64xf32>
    %248 = arith.addf %243, %247 : vector<288x64xf32>
    %c36_256 = arith.constant 36 : index
    %c0_257 = arith.constant 0 : index
    %249 = vector.load %arg11[%c36_256, %c0_257] : memref<328x64xf32, #tpu.memory_space<vmem>>, vector<288x64xf32>
    %c6_258 = arith.constant 6 : index
    %c0_259 = arith.constant 0 : index
    %250 = vector.load %arg8[%c6_258, %c0_259] : memref<9x64xf32, #tpu.memory_space<vmem>>, vector<1x64xf32>
    %251 = vector.broadcast %250 : vector<1x64xf32> to vector<288x64xf32>
    %252 = arith.mulf %249, %251 : vector<288x64xf32>
    %253 = arith.addf %248, %252 : vector<288x64xf32>
    %c37_260 = arith.constant 37 : index
    %c0_261 = arith.constant 0 : index
    %254 = vector.load %arg11[%c37_260, %c0_261] : memref<328x64xf32, #tpu.memory_space<vmem>>, vector<288x64xf32>
    %c7_262 = arith.constant 7 : index
    %c0_263 = arith.constant 0 : index
    %255 = vector.load %arg8[%c7_262, %c0_263] : memref<9x64xf32, #tpu.memory_space<vmem>>, vector<1x64xf32>
    %256 = vector.broadcast %255 : vector<1x64xf32> to vector<288x64xf32>
    %257 = arith.mulf %254, %256 : vector<288x64xf32>
    %258 = arith.addf %253, %257 : vector<288x64xf32>
    %c38_264 = arith.constant 38 : index
    %c0_265 = arith.constant 0 : index
    %259 = vector.load %arg11[%c38_264, %c0_265] : memref<328x64xf32, #tpu.memory_space<vmem>>, vector<288x64xf32>
    %c8_266 = arith.constant 8 : index
    %c0_267 = arith.constant 0 : index
    %260 = vector.load %arg8[%c8_266, %c0_267] : memref<9x64xf32, #tpu.memory_space<vmem>>, vector<1x64xf32>
    %261 = vector.broadcast %260 : vector<1x64xf32> to vector<288x64xf32>
    %262 = arith.mulf %259, %261 : vector<288x64xf32>
    %263 = arith.addf %258, %262 : vector<288x64xf32>
    %cst_268 = arith.constant dense<0.000000e+00> : vector<288xf32>
    %264 = vector.multi_reduction <add>, %263, %cst_268 [1] : vector<288x64xf32> to vector<288xf32>
    %265 = vector.shape_cast %264 : vector<288xf32> to vector<288x1xf32>
    %266 = vector.extract_strided_slice %6 {offsets = [0, 4], sizes = [288, 1], strides = [1, 1]} : vector<288x9xf32> to vector<288x1xf32>
    %267 = arith.addf %266, %265 : vector<288x1xf32>
    %c0_269 = arith.constant 0 : index
    %c0_270 = arith.constant 0 : index
    %c0_271 = arith.constant 0 : index
    %268 = vector.load %arg10[%c0_269, %c0_270, %c0_271] : memref<1x288x1xf32, #tpu.memory_space<vmem>>, vector<1x288x1xf32>
    %269 = vector.shape_cast %268 : vector<1x288x1xf32> to vector<288x1xf32>
    %270 = vector.shape_cast %267 : vector<288x1xf32> to vector<1x288x1xf32>
    tpu.vector_store %arg10[%c0_269, %c0_270, %c0_271], %270 {strides = array<i32>} : memref<1x288x1xf32, #tpu.memory_space<vmem>>, vector<1x288x1xf32>,
    return
  }
  func.func @transform_0(%arg0: i32) -> (i32, i32, i32) {
    %c0_i32 = arith.constant 0 : i32
    %c0_i32_0 = arith.constant 0 : i32
    %c0_i32_1 = arith.constant 0 : i32
    return %arg0, %c0_i32, %c0_i32_0 : i32, i32, i32
  }
  func.func @transform_1(%arg0: i32) -> (i32, i32) {
    %c0_i32 = arith.constant 0 : i32
    %c0_i32_0 = arith.constant 0 : i32
    %c0_i32_1 = arith.constant 0 : i32
    return %c0_i32, %c0_i32_0 : i32, i32
  }
  func.func @transform_2(%arg0: i32) -> (i32, i32) {
    %c0_i32 = arith.constant 0 : i32
    %c0_i32_0 = arith.constant 0 : i32
    %c0_i32_1 = arith.constant 0 : i32
    return %c0_i32, %c0_i32_0 : i32, i32
  }
  func.func @transform_3(%arg0: i32) -> (i32, i32, i32) {
    %c0_i32 = arith.constant 0 : i32
    %c0_i32_0 = arith.constant 0 : i32
    %c0_i32_1 = arith.constant 0 : i32
    %c0_i32_2 = arith.constant 0 : i32
    return %c0_i32, %c0_i32_0, %c0_i32_1 : i32, i32, i32
  }
  func.func @transform_4(%arg0: i32) -> (i32, i32, i32) {
    %c0_i32 = arith.constant 0 : i32
    %c0_i32_0 = arith.constant 0 : i32
    %c0_i32_1 = arith.constant 0 : i32
    %c0_i32_2 = arith.constant 0 : i32
    return %c0_i32, %c0_i32_0, %c0_i32_1 : i32, i32, i32
  }
  func.func @transform_5(%arg0: i32) -> (i32, i32, i32) {
    %c0_i32 = arith.constant 0 : i32
    %c0_i32_0 = arith.constant 0 : i32
    %c0_i32_1 = arith.constant 0 : i32
    %c0_i32_2 = arith.constant 0 : i32
    return %c0_i32, %c0_i32_0, %c0_i32_1 : i32, i32, i32
  }
  func.func @transform_6(%arg0: i32) -> (i32, i32, i32) {
    %c0_i32 = arith.constant 0 : i32
    %c0_i32_0 = arith.constant 0 : i32
    %c0_i32_1 = arith.constant 0 : i32
    %c0_i32_2 = arith.constant 0 : i32
    return %c0_i32, %c0_i32_0, %c0_i32_1 : i32, i32, i32
  }
  func.func @transform_7(%arg0: i32) -> (i32, i32) {
    %c0_i32 = arith.constant 0 : i32
    %c0_i32_0 = arith.constant 0 : i32
    %c0_i32_1 = arith.constant 0 : i32
    return %c0_i32, %c0_i32_0 : i32, i32
  }
  func.func @transform_8(%arg0: i32) -> i32 {
    %c0_i32 = arith.constant 0 : i32
    %c0_i32_0 = arith.constant 0 : i32
    return %c0_i32 : i32
  }
  func.func @transform_9(%arg0: i32) -> (i32, i32, i32) {
    %c0_i32 = arith.constant 0 : i32
    %c0_i32_0 = arith.constant 0 : i32
    %c0_i32_1 = arith.constant 0 : i32
    return %arg0, %c0_i32, %c0_i32_0 : i32, i32, i32
  }
}

</mosaic_0001>

<bundles_post_ra>
// kernel: custom-call
= control target key start
LH: loop header
LB: loop body
LE: loop exit
PB: predicated region body
PF: predicated region fallthrough
CT: control target
= control target key end

     0   :  { %2 = vsyncpa [#allocation0], 0  ;;  %s61_s0 = inlined_call_operand.hbm [shape: c64[2,1,16,16], index: 0, kind: input, shape index: {}]   ;;  %s62_s1 = inlined_call_operand.vmem [shape: f32[2,1,16,16], index: 1, kind: output, shape index: {}]  }
   0x1   :  { %s3_s8 = sshll.u32 %s62_s1, 4  ;;  %s9_s11 = scalar_lea.hbm %s61_s0, 512  ;;  %s4_s8 = int_to_ptr.vmem [resolvable:$true] %s3_s8 }
   0x2   :  { %p10_p0 = scmp.ne.s32.totalorder %s61_s0, %s9_s11  ;;  %s11_s16 = scalar_lea.hbm %s61_s0, 1024 }
   0x3   :  { %p12_p1 = scmp.lt.u32.totalorder %s11_s16, %s9_s11  ;;  %p13_p2 = scmp.lt.u32.totalorder %s9_s11, %s61_s0 }
   0x5   :  { %p14_p3 = por %p13_p2, %p12_p1 }
   0x7   :  { %p15_p4 = pnand %p14_p3, %p10_p0 }
   0x9   :  { %18 = shalt.err (!%p15_p4)  }
   0xa   :  { %s19_s1 = scalar_lea.vmem %s4_s8, 512  ;;  %p24_p6 = scmp.lt.s32.totalorder %s4_s8, %s4_s8 }
   0xb   :  { %p20_p5 = scmp.ne.s32.totalorder %s4_s8, %s19_s1  ;;  %p25_p7 = scmp.lt.s32.totalorder %s19_s1, %s19_s1 }
   0xd   :  { %p26_p8 = por %p25_p7, %p24_p6 }
   0xf   :  { %p27_p9 = pnand %p26_p8, %p20_p5 }
  0x11   :  { %30 = shalt.err (!%p27_p9)  }
  0x12   :  { %6 = dma.hbm_to_vmem [thread:$0]  %s61_s0, 512, %s4_s8, [#allocation0] }
  0x13   :  { %31 = dma.done.wait [#allocation0], 512  }
  0x14   :  { %32 = vsyncadd [#allocation0], 4294966784 }
  0x15   :  { %8 = vsyncpa [#allocation0], 1 }

// kernel: custom-call.1
= control target key start
LH: loop header
LB: loop body
LE: loop exit
PB: predicated region body
PF: predicated region fallthrough
CT: control target
= control target key end

     0   :  { %s59_s0 = inlined_call_operand.hbm [shape: c64[2,1,16,16], index: 0, kind: input, shape index: {}]   ;;  %s60_s1 = inlined_call_operand.vmem [shape: f32[2,1,16,16], index: 1, kind: output, shape index: {}]  }
   0x1   :  { %s2_s8 = scalar_lea.hbm %s59_s0, 512 }
   0x2   :  { %3 = vsyncpa [#allocation0], 0  ;;  %s4_s11 = sshll.u32 %s60_s1, 4  ;;  %s34_s14 = scalar_lea.hbm %s59_s0, 1024  ;;  %s5_s11 = int_to_ptr.vmem [resolvable:$true] %s4_s11 }
   0x3   :  { %p11_p0 = scmp.ne.s32.totalorder %s2_s8, %s34_s14  ;;  %p13_p1 = scmp.lt.u32.totalorder %s2_s8, %s59_s0 }
   0x4   :  { %p14_p2 = scmp.lt.u32.totalorder %s34_s14, %s34_s14  ;;  %p16_p4 = scmp.lt.u32.totalorder %s34_s14, %s2_s8 }
   0x6   :  { %p15_p3 = por %p14_p2, %p13_p1 }
   0x8   :  { %p17_p5 = por %p16_p4, %p15_p3 }
   0xa   :  { %p18_p6 = pnand %p17_p5, %p11_p0 }
   0xc   :  { %21 = shalt.err (!%p18_p6)  }
   0xd   :  { %s22_s17 = scalar_lea.vmem %s5_s11, 512  ;;  %p27_p8 = scmp.lt.s32.totalorder %s5_s11, %s5_s11 }
   0xe   :  { %p23_p7 = scmp.ne.s32.totalorder %s5_s11, %s22_s17  ;;  %p28_p9 = scmp.lt.s32.totalorder %s22_s17, %s22_s17 }
  0x10   :  { %p29_p10 = por %p28_p9, %p27_p8 }
  0x12   :  { %p30_p11 = pnand %p29_p10, %p23_p7 }
  0x14   :  { %33 = shalt.err (!%p30_p11)  }
  0x15   :  { %7 = dma.hbm_to_vmem [thread:$0]  %s2_s8, 512, %s5_s11, [#allocation0] }
  0x16   :  { %35 = dma.done.wait [#allocation0], 512  }
  0x17   :  { %36 = vsyncadd [#allocation0], 4294966784 }
  0x18   :  { %9 = vsyncpa [#allocation0], 1 }

// kernel: ista_net_plus_forward.8
= control target key start
LH: loop header
LB: loop body
LE: loop exit
PB: predicated region body
PF: predicated region fallthrough
CT: control target
= control target key end

     0   :  { %s30390_s0 = inlined_call_operand.hbm [shape: f32[2,288,9], index: 0, kind: input, shape index: {}]   ;;  %s30391_s1 = inlined_call_operand.hbm [shape: f32[288,1], index: 1, kind: input, shape index: {}]   ;;  %s30392_s2 = inlined_call_operand.hbm [shape: f32[9,64], index: 2, kind: input, shape index: {}]   ;;  %s30393_s3 = inlined_call_operand.hbm [shape: f32[9,64,64], index: 3, kind: input, shape index: {}]   ;;  %s30394_s4 = inlined_call_operand.hbm [shape: f32[9,64,64], index: 4, kind: input, shape index: {}]   ;;  %s30395_s5 = inlined_call_operand.hbm [shape: f32[9,64,64], index: 5, kind: input, shape index: {}]   ;;  %s30396_s6 = inlined_call_operand.hbm [shape: f32[9,64,64], index: 6, kind: input, shape index: {}]   ;;  %s30397_s7 = inlined_call_operand.hbm [shape: f32[9,64], index: 7, kind: input, shape index: {}]   ;;  %s30398_s8 = inlined_call_operand.<no memory space> [shape: f32[1], index: 8, kind: input, shape index: {}]   ;;  %s30399_s9 = inlined_call_operand.hbm [shape: f32[2,288,1], index: 9, kind: output, shape index: {}]  }
   0x1   :  { %30437 = sst [smem:[#allocation40_spill]] %s30391_s1 }
   0x2   :  { %30438 = sst [smem:[#allocation41_spill]] %s30392_s2 }
   0x3   :  { %14 = sst [smem:[#allocation3]] %s30398_s8 }
   0x4   :  { %15 = vsyncpa [#allocation5], 0 }
   0x5   :  { %17 = vsyncpa [#allocation5 + $0x1], 0 }
   0x6   :  { %18 = vsyncpa [#allocation8], 0 }
   0x7   :  { %19 = vsyncpa [#allocation11], 0 }
   0x8   :  { %20 = vsyncpa [#allocation14], 0 }
   0x9   :  { %21 = vsyncpa [#allocation17], 0 }
   0xa   :  { %22 = vsyncpa [#allocation6], 0 }
   0xb   :  { %24 = vsyncpa [#allocation6 + $0x1], 0  ;;  %s26377_s11 = smov 0   ;;  %s26379_s12 = smov 0  }
   0xc   :  { %s26381_s13 = smov 0   ;;  %s26383_s14 = smov 0  }
   0xd LB: > { %s26307_s8 = smov [#allocation7]   ;;  %s26398_s16 = sadd.s32 4294967295, %s26305_s14   ;;  %s26305_s14 = sphi %s26383_s14, %s30543_s14   ;;  %s26301_s13 = sphi %s26381_s13, %s30542_s13   ;;  %s26297_s12 = sphi %s26379_s12, %s30541_s12   ;;  %s26293_s11 = sphi %s26377_s11, %s30540_s11  }
   0xe   : > { %s267_s15 = sshll.u32 %s26307_s8, 4  ;;  %p18522_p0 = scmp.ge.s32.totalorder %s26305_s14, 1  ;;  %s26403_s15 = int_to_ptr.vmem [resolvable:$true] %s267_s15 }
   0xf   : > { %p30400_p1 = scmp.eq.s32.totalorder %s26398_s16, 0  ;;  %p255_p2 = scmp.lt.s32.totalorder %s26305_s14, 3 }
  0x10   : > { %s26308_s18 = smov [#allocation10]   ;;  %s26309_s21 = smov [#allocation13]  }
  0x11   : > { %p26405_p3 = pnand %p18522_p0, %p255_p2  ;;  %s293_s19 = sshll.u32 %s26308_s18, 4  ;;  %s26418_s19 = int_to_ptr.vmem [resolvable:$true] %s293_s19 }
  0x12   : > { %s319_s22 = sshll.u32 %s26309_s21, 4  ;;  %s30441_s1 = sld [smem:[#allocation40_spill]]  ;;  %s26420_s22 = int_to_ptr.vmem [resolvable:$true] %s319_s22 }
  0x13   : > { %s30439_s17 = scalar_select %p26405_p3, 1, 0 }
  0x14   : > { %p25857_p5 = pneg %p26405_p3 }
  0x16   : > { %p26414_p6 = pnand %p25857_p5, %p30400_p1 }
  0x18   : > { %s25997_s25 = scalar_lea.hbm %s30441_s1, 4608  ;;  %p26430_p8 = pneg %p26414_p6 }
  0x19   : > { %p25998_p7 = scmp.ne.s32.totalorder %s30441_s1, %s25997_s25  ;;  %p26004_p11 = scmp.lt.u32.totalorder %s25997_s25, %s30441_s1 }
  0x1b   : > { %p26000_p9 = pnand %p26430_p8, %p25998_p7 }
  0x1d   : > { %p26001_p10 = pneg %p26000_p9 }
  0x1f   : > { %p26006_p12 = pnand %p26004_p11, %p26001_p10 }
  0x21   : > { %26009 = shalt.err (!%p26006_p12)
}
  0x22   : > { %s26010_s10 = scalar_lea.vmem %s26403_s15, 4608  ;;  %p26018_p5 = scmp.lt.s32.totalorder %s26403_s15, %s26403_s15 }
  0x23   : > { %p26011_p13 = scmp.ne.s32.totalorder %s26403_s15, %s26010_s10  ;;  %p26019_p4 = scmp.lt.s32.totalorder %s26010_s10, %s26010_s10 }
  0x25   : > { %p26013_p0 = pnand %p26011_p13, %p26430_p8  ;;  %p26020_p7 = por %p26019_p4, %p26018_p5 }
  0x27   : > { %p26014_p2 = pneg %p26013_p0 }
  0x29   : > { %p26021_p9 = pnand %p26020_p7, %p26014_p2 }
  0x2b   : > { %26024 = shalt.err (!%p26021_p9)
}
  0x2c   : > { %s30402_s8 = smov 128   ;;  %s30403_s18 = smov 8  }
  0x2d   : > { %25860 = dma.hbm_to_vmem [thread:$0]  (!%p26414_p6), %s30441_s1, 4608, %s26403_s15, [#allocation8], %s30402_s8, %s30402_s8, %s30403_s18  }
  0x2e   : > { %s26025_s26 = scalar_lea.hbm %s30393_s3, 9216 }
  0x2f   : > { %p26026_p4 = scmp.ne.s32.totalorder %s30393_s3, %s26025_s26  ;;  %p26032_p12 = scmp.lt.u32.totalorder %s26025_s26, %s30393_s3 }
  0x31   : > { %p26028_p10 = pnand %p26026_p4, %p26430_p8 }
  0x33   : > { %p26029_p11 = pneg %p26028_p10 }
  0x35   : > { %p26034_p13 = pnand %p26032_p12, %p26029_p11 }
  0x37   : > { %26037 = shalt.err (!%p26034_p13)
}
  0x38   : > { %s26038_s15 = scalar_lea.vmem %s26418_s19, 9216  ;;  %p26046_p7 = scmp.lt.s32.totalorder %s26418_s19, %s26418_s19 }
  0x39   : > { %p26039_p0 = scmp.ne.s32.totalorder %s26418_s19, %s26038_s15  ;;  %p26047_p9 = scmp.lt.s32.totalorder %s26038_s15, %s26038_s15 }
  0x3b   : > { %p26041_p2 = pnand %p26039_p0, %p26430_p8  ;;  %p26048_p4 = por %p26047_p9, %p26046_p7 }
  0x3d   : > { %p26042_p5 = pneg %p26041_p2 }
  0x3f   : > { %p26049_p10 = pnand %p26048_p4, %p26042_p5 }
  0x41   : > { %26052 = shalt.err (!%p26049_p10)
}
  0x42   : > { %25866 = dma.hbm_to_vmem [thread:$0]  (!%p26414_p6), %s30393_s3, 9216, %s26418_s19, [#allocation11], %s30402_s8, %s30402_s8, %s30403_s18  }
  0x43   : > { %s26053_s26 = scalar_lea.hbm %s30395_s5, 9216 }
  0x44   : > { %p26054_p11 = scmp.ne.s32.totalorder %s30395_s5, %s26053_s26  ;;  %p26060_p0 = scmp.lt.u32.totalorder %s26053_s26, %s30395_s5 }
  0x46   : > { %p26056_p12 = pnand %p26054_p11, %p26430_p8 }
  0x48   : > { %p26057_p13 = pneg %p26056_p12 }
  0x4a   : > { %p26062_p2 = pnand %p26060_p0, %p26057_p13 }
  0x4c   : > { %26065 = shalt.err (!%p26062_p2)
}
  0x4d   : > { %s26066_s19 = scalar_lea.vmem %s26420_s22, 9216  ;;  %p26074_p4 = scmp.lt.s32.totalorder %s26420_s22, %s26420_s22 }
  0x4e   : > { %p26067_p5 = scmp.ne.s32.totalorder %s26420_s22, %s26066_s19  ;;  %p26075_p10 = scmp.lt.s32.totalorder %s26066_s19, %s26066_s19 }
  0x50   : > { %p26069_p7 = pnand %p26067_p5, %p26430_p8  ;;  %p26076_p11 = por %p26075_p10, %p26074_p4 }
  0x52   : > { %p26070_p9 = pneg %p26069_p7 }
  0x54   : > { %p26077_p12 = pnand %p26076_p11, %p26070_p9 }
  0x56   : > { %26080 = shalt.err (!%p26077_p12)
}
  0x57   : > { %25872 = dma.hbm_to_vmem [thread:$0]  (!%p26414_p6), %s30395_s5, 9216, %s26420_s22, [#allocation14], %s30402_s8, %s30402_s8, %s30403_s18  }
  0x58   : > { %s26312_s23 = smov [#allocation9]   ;;  %s26313_s25 = smov [#allocation12]  }
  0x59   : > { %s280_s24 = sshll.u32 %s26312_s23, 4  ;;  %s306_s26 = sshll.u32 %s26313_s25, 4  ;;  %s281_s24 = int_to_ptr.vmem [resolvable:$true] %s280_s24  ;;  %s307_s26 = int_to_ptr.vmem [resolvable:$true] %s306_s26 }
  0x5a   : > { %s30443_s2 = sld [smem:[#allocation41_spill]] }
  0x60   : > { %s26081_s30 = scalar_lea.hbm %s30443_s2, 256 }
  0x61   : > { %p26082_p13 = scmp.ne.s32.totalorder %s30443_s2, %s26081_s30  ;;  %p26088_p5 = scmp.lt.u32.totalorder %s26081_s30, %s30443_s2 }
  0x63   : > { %p26084_p0 = pnand %p26082_p13, %p26430_p8 }
  0x65   : > { %p26085_p2 = pneg %p26084_p0 }
  0x67   : > { %p26090_p7 = pnand %p26088_p5, %p26085_p2 }
  0x69   : > { %26093 = shalt.err (!%p26090_p7)
}
  0x6a   : > { %s26094_s22 = scalar_lea.vmem %s281_s24, 256  ;;  %p26102_p11 = scmp.lt.s32.totalorder %s281_s24, %s281_s24 }
  0x6b   : > { %p26095_p9 = scmp.ne.s32.totalorder %s281_s24, %s26094_s22  ;;  %p26103_p12 = scmp.lt.s32.totalorder %s26094_s22, %s26094_s22 }
  0x6d   : > { %p26097_p4 = pnand %p26095_p9, %p26430_p8  ;;  %p26104_p1 = por %p26103_p12, %p26102_p11 }
  0x6f   : > { %p26098_p10 = pneg %p26097_p4 }
  0x71   : > { %p26105_p3 = pnand %p26104_p1, %p26098_p10 }
  0x73   : > { %26108 = shalt.err (!%p26105_p3)
}
  0x74   : > { %25863 = dma.hbm_to_vmem [thread:$0]  (!%p26414_p6), %s30443_s2, 256, %s281_s24, [#allocation8], %s30402_s8, %s30402_s8, %s30403_s18  }
  0x75   : > { %s26109_s27 = scalar_lea.hbm %s30394_s4, 9216 }
  0x76   : > { %p26110_p1 = scmp.ne.s32.totalorder %s30394_s4, %s26109_s27  ;;  %p26116_p0 = scmp.lt.u32.totalorder %s26109_s27, %s30394_s4 }
  0x78   : > { %p26112_p3 = pnand %p26110_p1, %p26430_p8 }
  0x7a   : > { %p26113_p13 = pneg %p26112_p3 }
  0x7c   : > { %p26118_p2 = pnand %p26116_p0, %p26113_p13 }
  0x7e   : > { %26121 = shalt.err (!%p26118_p2)
}
  0x7f   : > { %s26122_s15 = scalar_lea.vmem %s307_s26, 9216  ;;  %p26130_p4 = scmp.lt.s32.totalorder %s307_s26, %s307_s26 }
  0x80   : > { %p26123_p5 = scmp.ne.s32.totalorder %s307_s26, %s26122_s15  ;;  %p26131_p10 = scmp.lt.s32.totalorder %s26122_s15, %s26122_s15 }
  0x82   : > { %p26125_p7 = pnand %p26123_p5, %p26430_p8  ;;  %p26132_p11 = por %p26131_p10, %p26130_p4 }
  0x84   : > { %p26126_p9 = pneg %p26125_p7 }
  0x86   : > { %p26133_p12 = pnand %p26132_p11, %p26126_p9 }
  0x88   : > { %26136 = shalt.err (!%p26133_p12)
}
  0x89   : > { %25869 = dma.hbm_to_vmem [thread:$0]  (!%p26414_p6), %s30394_s4, 9216, %s307_s26, [#allocation11], %s30402_s8, %s30402_s8, %s30403_s18  }
  0x8a   : > { %s26314_s1 = smov [#allocation15]   ;;  %s26315_s23 = smov [#allocation16]  }
  0x8b   : > { %s332_s21 = sshll.u32 %s26314_s1, 4  ;;  %s345_s25 = sshll.u32 %s26315_s23, 4  ;;  %s333_s21 = int_to_ptr.vmem [resolvable:$true] %s332_s21  ;;  %s346_s25 = int_to_ptr.vmem [resolvable:$true] %s345_s25 }
  0x8c   : > { %s26137_s30 = scalar_lea.hbm %s30396_s6, 9216 }
  0x8d   : > { %p26138_p1 = scmp.ne.s32.totalorder %s30396_s6, %s26137_s30  ;;  %p26144_p0 = scmp.lt.u32.totalorder %s26137_s30, %s30396_s6 }
  0x8f   : > { %p26140_p3 = pnand %p26138_p1, %p26430_p8 }
  0x91   : > { %p26141_p13 = pneg %p26140_p3 }
  0x93   : > { %p26146_p2 = pnand %p26144_p0, %p26141_p13 }
  0x95   : > { %26149 = shalt.err (!%p26146_p2)
}
  0x96   : > { %s26150_s26 = scalar_lea.vmem %s333_s21, 9216  ;;  %p26158_p4 = scmp.lt.s32.totalorder %s333_s21, %s333_s21 }
  0x97   : > { %p26151_p5 = scmp.ne.s32.totalorder %s333_s21, %s26150_s26  ;;  %p26159_p10 = scmp.lt.s32.totalorder %s26150_s26, %s26150_s26 }
  0x99   : > { %p26153_p7 = pnand %p26151_p5, %p26430_p8  ;;  %p26160_p11 = por %p26159_p10, %p26158_p4 }
  0x9b   : > { %p26154_p9 = pneg %p26153_p7 }
  0x9d   : > { %p26161_p12 = pnand %p26160_p11, %p26154_p9 }
  0x9f   : > { %26164 = shalt.err (!%p26161_p12)
}
  0xa0   : > { %25875 = dma.hbm_to_vmem [thread:$0]  (!%p26414_p6), %s30396_s6, 9216, %s333_s21, [#allocation14], %s30402_s8, %s30402_s8, %s30403_s18  }
  0xa1   : > { %s26165_s29 = scalar_lea.hbm %s30397_s7, 256 }
  0xa2   : > { %p26166_p1 = scmp.ne.s32.totalorder %s30397_s7, %s26165_s29  ;;  %p26172_p0 = scmp.lt.u32.totalorder %s26165_s29, %s30397_s7 }
  0xa4   : > { %p26168_p3 = pnand %p26166_p1, %p26430_p8 }
  0xa6   : > { %p26169_p13 = pneg %p26168_p3 }
  0xa8   : > { %p26174_p2 = pnand %p26172_p0, %p26169_p13 }
  0xaa   : > { %26177 = shalt.err (!%p26174_p2)
}
  0xab   : > { %s26178_s24 = scalar_lea.vmem %s346_s25, 256  ;;  %p26186_p4 = scmp.lt.s32.totalorder %s346_s25, %s346_s25 }
  0xac   : > { %p26179_p5 = scmp.ne.s32.totalorder %s346_s25, %s26178_s24  ;;  %p26187_p10 = scmp.lt.s32.totalorder %s26178_s24, %s26178_s24 }
  0xae   : > { %p26181_p7 = pnand %p26179_p5, %p26430_p8  ;;  %p26188_p11 = por %p26187_p10, %p26186_p4 }
  0xb0   : > { %p26182_p9 = pneg %p26181_p7 }
  0xb2   : > { %p26189_p12 = pnand %p26188_p11, %p26182_p9 }
  0xb4   : > { %26192 = shalt.err (!%p26189_p12)
}
  0xb5   : > { %25878 = dma.hbm_to_vmem [thread:$0]  (!%p26414_p6), %s30397_s7, 256, %s346_s25, [#allocation17], %s30402_s8, %s30402_s8, %s30403_s18  }
  0xb6   : > { %s18521_s20 = sadd.s32 4294967294, %s26305_s14   ;;  %s26592_s28 = sadd.s32 1, %s26305_s14  }
  0xb7   : > { %s37_s22 = sadd.s32 1, %s26301_s13  ;;  %s34_s1 = ssub.s32 %s26305_s14, %s26592_s28 }
  0xb8   : > { %p44_p8 = scmp.ne.s32.totalorder %s26301_s13, %s26297_s12  ;;  %p35_p1 = scmp.eq.s32.totalorder %s34_s1, 0 }
  0xb9   : > { %p45_p3 = scmp.eq.s32.totalorder %s26305_s14, 0  ;;  %p50_p13 = scmp.ne.s32.totalorder %s26297_s12, %s26293_s11 }
  0xba   : > { %p242_p0 = scmp.eq.s32.totalorder %s26398_s16, 1  ;;  %p30444_p5 = scmp.eq.s32.totalorder %s26398_s16, 0 }
  0xbb   : > { %s26604_s23 = scalar_select %p35_p1, %s26301_s13, %s37_s22  }
  0xbc   : > { %p46_p2 = por %p45_p3, %p44_p8  ;;  %p26608_p7 = por %p30444_p5, %p50_p13 }
  0xbd   : > { %p26612_p6 = por %p242_p0, %p44_p8  ;;  %p248_p9 = scmp.eq.s32.totalorder %s18521_s20, 1 }
  0xbe   : > { %p25894_p4 = scmp.lt.s32.totalorder %s26305_s14, 2  ;;  %s362_s29 = sand.u32 1, %s26301_s13  }
  0xbf   : > { %s30446_s25 = scalar_select %p26612_p6, 1, 0 }
  0xc0   : > { %p26618_p10 = por %p248_p9, %p50_p13  ;;  %s25821_s10 = smul.u32 288, %s362_s29 }
  0xc1   : > { %p26622_p11 = pnand %p25894_p4, %p46_p2  ;;  %s25822_s15 = smul.u32 4608, %s26305_s14 }
  0xc2   : > { %s30447_s30 = scalar_select %p26618_p10, 1, 0 }
  0xc3   : > { %s26630_s26 = scalar_lea.hbm %s30390_s0, %s25822_s15  ;;  %s366_s20 = scalar_lea.vmem [#allocation4], %s25821_s10 }
  0xc4   : > { %s373_s22 = sshll.u32 %s366_s20, 4  ;;  %s26634_s1 = scalar_lea.sflag [#allocation5], %s362_s29  ;;  %s26632_s22 = int_to_ptr.vmem [resolvable:$true] %s373_s22 }
  0xc5   : > { %s26193_s8 = scalar_lea.hbm %s26630_s26, 4608  ;;  %p26195_p8 = pneg %p26622_p11 }
  0xc6   : > { %p26194_p12 = scmp.ne.s32.totalorder %s26630_s26, %s26193_s8  ;;  %s26198_s21 = scalar_lea.hbm %s30390_s0, 9216 }
  0xc7   : > { %p26199_p13 = scmp.lt.u32.totalorder %s26630_s26, %s30390_s0  ;;  %p26200_p0 = scmp.lt.u32.totalorder %s26198_s21, %s26193_s8 }
  0xc8   : > { %p26196_p1 = pnand %p26195_p8, %p26194_p12  ;;  %p26202_p5 = scmp.lt.u32.totalorder %s26193_s8, %s26630_s26 }
  0xc9   : > { %p26201_p2 = por %p26200_p0, %p26199_p13 }
  0xca   : > { %p26197_p3 = pneg %p26196_p1 }
  0xcb   : > { %p26203_p9 = por %p26202_p5, %p26201_p2 }
  0xcd   : > { %p26204_p4 = pnand %p26203_p9, %p26197_p3 }
  0xcf   : > { %26207 = shalt.err (!%p26204_p4)
}
  0xd0   : > { %s26208_s29 = scalar_lea.vmem %s26632_s22, 4608  ;;  %s26316_s10 = smov [#allocation4]  }
  0xd1   : > { %p26209_p12 = scmp.ne.s32.totalorder %s26632_s22, %s26208_s29  ;;  %s26213_s20 = sshll.u32 %s26316_s10, 4  ;;  %s26214_s20 = int_to_ptr.vmem [resolvable:$false] %s26213_s20 }
  0xd2   : > { %s26215_s2 = scalar_lea.vmem %s26214_s20, 9216  ;;  %p26216_p6 = scmp.lt.s32.totalorder %s26632_s22, %s26214_s20 }
  0xd3   : > { %p26211_p1 = pnand %p26209_p12, %p26195_p8  ;;  %p26217_p13 = scmp.lt.s32.totalorder %s26215_s2, %s26208_s29 }
  0xd5   : > { %p26212_p10 = pneg %p26211_p1  ;;  %p26218_p0 = por %p26217_p13, %p26216_p6 }
  0xd7   : > { %p26219_p2 = pnand %p26218_p0, %p26212_p10 }
  0xd9   : > { %26222 = shalt.err (!%p26219_p2)
}
  0xda   : > { %s30449_s8 = smov 8   ;;  %s30450_s18 = smov 128  }
  0xdb   : > { %25882 = dma.hbm_to_vmem [thread:$0]  (!%p26622_p11), %s26630_s26, 4608, %s26632_s22, %s26634_s1, %s30450_s18, %s30450_s18, %s30449_s8  }
  0xdc   : > { %p30451_p8 = scmp.ne.s32.totalorder %s30439_s17, 0 }
  0xde   : > { %385 = sbr.rel (%p30451_p8) target bundleno = 4135 (0x1027), region = 56 }
  0xe5   : > { %s26668_s15 = sand.u32 1, %s26297_s12  }
  0xe6   : > { %s25823_s24 = smul.u32 288, %s26668_s15  ;;  %s388_s21 = scalar_lea.sflag [#allocation5], %s26668_s15 }
  0xe8   : > { %s26674_s19 = scalar_lea.vmem [#allocation4], %s25823_s24 }
  0xe9   : > { %26268 = dma.done.wait (%p26608_p7), %s388_s21, 4608  }
  0xea   : > { %26270 = vsyncadd (%p26608_p7), %s388_s21, 4294962688  ;;  %p30452_p6 = scmp.eq.s32.totalorder %s26398_s16, 0 }
  0xec   : > { %26272 = dma.done.wait (%p30452_p6), [#allocation8], 4864   ;;  %p30453_p10 = pmov %p30452_p6 }
  0xed   : > { %p30454_p11 = pmov %p30452_p6 }
  0xee   : > { %26274 = vsyncadd (%p30453_p10), [#allocation8], 4294962432 }
  0xef   : > { %26276 = dma.done.wait (%p30454_p11), [#allocation11], 18432   ;;  %p30455_p3 = pmov %p30452_p6 }
  0xf1   : > { %26278 = vsyncadd (%p30455_p3), [#allocation11], 4294948864  ;;  %p30456_p5 = pmov %p30455_p3 }
  0xf2   : > { %p30457_p9 = pmov %p30455_p3 }
  0xf3   : > { %26280 = dma.done.wait (%p30456_p5), [#allocation14], 18432  }
  0xf4   : > { %26282 = vsyncadd (%p30457_p9), [#allocation14], 4294948864  ;;  %p30458_p7 = pmov %p30455_p3 }
  0xf5   : > { %p30459_p4 = pmov %p30455_p3 }
  0xf6   : > { %26284 = dma.done.wait (%p30458_p7), [#allocation17], 256  }
  0xf7   : > { %26286 = vsyncadd (%p30459_p4), [#allocation17], 4294967040  ;;  %v26317_v0 = vmov 0   ;;  %vm646_vm0 = vcmask 1040384   ;;  %vm537_vm1 = vcmask 72704   ;;  %vm26318_vm2 = vmmov 1  }
  0xf8   : > { %25950 = vset.pattern.permute.xlu0 %v26317_v0  ;;  %25951 = vset.pattern.permute.xlu1 %v26317_v0  ;;  %vm24086_vm3 = vmpackc.low %vm646_vm0, %vm26318_vm2  ;;  %v535_v1 = vld [vmem:[#allocation9] sm:$0xff]  ;;  %v536_v2 = vld [vmem:[#allocation9 + $0x8] sm:$0x1]  ;;  %vm454_vm4 = vcmask 523264   ;;  %vm457_vm5 = vcmask 518144   ;;  %vm461_vm6 = vcmask 520192  }
  0xf9   : > { %v499_v3 = vld [vmem:[%s26674_s19] sm:$0xff]  ;;  %v24085_v4 = vpack.c.bf16 %v536_v2, %v535_v1  ;;  %v517_v5 = vld [vmem:[%s26674_s19 + $0x90] sm:$0xff]  ;;  %v500_v6 = vld [vmem:[%s26674_s19 + $0x8] sm:$0xff]  ;;  %s8921_s17 = sld [smem:[#allocation3]]  ;;  %s26320_s27 = smov 124  }
  0xfa   : > { %21511 = vmatprep.mubr.msk.f32.mxu0 %vm537_vm1, %v499_v3  ;;  %21538 = vmatprep.mubr.msk.f32.mxu1 %vm537_vm1, %v517_v5  ;;  %v518_v7 = vld [vmem:[%s26674_s19 + $0x98] sm:$0xff]  ;;  %v501_v8 = vld [vmem:[%s26674_s19 + $0x10] sm:$0xff]  ;;  %v519_v9 = vld [vmem:[%s26674_s19 + $0xa0] sm:$0xff]  ;;  %s30264_s26 = scalar_lea.vmem [#allocation18], %s25823_s24  ;;  %s25824_s22 = smul.u32 4608, %s26398_s16 }
  0xfb   : > { %24087 = vmatprep.subr.msk.bf16.mxu0 %vm24086_vm3, %v24085_v4  ;;  %24667 = vmatprep.subr.msk.bf16.mxu1 %vm24086_vm3, %v24085_v4  ;;  %v463_v10 = vld [vmem:[#allocation7] sm:$0xff]  ;;  %v465_v11 = vld [vmem:[#allocation7 + $0x10] sm:$0xff]  ;;  %v502_v12 = vld [vmem:[%s26674_s19 + $0x18] sm:$0xff]  ;;  %s18381_s1 = sshll.u32 %s30264_s26, 4  ;;  %s18368_s2 = scalar_lea.sflag [#allocation6], %s26668_s15  ;;  %s30344_s1 = int_to_ptr.vmem [resolvable:$true] %s18381_s1 }
  0xfc   : > { %24090 = vmatpush3.bf16.msk.msra.mxu0 %vm24086_vm3, %v24085_v4  ;;  %24668 = vmatpush3.bf16.msk.msra.mxu1 %vm24086_vm3, %v24085_v4  ;;  %v520_v13 = vld [vmem:[%s26674_s19 + $0xa8] sm:$0xff]  ;;  %v503_v14 = vld [vmem:[%s26674_s19 + $0x20] sm:$0xff]  ;;  %v521_v15 = vld [vmem:[%s26674_s19 + $0xb0] sm:$0xff]  ;;  %s30342_s20 = scalar_lea.hbm %s30399_s9, %s25824_s22  ;;  %s26223_s8 = scalar_lea.vmem %s30344_s1, 4608 }
  0xfd   : > { %897 = vperm.xlu0 %25950, %v463_v10   ;;  %907 = vperm.xlu1 %25951, %v465_v11   ;;  %v464_v16 = vld [vmem:[#allocation7 + $0x8] sm:$0xff]  ;;  %v466_v17 = vld [vmem:[#allocation7 + $0x18] sm:$0xff]  ;;  %v505_v20 = vld [vmem:[%s26674_s19 + $0x30] sm:$0xff]  ;;  %p26224_p12 = scmp.ne.s32.totalorder %s30344_s1, %s26223_s8  ;;  %p30537_p1 = scmp.ne.s32.totalorder %s30446_s25, 0 }
  0xfe   : > { %v504_v18 = vld [vmem:[%s26674_s19 + $0x28] sm:$0xff]  ;;  %v522_v19 = vld [vmem:[%s26674_s19 + $0xb8] sm:$0xff]  ;;  %v523_v21 = vld [vmem:[%s26674_s19 + $0xc0] sm:$0xff]  ;;  %s26321_s16 = smov [#allocation18]  }
  0xff   : > { %21512 = vmatmul.mubr.msk.f32.vlgmr.msra.gmra.mrb[0].mxu0 %vm537_vm1, %v500_v6  ;;  %21539 = vmatmul.mubr.msk.f32.vlgmr.msra.gmra.mrb[0].mxu1 %vm537_vm1, %v518_v7  ;;  %v467_v22 = vld [vmem:[#allocation7 + $0x20] sm:$0xff]  ;;  %v468_v23 = vld [vmem:[#allocation7 + $0x28] sm:$0xff]  ;;  %v506_v24 = vld [vmem:[%s26674_s19 + $0x38] sm:$0xff]  ;;  %p26225_p13 = pnand %p26224_p12, %p30537_p1  ;;  %s26227_s18 = sshll.u32 %s26321_s16, 4  ;;  %s26228_s18 = int_to_ptr.vmem [resolvable:$false] %s26227_s18 }
 0x100   : > { %21514 = vmatprep.mubr.msk.f32.mxu0 %vm537_vm1, %v501_v8  ;;  %21541 = vmatprep.mubr.msk.f32.mxu1 %vm537_vm1, %v519_v9  ;;  %v524_v25 = vld [vmem:[%s26674_s19 + $0xc8] sm:$0xff]  ;;  %v507_v26 = vld [vmem:[%s26674_s19 + $0x40] sm:$0xff]  ;;  %v525_v27 = vld [vmem:[%s26674_s19 + $0xd0] sm:$0xff]  ;;  %s26229_s24 = scalar_lea.vmem %s26228_s18, 9216  ;;  %p26230_p2 = scmp.lt.s32.totalorder %s30344_s1, %s26228_s18 }
 0x101   : > { %902 = vperm.xlu0 %25950, %v464_v16   ;;  %912 = vperm.xlu1 %25951, %v466_v17   ;;  %v469_v28 = vld [vmem:[#allocation7 + $0x30] sm:$0xff]  ;;  %v470_v29 = vld [vmem:[#allocation7 + $0x38] sm:$0xff]  ;;  %v508_v30 = vld [vmem:[%s26674_s19 + $0x48] sm:$0xff]  ;;  %p26226_p0 = pneg %p26225_p13  ;;  %p26231_p8 = scmp.lt.s32.totalorder %s26229_s24, %s26223_s8 }
 0x102   : > { %v526_v31 = vld [vmem:[%s26674_s19 + $0xd8] sm:$0xff]  ;;  %v509_v32 = vld [vmem:[%s26674_s19 + $0x50] sm:$0xff]  ;;  %v527_v33 = vld [vmem:[%s26674_s19 + $0xe0] sm:$0xff] }
 0x103   : > { %21515 = vmatmul.mubr.msk.f32.gmra.mrb[2].mxu0 %vm537_vm1, %v502_v12  ;;  %21542 = vmatmul.mubr.msk.f32.gmra.mrb[2].mxu1 %vm537_vm1, %v520_v13  ;;  %v471_v34 = vld [vmem:[#allocation7 + $0x40] sm:$0xff]  ;;  %v472_v35 = vld [vmem:[#allocation7 + $0x48] sm:$0xff]  ;;  %v510_v36 = vld [vmem:[%s26674_s19 + $0x58] sm:$0xff]  ;;  %p26232_p6 = por %p26231_p8, %p26230_p2 }
 0x104   : > { %21517 = vmatprep.mubr.msk.f32.mxu0 %vm537_vm1, %v503_v14  ;;  %21544 = vmatprep.mubr.msk.f32.mxu1 %vm537_vm1, %v521_v15  ;;  %v528_v37 = vld [vmem:[%s26674_s19 + $0xe8] sm:$0xff]  ;;  %v511_v38 = vld [vmem:[%s26674_s19 + $0x60] sm:$0xff]  ;;  %v529_v39 = vld [vmem:[%s26674_s19 + $0xf0] sm:$0xff] }
 0x105   : > { %917 = vperm.xlu0 %25950, %v467_v22   ;;  %922 = vperm.xlu1 %25951, %v468_v23   ;;  %v473_v40 = vld [vmem:[#allocation7 + $0x50] sm:$0xff]  ;;  %v474_v41 = vld [vmem:[#allocation7 + $0x58] sm:$0xff]  ;;  %v512_v42 = vld [vmem:[%s26674_s19 + $0x68] sm:$0xff]  ;;  %p26233_p10 = pnand %p26232_p6, %p26226_p0 }
 0x106   : > { %v530_v43 = vld [vmem:[%s26674_s19 + $0xf8] sm:$0xff]  ;;  %v513_v44 = vld [vmem:[%s26674_s19 + $0x70] sm:$0xff]  ;;  %v531_v45 = vld [vmem:[%s26674_s19 + $0x100] sm:$0xff] }
 0x107   : > { %21518 = vmatmul.mubr.msk.f32.gmra.mrb[4].mxu0 %vm537_vm1, %v504_v18  ;;  %21545 = vmatmul.mubr.msk.f32.gmra.mrb[4].mxu1 %vm537_vm1, %v522_v19  ;;  %v475_v46 = vld [vmem:[#allocation7 + $0x60] sm:$0xff]  ;;  %v476_v47 = vld [vmem:[#allocation7 + $0x68] sm:$0xff]  ;;  %v514_v48 = vld [vmem:[%s26674_s19 + $0x78] sm:$0xff] }
 0x108   : > { %21520 = vmatprep.mubr.msk.f32.mxu0 %vm537_vm1, %v505_v20  ;;  %21547 = vmatprep.mubr.msk.f32.mxu1 %vm537_vm1, %v523_v21  ;;  %v532_v49 = vld [vmem:[%s26674_s19 + $0x108] sm:$0xff]  ;;  %v515_v50 = vld [vmem:[%s26674_s19 + $0x80] sm:$0xff]  ;;  %v533_v51 = vld [vmem:[%s26674_s19 + $0x110] sm:$0xff] }
 0x109   : > { %927 = vperm.xlu0 %25950, %v469_v28   ;;  %932 = vperm.xlu1 %25951, %v470_v29   ;;  %v477_v52 = vld [vmem:[#allocation7 + $0x70] sm:$0xff]  ;;  %v478_v53 = vld [vmem:[#allocation7 + $0x78] sm:$0xff]  ;;  %v516_v54 = vld [vmem:[%s26674_s19 + $0x88] sm:$0xff] }
 0x10a   : > { %v534_v55 = vld [vmem:[%s26674_s19 + $0x118] sm:$0xff]  ;;  %v479_v56 = vld [vmem:[#allocation7 + $0x80] sm:$0xff]  ;;  %v480_v57 = vld [vmem:[#allocation7 + $0x88] sm:$0xff] }
 0x10b   : > { %21521 = vmatmul.mubr.msk.f32.gmra.mrb[6].mxu0 %vm537_vm1, %v506_v24  ;;  %21548 = vmatmul.mubr.msk.f32.gmra.mrb[6].mxu1 %vm537_vm1, %v524_v25  ;;  %v481_v58 = vld [vmem:[#allocation7 + $0x90] sm:$0xff]  ;;  %v482_v59 = vld [vmem:[#allocation7 + $0x98] sm:$0xff]  ;;  %v483_v60 = vld [vmem:[#allocation7 + $0xa0] sm:$0xff]  ;;  %v30405_v24 = vmov 0.0  }
 0x10c   : > { %21523 = vmatprep.mubr.msk.f32.mxu0 %vm537_vm1, %v507_v26  ;;  %21550 = vmatprep.mubr.msk.f32.mxu1 %vm537_vm1, %v525_v27  ;;  %v484_v61 = vld [vmem:[#allocation7 + $0xa8] sm:$0xff]  ;;  %v1228_v62 = vld [vmem:[#allocation10 + $0x40] sm:$0xff]  ;;  %v1229_v63 = vld [vmem:[#allocation10 + $0x48] sm:$0xff]  ;;  %455 = vst.msk [vmem:[#allocation2] sm:$0xff] %vm454_vm4, %v30405_v24 }
 0x10d   : > { %937 = vperm.xlu0 %25950, %v471_v34   ;;  %942 = vperm.xlu1 %25951, %v472_v35   ;;  %v24091_v0 = vpack.c.bf16 %v1229_v63, %v1228_v62  ;;  %v485_v1 = vld [vmem:[#allocation7 + $0xb0] sm:$0xff]  ;;  %v486_v2 = vld [vmem:[#allocation7 + $0xb8] sm:$0xff]  ;;  %v487_v3 = vld [vmem:[#allocation7 + $0xc0] sm:$0xff]  ;;  %456 = vst.msk [vmem:[#allocation2 + $0x8] sm:$0xff] %vm454_vm4, %v30405_v24 }
 0x10e   : > { %v488_v4 = vld [vmem:[#allocation7 + $0xc8] sm:$0xff]  ;;  %v1230_v5 = vld [vmem:[#allocation10 + $0x50] sm:$0xff]  ;;  %v489_v8 = vld [vmem:[#allocation7 + $0xd0] sm:$0xff]  ;;  %459 = vst.msk [vmem:[#allocation2 + $0x133] sm:$0xff] %vm454_vm4, %v30405_v24 }
 0x10f   : > { %21524 = vmatmul.mubr.msk.f32.gmra.mrb[8].mxu0 %vm537_vm1, %v508_v30  ;;  %21551 = vmatmul.mubr.msk.f32.gmra.mrb[8].mxu1 %vm537_vm1, %v526_v31  ;;  %v1231_v6 = vld [vmem:[#allocation10 + $0x58] sm:$0xff]  ;;  %v490_v9 = vld [vmem:[#allocation7 + $0xd8] sm:$0xff]  ;;  %v491_v10 = vld [vmem:[#allocation7 + $0xe0] sm:$0xff]  ;;  %460 = vst.msk [vmem:[#allocation2 + $0x13b] sm:$0xff] %vm454_vm4, %v30405_v24 }
 0x110   : > { %21526 = vmatprep.mubr.msk.f32.mxu0 %vm537_vm1, %v509_v32  ;;  %21553 = vmatprep.mubr.msk.f32.mxu1 %vm537_vm1, %v527_v33  ;;  %v24095_v7 = vpack.c.bf16 %v1231_v6, %v1230_v5  ;;  %v492_v11 = vld [vmem:[#allocation7 + $0xe8] sm:$0xff]  ;;  %v1232_v12 = vld [vmem:[#allocation10 + $0x60] sm:$0xff]  ;;  %v1233_v13 = vld [vmem:[#allocation10 + $0x68] sm:$0xff]  ;;  %458 = vst.msk [vmem:[#allocation2 + $0x10] sm:$0x7] %vm457_vm5, %v30405_v24 }
 0x111   : > { %947 = vperm.xlu0 %25950, %v473_v40   ;;  %952 = vperm.xlu1 %25951, %v474_v41   ;;  %v24099_v14 = vpack.c.bf16 %v1233_v13, %v1232_v12  ;;  %v493_v15 = vld [vmem:[#allocation7 + $0xf0] sm:$0xff]  ;;  %v494_v16 = vld [vmem:[#allocation7 + $0xf8] sm:$0xff]  ;;  %v495_v17 = vld [vmem:[#allocation7 + $0x100] sm:$0xff] }
 0x112   : > { %24092 = vmatprep.subr.bf16.mxu1 %v24091_v0  ;;  %v496_v18 = vld [vmem:[#allocation7 + $0x108] sm:$0xff]  ;;  %v497_v19 = vld [vmem:[#allocation7 + $0x110] sm:$0xff]  ;;  %v498_v20 = vld [vmem:[#allocation7 + $0x118] sm:$0xff] }
 0x113   : > { %21527 = vmatmul.mubr.msk.f32.gmra.mrb[10].mxu0 %vm537_vm1, %v510_v36  ;;  %21554 = vmatmul.mubr.msk.f32.gmra.mrb[10].mxu1 %vm537_vm1, %v528_v37  ;;  %v1234_v21 = vld [vmem:[#allocation10 + $0x70] sm:$0xff]  ;;  %v1235_v22 = vld [vmem:[#allocation10 + $0x78] sm:$0xff]  ;;  %v1183_v27 = vld [vmem:[#allocation10] sm:$0xff] }
 0x114   : > { %21529 = vmatprep.mubr.msk.f32.mxu0 %vm537_vm1, %v511_v38  ;;  %21556 = vmatprep.mubr.msk.f32.mxu1 %vm537_vm1, %v529_v39  ;;  %v24103_v23 = vpack.c.bf16 %v1235_v22, %v1234_v21  ;;  %v1191_v25 = vld [vmem:[#allocation2 + $0x1] sm:$0xff]  ;;  %v1186_v31 = vld [vmem:[#allocation10 + $0x18] sm:$0xff]  ;;  %v1187_v33 = vld [vmem:[#allocation10 + $0x20] sm:$0xff] }
 0x115   : > { %957 = vperm.xlu0 %25950, %v475_v46   ;;  %962 = vperm.xlu1 %25951, %v476_v47   ;;  %v1184_v28 = vld [vmem:[#allocation10 + $0x8] sm:$0xff]  ;;  %v1185_v30 = vld [vmem:[#allocation10 + $0x10] sm:$0xff] }
 0x116   : > { %24094 = vmatpush3.bf16.msra.mxu1 %v24091_v0  ;;  %v24107_v29 = vpack.c.bf16 %v1184_v28, %v1183_v27  ;;  %v24111_v32 = vpack.c.bf16 %v1186_v31, %v1185_v30  ;;  %v1188_v34 = vld [vmem:[#allocation10 + $0x28] sm:$0xff] }
 0x117   : > { %21530 = vmatmul.mubr.msk.f32.gmra.mrb[12].mxu0 %vm537_vm1, %v512_v42  ;;  %21557 = vmatmul.mubr.msk.f32.gmra.mrb[12].mxu1 %vm537_vm1, %v530_v43  ;;  %v1192_v26 = vld [vmem:[#allocation2 + $0x9] sm:$0xff]  ;;  %v24115_v35 = vpack.c.bf16 %v1188_v34, %v1187_v33 }
 0x118   : > { %21532 = vmatprep.mubr.msk.f32.mxu0 %vm537_vm1, %v513_v44  ;;  %21559 = vmatprep.mubr.msk.f32.mxu1 %vm537_vm1, %v531_v45  ;;  %v1189_v42 = vld [vmem:[#allocation10 + $0x30] sm:$0xff]  ;;  %v1190_v43 = vld [vmem:[#allocation10 + $0x38] sm:$0xff] }
 0x119   : > { %967 = vperm.xlu0 %25950, %v477_v52   ;;  %972 = vperm.xlu1 %25951, %v478_v53   ;;  %v24119_v44 = vpack.c.bf16 %v1190_v43, %v1189_v42 }
 0x11a   : > { %24096 = vmatprep.subr.bf16.mxu1 %v24095_v7 }
 0x11b   : > { %21533 = vmatmul.mubr.msk.f32.gmra.mrb[14].mxu0 %vm537_vm1, %v514_v48  ;;  %21560 = vmatmul.mubr.msk.f32.gmra.mrb[14].mxu1 %vm537_vm1, %v532_v49  ;;  %v1979_v49 = vld [vmem:[#allocation10 + $0x80] sm:$0xff] }
 0x11c   : > { %21535 = vmatprep.mubr.msk.f32.mxu0 %vm537_vm1, %v515_v50  ;;  %21562 = vmatprep.mubr.msk.f32.mxu1 %vm537_vm1, %v533_v51  ;;  %v1980_v50 = vld [vmem:[#allocation10 + $0x88] sm:$0xff] }
 0x11d   : > { %977 = vperm.xlu0 %25950, %v479_v56   ;;  %982 = vperm.xlu1 %25951, %v480_v57   ;;  %v26803_v53 = vpack.c.bf16 %v1980_v50, %v1979_v49 }
 0x11e   : > { %24098 = vmatpush3.bf16.msra.mxu1 %v24095_v7 }
 0x11f   : > { %21536 = vmatmul.mubr.msk.f32.gmra.mrb[16].mxu0 %vm537_vm1, %v516_v54  ;;  %21563 = vmatmul.mubr.msk.f32.gmra.mrb[16].mxu1 %vm537_vm1, %v534_v55 }
 0x120   : > { %24100 = vmatprep.subr.bf16.mxu1 %v24099_v14  ;;  %21581 = vmatprep.mubr.msk.f32.mxu1 %vm454_vm4, %v1191_v25 }
 0x121   : > { %987 = vperm.xlu0 %25950, %v481_v58   ;;  %992 = vperm.xlu1 %25951, %v482_v59  }
 0x122   : > { %24102 = vmatpush3.bf16.msra.mxu1 %v24099_v14 }
 0x123   : > { %24104 = vmatprep.subr.bf16.mxu1 %v24103_v23 }
 0x125   : > { %997 = vperm.xlu0 %25950, %v483_v60   ;;  %1002 = vperm.xlu1 %25951, %v484_v61  }
 0x126   : > { %24106 = vmatpush3.bf16.msra.mxu1 %v24103_v23 }
 0x127   : > { %24108 = vmatprep.subr.bf16.mxu1 %v24107_v29 }
 0x129   : > { %1007 = vperm.xlu0 %25950, %v485_v1   ;;  %1012 = vperm.xlu1 %25951, %v486_v2  }
 0x12a   : > { %21582 = vmatmul.mubr.msk.f32.vlgmr.msra.gmra.mrb[18].mxu1 %vm454_vm4, %v1192_v26 }
 0x12b   : > { %24110 = vmatpush3.bf16.msra.mxu1 %v24107_v29 }
 0x12c   : > { %24112 = vmatprep.subr.bf16.mxu1 %v24111_v32 }
 0x12d   : > { %1017 = vperm.xlu0 %25950, %v487_v3   ;;  %1022 = vperm.xlu1 %25951, %v488_v4  }
 0x12f   : > { %24114 = vmatpush3.bf16.msra.mxu1 %v24111_v32 }
 0x130   : > { %24116 = vmatprep.subr.bf16.mxu1 %v24115_v35 }
 0x131   : > { %1027 = vperm.xlu0 %25950, %v489_v8   ;;  %1032 = vperm.xlu1 %25951, %v490_v9  }
 0x133   : > { %24118 = vmatpush3.bf16.msra.mxu1 %v24115_v35 }
 0x134   : > { %24120 = vmatprep.subr.bf16.mxu1 %v24119_v44 }
 0x135   : > { %1037 = vperm.xlu0 %25950, %v491_v10   ;;  %1042 = vperm.xlu1 %25951, %v492_v11  }
 0x137   : > { %24122 = vmatpush3.bf16.msra.mxu1 %v24119_v44 }
 0x138   : > { %24124 = vmatprep.subr.bf16.mxu1 %v26803_v53 }
 0x139   : > { %1047 = vperm.xlu0 %25950, %v493_v15   ;;  %1052 = vperm.xlu1 %25951, %v494_v16  }
 0x13d   : > { %1057 = vperm.xlu0 %25950, %v495_v17   ;;  %1062 = vperm.xlu1 %25951, %v496_v18  }
 0x141   : > { %1067 = vperm.xlu0 %25950, %v497_v19   ;;  %1072 = vperm.xlu1 %25951, %v498_v20  }
 0x17c   : > { %v26779_v36 = vpop.permute.xlu0 %897  ;;  %v26781_v37 = vpop.permute.xlu1 %907 }
 0x180   : > { %v26783_v38 = vpop.permute.xlu0 %902  ;;  %v26785_v39 = vpop.permute.xlu1 %912 }
 0x184   : > { %v26787_v40 = vpop.permute.xlu0 %917  ;;  %v26789_v41 = vpop.permute.xlu1 %922 }
 0x188   : > { %v26791_v45 = vpop.permute.xlu0 %927  ;;  %v26793_v46 = vpop.permute.xlu1 %932 }
 0x18c   : > { %v26795_v47 = vpop.permute.xlu0 %937  ;;  %v26797_v48 = vpop.permute.xlu1 %942 }
 0x190   : > { %v26799_v51 = vpop.permute.xlu0 %947  ;;  %v26801_v52 = vpop.permute.xlu1 %952 }
 0x194   : > { %v26806_v54 = vpop.permute.xlu0 %957  ;;  %v26808_v55 = vpop.permute.xlu1 %962 }
 0x198   : > { %v26810_v56 = vpop.permute.xlu0 %967  ;;  %v26812_v57 = vpop.permute.xlu1 %972 }
 0x19c   : > { %v26814_v58 = vpop.permute.xlu0 %977  ;;  %v26816_v59 = vpop.permute.xlu1 %982 }
 0x1a0   : > { %v26818_v60 = vpop.permute.xlu0 %987  ;;  %v26820_v61 = vpop.permute.xlu1 %992 }
 0x1a4   : > { %v26822_v62 = vpop.permute.xlu0 %997  ;;  %v26824_v63 = vpop.permute.xlu1 %1002 }
 0x1a5   : > { %30460 = vst [vmem:[#allocation25_spill] sm:$0xff] %v26822_v62 }
 0x1a8   : > { %v26826_v0 = vpop.permute.xlu0 %1007  ;;  %v26828_v1 = vpop.permute.xlu1 %1012 }
 0x1a9   : > { %30461 = vst [vmem:[#allocation26_spill] sm:$0xff] %v26826_v0  ;;  %30462 = vst [vmem:[#allocation27_spill] sm:$0xff] %v26828_v1 }
 0x1ac   : > { %v26830_v2 = vpop.permute.xlu0 %1017  ;;  %v26832_v3 = vpop.permute.xlu1 %1022 }
 0x1ad   : > { %30463 = vst [vmem:[#allocation28_spill] sm:$0xff] %v26830_v2  ;;  %30464 = vst [vmem:[#allocation29_spill] sm:$0xff] %v26832_v3 }
 0x1b0   : > { %v26834_v4 = vpop.permute.xlu0 %1027  ;;  %v26836_v5 = vpop.permute.xlu1 %1032 }
 0x1b1   : > { %30465 = vst [vmem:[#allocation30_spill] sm:$0xff] %v26834_v4  ;;  %30466 = vst [vmem:[#allocation31_spill] sm:$0xff] %v26836_v5 }
 0x1b4   : > { %v26850_v22 = vpop.permute.xlu0 %1037  ;;  %v26852_v23 = vpop.permute.xlu1 %1042 }
 0x1b5   : > { %30467 = vst [vmem:[#allocation32_spill] sm:$0xff] %v26850_v22  ;;  %30468 = vst [vmem:[#allocation33_spill] sm:$0xff] %v26852_v23 }
 0x1d2   : > { %v21513_v6 = vpop.f32.mrb[0].mxu0  ;;  %v21540_v7 = vpop.f32.mrb[0].mxu1 }
 0x1d3   : > { %v1076_v8 = vmul.f32 %v21513_v6, %v26783_v38  ;;  %v1094_v9 = vmul.f32 %v21540_v7, %v26820_v61  ;;  %v716_v10 = vpop.f32.mrb[1].mxu0  ;;  %v806_v11 = vpop.f32.mrb[1].mxu1 }
 0x1d4   : > { %v1075_v12 = vmul.f32 %v26779_v36, %v716_v10  ;;  %v1093_v13 = vmul.f32 %v26818_v60, %v806_v11 }
 0x1d5   : > { %1112 = vst.msk [vmem:[#allocation2 + $0x1b] sm:$0xff] %vm454_vm4, %v1076_v8  ;;  %1130 = vst.msk [vmem:[#allocation2 + $0xab] sm:$0xff] %vm454_vm4, %v1094_v9  ;;  %v26872_v8 = vpop.permute.xlu0 %1047  ;;  %v26874_v9 = vpop.permute.xlu1 %1052 }
 0x1d6   : > { %1111 = vst.msk [vmem:[#allocation2 + $0x13] sm:$0xff] %vm454_vm4, %v1075_v12  ;;  %1129 = vst.msk [vmem:[#allocation2 + $0xa3] sm:$0xff] %vm454_vm4, %v1093_v13  ;;  %v21516_v14 = vpop.f32.mrb[2].mxu0  ;;  %v21543_v15 = vpop.f32.mrb[2].mxu1 }
 0x1d7   : > { %v1078_v16 = vmul.f32 %v21516_v14, %v26785_v39  ;;  %v1096_v17 = vmul.f32 %v21543_v15, %v26824_v63  ;;  %v726_v18 = vpop.f32.mrb[3].mxu0  ;;  %v816_v19 = vpop.f32.mrb[3].mxu1  ;;  %30469 = vst [vmem:[#allocation34_spill] sm:$0xff] %v26872_v8  ;;  %30470 = vst [vmem:[#allocation35_spill] sm:$0xff] %v26874_v9 }
 0x1d8   : > { %v1077_v20 = vmul.f32 %v26781_v37, %v726_v18  ;;  %v1095_v21 = vmul.f32 %v26822_v62, %v816_v19  ;;  %v2854_v62 = vld [vmem:[#allocation10 + $0x138] sm:$0xff] }
 0x1d9   : > { %1114 = vst.msk [vmem:[#allocation2 + $0x2b] sm:$0xff] %vm454_vm4, %v1078_v16  ;;  %1132 = vst.msk [vmem:[#allocation2 + $0xbb] sm:$0xff] %vm454_vm4, %v1096_v17 }
 0x1da   : > { %1113 = vst.msk [vmem:[#allocation2 + $0x23] sm:$0xff] %vm454_vm4, %v1077_v20  ;;  %1131 = vst.msk [vmem:[#allocation2 + $0xb3] sm:$0xff] %vm454_vm4, %v1095_v21  ;;  %v21519_v25 = vpop.f32.mrb[4].mxu0  ;;  %v21546_v26 = vpop.f32.mrb[4].mxu1 }
 0x1db   : > { %v1080_v27 = vmul.f32 %v21519_v25, %v26789_v41  ;;  %v1098_v28 = vmul.f32 %v21546_v26, %v26828_v1  ;;  %v736_v29 = vpop.f32.mrb[5].mxu0  ;;  %v826_v30 = vpop.f32.mrb[5].mxu1  ;;  %v2853_v1 = vld [vmem:[#allocation10 + $0x130] sm:$0xff] }
 0x1dc   : > { %v1079_v31 = vmul.f32 %v26787_v40, %v736_v29  ;;  %v1097_v32 = vmul.f32 %v26826_v0, %v826_v30 }
 0x1dd   : > { %1116 = vst.msk [vmem:[#allocation2 + $0x3b] sm:$0xff] %vm454_vm4, %v1080_v27  ;;  %1134 = vst.msk [vmem:[#allocation2 + $0xcb] sm:$0xff] %vm454_vm4, %v1098_v28  ;;  %v1193_v33 = vld [vmem:[#allocation2 + $0x11] sm:$0xff]  ;;  %v1194_v34 = vld [vmem:[#allocation2 + $0x19] sm:$0xff] }
 0x1de   : > { %1115 = vst.msk [vmem:[#allocation2 + $0x33] sm:$0xff] %vm454_vm4, %v1079_v31  ;;  %1133 = vst.msk [vmem:[#allocation2 + $0xc3] sm:$0xff] %vm454_vm4, %v1097_v32  ;;  %v21522_v35 = vpop.f32.mrb[6].mxu0  ;;  %v21549_v42 = vpop.f32.mrb[6].mxu1  ;;  %21584 = vmatprep.mubr.msk.f32.mxu1 %vm454_vm4, %v1193_v33 }
 0x1df   : > { %v1082_v43 = vmul.f32 %v21522_v35, %v26793_v46  ;;  %v1100_v44 = vmul.f32 %v21549_v42, %v26832_v3  ;;  %v746_v49 = vpop.f32.mrb[7].mxu0  ;;  %v836_v50 = vpop.f32.mrb[7].mxu1  ;;  %21585 = vmatmul.mubr.msk.f32.gmra.mrb[20].mxu1 %vm454_vm4, %v1194_v34  ;;  %v2852_v3 = vld [vmem:[#allocation10 + $0x128] sm:$0xff] }
 0x1e0   : > { %v1081_v6 = vmul.f32 %v26791_v45, %v746_v49  ;;  %v1099_v7 = vmul.f32 %v26830_v2, %v836_v50  ;;  %v26896_v33 = vpop.permute.xlu0 %1057  ;;  %v26898_v34 = vpop.permute.xlu1 %1062  ;;  %v2851_v2 = vld [vmem:[#allocation10 + $0x120] sm:$0xff] }
 0x1e1   : > { %1118 = vst.msk [vmem:[#allocation2 + $0x4b] sm:$0xff] %vm454_vm4, %v1082_v43  ;;  %1136 = vst.msk [vmem:[#allocation2 + $0xdb] sm:$0xff] %vm454_vm4, %v1100_v44  ;;  %v1195_v10 = vld [vmem:[#allocation2 + $0x21] sm:$0xff]  ;;  %v1196_v11 = vld [vmem:[#allocation2 + $0x29] sm:$0xff]  ;;  %v24163_v0 = vpack.c.bf16 %v2852_v3, %v2851_v2 }
 0x1e2   : > { %1117 = vst.msk [vmem:[#allocation2 + $0x43] sm:$0xff] %vm454_vm4, %v1081_v6  ;;  %1135 = vst.msk [vmem:[#allocation2 + $0xd3] sm:$0xff] %vm454_vm4, %v1099_v7  ;;  %v21525_v12 = vpop.f32.mrb[8].mxu0  ;;  %v21552_v13 = vpop.f32.mrb[8].mxu1  ;;  %21587 = vmatprep.mubr.msk.f32.mxu1 %vm454_vm4, %v1195_v10  ;;  %v2810_v3 = vld [vmem:[#allocation2 + $0x13] sm:$0xff] }
 0x1e3   : > { %v1084_v14 = vmul.f32 %v21525_v12, %v26797_v48  ;;  %v1102_v15 = vmul.f32 %v21552_v13, %v26836_v5  ;;  %v756_v16 = vpop.f32.mrb[9].mxu0  ;;  %v846_v17 = vpop.f32.mrb[9].mxu1  ;;  %21588 = vmatmul.mubr.msk.f32.gmra.mrb[22].mxu1 %vm454_vm4, %v1196_v11  ;;  %30471 = vst [vmem:[#allocation36_spill] sm:$0xff] %v26896_v33  ;;  %30472 = vst [vmem:[#allocation37_spill] sm:$0xff] %v26898_v34 }
 0x1e4   : > { %v1083_v18 = vmul.f32 %v26795_v47, %v756_v16  ;;  %v1101_v19 = vmul.f32 %v26834_v4, %v846_v17  ;;  %v2850_v4 = vld [vmem:[#allocation10 + $0x118] sm:$0xff] }
 0x1e5   : > { %1120 = vst.msk [vmem:[#allocation2 + $0x5b] sm:$0xff] %vm454_vm4, %v1084_v14  ;;  %1138 = vst.msk [vmem:[#allocation2 + $0xeb] sm:$0xff] %vm454_vm4, %v1102_v15  ;;  %v1197_v20 = vld [vmem:[#allocation2 + $0x31] sm:$0xff]  ;;  %v1198_v21 = vld [vmem:[#allocation2 + $0x39] sm:$0xff] }
 0x1e6   : > { %1119 = vst.msk [vmem:[#allocation2 + $0x53] sm:$0xff] %vm454_vm4, %v1083_v18  ;;  %1137 = vst.msk [vmem:[#allocation2 + $0xe3] sm:$0xff] %vm454_vm4, %v1101_v19  ;;  %v21528_v25 = vpop.f32.mrb[10].mxu0  ;;  %v21555_v26 = vpop.f32.mrb[10].mxu1  ;;  %21590 = vmatprep.mubr.msk.f32.mxu1 %vm454_vm4, %v1197_v20 }
 0x1e7   : > { %v1086_v27 = vmul.f32 %v21528_v25, %v26801_v52  ;;  %v1104_v28 = vmul.f32 %v21555_v26, %v26852_v23  ;;  %v766_v29 = vpop.f32.mrb[11].mxu0  ;;  %v856_v30 = vpop.f32.mrb[11].mxu1  ;;  %21591 = vmatmul.mubr.msk.f32.gmra.mrb[24].mxu1 %vm454_vm4, %v1198_v21  ;;  %v2849_v23 = vld [vmem:[#allocation10 + $0x110] sm:$0xff] }
 0x1e8   : > { %v1085_v31 = vmul.f32 %v26799_v51, %v766_v29  ;;  %v1103_v32 = vmul.f32 %v26850_v22, %v856_v30  ;;  %v26920_v25 = vpop.permute.xlu0 %1067  ;;  %v26922_v26 = vpop.permute.xlu1 %1072  ;;  %v24159_v5 = vpack.c.bf16 %v2850_v4, %v2849_v23  ;;  %v24167_v4 = vpack.c.bf16 %v2854_v62, %v2853_v1  ;;  %v3281_v23 = vld [vmem:[#allocation10 + $0x140] sm:$0xff]  ;;  %v3283_v1 = vld [vmem:[#allocation10 + $0x150] sm:$0xff] }
 0x1e9   : > { %1122 = vst.msk [vmem:[#allocation2 + $0x6b] sm:$0xff] %vm454_vm4, %v1086_v27  ;;  %1140 = vst.msk [vmem:[#allocation2 + $0xfb] sm:$0xff] %vm454_vm4, %v1104_v28  ;;  %v1199_v35 = vld [vmem:[#allocation2 + $0x41] sm:$0xff]  ;;  %v1200_v42 = vld [vmem:[#allocation2 + $0x49] sm:$0xff] }
 0x1ea   : > { %1121 = vst.msk [vmem:[#allocation2 + $0x63] sm:$0xff] %vm454_vm4, %v1085_v31  ;;  %1139 = vst.msk [vmem:[#allocation2 + $0xf3] sm:$0xff] %vm454_vm4, %v1103_v32  ;;  %v21531_v43 = vpop.f32.mrb[12].mxu0  ;;  %v21558_v44 = vpop.f32.mrb[12].mxu1  ;;  %21593 = vmatprep.mubr.msk.f32.mxu1 %vm454_vm4, %v1199_v35 }
 0x1eb   : > { %v1088_v49 = vmul.f32 %v21531_v43, %v26808_v55  ;;  %v1106_v50 = vmul.f32 %v21558_v44, %v26874_v9  ;;  %v776_v6 = vpop.f32.mrb[13].mxu0  ;;  %v866_v7 = vpop.f32.mrb[13].mxu1  ;;  %21594 = vmatmul.mubr.msk.f32.gmra.mrb[26].mxu1 %vm454_vm4, %v1200_v42  ;;  %30473 = vst [vmem:[#allocation38_spill] sm:$0xff] %v26920_v25  ;;  %30474 = vst [vmem:[#allocation39_spill] sm:$0xff] %v26922_v26 }
 0x1ec   : > { %v1087_v10 = vmul.f32 %v26806_v54, %v776_v6  ;;  %v1105_v11 = vmul.f32 %v26872_v8, %v866_v7 }
 0x1ed   : > { %1124 = vst.msk [vmem:[#allocation2 + $0x7b] sm:$0xff] %vm454_vm4, %v1088_v49  ;;  %1142 = vst.msk [vmem:[#allocation2 + $0x10b] sm:$0xff] %vm454_vm4, %v1106_v50  ;;  %v1201_v12 = vld [vmem:[#allocation2 + $0x51] sm:$0xff]  ;;  %v1202_v13 = vld [vmem:[#allocation2 + $0x59] sm:$0xff] }
 0x1ee   : > { %1123 = vst.msk [vmem:[#allocation2 + $0x73] sm:$0xff] %vm454_vm4, %v1087_v10  ;;  %1141 = vst.msk [vmem:[#allocation2 + $0x103] sm:$0xff] %vm454_vm4, %v1105_v11  ;;  %v21534_v14 = vpop.f32.mrb[14].mxu0  ;;  %v21561_v15 = vpop.f32.mrb[14].mxu1  ;;  %21596 = vmatprep.mubr.msk.f32.mxu1 %vm454_vm4, %v1201_v12  ;;  %v1970_v24 = vld [vmem:[#allocation2 + $0xe2] sm:$0xff] }
 0x1ef   : > { %v1090_v16 = vmul.f32 %v21534_v14, %v26812_v57  ;;  %v1108_v17 = vmul.f32 %v21561_v15, %v26898_v34  ;;  %v786_v18 = vpop.f32.mrb[15].mxu0  ;;  %v876_v19 = vpop.f32.mrb[15].mxu1  ;;  %21597 = vmatmul.mubr.msk.f32.gmra.mrb[28].mxu1 %vm454_vm4, %v1202_v13  ;;  %v1212_v13 = vld [vmem:[#allocation2 + $0xa9] sm:$0xff]  ;;  %v1213_v14 = vld [vmem:[#allocation2 + $0xb1] sm:$0xff]  ;;  %v1214_v15 = vld [vmem:[#allocation2 + $0xb9] sm:$0xff] }
 0x1f0   : > { %v1089_v20 = vmul.f32 %v26810_v56, %v786_v18  ;;  %v1107_v21 = vmul.f32 %v26896_v33, %v876_v19  ;;  %v1217_v18 = vld [vmem:[#allocation2 + $0xd1] sm:$0xff]  ;;  %v1218_v19 = vld [vmem:[#allocation2 + $0xd9] sm:$0xff] }
 0x1f1   : > { %1126 = vst.msk [vmem:[#allocation2 + $0x8b] sm:$0xff] %vm454_vm4, %v1090_v16  ;;  %1144 = vst.msk [vmem:[#allocation2 + $0x11b] sm:$0xff] %vm454_vm4, %v1108_v17  ;;  %v1203_v27 = vld [vmem:[#allocation2 + $0x61] sm:$0xff]  ;;  %v1204_v28 = vld [vmem:[#allocation2 + $0x69] sm:$0xff] }
 0x1f2   : > { %1125 = vst.msk [vmem:[#allocation2 + $0x83] sm:$0xff] %vm454_vm4, %v1089_v20  ;;  %1143 = vst.msk [vmem:[#allocation2 + $0x113] sm:$0xff] %vm454_vm4, %v1107_v21  ;;  %v21537_v29 = vpop.f32.mrb[16].mxu0  ;;  %v21564_v30 = vpop.f32.mrb[16].mxu1  ;;  %21599 = vmatprep.mubr.msk.f32.mxu1 %vm454_vm4, %v1203_v27  ;;  %v1215_v16 = vld [vmem:[#allocation2 + $0xc1] sm:$0xff]  ;;  %v1216_v17 = vld [vmem:[#allocation2 + $0xc9] sm:$0xff] }
 0x1f3   : > { %v1092_v31 = vmul.f32 %v21537_v29, %v26816_v59  ;;  %v1110_v32 = vmul.f32 %v21564_v30, %v26922_v26  ;;  %v796_v35 = vpop.f32.mrb[17].mxu0  ;;  %v886_v42 = vpop.f32.mrb[17].mxu1  ;;  %21600 = vmatmul.mubr.msk.f32.gmra.mrb[30].mxu1 %vm454_vm4, %v1204_v28  ;;  %v1219_v20 = vld [vmem:[#allocation2 + $0xe1] sm:$0xff]  ;;  %v1220_v21 = vld [vmem:[#allocation2 + $0xe9] sm:$0xff]  ;;  %v1221_v27 = vld [vmem:[#allocation2 + $0xf1] sm:$0xff] }
 0x1f4   : > { %v1091_v43 = vmul.f32 %v26814_v58, %v796_v35  ;;  %v1109_v44 = vmul.f32 %v26920_v25, %v886_v42  ;;  %v1222_v28 = vld [vmem:[#allocation2 + $0xf9] sm:$0xff]  ;;  %v1981_v42 = vld [vmem:[#allocation10 + $0x90] sm:$0xff] }
 0x1f5   : > { %1128 = vst.msk [vmem:[#allocation2 + $0x9b] sm:$0xff] %vm454_vm4, %v1092_v31  ;;  %1146 = vst.msk [vmem:[#allocation2 + $0x12b] sm:$0xff] %vm454_vm4, %v1110_v32  ;;  %v1205_v49 = vld [vmem:[#allocation2 + $0x71] sm:$0xff]  ;;  %v1206_v50 = vld [vmem:[#allocation2 + $0x79] sm:$0xff] }
 0x1f6   : > { %1127 = vst.msk [vmem:[#allocation2 + $0x93] sm:$0xff] %vm454_vm4, %v1091_v43  ;;  %1145 = vst.msk [vmem:[#allocation2 + $0x123] sm:$0xff] %vm454_vm4, %v1109_v44  ;;  %21602 = vmatprep.mubr.msk.f32.mxu1 %vm454_vm4, %v1205_v49  ;;  %v1223_v29 = vld [vmem:[#allocation2 + $0x101] sm:$0xff]  ;;  %v1224_v30 = vld [vmem:[#allocation2 + $0x109] sm:$0xff] }
 0x1f7   : > { %21603 = vmatmul.mubr.msk.f32.gmra.mrb[32].mxu1 %vm454_vm4, %v1206_v50  ;;  %v1147_v32 = vld [vmem:[#allocation2] sm:$0xff]  ;;  %v1982_v43 = vld [vmem:[#allocation10 + $0x98] sm:$0xff]  ;;  %v1148_v44 = vld [vmem:[#allocation2 + $0x8] sm:$0xff] }
 0x1f8   : > { %v24127_v49 = vpack.c.bf16 %v1982_v43, %v1981_v42  ;;  %v1983_v50 = vld [vmem:[#allocation10 + $0xa0] sm:$0xff]  ;;  %v1971_v25 = vld [vmem:[#allocation2 + $0xea] sm:$0xff]  ;;  %v1974_v34 = vld [vmem:[#allocation2 + $0x102] sm:$0xff] }
 0x1f9   : > { %v1207_v6 = vld [vmem:[#allocation2 + $0x81] sm:$0xff]  ;;  %v1208_v7 = vld [vmem:[#allocation2 + $0x89] sm:$0xff]  ;;  %v1225_v31 = vld [vmem:[#allocation2 + $0x111] sm:$0xff] }
 0x1fa   : > { %21605 = vmatprep.mubr.msk.f32.mxu1 %vm454_vm4, %v1207_v6  ;;  %v1226_v35 = vld [vmem:[#allocation2 + $0x119] sm:$0xff]  ;;  %v1164_v43 = vld [vmem:[#allocation2 + $0x88] sm:$0xff] }
 0x1fb   : > { %21606 = vmatmul.mubr.msk.f32.gmra.mrb[34].mxu1 %vm454_vm4, %v1208_v7  ;;  %v1984_v6 = vld [vmem:[#allocation10 + $0xa8] sm:$0xff]  ;;  %v1149_v7 = vld [vmem:[#allocation2 + $0x10] sm:$0xff] }
 0x1fc   : > { %v1211_v12 = vld [vmem:[#allocation2 + $0xa1] sm:$0xff]  ;;  %v1972_v26 = vld [vmem:[#allocation2 + $0xf2] sm:$0xff]  ;;  %v1975_v8 = vld [vmem:[#allocation2 + $0x10a] sm:$0xff] }
 0x1fd   : > { %v1209_v10 = vld [vmem:[#allocation2 + $0x91] sm:$0xff]  ;;  %v1210_v11 = vld [vmem:[#allocation2 + $0x99] sm:$0xff]  ;;  %v2410_v62 = vld [vmem:[#allocation2 + $0x122] sm:$0xff] }
 0x1fe   : > { %21608 = vmatprep.mubr.msk.f32.mxu1 %vm454_vm4, %v1209_v10  ;;  %v24131_v10 = vpack.c.bf16 %v1984_v6, %v1983_v50  ;;  %v1163_v42 = vld [vmem:[#allocation2 + $0x80] sm:$0xff]  ;;  %v1168_v6 = vld [vmem:[#allocation2 + $0xa8] sm:$0xff]  ;;  %v1976_v9 = vld [vmem:[#allocation2 + $0x112] sm:$0xff] }
 0x1ff   : > { %21609 = vmatmul.mubr.msk.f32.gmra.mrb[36].mxu1 %vm454_vm4, %v1210_v11  ;;  %v1150_v11 = vld [vmem:[#allocation2 + $0x18] sm:$0xff]  ;;  %v1167_v50 = vld [vmem:[#allocation2 + $0xa0] sm:$0xff] }
 0x200   : > { %21611 = vmatprep.mubr.msk.f32.mxu1 %vm454_vm4, %v1211_v12  ;;  %v1985_v12 = vld [vmem:[#allocation10 + $0xb0] sm:$0xff]  ;;  %v1973_v33 = vld [vmem:[#allocation2 + $0xfa] sm:$0xff] }
 0x201   : > { %v1977_v22 = vld [vmem:[#allocation2 + $0x11a] sm:$0xff] }
 0x203   : > { %21612 = vmatmul.mubr.msk.f32.gmra.mrb[38].mxu1 %vm454_vm4, %v1212_v13  ;;  %v1986_v13 = vld [vmem:[#allocation10 + $0xb8] sm:$0xff] }
 0x204   : > { %21614 = vmatprep.mubr.msk.f32.mxu1 %vm454_vm4, %v1213_v14  ;;  %v1151_v14 = vld [vmem:[#allocation2 + $0x20] sm:$0xff] }
 0x207   : > { %21615 = vmatmul.mubr.msk.f32.gmra.mrb[40].mxu1 %vm454_vm4, %v1214_v15  ;;  %v24135_v15 = vpack.c.bf16 %v1986_v13, %v1985_v12  ;;  %v1172_v12 = vld [vmem:[#allocation2 + $0xc8] sm:$0xff]  ;;  %v1173_v13 = vld [vmem:[#allocation2 + $0xd0] sm:$0xff] }
 0x208   : > { %21617 = vmatprep.mubr.msk.f32.mxu1 %vm454_vm4, %v1215_v16  ;;  %v1152_v16 = vld [vmem:[#allocation2 + $0x28] sm:$0xff] }
 0x20b   : > { %21618 = vmatmul.mubr.msk.f32.gmra.mrb[42].mxu1 %vm454_vm4, %v1216_v17  ;;  %v2413_v17 = vld [vmem:[#allocation10 + $0xc0] sm:$0xff] }
 0x20c   : > { %21620 = vmatprep.mubr.msk.f32.mxu1 %vm454_vm4, %v1217_v18  ;;  %v2414_v18 = vld [vmem:[#allocation10 + $0xc8] sm:$0xff] }
 0x20f   : > { %21621 = vmatmul.mubr.msk.f32.gmra.mrb[44].mxu1 %vm454_vm4, %v1218_v19  ;;  %v26968_v19 = vpack.c.bf16 %v2414_v18, %v2413_v17  ;;  %v1177_v17 = vld [vmem:[#allocation2 + $0xf0] sm:$0xff]  ;;  %v1178_v18 = vld [vmem:[#allocation2 + $0xf8] sm:$0xff] }
 0x210   : > { %21623 = vmatprep.mubr.msk.f32.mxu1 %vm454_vm4, %v1219_v20  ;;  %v1154_v20 = vld [vmem:[#allocation2 + $0x38] sm:$0xff] }
 0x213   : > { %21624 = vmatmul.mubr.msk.f32.gmra.mrb[46].mxu1 %vm454_vm4, %v1220_v21  ;;  %v1155_v21 = vld [vmem:[#allocation2 + $0x40] sm:$0xff] }
 0x214   : > { %21626 = vmatprep.mubr.msk.f32.mxu1 %vm454_vm4, %v1221_v27  ;;  %v1156_v27 = vld [vmem:[#allocation2 + $0x48] sm:$0xff] }
 0x217   : > { %21627 = vmatmul.mubr.msk.f32.gmra.mrb[48].mxu1 %vm454_vm4, %v1222_v28  ;;  %v1157_v28 = vld [vmem:[#allocation2 + $0x50] sm:$0xff] }
 0x218   : > { %21629 = vmatprep.mubr.msk.f32.mxu1 %vm454_vm4, %v1223_v29  ;;  %v1158_v29 = vld [vmem:[#allocation2 + $0x58] sm:$0xff] }
 0x21b   : > { %21630 = vmatmul.mubr.msk.f32.gmra.mrb[50].mxu1 %vm454_vm4, %v1224_v30  ;;  %v1159_v30 = vld [vmem:[#allocation2 + $0x60] sm:$0xff] }
 0x21c   : > { %21632 = vmatprep.mubr.msk.f32.mxu1 %vm454_vm4, %v1225_v31  ;;  %v1160_v31 = vld [vmem:[#allocation2 + $0x68] sm:$0xff] }
 0x21f   : > { %21633 = vmatmul.mubr.msk.f32.gmra.mrb[52].mxu1 %vm454_vm4, %v1226_v35  ;;  %v1162_v35 = vld [vmem:[#allocation2 + $0x78] sm:$0xff] }
 0x220   : > { %21651 = vmatprep.mubr.msk.f32.mxu1 %vm454_vm4, %v1147_v32  ;;  %v1161_v32 = vld [vmem:[#allocation2 + $0x70] sm:$0xff] }
 0x223   : > { %21652 = vmatmul.mubr.msk.f32.vlgmr.msra.gmra.mrb[18].mxu1 %vm454_vm4, %v1148_v44  ;;  %v1165_v44 = vld [vmem:[#allocation2 + $0x90] sm:$0xff] }
 0x224   : > { %24126 = vmatpush3.bf16.msra.mxu1 %v26803_v53  ;;  %21654 = vmatprep.mubr.msk.f32.mxu1 %vm454_vm4, %v1149_v7  ;;  %v1153_v53 = vld [vmem:[#allocation2 + $0x30] sm:$0xff] }
 0x225   : > { %24128 = vmatprep.subr.bf16.mxu1 %v24127_v49  ;;  %v1169_v7 = vld [vmem:[#allocation2 + $0xb0] sm:$0xff] }
 0x227   : > { %21655 = vmatmul.mubr.msk.f32.gmra.mrb[20].mxu1 %vm454_vm4, %v1150_v11  ;;  %v1171_v11 = vld [vmem:[#allocation2 + $0xc0] sm:$0xff] }
 0x228   : > { %21657 = vmatprep.mubr.msk.f32.mxu1 %vm454_vm4, %v1151_v14  ;;  %24130 = vmatpush3.bf16.msra.mxu1 %v24127_v49  ;;  %v1166_v49 = vld [vmem:[#allocation2 + $0x98] sm:$0xff] }
 0x229   : > { %24132 = vmatprep.subr.bf16.mxu1 %v24131_v10  ;;  %v1174_v14 = vld [vmem:[#allocation2 + $0xd8] sm:$0xff] }
 0x22b   : > { %21658 = vmatmul.mubr.msk.f32.gmra.mrb[22].mxu1 %vm454_vm4, %v1152_v16  ;;  %v1176_v16 = vld [vmem:[#allocation2 + $0xe8] sm:$0xff] }
 0x22c   : > { %21660 = vmatprep.mubr.msk.f32.mxu1 %vm454_vm4, %v1153_v53  ;;  %24134 = vmatpush3.bf16.msra.mxu1 %v24131_v10  ;;  %v1170_v10 = vld [vmem:[#allocation2 + $0xb8] sm:$0xff]  ;;  %v1179_v53 = vld [vmem:[#allocation2 + $0x100] sm:$0xff] }
 0x22d   : > { %24136 = vmatprep.subr.bf16.mxu1 %v24135_v15 }
 0x22f   : > { %21661 = vmatmul.mubr.msk.f32.gmra.mrb[24].mxu1 %vm454_vm4, %v1154_v20  ;;  %v1180_v20 = vld [vmem:[#allocation2 + $0x108] sm:$0xff] }
 0x230   : > { %21663 = vmatprep.mubr.msk.f32.mxu1 %vm454_vm4, %v1155_v21  ;;  %24138 = vmatpush3.bf16.msra.mxu1 %v24135_v15  ;;  %v1175_v15 = vld [vmem:[#allocation2 + $0xe0] sm:$0xff]  ;;  %v1181_v21 = vld [vmem:[#allocation2 + $0x110] sm:$0xff] }
 0x231   : > { %24140 = vmatprep.subr.bf16.mxu1 %v26968_v19 }
 0x233   : > { %21664 = vmatmul.mubr.msk.f32.gmra.mrb[26].mxu1 %vm454_vm4, %v1156_v27  ;;  %v1942_v27 = vld [vmem:[#allocation2 + $0x2] sm:$0xff] }
 0x234   : > { %21666 = vmatprep.mubr.msk.f32.mxu1 %vm454_vm4, %v1157_v28  ;;  %v1182_v28 = vld [vmem:[#allocation2 + $0x118] sm:$0xff] }
 0x237   : > { %21667 = vmatmul.mubr.msk.f32.gmra.mrb[28].mxu1 %vm454_vm4, %v1158_v29  ;;  %v2415_v29 = vld [vmem:[#allocation10 + $0xd0] sm:$0xff] }
 0x238   : > { %21669 = vmatprep.mubr.msk.f32.mxu1 %vm454_vm4, %v1159_v30  ;;  %v2416_v30 = vld [vmem:[#allocation10 + $0xd8] sm:$0xff] }
 0x23b   : > { %21670 = vmatmul.mubr.msk.f32.gmra.mrb[30].mxu1 %vm454_vm4, %v1160_v31  ;;  %v1943_v31 = vld [vmem:[#allocation2 + $0xa] sm:$0xff] }
 0x23c   : > { %21672 = vmatprep.mubr.msk.f32.mxu1 %vm454_vm4, %v1161_v32  ;;  %v24143_v32 = vpack.c.bf16 %v2416_v30, %v2415_v29  ;;  %v27062_v29 = vld [vmem:[#allocation2 + $0x82] sm:$0xff]  ;;  %v27066_v30 = vld [vmem:[#allocation2 + $0x8a] sm:$0xff] }
 0x23f   : > { %21673 = vmatmul.mubr.msk.f32.gmra.mrb[32].mxu1 %vm454_vm4, %v1162_v35  ;;  %v2417_v35 = vld [vmem:[#allocation10 + $0xe0] sm:$0xff] }
 0x240   : > { %21675 = vmatprep.mubr.msk.f32.mxu1 %vm454_vm4, %v1163_v42  ;;  %v2418_v42 = vld [vmem:[#allocation10 + $0xe8] sm:$0xff] }
 0x243   : > { %21676 = vmatmul.mubr.msk.f32.gmra.mrb[34].mxu1 %vm454_vm4, %v1164_v43  ;;  %v27002_v43 = vld [vmem:[#allocation2 + $0x12] sm:$0xff] }
 0x244   : > { %21678 = vmatprep.mubr.msk.f32.mxu1 %vm454_vm4, %v1165_v44  ;;  %v24147_v44 = vpack.c.bf16 %v2418_v42, %v2417_v35  ;;  %v27078_v35 = vld [vmem:[#allocation2 + $0xa2] sm:$0xff]  ;;  %v27082_v42 = vld [vmem:[#allocation2 + $0xaa] sm:$0xff] }
 0x247   : > { %21679 = vmatmul.mubr.msk.f32.gmra.mrb[36].mxu1 %vm454_vm4, %v1166_v49  ;;  %v27007_v49 = vld [vmem:[#allocation2 + $0x1a] sm:$0xff] }
 0x248   : > { %21681 = vmatprep.mubr.msk.f32.mxu1 %vm454_vm4, %v1167_v50  ;;  %v2419_v50 = vld [vmem:[#allocation10 + $0xf0] sm:$0xff] }
 0x24b   : > { %21682 = vmatmul.mubr.msk.f32.gmra.mrb[38].mxu1 %vm454_vm4, %v1168_v6  ;;  %v2420_v6 = vld [vmem:[#allocation10 + $0xf8] sm:$0xff] }
 0x24c   : > { %21684 = vmatprep.mubr.msk.f32.mxu1 %vm454_vm4, %v1169_v7  ;;  %v27011_v7 = vld [vmem:[#allocation2 + $0x22] sm:$0xff] }
 0x24f   : > { %21685 = vmatmul.mubr.msk.f32.gmra.mrb[40].mxu1 %vm454_vm4, %v1170_v10  ;;  %v27015_v10 = vld [vmem:[#allocation2 + $0x2a] sm:$0xff] }
 0x250   : > { %21687 = vmatprep.mubr.msk.f32.mxu1 %vm454_vm4, %v1171_v11  ;;  %v2847_v11 = vld [vmem:[#allocation10 + $0x100] sm:$0xff] }
 0x253   : > { %21688 = vmatmul.mubr.msk.f32.gmra.mrb[42].mxu1 %vm454_vm4, %v1172_v12  ;;  %v2848_v12 = vld [vmem:[#allocation10 + $0x108] sm:$0xff] }
 0x254   : > { %21690 = vmatprep.mubr.msk.f32.mxu1 %vm454_vm4, %v1173_v13  ;;  %v27019_v13 = vld [vmem:[#allocation2 + $0x32] sm:$0xff] }
 0x257   : > { %21691 = vmatmul.mubr.msk.f32.gmra.mrb[44].mxu1 %vm454_vm4, %v1174_v14  ;;  %v27023_v14 = vpack.c.bf16 %v2848_v12, %v2847_v11  ;;  %v27102_v11 = vld [vmem:[#allocation2 + $0xd2] sm:$0xff]  ;;  %v27106_v12 = vld [vmem:[#allocation2 + $0xda] sm:$0xff] }
 0x258   : > { %21693 = vmatprep.mubr.msk.f32.mxu1 %vm454_vm4, %v1175_v15  ;;  %v27025_v15 = vld [vmem:[#allocation2 + $0x3a] sm:$0xff] }
 0x25b   : > { %21694 = vmatmul.mubr.msk.f32.gmra.mrb[46].mxu1 %vm454_vm4, %v1176_v16  ;;  %v27029_v16 = vld [vmem:[#allocation2 + $0x42] sm:$0xff] }
 0x25c   : > { %21696 = vmatprep.mubr.msk.f32.mxu1 %vm454_vm4, %v1177_v17  ;;  %v27034_v17 = vld [vmem:[#allocation2 + $0x4a] sm:$0xff] }
 0x25f   : > { %21697 = vmatmul.mubr.msk.f32.gmra.mrb[48].mxu1 %vm454_vm4, %v1178_v18  ;;  %v27038_v18 = vld [vmem:[#allocation2 + $0x52] sm:$0xff] }
 0x260   : > { %21699 = vmatprep.mubr.msk.f32.mxu1 %vm454_vm4, %v1179_v53  ;;  %v27042_v53 = vld [vmem:[#allocation2 + $0x5a] sm:$0xff] }
 0x263   : > { %21700 = vmatmul.mubr.msk.f32.gmra.mrb[50].mxu1 %vm454_vm4, %v1180_v20  ;;  %v27046_v20 = vld [vmem:[#allocation2 + $0x62] sm:$0xff] }
 0x264   : > { %21702 = vmatprep.mubr.msk.f32.mxu1 %vm454_vm4, %v1181_v21  ;;  %v27050_v21 = vld [vmem:[#allocation2 + $0x6a] sm:$0xff] }
 0x267   : > { %21703 = vmatmul.mubr.msk.f32.gmra.mrb[52].mxu1 %vm454_vm4, %v1182_v28  ;;  %v27058_v28 = vld [vmem:[#allocation2 + $0x7a] sm:$0xff] }
 0x268   : > { %21721 = vmatprep.mubr.msk.f32.mxu1 %vm454_vm4, %v1942_v27  ;;  %v27054_v27 = vld [vmem:[#allocation2 + $0x72] sm:$0xff] }
 0x26b   : > { %21722 = vmatmul.mubr.msk.f32.vlgmr.msra.gmra.mrb[18].mxu1 %vm454_vm4, %v1943_v31  ;;  %v27070_v31 = vld [vmem:[#allocation2 + $0x92] sm:$0xff] }
 0x26c   : > { %24142 = vmatpush3.bf16.msra.mxu1 %v26968_v19  ;;  %21724 = vmatprep.mubr.msk.f32.mxu1 %vm454_vm4, %v27002_v43  ;;  %v24151_v19 = vpack.c.bf16 %v2420_v6, %v2419_v50  ;;  %v27090_v50 = vld [vmem:[#allocation2 + $0xba] sm:$0xff]  ;;  %v27094_v6 = vld [vmem:[#allocation2 + $0xc2] sm:$0xff] }
 0x26d   : > { %24144 = vmatprep.subr.bf16.mxu1 %v24143_v32 }
 0x26f   : > { %21725 = vmatmul.mubr.msk.f32.gmra.mrb[20].mxu1 %vm454_vm4, %v27007_v49 }
 0x270   : > { %21727 = vmatprep.mubr.msk.f32.mxu1 %vm454_vm4, %v27011_v7  ;;  %24146 = vmatpush3.bf16.msra.mxu1 %v24143_v32  ;;  %v27074_v32 = vld [vmem:[#allocation2 + $0x9a] sm:$0xff] }
 0x271   : > { %24148 = vmatprep.subr.bf16.mxu1 %v24147_v44 }
 0x273   : > { %21728 = vmatmul.mubr.msk.f32.gmra.mrb[22].mxu1 %vm454_vm4, %v27015_v10 }
 0x274   : > { %21730 = vmatprep.mubr.msk.f32.mxu1 %vm454_vm4, %v27019_v13  ;;  %24150 = vmatpush3.bf16.msra.mxu1 %v24147_v44  ;;  %v27086_v44 = vld [vmem:[#allocation2 + $0xb2] sm:$0xff] }
 0x275   : > { %24152 = vmatprep.subr.bf16.mxu1 %v24151_v19 }
 0x277   : > { %21731 = vmatmul.mubr.msk.f32.gmra.mrb[24].mxu1 %vm454_vm4, %v27025_v15 }
 0x278   : > { %21733 = vmatprep.mubr.msk.f32.mxu1 %vm454_vm4, %v27029_v16  ;;  %24154 = vmatpush3.bf16.msra.mxu1 %v24151_v19  ;;  %v27098_v19 = vld [vmem:[#allocation2 + $0xca] sm:$0xff] }
 0x279   : > { %24156 = vmatprep.subr.bf16.mxu1 %v27023_v14 }
 0x27b   : > { %21734 = vmatmul.mubr.msk.f32.gmra.mrb[26].mxu1 %vm454_vm4, %v27034_v17 }
 0x27c   : > { %21736 = vmatprep.mubr.msk.f32.mxu1 %vm454_vm4, %v27038_v18 }
 0x27f   : > { %21737 = vmatmul.mubr.msk.f32.gmra.mrb[28].mxu1 %vm454_vm4, %v27042_v53 }
 0x280   : > { %21739 = vmatprep.mubr.msk.f32.mxu1 %vm454_vm4, %v27046_v20 }
 0x283   : > { %21740 = vmatmul.mubr.msk.f32.gmra.mrb[30].mxu1 %vm454_vm4, %v27050_v21 }
 0x284   : > { %21742 = vmatprep.mubr.msk.f32.mxu1 %vm454_vm4, %v27054_v27 }
 0x287   : > { %21743 = vmatmul.mubr.msk.f32.gmra.mrb[32].mxu1 %vm454_vm4, %v27058_v28 }
 0x288   : > { %21745 = vmatprep.mubr.msk.f32.mxu1 %vm454_vm4, %v27062_v29 }
 0x28b   : > { %21746 = vmatmul.mubr.msk.f32.gmra.mrb[34].mxu1 %vm454_vm4, %v27066_v30 }
 0x28c   : > { %21748 = vmatprep.mubr.msk.f32.mxu1 %vm454_vm4, %v27070_v31 }
 0x28f   : > { %21749 = vmatmul.mubr.msk.f32.gmra.mrb[36].mxu1 %vm454_vm4, %v27074_v32 }
 0x290   : > { %21751 = vmatprep.mubr.msk.f32.mxu1 %vm454_vm4, %v27078_v35 }
 0x293   : > { %21752 = vmatmul.mubr.msk.f32.gmra.mrb[38].mxu1 %vm454_vm4, %v27082_v42 }
 0x294   : > { %21754 = vmatprep.mubr.msk.f32.mxu1 %vm454_vm4, %v27086_v44 }
 0x297   : > { %21755 = vmatmul.mubr.msk.f32.gmra.mrb[40].mxu1 %vm454_vm4, %v27090_v50 }
 0x298   : > { %21757 = vmatprep.mubr.msk.f32.mxu1 %vm454_vm4, %v27094_v6 }
 0x29b   : > { %21758 = vmatmul.mubr.msk.f32.gmra.mrb[42].mxu1 %vm454_vm4, %v27098_v19 }
 0x29c   : > { %21760 = vmatprep.mubr.msk.f32.mxu1 %vm454_vm4, %v27102_v11 }
 0x29f   : > { %21761 = vmatmul.mubr.msk.f32.gmra.mrb[44].mxu1 %vm454_vm4, %v27106_v12 }
 0x2a0   : > { %21763 = vmatprep.mubr.msk.f32.mxu1 %vm454_vm4, %v1970_v24 }
 0x2a3   : > { %21764 = vmatmul.mubr.msk.f32.gmra.mrb[46].mxu1 %vm454_vm4, %v1971_v25 }
 0x2a4   : > { %21766 = vmatprep.mubr.msk.f32.mxu1 %vm454_vm4, %v1972_v26 }
 0x2a7   : > { %21767 = vmatmul.mubr.msk.f32.gmra.mrb[48].mxu1 %vm454_vm4, %v1973_v33 }
 0x2a8   : > { %21769 = vmatprep.mubr.msk.f32.mxu1 %vm454_vm4, %v1974_v34 }
 0x2ab   : > { %21770 = vmatmul.mubr.msk.f32.gmra.mrb[50].mxu1 %vm454_vm4, %v1975_v8 }
 0x2ac   : > { %21772 = vmatprep.mubr.msk.f32.mxu1 %vm454_vm4, %v1976_v9 }
 0x2af   : > { %21773 = vmatmul.mubr.msk.f32.gmra.mrb[52].mxu1 %vm454_vm4, %v1977_v22 }
 0x2b0   : > { %21791 = vmatprep.mubr.msk.f32.mxu1 %vm454_vm4, %v27002_v43  ;;  %v3282_v43 = vld [vmem:[#allocation10 + $0x148] sm:$0xff] }
 0x2b1   : > { %v24171_v2 = vpack.c.bf16 %v3282_v43, %v3281_v23  ;;  %v2836_v23 = vld [vmem:[#allocation2 + $0xe3] sm:$0xff]  ;;  %v2837_v43 = vld [vmem:[#allocation2 + $0xeb] sm:$0xff] }
 0x2b3   : > { %21792 = vmatmul.mubr.msk.f32.vlgmr.msra.gmra.mrb[18].mxu1 %vm454_vm4, %v27007_v49  ;;  %v3288_v49 = vld [vmem:[#allocation10 + $0x178] sm:$0xff] }
 0x2b4   : > { %24158 = vmatpush3.bf16.msra.mxu1 %v27023_v14  ;;  %21794 = vmatprep.mubr.msk.f32.mxu1 %vm454_vm4, %v27011_v7  ;;  %v2814_v7 = vld [vmem:[#allocation2 + $0x33] sm:$0xff] }
 0x2b5   : > { %24160 = vmatprep.subr.bf16.mxu1 %v24159_v5  ;;  %v3715_v14 = vld [vmem:[#allocation10 + $0x180] sm:$0xff] }
 0x2b7   : > { %21795 = vmatmul.mubr.msk.f32.gmra.mrb[20].mxu1 %vm454_vm4, %v27015_v10 }
 0x2b8   : > { %21797 = vmatprep.mubr.msk.f32.mxu1 %vm454_vm4, %v27019_v13  ;;  %24162 = vmatpush3.bf16.msra.mxu1 %v24159_v5  ;;  %v2815_v13 = vld [vmem:[#allocation2 + $0x3b] sm:$0xff] }
 0x2b9   : > { %24164 = vmatprep.subr.bf16.mxu1 %v24163_v0 }
 0x2bb   : > { %21798 = vmatmul.mubr.msk.f32.gmra.mrb[22].mxu1 %vm454_vm4, %v27025_v15  ;;  %v3716_v15 = vld [vmem:[#allocation10 + $0x188] sm:$0xff] }
 0x2bc   : > { %21800 = vmatprep.mubr.msk.f32.mxu1 %vm454_vm4, %v27029_v16  ;;  %24166 = vmatpush3.bf16.msra.mxu1 %v24163_v0  ;;  %v2411_v0 = vld [vmem:[#allocation2 + $0x12a] sm:$0xff] }
 0x2bd   : > { %24168 = vmatprep.subr.bf16.mxu1 %v24167_v4  ;;  %v2816_v16 = vld [vmem:[#allocation2 + $0x43] sm:$0xff] }
 0x2bf   : > { %21801 = vmatmul.mubr.msk.f32.gmra.mrb[24].mxu1 %vm454_vm4, %v27034_v17  ;;  %v27188_v17 = vpack.c.bf16 %v3716_v15, %v3715_v14  ;;  %v3721_v14 = vld [vmem:[#allocation10 + $0x1b0] sm:$0xff]  ;;  %v3722_v15 = vld [vmem:[#allocation10 + $0x1b8] sm:$0xff] }
 0x2c0   : > { %21803 = vmatprep.mubr.msk.f32.mxu1 %vm454_vm4, %v27038_v18  ;;  %24170 = vmatpush3.bf16.msra.mxu1 %v24167_v4  ;;  %v2817_v18 = vld [vmem:[#allocation2 + $0x4b] sm:$0xff]  ;;  %v2835_v4 = vld [vmem:[#allocation2 + $0xdb] sm:$0xff] }
 0x2c1   : > { %24172 = vmatprep.subr.bf16.mxu1 %v24171_v2 }
 0x2c3   : > { %21804 = vmatmul.mubr.msk.f32.gmra.mrb[26].mxu1 %vm454_vm4, %v27042_v53  ;;  %v2818_v53 = vld [vmem:[#allocation2 + $0x53] sm:$0xff] }
 0x2c4   : > { %21806 = vmatprep.mubr.msk.f32.mxu1 %vm454_vm4, %v27046_v20  ;;  %v2819_v20 = vld [vmem:[#allocation2 + $0x5b] sm:$0xff] }
 0x2c7   : > { %21807 = vmatmul.mubr.msk.f32.gmra.mrb[28].mxu1 %vm454_vm4, %v27050_v21  ;;  %v2820_v21 = vld [vmem:[#allocation2 + $0x63] sm:$0xff] }
 0x2c8   : > { %21809 = vmatprep.mubr.msk.f32.mxu1 %vm454_vm4, %v27054_v27  ;;  %v2821_v27 = vld [vmem:[#allocation2 + $0x6b] sm:$0xff] }
 0x2cb   : > { %21810 = vmatmul.mubr.msk.f32.gmra.mrb[30].mxu1 %vm454_vm4, %v27058_v28  ;;  %v2822_v28 = vld [vmem:[#allocation2 + $0x73] sm:$0xff] }
 0x2cc   : > { %21812 = vmatprep.mubr.msk.f32.mxu1 %vm454_vm4, %v27062_v29  ;;  %v2823_v29 = vld [vmem:[#allocation2 + $0x7b] sm:$0xff] }
 0x2cf   : > { %21813 = vmatmul.mubr.msk.f32.gmra.mrb[32].mxu1 %vm454_vm4, %v27066_v30  ;;  %v2824_v30 = vld [vmem:[#allocation2 + $0x83] sm:$0xff] }
 0x2d0   : > { %21815 = vmatprep.mubr.msk.f32.mxu1 %vm454_vm4, %v27070_v31  ;;  %v2825_v31 = vld [vmem:[#allocation2 + $0x8b] sm:$0xff] }
 0x2d3   : > { %21816 = vmatmul.mubr.msk.f32.gmra.mrb[34].mxu1 %vm454_vm4, %v27074_v32  ;;  %v2826_v32 = vld [vmem:[#allocation2 + $0x93] sm:$0xff] }
 0x2d4   : > { %21818 = vmatprep.mubr.msk.f32.mxu1 %vm454_vm4, %v27078_v35  ;;  %v2827_v35 = vld [vmem:[#allocation2 + $0x9b] sm:$0xff] }
 0x2d7   : > { %21819 = vmatmul.mubr.msk.f32.gmra.mrb[36].mxu1 %vm454_vm4, %v27082_v42  ;;  %v2828_v42 = vld [vmem:[#allocation2 + $0xa3] sm:$0xff] }
 0x2d8   : > { %21821 = vmatprep.mubr.msk.f32.mxu1 %vm454_vm4, %v27086_v44  ;;  %v2829_v44 = vld [vmem:[#allocation2 + $0xab] sm:$0xff] }
 0x2db   : > { %21822 = vmatmul.mubr.msk.f32.gmra.mrb[38].mxu1 %vm454_vm4, %v27090_v50  ;;  %v2830_v50 = vld [vmem:[#allocation2 + $0xb3] sm:$0xff] }
 0x2dc   : > { %21824 = vmatprep.mubr.msk.f32.mxu1 %vm454_vm4, %v27094_v6  ;;  %v2831_v6 = vld [vmem:[#allocation2 + $0xbb] sm:$0xff] }
 0x2df   : > { %21825 = vmatmul.mubr.msk.f32.gmra.mrb[40].mxu1 %vm454_vm4, %v27098_v19  ;;  %v2832_v19 = vld [vmem:[#allocation2 + $0xc3] sm:$0xff] }
 0x2e0   : > { %21827 = vmatprep.mubr.msk.f32.mxu1 %vm454_vm4, %v27102_v11  ;;  %v2833_v11 = vld [vmem:[#allocation2 + $0xcb] sm:$0xff] }
 0x2e3   : > { %21828 = vmatmul.mubr.msk.f32.gmra.mrb[42].mxu1 %vm454_vm4, %v27106_v12  ;;  %v2834_v12 = vld [vmem:[#allocation2 + $0xd3] sm:$0xff] }
 0x2e4   : > { %21830 = vmatprep.mubr.msk.f32.mxu1 %vm454_vm4, %v1970_v24  ;;  %v3284_v24 = vld [vmem:[#allocation10 + $0x158] sm:$0xff] }
 0x2e5   : > { %v24175_v5 = vpack.c.bf16 %v3284_v24, %v3283_v1  ;;  %v2841_v1 = vld [vmem:[#allocation2 + $0x10b] sm:$0xff]  ;;  %v2842_v24 = vld [vmem:[#allocation2 + $0x113] sm:$0xff] }
 0x2e7   : > { %21831 = vmatmul.mubr.msk.f32.gmra.mrb[44].mxu1 %vm454_vm4, %v1971_v25  ;;  %v3286_v25 = vld [vmem:[#allocation10 + $0x168] sm:$0xff] }
 0x2e8   : > { %21833 = vmatprep.mubr.msk.f32.mxu1 %vm454_vm4, %v1972_v26  ;;  %v3287_v26 = vld [vmem:[#allocation10 + $0x170] sm:$0xff] }
 0x2e9   : > { %v24183_v10 = vpack.c.bf16 %v3288_v49, %v3287_v26  ;;  %v3719_v26 = vld [vmem:[#allocation10 + $0x1a0] sm:$0xff]  ;;  %v3720_v49 = vld [vmem:[#allocation10 + $0x1a8] sm:$0xff] }
 0x2eb   : > { %21834 = vmatmul.mubr.msk.f32.gmra.mrb[46].mxu1 %vm454_vm4, %v1973_v33  ;;  %v2811_v33 = vld [vmem:[#allocation2 + $0x1b] sm:$0xff] }
 0x2ec   : > { %21836 = vmatprep.mubr.msk.f32.mxu1 %vm454_vm4, %v1974_v34  ;;  %v3285_v34 = vld [vmem:[#allocation10 + $0x160] sm:$0xff] }
 0x2ef   : > { %21837 = vmatmul.mubr.msk.f32.gmra.mrb[48].mxu1 %vm454_vm4, %v1975_v8  ;;  %v2812_v8 = vld [vmem:[#allocation2 + $0x23] sm:$0xff] }
 0x2f0   : > { %21839 = vmatprep.mubr.msk.f32.mxu1 %vm454_vm4, %v1976_v9  ;;  %v2813_v9 = vld [vmem:[#allocation2 + $0x2b] sm:$0xff] }
 0x2f3   : > { %21840 = vmatmul.mubr.msk.f32.gmra.mrb[50].mxu1 %vm454_vm4, %v1977_v22  ;;  %v24179_v22 = vpack.c.bf16 %v3286_v25, %v3285_v34  ;;  %v3717_v34 = vld [vmem:[#allocation10 + $0x190] sm:$0xff]  ;;  %v3718_v25 = vld [vmem:[#allocation10 + $0x198] sm:$0xff] }
 0x2f4   : > { %21842 = vmatprep.mubr.msk.f32.mxu1 %vm454_vm4, %v2410_v62  ;;  %v2839_v62 = vld [vmem:[#allocation2 + $0xfb] sm:$0xff] }
 0x2f7   : > { %21843 = vmatmul.mubr.msk.f32.gmra.mrb[52].mxu1 %vm454_vm4, %v2411_v0  ;;  %v2840_v0 = vld [vmem:[#allocation2 + $0x103] sm:$0xff] }
 0x2f8   : > { %21861 = vmatprep.mubr.msk.f32.mxu1 %vm454_vm4, %v2810_v3  ;;  %v2843_v3 = vld [vmem:[#allocation2 + $0x11b] sm:$0xff] }
 0x2fb   : > { %21862 = vmatmul.mubr.msk.f32.vlgmr.msra.gmra.mrb[18].mxu1 %vm454_vm4, %v2811_v33  ;;  %v2845_v33 = vld [vmem:[#allocation2 + $0x12b] sm:$0xff] }
 0x2fc   : > { %24174 = vmatpush3.bf16.msra.mxu1 %v24171_v2  ;;  %21864 = vmatprep.mubr.msk.f32.mxu1 %vm454_vm4, %v2812_v8  ;;  %v2838_v2 = vld [vmem:[#allocation2 + $0xf3] sm:$0xff] }
 0x2fd   : > { %24176 = vmatprep.subr.bf16.mxu1 %v24175_v5  ;;  %v3244_v8 = vld [vmem:[#allocation2 + $0x14] sm:$0xff] }
 0x2ff   : > { %21865 = vmatmul.mubr.msk.f32.gmra.mrb[20].mxu1 %vm454_vm4, %v2813_v9  ;;  %v3245_v9 = vld [vmem:[#allocation2 + $0x1c] sm:$0xff] }
 0x300   : > { %21867 = vmatprep.mubr.msk.f32.mxu1 %vm454_vm4, %v2814_v7  ;;  %24178 = vmatpush3.bf16.msra.mxu1 %v24175_v5  ;;  %v2844_v5 = vld [vmem:[#allocation2 + $0x123] sm:$0xff] }
 0x301   : > { %24180 = vmatprep.subr.bf16.mxu1 %v24179_v22  ;;  %v27222_v7 = vld [vmem:[#allocation2 + $0x24] sm:$0xff] }
 0x303   : > { %21868 = vmatmul.mubr.msk.f32.gmra.mrb[22].mxu1 %vm454_vm4, %v2815_v13  ;;  %v27227_v13 = vld [vmem:[#allocation2 + $0x2c] sm:$0xff] }
 0x304   : > { %21870 = vmatprep.mubr.msk.f32.mxu1 %vm454_vm4, %v2816_v16  ;;  %24182 = vmatpush3.bf16.msra.mxu1 %v24179_v22  ;;  %v24191_v22 = vpack.c.bf16 %v3718_v25, %v3717_v34  ;;  %v27231_v16 = vld [vmem:[#allocation2 + $0x34] sm:$0xff]  ;;  %v3274_v34 = vld [vmem:[#allocation2 + $0x104] sm:$0xff]  ;;  %v3275_v25 = vld [vmem:[#allocation2 + $0x10c] sm:$0xff] }
 0x305   : > { %24184 = vmatprep.subr.bf16.mxu1 %v24183_v10 }
 0x307   : > { %21871 = vmatmul.mubr.msk.f32.gmra.mrb[24].mxu1 %vm454_vm4, %v2817_v18  ;;  %v27235_v18 = vld [vmem:[#allocation2 + $0x3c] sm:$0xff] }
 0x308   : > { %21873 = vmatprep.mubr.msk.f32.mxu1 %vm454_vm4, %v2818_v53  ;;  %24186 = vmatpush3.bf16.msra.mxu1 %v24183_v10  ;;  %v24195_v10 = vpack.c.bf16 %v3720_v49, %v3719_v26  ;;  %v4149_v53 = vld [vmem:[#allocation10 + $0x1c0] sm:$0xff]  ;;  %v3279_v26 = vld [vmem:[#allocation2 + $0x12c] sm:$0xff] }
 0x309   : > { %24188 = vmatprep.subr.bf16.mxu1 %v27188_v17  ;;  %v4151_v49 = vld [vmem:[#allocation10 + $0x1d0] sm:$0xff] }
 0x30b   : > { %21874 = vmatmul.mubr.msk.f32.gmra.mrb[26].mxu1 %vm454_vm4, %v2819_v20  ;;  %v4150_v20 = vld [vmem:[#allocation10 + $0x1c8] sm:$0xff] }
 0x30c   : > { %21876 = vmatprep.mubr.msk.f32.mxu1 %vm454_vm4, %v2820_v21  ;;  %v27239_v21 = vld [vmem:[#allocation2 + $0x44] sm:$0xff] }
 0x30f   : > { %21877 = vmatmul.mubr.msk.f32.gmra.mrb[28].mxu1 %vm454_vm4, %v2821_v27  ;;  %v27243_v27 = vpack.c.bf16 %v4150_v20, %v4149_v53  ;;  %v4155_v20 = vld [vmem:[#allocation10 + $0x1f0] sm:$0xff] }
 0x310   : > { %21879 = vmatprep.mubr.msk.f32.mxu1 %vm454_vm4, %v2822_v28  ;;  %v30475_v28 = vmov 0.0  }
 0x311   : > { %462 = vst.msk [vmem:[#allocation2 + $0x143] sm:$0x1f] %vm461_vm6, %v30475_v28  ;;  %v4156_v28 = vld [vmem:[#allocation10 + $0x1f8] sm:$0xff] }
 0x313   : > { %21880 = vmatmul.mubr.msk.f32.gmra.mrb[30].mxu1 %vm454_vm4, %v2823_v29  ;;  %v27246_v29 = vld [vmem:[#allocation2 + $0x4c] sm:$0xff] }
 0x314   : > { %21882 = vmatprep.mubr.msk.f32.mxu1 %vm454_vm4, %v2824_v30  ;;  %v27250_v30 = vld [vmem:[#allocation2 + $0x54] sm:$0xff] }
 0x317   : > { %21883 = vmatmul.mubr.msk.f32.gmra.mrb[32].mxu1 %vm454_vm4, %v2825_v31  ;;  %v27255_v31 = vld [vmem:[#allocation2 + $0x5c] sm:$0xff] }
 0x318   : > { %21885 = vmatprep.mubr.msk.f32.mxu1 %vm454_vm4, %v2826_v32  ;;  %v27259_v32 = vld [vmem:[#allocation2 + $0x64] sm:$0xff] }
 0x31b   : > { %21886 = vmatmul.mubr.msk.f32.gmra.mrb[34].mxu1 %vm454_vm4, %v2827_v35  ;;  %v27263_v35 = vld [vmem:[#allocation2 + $0x6c] sm:$0xff] }
 0x31c   : > { %21888 = vmatprep.mubr.msk.f32.mxu1 %vm454_vm4, %v2828_v42  ;;  %v27267_v42 = vld [vmem:[#allocation2 + $0x74] sm:$0xff] }
 0x31f   : > { %21889 = vmatmul.mubr.msk.f32.gmra.mrb[36].mxu1 %vm454_vm4, %v2829_v44  ;;  %v27271_v44 = vld [vmem:[#allocation2 + $0x7c] sm:$0xff] }
 0x320   : > { %21891 = vmatprep.mubr.msk.f32.mxu1 %vm454_vm4, %v2830_v50  ;;  %v27275_v50 = vld [vmem:[#allocation2 + $0x84] sm:$0xff] }
 0x323   : > { %21892 = vmatmul.mubr.msk.f32.gmra.mrb[38].mxu1 %vm454_vm4, %v2831_v6  ;;  %v27279_v6 = vld [vmem:[#allocation2 + $0x8c] sm:$0xff] }
 0x324   : > { %21894 = vmatprep.mubr.msk.f32.mxu1 %vm454_vm4, %v2832_v19  ;;  %v27283_v19 = vld [vmem:[#allocation2 + $0x94] sm:$0xff] }
 0x327   : > { %21895 = vmatmul.mubr.msk.f32.gmra.mrb[40].mxu1 %vm454_vm4, %v2833_v11  ;;  %v27287_v11 = vld [vmem:[#allocation2 + $0x9c] sm:$0xff] }
 0x328   : > { %21897 = vmatprep.mubr.msk.f32.mxu1 %vm454_vm4, %v2834_v12  ;;  %v27291_v12 = vld [vmem:[#allocation2 + $0xa4] sm:$0xff] }
 0x32b   : > { %21898 = vmatmul.mubr.msk.f32.gmra.mrb[42].mxu1 %vm454_vm4, %v2835_v4  ;;  %v27295_v4 = vld [vmem:[#allocation2 + $0xac] sm:$0xff] }
 0x32c   : > { %21900 = vmatprep.mubr.msk.f32.mxu1 %vm454_vm4, %v2836_v23  ;;  %v27299_v23 = vld [vmem:[#allocation2 + $0xb4] sm:$0xff] }
 0x32f   : > { %21901 = vmatmul.mubr.msk.f32.gmra.mrb[44].mxu1 %vm454_vm4, %v2837_v43  ;;  %v27303_v43 = vld [vmem:[#allocation2 + $0xbc] sm:$0xff] }
 0x330   : > { %21903 = vmatprep.mubr.msk.f32.mxu1 %vm454_vm4, %v2838_v2  ;;  %v27307_v2 = vld [vmem:[#allocation2 + $0xc4] sm:$0xff] }
 0x333   : > { %21904 = vmatmul.mubr.msk.f32.gmra.mrb[46].mxu1 %vm454_vm4, %v2839_v62  ;;  %v27311_v62 = vld [vmem:[#allocation2 + $0xcc] sm:$0xff] }
 0x334   : > { %21906 = vmatprep.mubr.msk.f32.mxu1 %vm454_vm4, %v2840_v0  ;;  %v27315_v0 = vld [vmem:[#allocation2 + $0xd4] sm:$0xff] }
 0x337   : > { %21907 = vmatmul.mubr.msk.f32.gmra.mrb[48].mxu1 %vm454_vm4, %v2841_v1  ;;  %v27319_v1 = vld [vmem:[#allocation2 + $0xdc] sm:$0xff] }
 0x338   : > { %21909 = vmatprep.mubr.msk.f32.mxu1 %vm454_vm4, %v2842_v24  ;;  %v27323_v24 = vld [vmem:[#allocation2 + $0xe4] sm:$0xff] }
 0x33b   : > { %21910 = vmatmul.mubr.msk.f32.gmra.mrb[50].mxu1 %vm454_vm4, %v2843_v3  ;;  %v27327_v3 = vld [vmem:[#allocation2 + $0xec] sm:$0xff] }
 0x33c   : > { %21912 = vmatprep.mubr.msk.f32.mxu1 %vm454_vm4, %v2844_v5  ;;  %v3272_v5 = vld [vmem:[#allocation2 + $0xf4] sm:$0xff] }
 0x33f   : > { %21913 = vmatmul.mubr.msk.f32.gmra.mrb[52].mxu1 %vm454_vm4, %v2845_v33  ;;  %v3273_v33 = vld [vmem:[#allocation2 + $0xfc] sm:$0xff] }
 0x340   : > { %21931 = vmatprep.mubr.msk.f32.mxu1 %vm454_vm4, %v3244_v8  ;;  %v3276_v8 = vld [vmem:[#allocation2 + $0x114] sm:$0xff] }
 0x343   : > { %21932 = vmatmul.mubr.msk.f32.vlgmr.msra.gmra.mrb[18].mxu1 %vm454_vm4, %v3245_v9  ;;  %v3278_v9 = vld [vmem:[#allocation2 + $0x124] sm:$0xff] }
 0x344   : > { %24190 = vmatpush3.bf16.msra.mxu1 %v27188_v17  ;;  %21934 = vmatprep.mubr.msk.f32.mxu1 %vm454_vm4, %v27222_v7  ;;  %v24199_v17 = vpack.c.bf16 %v3722_v15, %v3721_v14  ;;  %v4153_v15 = vld [vmem:[#allocation10 + $0x1e0] sm:$0xff] }
 0x345   : > { %24192 = vmatprep.subr.bf16.mxu1 %v24191_v22 }
 0x347   : > { %21935 = vmatmul.mubr.msk.f32.gmra.mrb[20].mxu1 %vm454_vm4, %v27227_v13 }
 0x348   : > { %21937 = vmatprep.mubr.msk.f32.mxu1 %vm454_vm4, %v27231_v16  ;;  %24194 = vmatpush3.bf16.msra.mxu1 %v24191_v22  ;;  %v3277_v22 = vld [vmem:[#allocation2 + $0x11c] sm:$0xff] }
 0x349   : > { %24196 = vmatprep.subr.bf16.mxu1 %v24195_v10 }
 0x34b   : > { %21938 = vmatmul.mubr.msk.f32.gmra.mrb[22].mxu1 %vm454_vm4, %v27235_v18 }
 0x34c   : > { %21940 = vmatprep.mubr.msk.f32.mxu1 %vm454_vm4, %v27239_v21  ;;  %24198 = vmatpush3.bf16.msra.mxu1 %v24195_v10  ;;  %v4152_v10 = vld [vmem:[#allocation10 + $0x1d8] sm:$0xff] }
 0x34d   : > { %24200 = vmatprep.subr.bf16.mxu1 %v24199_v17  ;;  %v24207_v14 = vpack.c.bf16 %v4152_v10, %v4151_v49  ;;  %v4583_v49 = vld [vmem:[#allocation10 + $0x200] sm:$0xff]  ;;  %v4125_v10 = vld [vmem:[#allocation2 + $0x8d] sm:$0xff] }
 0x34f   : > { %21941 = vmatmul.mubr.msk.f32.gmra.mrb[24].mxu1 %vm454_vm4, %v27246_v29 }
 0x350   : > { %21943 = vmatprep.mubr.msk.f32.mxu1 %vm454_vm4, %v27250_v30  ;;  %24202 = vmatpush3.bf16.msra.mxu1 %v24199_v17  ;;  %v4154_v17 = vld [vmem:[#allocation10 + $0x1e8] sm:$0xff] }
 0x351   : > { %24204 = vmatprep.subr.bf16.mxu1 %v27243_v27  ;;  %v24211_v53 = vpack.c.bf16 %v4154_v17, %v4153_v15  ;;  %v4127_v15 = vld [vmem:[#allocation2 + $0x9d] sm:$0xff]  ;;  %v4128_v17 = vld [vmem:[#allocation2 + $0xa5] sm:$0xff] }
 0x353   : > { %21944 = vmatmul.mubr.msk.f32.gmra.mrb[26].mxu1 %vm454_vm4, %v27255_v31 }
 0x354   : > { %21946 = vmatprep.mubr.msk.f32.mxu1 %vm454_vm4, %v27259_v32 }
 0x357   : > { %21947 = vmatmul.mubr.msk.f32.gmra.mrb[28].mxu1 %vm454_vm4, %v27263_v35 }
 0x358   : > { %21949 = vmatprep.mubr.msk.f32.mxu1 %vm454_vm4, %v27267_v42 }
 0x35b   : > { %21950 = vmatmul.mubr.msk.f32.gmra.mrb[30].mxu1 %vm454_vm4, %v27271_v44 }
 0x35c   : > { %21952 = vmatprep.mubr.msk.f32.mxu1 %vm454_vm4, %v27275_v50 }
 0x35f   : > { %21953 = vmatmul.mubr.msk.f32.gmra.mrb[32].mxu1 %vm454_vm4, %v27279_v6 }
 0x360   : > { %21955 = vmatprep.mubr.msk.f32.mxu1 %vm454_vm4, %v27283_v19 }
 0x363   : > { %21956 = vmatmul.mubr.msk.f32.gmra.mrb[34].mxu1 %vm454_vm4, %v27287_v11 }
 0x364   : > { %21958 = vmatprep.mubr.msk.f32.mxu1 %vm454_vm4, %v27291_v12 }
 0x367   : > { %21959 = vmatmul.mubr.msk.f32.gmra.mrb[36].mxu1 %vm454_vm4, %v27295_v4 }
 0x368   : > { %21961 = vmatprep.mubr.msk.f32.mxu1 %vm454_vm4, %v27299_v23 }
 0x36b   : > { %21962 = vmatmul.mubr.msk.f32.gmra.mrb[38].mxu1 %vm454_vm4, %v27303_v43 }
 0x36c   : > { %21964 = vmatprep.mubr.msk.f32.mxu1 %vm454_vm4, %v27307_v2 }
 0x36f   : > { %21965 = vmatmul.mubr.msk.f32.gmra.mrb[40].mxu1 %vm454_vm4, %v27311_v62 }
 0x370   : > { %21967 = vmatprep.mubr.msk.f32.mxu1 %vm454_vm4, %v27315_v0 }
 0x373   : > { %21968 = vmatmul.mubr.msk.f32.gmra.mrb[42].mxu1 %vm454_vm4, %v27319_v1 }
 0x374   : > { %21970 = vmatprep.mubr.msk.f32.mxu1 %vm454_vm4, %v27323_v24 }
 0x377   : > { %21971 = vmatmul.mubr.msk.f32.gmra.mrb[44].mxu1 %vm454_vm4, %v27327_v3 }
 0x378   : > { %21973 = vmatprep.mubr.msk.f32.mxu1 %vm454_vm4, %v3272_v5 }
 0x37b   : > { %21974 = vmatmul.mubr.msk.f32.gmra.mrb[46].mxu1 %vm454_vm4, %v3273_v33 }
 0x37c   : > { %21976 = vmatprep.mubr.msk.f32.mxu1 %vm454_vm4, %v3274_v34 }
 0x37f   : > { %21977 = vmatmul.mubr.msk.f32.gmra.mrb[48].mxu1 %vm454_vm4, %v3275_v25 }
 0x380   : > { %21979 = vmatprep.mubr.msk.f32.mxu1 %vm454_vm4, %v3276_v8 }
 0x383   : > { %21980 = vmatmul.mubr.msk.f32.gmra.mrb[50].mxu1 %vm454_vm4, %v3277_v22 }
 0x384   : > { %21982 = vmatprep.mubr.msk.f32.mxu1 %vm454_vm4, %v3278_v9 }
 0x387   : > { %21983 = vmatmul.mubr.msk.f32.gmra.mrb[52].mxu1 %vm454_vm4, %v3279_v26 }
 0x388   : > { %22001 = vmatprep.mubr.msk.f32.mxu1 %vm454_vm4, %v27222_v7  ;;  %v24215_v7 = vpack.c.bf16 %v4156_v28, %v4155_v20  ;;  %v4586_v28 = vld [vmem:[#allocation10 + $0x218] sm:$0xff] }
 0x389   : > { %v4130_v20 = vld [vmem:[#allocation2 + $0xb5] sm:$0xff] }
 0x38b   : > { %22002 = vmatmul.mubr.msk.f32.vlgmr.msra.gmra.mrb[18].mxu1 %vm454_vm4, %v27227_v13  ;;  %v4584_v13 = vld [vmem:[#allocation10 + $0x208] sm:$0xff] }
 0x38c   : > { %24206 = vmatpush3.bf16.msra.mxu1 %v27243_v27  ;;  %22004 = vmatprep.mubr.msk.f32.mxu1 %vm454_vm4, %v27231_v16  ;;  %v24219_v16 = vpack.c.bf16 %v4584_v13, %v4583_v49  ;;  %v4585_v27 = vld [vmem:[#allocation10 + $0x210] sm:$0xff] }
 0x38d   : > { %24208 = vmatprep.subr.bf16.mxu1 %v24207_v14  ;;  %v4132_v49 = vld [vmem:[#allocation2 + $0xc5] sm:$0xff]  ;;  %v4133_v13 = vld [vmem:[#allocation2 + $0xcd] sm:$0xff] }
 0x38f   : > { %22005 = vmatmul.mubr.msk.f32.gmra.mrb[20].mxu1 %vm454_vm4, %v27235_v18  ;;  %v3712_v18 = vld [vmem:[#allocation2 + $0x134] sm:$0xff] }
 0x390   : > { %22007 = vmatprep.mubr.msk.f32.mxu1 %vm454_vm4, %v27239_v21  ;;  %24210 = vmatpush3.bf16.msra.mxu1 %v24207_v14  ;;  %v3713_v21 = vld [vmem:[#allocation2 + $0x13c] sm:$0xff] }
 0x391   : > { %24212 = vmatprep.subr.bf16.mxu1 %v24211_v53  ;;  %v4126_v14 = vld [vmem:[#allocation2 + $0x95] sm:$0xff] }
 0x393   : > { %22008 = vmatmul.mubr.msk.f32.gmra.mrb[22].mxu1 %vm454_vm4, %v27246_v29  ;;  %v4112_v29 = vld [vmem:[#allocation2 + $0x25] sm:$0xff] }
 0x394   : > { %22010 = vmatprep.mubr.msk.f32.mxu1 %vm454_vm4, %v27250_v30  ;;  %24214 = vmatpush3.bf16.msra.mxu1 %v24211_v53  ;;  %v24223_v30 = vpack.c.bf16 %v4586_v28, %v4585_v27  ;;  %v4129_v53 = vld [vmem:[#allocation2 + $0xad] sm:$0xff]  ;;  %v4138_v28 = vld [vmem:[#allocation2 + $0xf5] sm:$0xff] }
 0x395   : > { %24216 = vmatprep.subr.bf16.mxu1 %v24215_v7  ;;  %v4137_v27 = vld [vmem:[#allocation2 + $0xed] sm:$0xff] }
 0x397   : > { %22011 = vmatmul.mubr.msk.f32.gmra.mrb[24].mxu1 %vm454_vm4, %v27255_v31  ;;  %v4113_v31 = vld [vmem:[#allocation2 + $0x2d] sm:$0xff] }
 0x398   : > { %22013 = vmatprep.mubr.msk.f32.mxu1 %vm454_vm4, %v27259_v32  ;;  %24218 = vmatpush3.bf16.msra.mxu1 %v24215_v7  ;;  %v4587_v32 = vld [vmem:[#allocation10 + $0x220] sm:$0xff] }
 0x399   : > { %24220 = vmatprep.subr.bf16.mxu1 %v24219_v16  ;;  %v4131_v7 = vld [vmem:[#allocation2 + $0xbd] sm:$0xff] }
 0x39b   : > { %22014 = vmatmul.mubr.msk.f32.gmra.mrb[26].mxu1 %vm454_vm4, %v27263_v35  ;;  %v4588_v35 = vld [vmem:[#allocation10 + $0x228] sm:$0xff] }
 0x39c   : > { %22016 = vmatprep.mubr.msk.f32.mxu1 %vm454_vm4, %v27267_v42  ;;  %v4114_v42 = vld [vmem:[#allocation2 + $0x35] sm:$0xff] }
 0x39f   : > { %22017 = vmatmul.mubr.msk.f32.gmra.mrb[28].mxu1 %vm454_vm4, %v27271_v44  ;;  %v24227_v44 = vpack.c.bf16 %v4588_v35, %v4587_v32  ;;  %v4142_v32 = vld [vmem:[#allocation2 + $0x115] sm:$0xff]  ;;  %v4143_v35 = vld [vmem:[#allocation2 + $0x11d] sm:$0xff] }
 0x3a0   : > { %22019 = vmatprep.mubr.msk.f32.mxu1 %vm454_vm4, %v27275_v50  ;;  %v4115_v50 = vld [vmem:[#allocation2 + $0x3d] sm:$0xff] }
 0x3a3   : > { %22020 = vmatmul.mubr.msk.f32.gmra.mrb[30].mxu1 %vm454_vm4, %v27279_v6  ;;  %v4589_v6 = vld [vmem:[#allocation10 + $0x230] sm:$0xff] }
 0x3a4   : > { %22022 = vmatprep.mubr.msk.f32.mxu1 %vm454_vm4, %v27283_v19  ;;  %v4590_v19 = vld [vmem:[#allocation10 + $0x238] sm:$0xff] }
 0x3a7   : > { %22023 = vmatmul.mubr.msk.f32.gmra.mrb[32].mxu1 %vm454_vm4, %v27287_v11  ;;  %v4116_v11 = vld [vmem:[#allocation2 + $0x45] sm:$0xff] }
 0x3a8   : > { %22025 = vmatprep.mubr.msk.f32.mxu1 %vm454_vm4, %v27291_v12  ;;  %v24231_v12 = vpack.c.bf16 %v4590_v19, %v4589_v6  ;;  %v4147_v6 = vld [vmem:[#allocation2 + $0x13d] sm:$0xff]  ;;  %v4546_v19 = vld [vmem:[#allocation2 + $0x26] sm:$0xff] }
 0x3ab   : > { %22026 = vmatmul.mubr.msk.f32.gmra.mrb[34].mxu1 %vm454_vm4, %v27295_v4  ;;  %v4117_v4 = vld [vmem:[#allocation2 + $0x4d] sm:$0xff] }
 0x3ac   : > { %22028 = vmatprep.mubr.msk.f32.mxu1 %vm454_vm4, %v27299_v23  ;;  %v4118_v23 = vld [vmem:[#allocation2 + $0x55] sm:$0xff] }
 0x3af   : > { %22029 = vmatmul.mubr.msk.f32.gmra.mrb[36].mxu1 %vm454_vm4, %v27303_v43  ;;  %v4119_v43 = vld [vmem:[#allocation2 + $0x5d] sm:$0xff] }
 0x3b0   : > { %22031 = vmatprep.mubr.msk.f32.mxu1 %vm454_vm4, %v27307_v2  ;;  %v4120_v2 = vld [vmem:[#allocation2 + $0x65] sm:$0xff] }
 0x3b3   : > { %22032 = vmatmul.mubr.msk.f32.gmra.mrb[38].mxu1 %vm454_vm4, %v27311_v62  ;;  %v5169_v62 = vld [vmem:[#allocation12 + $0x40] sm:$0xff] }
 0x3b4   : > { %22034 = vmatprep.mubr.msk.f32.mxu1 %vm454_vm4, %v27315_v0  ;;  %v5170_v0 = vld [vmem:[#allocation12 + $0x48] sm:$0xff] }
 0x3b7   : > { %22035 = vmatmul.mubr.msk.f32.gmra.mrb[40].mxu1 %vm454_vm4, %v27319_v1  ;;  %v5171_v1 = vld [vmem:[#allocation12 + $0x50] sm:$0xff] }
 0x3b8   : > { %22037 = vmatprep.mubr.msk.f32.mxu1 %vm454_vm4, %v27323_v24  ;;  %v24235_v24 = vpack.c.bf16 %v5170_v0, %v5169_v62  ;;  %v4553_v62 = vld [vmem:[#allocation2 + $0x5e] sm:$0xff]  ;;  %v4554_v0 = vld [vmem:[#allocation2 + $0x66] sm:$0xff] }
 0x3ba   : > { %24236 = vmatprep.subr.bf16.mxu0 %v24235_v24 }
 0x3bb   : > { %22038 = vmatmul.mubr.msk.f32.gmra.mrb[42].mxu1 %vm454_vm4, %v27327_v3  ;;  %v5172_v3 = vld [vmem:[#allocation12 + $0x58] sm:$0xff]  ;;  %24238 = vmatpush3.bf16.msra.mxu0 %v24235_v24 }
 0x3bc   : > { %22040 = vmatprep.mubr.msk.f32.mxu1 %vm454_vm4, %v3272_v5  ;;  %v24239_v5 = vpack.c.bf16 %v5172_v3, %v5171_v1  ;;  %v4555_v1 = vld [vmem:[#allocation2 + $0x6e] sm:$0xff]  ;;  %v4556_v24 = vld [vmem:[#allocation2 + $0x76] sm:$0xff]  ;;  %v4557_v3 = vld [vmem:[#allocation2 + $0x7e] sm:$0xff] }
 0x3be   : > { %24240 = vmatprep.subr.bf16.mxu0 %v24239_v5 }
 0x3bf   : > { %22041 = vmatmul.mubr.msk.f32.gmra.mrb[44].mxu1 %vm454_vm4, %v3273_v33  ;;  %v5173_v33 = vld [vmem:[#allocation12 + $0x60] sm:$0xff]  ;;  %24242 = vmatpush3.bf16.msra.mxu0 %v24239_v5  ;;  %v4558_v5 = vld [vmem:[#allocation2 + $0x86] sm:$0xff] }
 0x3c0   : > { %22043 = vmatprep.mubr.msk.f32.mxu1 %vm454_vm4, %v3274_v34  ;;  %v5174_v34 = vld [vmem:[#allocation12 + $0x68] sm:$0xff] }
 0x3c3   : > { %22044 = vmatmul.mubr.msk.f32.gmra.mrb[46].mxu1 %vm454_vm4, %v3275_v25  ;;  %v4121_v25 = vld [vmem:[#allocation2 + $0x6d] sm:$0xff] }
 0x3c4   : > { %22046 = vmatprep.mubr.msk.f32.mxu1 %vm454_vm4, %v3276_v8  ;;  %v4122_v8 = vld [vmem:[#allocation2 + $0x75] sm:$0xff] }
 0x3c7   : > { %22047 = vmatmul.mubr.msk.f32.gmra.mrb[48].mxu1 %vm454_vm4, %v3277_v22  ;;  %v24243_v22 = vpack.c.bf16 %v5174_v34, %v5173_v33  ;;  %v4559_v33 = vld [vmem:[#allocation2 + $0x8e] sm:$0xff]  ;;  %v4560_v34 = vld [vmem:[#allocation2 + $0x96] sm:$0xff] }
 0x3c8   : > { %22049 = vmatprep.mubr.msk.f32.mxu1 %vm454_vm4, %v3278_v9  ;;  %v4123_v9 = vld [vmem:[#allocation2 + $0x7d] sm:$0xff] }
 0x3c9   : > { %24244 = vmatprep.subr.bf16.mxu0 %v24243_v22 }
 0x3ca   : > { %24246 = vmatpush3.bf16.msra.mxu0 %v24243_v22  ;;  %v4563_v22 = vld [vmem:[#allocation2 + $0xae] sm:$0xff] }
 0x3cb   : > { %22050 = vmatmul.mubr.msk.f32.gmra.mrb[50].mxu1 %vm454_vm4, %v3279_v26  ;;  %v4124_v26 = vld [vmem:[#allocation2 + $0x85] sm:$0xff] }
 0x3cc   : > { %22052 = vmatprep.mubr.msk.f32.mxu1 %vm454_vm4, %v3712_v18  ;;  %v4135_v18 = vld [vmem:[#allocation2 + $0xdd] sm:$0xff] }
 0x3cf   : > { %22053 = vmatmul.mubr.msk.f32.gmra.mrb[52].mxu1 %vm454_vm4, %v3713_v21  ;;  %v4136_v21 = vld [vmem:[#allocation2 + $0xe5] sm:$0xff] }
 0x3d0   : > { %22071 = vmatprep.mubr.msk.f32.mxu1 %vm454_vm4, %v4112_v29  ;;  %v4139_v29 = vld [vmem:[#allocation2 + $0xfd] sm:$0xff] }
 0x3d3   : > { %22072 = vmatmul.mubr.msk.f32.vlgmr.msra.gmra.mrb[18].mxu1 %vm454_vm4, %v4113_v31  ;;  %v4141_v31 = vld [vmem:[#allocation2 + $0x10d] sm:$0xff] }
 0x3d4   : > { %24222 = vmatpush3.bf16.msra.mxu1 %v24219_v16  ;;  %22074 = vmatprep.mubr.msk.f32.mxu1 %vm454_vm4, %v4114_v42  ;;  %v4134_v16 = vld [vmem:[#allocation2 + $0xd5] sm:$0xff]  ;;  %v4144_v42 = vld [vmem:[#allocation2 + $0x125] sm:$0xff] }
 0x3d5   : > { %24224 = vmatprep.subr.bf16.mxu1 %v24223_v30 }
 0x3d7   : > { %22075 = vmatmul.mubr.msk.f32.gmra.mrb[20].mxu1 %vm454_vm4, %v4115_v50  ;;  %v4145_v50 = vld [vmem:[#allocation2 + $0x12d] sm:$0xff] }
 0x3d8   : > { %22077 = vmatprep.mubr.msk.f32.mxu1 %vm454_vm4, %v4116_v11  ;;  %24226 = vmatpush3.bf16.msra.mxu1 %v24223_v30  ;;  %v4140_v30 = vld [vmem:[#allocation2 + $0x105] sm:$0xff]  ;;  %v4547_v11 = vld [vmem:[#allocation2 + $0x2e] sm:$0xff] }
 0x3d9   : > { %24228 = vmatprep.subr.bf16.mxu1 %v24227_v44 }
 0x3db   : > { %22078 = vmatmul.mubr.msk.f32.gmra.mrb[22].mxu1 %vm454_vm4, %v4117_v4  ;;  %v4549_v4 = vld [vmem:[#allocation2 + $0x3e] sm:$0xff] }
 0x3dc   : > { %22080 = vmatprep.mubr.msk.f32.mxu1 %vm454_vm4, %v4118_v23  ;;  %24230 = vmatpush3.bf16.msra.mxu1 %v24227_v44  ;;  %v4146_v44 = vld [vmem:[#allocation2 + $0x135] sm:$0xff]  ;;  %v4550_v23 = vld [vmem:[#allocation2 + $0x46] sm:$0xff] }
 0x3dd   : > { %24232 = vmatprep.subr.bf16.mxu1 %v24231_v12 }
 0x3df   : > { %22081 = vmatmul.mubr.msk.f32.gmra.mrb[24].mxu1 %vm454_vm4, %v4119_v43  ;;  %v4551_v43 = vld [vmem:[#allocation2 + $0x4e] sm:$0xff] }
 0x3e0   : > { %22083 = vmatprep.mubr.msk.f32.mxu1 %vm454_vm4, %v4120_v2  ;;  %24234 = vmatpush3.bf16.msra.mxu1 %v24231_v12  ;;  %v4548_v12 = vld [vmem:[#allocation2 + $0x36] sm:$0xff] }
 0x3e1   : > { %v4552_v2 = vld [vmem:[#allocation2 + $0x56] sm:$0xff] }
 0x3e3   : > { %22084 = vmatmul.mubr.msk.f32.gmra.mrb[26].mxu1 %vm454_vm4, %v4121_v25  ;;  %v4561_v25 = vld [vmem:[#allocation2 + $0x9e] sm:$0xff] }
 0x3e4   : > { %22086 = vmatprep.mubr.msk.f32.mxu1 %vm454_vm4, %v4122_v8  ;;  %v4562_v8 = vld [vmem:[#allocation2 + $0xa6] sm:$0xff] }
 0x3e7   : > { %22087 = vmatmul.mubr.msk.f32.gmra.mrb[28].mxu1 %vm454_vm4, %v4123_v9  ;;  %v4564_v9 = vld [vmem:[#allocation2 + $0xb6] sm:$0xff] }
 0x3e8   : > { %22089 = vmatprep.mubr.msk.f32.mxu1 %vm454_vm4, %v4124_v26  ;;  %v4565_v26 = vld [vmem:[#allocation2 + $0xbe] sm:$0xff] }
 0x3eb   : > { %22090 = vmatmul.mubr.msk.f32.gmra.mrb[30].mxu1 %vm454_vm4, %v4125_v10  ;;  %v4566_v10 = vld [vmem:[#allocation2 + $0xc6] sm:$0xff] }
 0x3ec   : > { %22092 = vmatprep.mubr.msk.f32.mxu1 %vm454_vm4, %v4126_v14  ;;  %v4567_v14 = vld [vmem:[#allocation2 + $0xce] sm:$0xff] }
 0x3ef   : > { %22093 = vmatmul.mubr.msk.f32.gmra.mrb[32].mxu1 %vm454_vm4, %v4127_v15  ;;  %v4568_v15 = vld [vmem:[#allocation2 + $0xd6] sm:$0xff] }
 0x3f0   : > { %22095 = vmatprep.mubr.msk.f32.mxu1 %vm454_vm4, %v4128_v17  ;;  %v4569_v17 = vld [vmem:[#allocation2 + $0xde] sm:$0xff] }
 0x3f3   : > { %22096 = vmatmul.mubr.msk.f32.gmra.mrb[34].mxu1 %vm454_vm4, %v4129_v53  ;;  %v4570_v53 = vld [vmem:[#allocation2 + $0xe6] sm:$0xff] }
 0x3f4   : > { %22098 = vmatprep.mubr.msk.f32.mxu1 %vm454_vm4, %v4130_v20  ;;  %v4571_v20 = vld [vmem:[#allocation2 + $0xee] sm:$0xff] }
 0x3f7   : > { %22099 = vmatmul.mubr.msk.f32.gmra.mrb[36].mxu1 %vm454_vm4, %v4131_v7  ;;  %v4572_v7 = vld [vmem:[#allocation2 + $0xf6] sm:$0xff] }
 0x3f8   : > { %22101 = vmatprep.mubr.msk.f32.mxu1 %vm454_vm4, %v4132_v49  ;;  %v4573_v49 = vld [vmem:[#allocation2 + $0xfe] sm:$0xff] }
 0x3fb   : > { %22102 = vmatmul.mubr.msk.f32.gmra.mrb[38].mxu1 %vm454_vm4, %v4133_v13  ;;  %v4574_v13 = vld [vmem:[#allocation2 + $0x106] sm:$0xff] }
 0x3fc   : > { %22104 = vmatprep.mubr.msk.f32.mxu1 %vm454_vm4, %v4134_v16  ;;  %v4575_v16 = vld [vmem:[#allocation2 + $0x10e] sm:$0xff] }
 0x3ff   : > { %22105 = vmatmul.mubr.msk.f32.gmra.mrb[40].mxu1 %vm454_vm4, %v4135_v18  ;;  %v4576_v18 = vld [vmem:[#allocation2 + $0x116] sm:$0xff] }
 0x400   : > { %22107 = vmatprep.mubr.msk.f32.mxu1 %vm454_vm4, %v4136_v21  ;;  %v4577_v21 = vld [vmem:[#allocation2 + $0x11e] sm:$0xff] }
 0x403   : > { %22108 = vmatmul.mubr.msk.f32.gmra.mrb[42].mxu1 %vm454_vm4, %v4137_v27  ;;  %v4578_v27 = vld [vmem:[#allocation2 + $0x126] sm:$0xff] }
 0x404   : > { %22110 = vmatprep.mubr.msk.f32.mxu1 %vm454_vm4, %v4138_v28  ;;  %v4580_v28 = vld [vmem:[#allocation2 + $0x136] sm:$0xff] }
 0x407   : > { %22111 = vmatmul.mubr.msk.f32.gmra.mrb[44].mxu1 %vm454_vm4, %v4139_v29  ;;  %v4579_v29 = vld [vmem:[#allocation2 + $0x12e] sm:$0xff] }
 0x408   : > { %22113 = vmatprep.mubr.msk.f32.mxu1 %vm454_vm4, %v4140_v30  ;;  %v4581_v30 = vld [vmem:[#allocation2 + $0x13e] sm:$0xff] }
 0x40b   : > { %22114 = vmatmul.mubr.msk.f32.gmra.mrb[46].mxu1 %vm454_vm4, %v4141_v31  ;;  %v5175_v31 = vld [vmem:[#allocation12 + $0x70] sm:$0xff] }
 0x40c   : > { %22116 = vmatprep.mubr.msk.f32.mxu1 %vm454_vm4, %v4142_v32  ;;  %v5176_v32 = vld [vmem:[#allocation12 + $0x78] sm:$0xff] }
 0x40f   : > { %22117 = vmatmul.mubr.msk.f32.gmra.mrb[48].mxu1 %vm454_vm4, %v4143_v35  ;;  %v24247_v35 = vpack.c.bf16 %v5176_v32, %v5175_v31 }
 0x410   : > { %22119 = vmatprep.mubr.msk.f32.mxu1 %vm454_vm4, %v4144_v42  ;;  %v5132_v42 = vld [vmem:[#allocation2 + $0x1] sm:$0xff] }
 0x411   : > { %24248 = vmatprep.subr.bf16.mxu0 %v24247_v35  ;;  %22211 = vmatprep.mubr.msk.f32.mxu0 %vm454_vm4, %v5132_v42 }
 0x412   : > { %24250 = vmatpush3.bf16.msra.mxu0 %v24247_v35 }
 0x413   : > { %22120 = vmatmul.mubr.msk.f32.gmra.mrb[50].mxu1 %vm454_vm4, %v4145_v50  ;;  %v5125_v50 = vld [vmem:[#allocation12 + $0x8] sm:$0xff] }
 0x414   : > { %22122 = vmatprep.mubr.msk.f32.mxu1 %vm454_vm4, %v4146_v44  ;;  %v5124_v44 = vld [vmem:[#allocation12] sm:$0xff] }
 0x417   : > { %22123 = vmatmul.mubr.msk.f32.gmra.mrb[52].mxu1 %vm454_vm4, %v4147_v6  ;;  %v24251_v6 = vpack.c.bf16 %v5125_v50, %v5124_v44 }
 0x418   : > { %22141 = vmatprep.mubr.msk.f32.mxu1 %vm454_vm4, %v4546_v19  ;;  %v5133_v19 = vld [vmem:[#allocation2 + $0x9] sm:$0xff] }
 0x419   : > { %22212 = vmatmul.mubr.msk.f32.vlgmr.msra.gmra.mrb[18].mxu0 %vm454_vm4, %v5133_v19  ;;  %24252 = vmatprep.subr.bf16.mxu0 %v24251_v6 }
 0x41a   : > { %24254 = vmatpush3.bf16.msra.mxu0 %v24251_v6 }
 0x41b   : > { %22142 = vmatmul.mubr.msk.f32.vlgmr.msra.gmra.mrb[18].mxu1 %vm454_vm4, %v4547_v11  ;;  %v5126_v11 = vld [vmem:[#allocation12 + $0x10] sm:$0xff] }
 0x41c   : > { %22144 = vmatprep.mubr.msk.f32.mxu1 %vm454_vm4, %v4548_v12  ;;  %v5127_v12 = vld [vmem:[#allocation12 + $0x18] sm:$0xff] }
 0x41f   : > { %22145 = vmatmul.mubr.msk.f32.gmra.mrb[20].mxu1 %vm454_vm4, %v4549_v4  ;;  %v24255_v4 = vpack.c.bf16 %v5127_v12, %v5126_v11 }
 0x420   : > { %22147 = vmatprep.mubr.msk.f32.mxu1 %vm454_vm4, %v4550_v23  ;;  %v5128_v23 = vld [vmem:[#allocation12 + $0x20] sm:$0xff] }
 0x421   : > { %24256 = vmatprep.subr.bf16.mxu0 %v24255_v4 }
 0x422   : > { %24258 = vmatpush3.bf16.msra.mxu0 %v24255_v4 }
 0x423   : > { %22148 = vmatmul.mubr.msk.f32.gmra.mrb[22].mxu1 %vm454_vm4, %v4551_v43  ;;  %v5129_v43 = vld [vmem:[#allocation12 + $0x28] sm:$0xff] }
 0x424   : > { %22150 = vmatprep.mubr.msk.f32.mxu1 %vm454_vm4, %v4552_v2  ;;  %v24259_v2 = vpack.c.bf16 %v5129_v43, %v5128_v23 }
 0x426   : > { %24260 = vmatprep.subr.bf16.mxu0 %v24259_v2 }
 0x427   : > { %22151 = vmatmul.mubr.msk.f32.gmra.mrb[24].mxu1 %vm454_vm4, %v4553_v62  ;;  %24262 = vmatpush3.bf16.msra.mxu0 %v24259_v2  ;;  %v5130_v62 = vld [vmem:[#allocation12 + $0x30] sm:$0xff] }
 0x428   : > { %22153 = vmatprep.mubr.msk.f32.mxu1 %vm454_vm4, %v4554_v0  ;;  %v5131_v0 = vld [vmem:[#allocation12 + $0x38] sm:$0xff] }
 0x42b   : > { %22154 = vmatmul.mubr.msk.f32.gmra.mrb[26].mxu1 %vm454_vm4, %v4555_v1  ;;  %v24263_v1 = vpack.c.bf16 %v5131_v0, %v5130_v62 }
 0x42c   : > { %22156 = vmatprep.mubr.msk.f32.mxu1 %vm454_vm4, %v4556_v24  ;;  %v5920_v24 = vld [vmem:[#allocation12 + $0x80] sm:$0xff] }
 0x42d   : > { %24264 = vmatprep.subr.bf16.mxu0 %v24263_v1 }
 0x42e   : > { %24266 = vmatpush3.bf16.msra.mxu0 %v24263_v1 }
 0x42f   : > { %22157 = vmatmul.mubr.msk.f32.gmra.mrb[28].mxu1 %vm454_vm4, %v4557_v3  ;;  %v5921_v3 = vld [vmem:[#allocation12 + $0x88] sm:$0xff] }
 0x430   : > { %22159 = vmatprep.mubr.msk.f32.mxu1 %vm454_vm4, %v4558_v5  ;;  %v27476_v5 = vpack.c.bf16 %v5921_v3, %v5920_v24 }
 0x432   : > { %24268 = vmatprep.subr.bf16.mxu0 %v27476_v5 }
 0x433   : > { %22160 = vmatmul.mubr.msk.f32.gmra.mrb[30].mxu1 %vm454_vm4, %v4559_v33 }
 0x434   : > { %22162 = vmatprep.mubr.msk.f32.mxu1 %vm454_vm4, %v4560_v34 }
 0x437   : > { %22163 = vmatmul.mubr.msk.f32.gmra.mrb[32].mxu1 %vm454_vm4, %v4561_v25 }
 0x438   : > { %22165 = vmatprep.mubr.msk.f32.mxu1 %vm454_vm4, %v4562_v8 }
 0x43b   : > { %22166 = vmatmul.mubr.msk.f32.gmra.mrb[34].mxu1 %vm454_vm4, %v4563_v22 }
 0x43c   : > { %22168 = vmatprep.mubr.msk.f32.mxu1 %vm454_vm4, %v4564_v9 }
 0x43f   : > { %22169 = vmatmul.mubr.msk.f32.gmra.mrb[36].mxu1 %vm454_vm4, %v4565_v26 }
 0x440   : > { %22171 = vmatprep.mubr.msk.f32.mxu1 %vm454_vm4, %v4566_v10 }
 0x443   : > { %22172 = vmatmul.mubr.msk.f32.gmra.mrb[38].mxu1 %vm454_vm4, %v4567_v14 }
 0x444   : > { %22174 = vmatprep.mubr.msk.f32.mxu1 %vm454_vm4, %v4568_v15 }
 0x447   : > { %22175 = vmatmul.mubr.msk.f32.gmra.mrb[40].mxu1 %vm454_vm4, %v4569_v17 }
 0x448   : > { %22177 = vmatprep.mubr.msk.f32.mxu1 %vm454_vm4, %v4570_v53 }
 0x44b   : > { %22178 = vmatmul.mubr.msk.f32.gmra.mrb[42].mxu1 %vm454_vm4, %v4571_v20 }
 0x44c   : > { %22180 = vmatprep.mubr.msk.f32.mxu1 %vm454_vm4, %v4572_v7 }
 0x44f   : > { %22181 = vmatmul.mubr.msk.f32.gmra.mrb[44].mxu1 %vm454_vm4, %v4573_v49 }
 0x450   : > { %22183 = vmatprep.mubr.msk.f32.mxu1 %vm454_vm4, %v4574_v13 }
 0x453   : > { %22184 = vmatmul.mubr.msk.f32.gmra.mrb[46].mxu1 %vm454_vm4, %v4575_v16 }
 0x454   : > { %22186 = vmatprep.mubr.msk.f32.mxu1 %vm454_vm4, %v4576_v18 }
 0x457   : > { %22187 = vmatmul.mubr.msk.f32.gmra.mrb[48].mxu1 %vm454_vm4, %v4577_v21 }
 0x458   : > { %22189 = vmatprep.mubr.msk.f32.mxu1 %vm454_vm4, %v4578_v27 }
 0x45b   : > { %22190 = vmatmul.mubr.msk.f32.gmra.mrb[50].mxu1 %vm454_vm4, %v4579_v29 }
 0x45c   : > { %22192 = vmatprep.mubr.msk.f32.mxu1 %vm454_vm4, %v4580_v28 }
 0x45f   : > { %22193 = vmatmul.mubr.msk.f32.gmra.mrb[52].mxu1 %vm454_vm4, %v4581_v30 }
 0x4ee   : > { %v22143_v33 = vpop.f32.mrb[18].mxu1 }
 0x4ef   : > { %v4981_v34 = vmax.f32 %v22143_v33, 0.0  ;;  %v4765_v25 = vpop.f32.mrb[19].mxu1 }
 0x4f0   : > { %v4980_v8 = vmax.f32 %v4765_v25, 0.0 }
 0x4f1   : > { %v5017_v22 = vmul.f32 %v4981_v34, %v26783_v38 }
 0x4f2   : > { %v5016_v9 = vmul.f32 %v4980_v8, %v26779_v36  ;;  %v22146_v26 = vpop.f32.mrb[20].mxu1 }
 0x4f3   : > { %5053 = vst.msk [vmem:[#allocation2 + $0x1b] sm:$0xff] %vm454_vm4, %v5017_v22  ;;  %v4983_v10 = vmax.f32 %v22146_v26, 0.0  ;;  %v4775_v14 = vpop.f32.mrb[21].mxu1 }
 0x4f4   : > { %5052 = vst.msk [vmem:[#allocation2 + $0x13] sm:$0xff] %vm454_vm4, %v5016_v9  ;;  %v4982_v15 = vmax.f32 %v4775_v14, 0.0 }
 0x4f5   : > { %v5019_v17 = vmul.f32 %v4983_v10, %v26785_v39 }
 0x4f6   : > { %v5018_v53 = vmul.f32 %v4982_v15, %v26781_v37  ;;  %v22149_v20 = vpop.f32.mrb[22].mxu1 }
 0x4f7   : > { %5055 = vst.msk [vmem:[#allocation2 + $0x2b] sm:$0xff] %vm454_vm4, %v5019_v17  ;;  %v4985_v7 = vmax.f32 %v22149_v20, 0.0  ;;  %v4785_v49 = vpop.f32.mrb[23].mxu1 }
 0x4f8   : > { %5054 = vst.msk [vmem:[#allocation2 + $0x23] sm:$0xff] %vm454_vm4, %v5018_v53  ;;  %v4984_v13 = vmax.f32 %v4785_v49, 0.0 }
 0x4f9   : > { %v5021_v16 = vmul.f32 %v4985_v7, %v26789_v41 }
 0x4fa   : > { %v5020_v18 = vmul.f32 %v4984_v13, %v26787_v40  ;;  %v22152_v21 = vpop.f32.mrb[24].mxu1 }
 0x4fb   : > { %5057 = vst.msk [vmem:[#allocation2 + $0x3b] sm:$0xff] %vm454_vm4, %v5021_v16  ;;  %v4987_v27 = vmax.f32 %v22152_v21, 0.0  ;;  %v4795_v28 = vpop.f32.mrb[25].mxu1  ;;  %v5134_v29 = vld [vmem:[#allocation2 + $0x11] sm:$0xff]  ;;  %v5135_v30 = vld [vmem:[#allocation2 + $0x19] sm:$0xff] }
 0x4fc   : > { %5056 = vst.msk [vmem:[#allocation2 + $0x33] sm:$0xff] %vm454_vm4, %v5020_v18  ;;  %v4986_v31 = vmax.f32 %v4795_v28, 0.0  ;;  %22214 = vmatprep.mubr.msk.f32.mxu0 %vm454_vm4, %v5134_v29 }
 0x4fd   : > { %v5023_v32 = vmul.f32 %v4987_v27, %v26793_v46  ;;  %22215 = vmatmul.mubr.msk.f32.gmra.mrb[20].mxu0 %vm454_vm4, %v5135_v30 }
 0x4fe   : > { %v5022_v35 = vmul.f32 %v4986_v31, %v26791_v45  ;;  %v22155_v42 = vpop.f32.mrb[26].mxu1 }
 0x4ff   : > { %5059 = vst.msk [vmem:[#allocation2 + $0x4b] sm:$0xff] %vm454_vm4, %v5023_v32  ;;  %v4989_v44 = vmax.f32 %v22155_v42, 0.0  ;;  %v4805_v50 = vpop.f32.mrb[27].mxu1  ;;  %v5136_v6 = vld [vmem:[#allocation2 + $0x21] sm:$0xff]  ;;  %v5137_v19 = vld [vmem:[#allocation2 + $0x29] sm:$0xff] }
 0x500   : > { %5058 = vst.msk [vmem:[#allocation2 + $0x43] sm:$0xff] %vm454_vm4, %v5022_v35  ;;  %v4988_v11 = vmax.f32 %v4805_v50, 0.0  ;;  %22217 = vmatprep.mubr.msk.f32.mxu0 %vm454_vm4, %v5136_v6 }
 0x501   : > { %v5025_v12 = vmul.f32 %v4989_v44, %v26797_v48  ;;  %22218 = vmatmul.mubr.msk.f32.gmra.mrb[22].mxu0 %vm454_vm4, %v5137_v19 }
 0x502   : > { %v5024_v4 = vmul.f32 %v4988_v11, %v26795_v47  ;;  %v22158_v23 = vpop.f32.mrb[28].mxu1 }
 0x503   : > { %5061 = vst.msk [vmem:[#allocation2 + $0x5b] sm:$0xff] %vm454_vm4, %v5025_v12  ;;  %v4991_v43 = vmax.f32 %v22158_v23, 0.0  ;;  %v4815_v2 = vpop.f32.mrb[29].mxu1  ;;  %v5138_v62 = vld [vmem:[#allocation2 + $0x31] sm:$0xff]  ;;  %v5139_v0 = vld [vmem:[#allocation2 + $0x39] sm:$0xff] }
 0x504   : > { %5060 = vst.msk [vmem:[#allocation2 + $0x53] sm:$0xff] %vm454_vm4, %v5024_v4  ;;  %v4990_v1 = vmax.f32 %v4815_v2, 0.0  ;;  %22220 = vmatprep.mubr.msk.f32.mxu0 %vm454_vm4, %v5138_v62 }
 0x505   : > { %v5027_v24 = vmul.f32 %v4991_v43, %v26801_v52  ;;  %22221 = vmatmul.mubr.msk.f32.gmra.mrb[24].mxu0 %vm454_vm4, %v5139_v0 }
 0x506   : > { %v5026_v3 = vmul.f32 %v4990_v1, %v26799_v51  ;;  %v22161_v33 = vpop.f32.mrb[30].mxu1  ;;  %v30476_v1 = vld [vmem:[#allocation25_spill] sm:$0xff] }
 0x507   : > { %5063 = vst.msk [vmem:[#allocation2 + $0x6b] sm:$0xff] %vm454_vm4, %v5027_v24  ;;  %v4993_v34 = vmax.f32 %v22161_v33, 0.0  ;;  %v4825_v25 = vpop.f32.mrb[31].mxu1  ;;  %v5140_v8 = vld [vmem:[#allocation2 + $0x41] sm:$0xff]  ;;  %v5141_v22 = vld [vmem:[#allocation2 + $0x49] sm:$0xff] }
 0x508   : > { %5062 = vst.msk [vmem:[#allocation2 + $0x63] sm:$0xff] %vm454_vm4, %v5026_v3  ;;  %v4992_v9 = vmax.f32 %v4825_v25, 0.0  ;;  %22223 = vmatprep.mubr.msk.f32.mxu0 %vm454_vm4, %v5140_v8 }
 0x509   : > { %v5029_v26 = vmul.f32 %v4993_v34, %v26808_v55  ;;  %22224 = vmatmul.mubr.msk.f32.gmra.mrb[26].mxu0 %vm454_vm4, %v5141_v22 }
 0x50a   : > { %v5028_v10 = vmul.f32 %v4992_v9, %v26806_v54  ;;  %v22164_v14 = vpop.f32.mrb[32].mxu1  ;;  %v30477_v9 = vld [vmem:[#allocation27_spill] sm:$0xff] }
 0x50b   : > { %5065 = vst.msk [vmem:[#allocation2 + $0x7b] sm:$0xff] %vm454_vm4, %v5029_v26  ;;  %v4995_v15 = vmax.f32 %v22164_v14, 0.0  ;;  %v4835_v17 = vpop.f32.mrb[33].mxu1  ;;  %v5142_v53 = vld [vmem:[#allocation2 + $0x51] sm:$0xff]  ;;  %v5143_v20 = vld [vmem:[#allocation2 + $0x59] sm:$0xff] }
 0x50c   : > { %5064 = vst.msk [vmem:[#allocation2 + $0x73] sm:$0xff] %vm454_vm4, %v5028_v10  ;;  %v4994_v7 = vmax.f32 %v4835_v17, 0.0  ;;  %22226 = vmatprep.mubr.msk.f32.mxu0 %vm454_vm4, %v5142_v53  ;;  %v30478_v10 = vld [vmem:[#allocation26_spill] sm:$0xff] }
 0x50d   : > { %v5031_v49 = vmul.f32 %v4995_v15, %v26812_v57  ;;  %22227 = vmatmul.mubr.msk.f32.gmra.mrb[28].mxu0 %vm454_vm4, %v5143_v20 }
 0x50e   : > { %v5030_v13 = vmul.f32 %v4994_v7, %v26810_v56  ;;  %v22167_v16 = vpop.f32.mrb[34].mxu1 }
 0x50f   : > { %5067 = vst.msk [vmem:[#allocation2 + $0x8b] sm:$0xff] %vm454_vm4, %v5031_v49  ;;  %v4997_v18 = vmax.f32 %v22167_v16, 0.0  ;;  %v4845_v21 = vpop.f32.mrb[35].mxu1  ;;  %v5144_v27 = vld [vmem:[#allocation2 + $0x61] sm:$0xff]  ;;  %v5145_v28 = vld [vmem:[#allocation2 + $0x69] sm:$0xff] }
 0x510   : > { %5066 = vst.msk [vmem:[#allocation2 + $0x83] sm:$0xff] %vm454_vm4, %v5030_v13  ;;  %v4996_v29 = vmax.f32 %v4845_v21, 0.0  ;;  %22229 = vmatprep.mubr.msk.f32.mxu0 %vm454_vm4, %v5144_v27  ;;  %v30479_v13 = vld [vmem:[#allocation29_spill] sm:$0xff] }
 0x511   : > { %v5033_v30 = vmul.f32 %v4997_v18, %v26816_v59  ;;  %22230 = vmatmul.mubr.msk.f32.gmra.mrb[30].mxu0 %vm454_vm4, %v5145_v28  ;;  %v30480_v18 = vld [vmem:[#allocation28_spill] sm:$0xff] }
 0x512   : > { %v5032_v31 = vmul.f32 %v4996_v29, %v26814_v58  ;;  %v22170_v32 = vpop.f32.mrb[36].mxu1 }
 0x513   : > { %5069 = vst.msk [vmem:[#allocation2 + $0x9b] sm:$0xff] %vm454_vm4, %v5033_v30  ;;  %v4999_v35 = vmax.f32 %v22170_v32, 0.0  ;;  %v4855_v42 = vpop.f32.mrb[37].mxu1  ;;  %v5146_v44 = vld [vmem:[#allocation2 + $0x71] sm:$0xff]  ;;  %v5147_v50 = vld [vmem:[#allocation2 + $0x79] sm:$0xff] }
 0x514   : > { %5068 = vst.msk [vmem:[#allocation2 + $0x93] sm:$0xff] %vm454_vm4, %v5032_v31  ;;  %v4998_v6 = vmax.f32 %v4855_v42, 0.0  ;;  %22232 = vmatprep.mubr.msk.f32.mxu0 %vm454_vm4, %v5146_v44  ;;  %v30482_v44 = vld [vmem:[#allocation30_spill] sm:$0xff] }
 0x515   : > { %v5035_v19 = vmul.f32 %v4999_v35, %v26820_v61  ;;  %22233 = vmatmul.mubr.msk.f32.gmra.mrb[32].mxu0 %vm454_vm4, %v5147_v50  ;;  %v30481_v35 = vld [vmem:[#allocation31_spill] sm:$0xff] }
 0x516   : > { %v5034_v11 = vmul.f32 %v4998_v6, %v26818_v60  ;;  %v22173_v12 = vpop.f32.mrb[38].mxu1 }
 0x517   : > { %5071 = vst.msk [vmem:[#allocation2 + $0xab] sm:$0xff] %vm454_vm4, %v5035_v19  ;;  %v5001_v4 = vmax.f32 %v22173_v12, 0.0  ;;  %v4865_v23 = vpop.f32.mrb[39].mxu1  ;;  %v5148_v43 = vld [vmem:[#allocation2 + $0x81] sm:$0xff]  ;;  %v5149_v2 = vld [vmem:[#allocation2 + $0x89] sm:$0xff] }
 0x518   : > { %5070 = vst.msk [vmem:[#allocation2 + $0xa3] sm:$0xff] %vm454_vm4, %v5034_v11  ;;  %v5000_v62 = vmax.f32 %v4865_v23, 0.0  ;;  %22235 = vmatprep.mubr.msk.f32.mxu0 %vm454_vm4, %v5148_v43  ;;  %v30483_v43 = vld [vmem:[#allocation33_spill] sm:$0xff] }
 0x519   : > { %v5037_v0 = vmul.f32 %v5001_v4, %v26824_v63  ;;  %22236 = vmatmul.mubr.msk.f32.gmra.mrb[34].mxu0 %vm454_vm4, %v5149_v2 }
 0x51a   : > { %v5036_v24 = vmul.f32 %v5000_v62, %v30476_v1  ;;  %v22176_v3 = vpop.f32.mrb[40].mxu1  ;;  %v30484_v62 = vld [vmem:[#allocation32_spill] sm:$0xff]  ;;  %v6795_v1 = vld [vmem:[#allocation12 + $0x138] sm:$0xff] }
 0x51b   : > { %5073 = vst.msk [vmem:[#allocation2 + $0xbb] sm:$0xff] %vm454_vm4, %v5037_v0  ;;  %v5003_v33 = vmax.f32 %v22176_v3, 0.0  ;;  %v4875_v34 = vpop.f32.mrb[41].mxu1  ;;  %v5150_v25 = vld [vmem:[#allocation2 + $0x91] sm:$0xff]  ;;  %v5151_v8 = vld [vmem:[#allocation2 + $0x99] sm:$0xff] }
 0x51c   : > { %5072 = vst.msk [vmem:[#allocation2 + $0xb3] sm:$0xff] %vm454_vm4, %v5036_v24  ;;  %v5002_v22 = vmax.f32 %v4875_v34, 0.0  ;;  %22238 = vmatprep.mubr.msk.f32.mxu0 %vm454_vm4, %v5150_v25 }
 0x51d   : > { %v5039_v26 = vmul.f32 %v5003_v33, %v30477_v9  ;;  %22239 = vmatmul.mubr.msk.f32.gmra.mrb[36].mxu0 %vm454_vm4, %v5151_v8  ;;  %v6794_v9 = vld [vmem:[#allocation12 + $0x130] sm:$0xff] }
 0x51e   : > { %v5038_v14 = vmul.f32 %v5002_v22, %v30478_v10  ;;  %v22179_v15 = vpop.f32.mrb[42].mxu1  ;;  %v30485_v22 = vld [vmem:[#allocation35_spill] sm:$0xff] }
 0x51f   : > { %5075 = vst.msk [vmem:[#allocation2 + $0xcb] sm:$0xff] %vm454_vm4, %v5039_v26  ;;  %v5005_v17 = vmax.f32 %v22179_v15, 0.0  ;;  %v4885_v53 = vpop.f32.mrb[43].mxu1  ;;  %v5152_v20 = vld [vmem:[#allocation2 + $0xa1] sm:$0xff]  ;;  %v5153_v7 = vld [vmem:[#allocation2 + $0xa9] sm:$0xff] }
 0x520   : > { %5074 = vst.msk [vmem:[#allocation2 + $0xc3] sm:$0xff] %vm454_vm4, %v5038_v14  ;;  %v5004_v49 = vmax.f32 %v4885_v53, 0.0  ;;  %22241 = vmatprep.mubr.msk.f32.mxu0 %vm454_vm4, %v5152_v20  ;;  %v30486_v14 = vld [vmem:[#allocation34_spill] sm:$0xff] }
 0x521   : > { %v5041_v16 = vmul.f32 %v5005_v17, %v30479_v13  ;;  %22242 = vmatmul.mubr.msk.f32.gmra.mrb[38].mxu0 %vm454_vm4, %v5153_v7  ;;  %v6793_v13 = vld [vmem:[#allocation12 + $0x128] sm:$0xff] }
 0x522   : > { %v5040_v21 = vmul.f32 %v5004_v49, %v30480_v18  ;;  %v22182_v27 = vpop.f32.mrb[44].mxu1  ;;  %v6792_v18 = vld [vmem:[#allocation12 + $0x120] sm:$0xff] }
 0x523   : > { %5077 = vst.msk [vmem:[#allocation2 + $0xdb] sm:$0xff] %vm454_vm4, %v5041_v16  ;;  %v5007_v28 = vmax.f32 %v22182_v27, 0.0  ;;  %v4895_v29 = vpop.f32.mrb[45].mxu1  ;;  %v5154_v30 = vld [vmem:[#allocation2 + $0xb1] sm:$0xff]  ;;  %v5155_v31 = vld [vmem:[#allocation2 + $0xb9] sm:$0xff]  ;;  %v24307_v10 = vpack.c.bf16 %v6793_v13, %v6792_v18 }
 0x524   : > { %5076 = vst.msk [vmem:[#allocation2 + $0xd3] sm:$0xff] %vm454_vm4, %v5040_v21  ;;  %v5006_v32 = vmax.f32 %v4895_v29, 0.0  ;;  %22244 = vmatprep.mubr.msk.f32.mxu0 %vm454_vm4, %v5154_v30  ;;  %v30487_v21 = vld [vmem:[#allocation37_spill] sm:$0xff]  ;;  %v7225_v18 = vld [vmem:[#allocation12 + $0x158] sm:$0xff] }
 0x525   : > { %v5043_v42 = vmul.f32 %v5007_v28, %v30481_v35  ;;  %22245 = vmatmul.mubr.msk.f32.gmra.mrb[40].mxu0 %vm454_vm4, %v5155_v31  ;;  %v30488_v28 = vld [vmem:[#allocation36_spill] sm:$0xff] }
 0x526   : > { %v5042_v50 = vmul.f32 %v5006_v32, %v30482_v44  ;;  %v22185_v6 = vpop.f32.mrb[46].mxu1  ;;  %v6791_v44 = vld [vmem:[#allocation12 + $0x118] sm:$0xff] }
 0x527   : > { %5079 = vst.msk [vmem:[#allocation2 + $0xeb] sm:$0xff] %vm454_vm4, %v5043_v42  ;;  %v5009_v19 = vmax.f32 %v22185_v6, 0.0  ;;  %v4905_v11 = vpop.f32.mrb[47].mxu1  ;;  %v5156_v12 = vld [vmem:[#allocation2 + $0xc1] sm:$0xff]  ;;  %v5157_v4 = vld [vmem:[#allocation2 + $0xc9] sm:$0xff] }
 0x528   : > { %5078 = vst.msk [vmem:[#allocation2 + $0xe3] sm:$0xff] %vm454_vm4, %v5042_v50  ;;  %v5008_v23 = vmax.f32 %v4905_v11, 0.0  ;;  %22247 = vmatprep.mubr.msk.f32.mxu0 %vm454_vm4, %v5156_v12  ;;  %v30490_v12 = vld [vmem:[#allocation38_spill] sm:$0xff] }
 0x529   : > { %v5045_v2 = vmul.f32 %v5009_v19, %v30483_v43  ;;  %22248 = vmatmul.mubr.msk.f32.gmra.mrb[42].mxu0 %vm454_vm4, %v5157_v4  ;;  %v30489_v19 = vld [vmem:[#allocation39_spill] sm:$0xff]  ;;  %v6790_v43 = vld [vmem:[#allocation12 + $0x110] sm:$0xff] }
 0x52a   : > { %v5044_v0 = vmul.f32 %v5008_v23, %v30484_v62  ;;  %v22188_v24 = vpop.f32.mrb[48].mxu1  ;;  %v24303_v35 = vpack.c.bf16 %v6791_v44, %v6790_v43  ;;  %v24311_v44 = vpack.c.bf16 %v6795_v1, %v6794_v9  ;;  %v7222_v43 = vld [vmem:[#allocation12 + $0x140] sm:$0xff] }
 0x52b   : > { %5081 = vst.msk [vmem:[#allocation2 + $0xfb] sm:$0xff] %vm454_vm4, %v5045_v2  ;;  %v5011_v3 = vmax.f32 %v22188_v24, 0.0  ;;  %v4915_v33 = vpop.f32.mrb[49].mxu1  ;;  %v5158_v34 = vld [vmem:[#allocation2 + $0xd1] sm:$0xff]  ;;  %v5159_v25 = vld [vmem:[#allocation2 + $0xd9] sm:$0xff] }
 0x52c   : > { %5080 = vst.msk [vmem:[#allocation2 + $0xf3] sm:$0xff] %vm454_vm4, %v5044_v0  ;;  %v5010_v8 = vmax.f32 %v4915_v33, 0.0  ;;  %22250 = vmatprep.mubr.msk.f32.mxu0 %vm454_vm4, %v5158_v34  ;;  %v5922_v33 = vld [vmem:[#allocation12 + $0x90] sm:$0xff]  ;;  %v5923_v34 = vld [vmem:[#allocation12 + $0x98] sm:$0xff] }
 0x52d   : > { %v5047_v26 = vmul.f32 %v5011_v3, %v30485_v22  ;;  %22251 = vmatmul.mubr.msk.f32.gmra.mrb[44].mxu0 %vm454_vm4, %v5159_v25  ;;  %v5088_v3 = vld [vmem:[#allocation2] sm:$0xff]  ;;  %v5089_v25 = vld [vmem:[#allocation2 + $0x8] sm:$0xff] }
 0x52e   : > { %v5046_v15 = vmul.f32 %v5010_v8, %v30486_v14  ;;  %v22191_v17 = vpop.f32.mrb[50].mxu1  ;;  %v24271_v8 = vpack.c.bf16 %v5923_v34, %v5922_v33  ;;  %v5105_v33 = vld [vmem:[#allocation2 + $0x88] sm:$0xff]  ;;  %v5106_v34 = vld [vmem:[#allocation2 + $0x90] sm:$0xff] }
 0x52f   : > { %5083 = vst.msk [vmem:[#allocation2 + $0x10b] sm:$0xff] %vm454_vm4, %v5047_v26  ;;  %v5013_v53 = vmax.f32 %v22191_v17, 0.0  ;;  %v4925_v20 = vpop.f32.mrb[51].mxu1  ;;  %v5160_v7 = vld [vmem:[#allocation2 + $0xe1] sm:$0xff]  ;;  %v5161_v49 = vld [vmem:[#allocation2 + $0xe9] sm:$0xff]  ;;  %v5924_v26 = vld [vmem:[#allocation12 + $0xa0] sm:$0xff] }
 0x530   : > { %5082 = vst.msk [vmem:[#allocation2 + $0x103] sm:$0xff] %vm454_vm4, %v5046_v15  ;;  %v5012_v16 = vmax.f32 %v4925_v20, 0.0  ;;  %22253 = vmatprep.mubr.msk.f32.mxu0 %vm454_vm4, %v5160_v7  ;;  %v5925_v15 = vld [vmem:[#allocation12 + $0xa8] sm:$0xff]  ;;  %v5090_v17 = vld [vmem:[#allocation2 + $0x10] sm:$0xff]  ;;  %v5091_v20 = vld [vmem:[#allocation2 + $0x18] sm:$0xff] }
 0x531   : > { %v5049_v27 = vmul.f32 %v5013_v53, %v30487_v21  ;;  %22254 = vmatmul.mubr.msk.f32.gmra.mrb[46].mxu0 %vm454_vm4, %v5161_v49  ;;  %v24275_v53 = vpack.c.bf16 %v5925_v15, %v5924_v26  ;;  %v5926_v7 = vld [vmem:[#allocation12 + $0xb0] sm:$0xff]  ;;  %v5927_v49 = vld [vmem:[#allocation12 + $0xb8] sm:$0xff] }
 0x532   : > { %v5048_v29 = vmul.f32 %v5012_v16, %v30488_v28  ;;  %v22194_v30 = vpop.f32.mrb[52].mxu1  ;;  %v5092_v16 = vld [vmem:[#allocation2 + $0x20] sm:$0xff]  ;;  %v5109_v26 = vld [vmem:[#allocation2 + $0xa8] sm:$0xff]  ;;  %v5110_v15 = vld [vmem:[#allocation2 + $0xb0] sm:$0xff] }
 0x533   : > { %5085 = vst.msk [vmem:[#allocation2 + $0x11b] sm:$0xff] %vm454_vm4, %v5049_v27  ;;  %v5015_v31 = vmax.f32 %v22194_v30, 0.0  ;;  %v4935_v32 = vpop.f32.mrb[53].mxu1  ;;  %v5162_v42 = vld [vmem:[#allocation2 + $0xf1] sm:$0xff]  ;;  %v5163_v50 = vld [vmem:[#allocation2 + $0xf9] sm:$0xff]  ;;  %v24279_v27 = vpack.c.bf16 %v5927_v49, %v5926_v7 }
 0x534   : > { %5084 = vst.msk [vmem:[#allocation2 + $0x113] sm:$0xff] %vm454_vm4, %v5048_v29  ;;  %v5014_v6 = vmax.f32 %v4935_v32, 0.0  ;;  %22256 = vmatprep.mubr.msk.f32.mxu0 %vm454_vm4, %v5162_v42  ;;  %v5093_v29 = vld [vmem:[#allocation2 + $0x28] sm:$0xff]  ;;  %v6354_v30 = vld [vmem:[#allocation12 + $0xc0] sm:$0xff]  ;;  %v5114_v7 = vld [vmem:[#allocation2 + $0xd0] sm:$0xff] }
 0x535   : > { %v5051_v11 = vmul.f32 %v5015_v31, %v30489_v19  ;;  %22257 = vmatmul.mubr.msk.f32.gmra.mrb[48].mxu0 %vm454_vm4, %v5163_v50  ;;  %v6355_v31 = vld [vmem:[#allocation12 + $0xc8] sm:$0xff]  ;;  %v5095_v42 = vld [vmem:[#allocation2 + $0x38] sm:$0xff] }
 0x536   : > { %v5050_v4 = vmul.f32 %v5014_v6, %v30490_v12  ;;  %v27593_v32 = vpack.c.bf16 %v6355_v31, %v6354_v30  ;;  %v5096_v50 = vld [vmem:[#allocation2 + $0x40] sm:$0xff]  ;;  %v5097_v6 = vld [vmem:[#allocation2 + $0x48] sm:$0xff]  ;;  %v5115_v49 = vld [vmem:[#allocation2 + $0xd8] sm:$0xff] }
 0x537   : > { %5087 = vst.msk [vmem:[#allocation2 + $0x12b] sm:$0xff] %vm454_vm4, %v5051_v11  ;;  %v5164_v23 = vld [vmem:[#allocation2 + $0x101] sm:$0xff]  ;;  %v5165_v2 = vld [vmem:[#allocation2 + $0x109] sm:$0xff]  ;;  %v5119_v30 = vld [vmem:[#allocation2 + $0xf8] sm:$0xff] }
 0x538   : > { %5086 = vst.msk [vmem:[#allocation2 + $0x123] sm:$0xff] %vm454_vm4, %v5050_v4  ;;  %22259 = vmatprep.mubr.msk.f32.mxu0 %vm454_vm4, %v5164_v23  ;;  %v5098_v11 = vld [vmem:[#allocation2 + $0x50] sm:$0xff]  ;;  %v5099_v4 = vld [vmem:[#allocation2 + $0x58] sm:$0xff]  ;;  %v5100_v23 = vld [vmem:[#allocation2 + $0x60] sm:$0xff] }
 0x539   : > { %22260 = vmatmul.mubr.msk.f32.gmra.mrb[50].mxu0 %vm454_vm4, %v5165_v2  ;;  %v5101_v2 = vld [vmem:[#allocation2 + $0x68] sm:$0xff]  ;;  %v5120_v31 = vld [vmem:[#allocation2 + $0x100] sm:$0xff]  ;;  %v5913_v19 = vld [vmem:[#allocation2 + $0xf2] sm:$0xff] }
 0x53a   : > { %v5912_v12 = vld [vmem:[#allocation2 + $0xea] sm:$0xff]  ;;  %v5914_v28 = vld [vmem:[#allocation2 + $0xfa] sm:$0xff]  ;;  %v5915_v21 = vld [vmem:[#allocation2 + $0x102] sm:$0xff] }
 0x53b   : > { %v5166_v0 = vld [vmem:[#allocation2 + $0x111] sm:$0xff]  ;;  %v5167_v24 = vld [vmem:[#allocation2 + $0x119] sm:$0xff] }
 0x53c   : > { %22262 = vmatprep.mubr.msk.f32.mxu0 %vm454_vm4, %v5166_v0  ;;  %v5102_v0 = vld [vmem:[#allocation2 + $0x70] sm:$0xff]  ;;  %v5918_v62 = vld [vmem:[#allocation2 + $0x11a] sm:$0xff] }
 0x53d   : > { %22263 = vmatmul.mubr.msk.f32.gmra.mrb[52].mxu0 %vm454_vm4, %v5167_v24  ;;  %v5103_v24 = vld [vmem:[#allocation2 + $0x78] sm:$0xff]  ;;  %v5916_v14 = vld [vmem:[#allocation2 + $0x10a] sm:$0xff] }
 0x53e   : > { %22281 = vmatprep.mubr.msk.f32.mxu0 %vm454_vm4, %v5088_v3  ;;  %v5104_v3 = vld [vmem:[#allocation2 + $0x80] sm:$0xff]  ;;  %v5917_v22 = vld [vmem:[#allocation2 + $0x112] sm:$0xff] }
 0x53f   : > { %v6351_v1 = vld [vmem:[#allocation2 + $0x122] sm:$0xff]  ;;  %v6352_v9 = vld [vmem:[#allocation2 + $0x12a] sm:$0xff] }
 0x541   : > { %22282 = vmatmul.mubr.msk.f32.vlgmr.msra.gmra.mrb[18].mxu0 %vm454_vm4, %v5089_v25  ;;  %v5107_v25 = vld [vmem:[#allocation2 + $0x98] sm:$0xff] }
 0x542   : > { %24270 = vmatpush3.bf16.msra.mxu0 %v27476_v5  ;;  %22284 = vmatprep.mubr.msk.f32.mxu0 %vm454_vm4, %v5090_v17  ;;  %v5094_v5 = vld [vmem:[#allocation2 + $0x30] sm:$0xff]  ;;  %v5111_v17 = vld [vmem:[#allocation2 + $0xb8] sm:$0xff] }
 0x543   : > { %24272 = vmatprep.subr.bf16.mxu0 %v24271_v8 }
 0x545   : > { %22285 = vmatmul.mubr.msk.f32.gmra.mrb[20].mxu0 %vm454_vm4, %v5091_v20  ;;  %v5113_v20 = vld [vmem:[#allocation2 + $0xc8] sm:$0xff] }
 0x546   : > { %22287 = vmatprep.mubr.msk.f32.mxu0 %vm454_vm4, %v5092_v16  ;;  %24274 = vmatpush3.bf16.msra.mxu0 %v24271_v8  ;;  %v5108_v8 = vld [vmem:[#allocation2 + $0xa0] sm:$0xff] }
 0x547   : > { %24276 = vmatprep.subr.bf16.mxu0 %v24275_v53  ;;  %v5116_v16 = vld [vmem:[#allocation2 + $0xe0] sm:$0xff] }
 0x549   : > { %22288 = vmatmul.mubr.msk.f32.gmra.mrb[22].mxu0 %vm454_vm4, %v5093_v29  ;;  %v5118_v29 = vld [vmem:[#allocation2 + $0xf0] sm:$0xff] }
 0x54a   : > { %22290 = vmatprep.mubr.msk.f32.mxu0 %vm454_vm4, %v5094_v5  ;;  %24278 = vmatpush3.bf16.msra.mxu0 %v24275_v53  ;;  %v5112_v53 = vld [vmem:[#allocation2 + $0xc0] sm:$0xff]  ;;  %v5121_v5 = vld [vmem:[#allocation2 + $0x108] sm:$0xff] }
 0x54b   : > { %24280 = vmatprep.subr.bf16.mxu0 %v24279_v27 }
 0x54d   : > { %22291 = vmatmul.mubr.msk.f32.gmra.mrb[24].mxu0 %vm454_vm4, %v5095_v42  ;;  %v5122_v42 = vld [vmem:[#allocation2 + $0x110] sm:$0xff] }
 0x54e   : > { %22293 = vmatprep.mubr.msk.f32.mxu0 %vm454_vm4, %v5096_v50  ;;  %24282 = vmatpush3.bf16.msra.mxu0 %v24279_v27  ;;  %v5117_v27 = vld [vmem:[#allocation2 + $0xe8] sm:$0xff] }
 0x54f   : > { %24284 = vmatprep.subr.bf16.mxu0 %v27593_v32  ;;  %v5883_v50 = vld [vmem:[#allocation2 + $0x2] sm:$0xff] }
 0x551   : > { %22294 = vmatmul.mubr.msk.f32.gmra.mrb[26].mxu0 %vm454_vm4, %v5097_v6  ;;  %v5123_v6 = vld [vmem:[#allocation2 + $0x118] sm:$0xff] }
 0x552   : > { %22296 = vmatprep.mubr.msk.f32.mxu0 %vm454_vm4, %v5098_v11  ;;  %v6356_v11 = vld [vmem:[#allocation12 + $0xd0] sm:$0xff] }
 0x555   : > { %22297 = vmatmul.mubr.msk.f32.gmra.mrb[28].mxu0 %vm454_vm4, %v5099_v4  ;;  %v6357_v4 = vld [vmem:[#allocation12 + $0xd8] sm:$0xff] }
 0x556   : > { %22299 = vmatprep.mubr.msk.f32.mxu0 %vm454_vm4, %v5100_v23  ;;  %v5884_v23 = vld [vmem:[#allocation2 + $0xa] sm:$0xff] }
 0x559   : > { %22300 = vmatmul.mubr.msk.f32.gmra.mrb[30].mxu0 %vm454_vm4, %v5101_v2  ;;  %v24287_v2 = vpack.c.bf16 %v6357_v4, %v6356_v11  ;;  %v27691_v11 = vld [vmem:[#allocation2 + $0x8a] sm:$0xff]  ;;  %v27695_v4 = vld [vmem:[#allocation2 + $0x92] sm:$0xff] }
 0x55a   : > { %22302 = vmatprep.mubr.msk.f32.mxu0 %vm454_vm4, %v5102_v0  ;;  %v6358_v0 = vld [vmem:[#allocation12 + $0xe0] sm:$0xff] }
 0x55d   : > { %22303 = vmatmul.mubr.msk.f32.gmra.mrb[32].mxu0 %vm454_vm4, %v5103_v24  ;;  %v6359_v24 = vld [vmem:[#allocation12 + $0xe8] sm:$0xff] }
 0x55e   : > { %22305 = vmatprep.mubr.msk.f32.mxu0 %vm454_vm4, %v5104_v3  ;;  %v27627_v3 = vld [vmem:[#allocation2 + $0x12] sm:$0xff] }
 0x561   : > { %22306 = vmatmul.mubr.msk.f32.gmra.mrb[34].mxu0 %vm454_vm4, %v5105_v33  ;;  %v24291_v33 = vpack.c.bf16 %v6359_v24, %v6358_v0  ;;  %v27707_v0 = vld [vmem:[#allocation2 + $0xaa] sm:$0xff]  ;;  %v27711_v24 = vld [vmem:[#allocation2 + $0xb2] sm:$0xff] }
 0x562   : > { %22308 = vmatprep.mubr.msk.f32.mxu0 %vm454_vm4, %v5106_v34  ;;  %v27632_v34 = vld [vmem:[#allocation2 + $0x1a] sm:$0xff] }
 0x565   : > { %22309 = vmatmul.mubr.msk.f32.gmra.mrb[36].mxu0 %vm454_vm4, %v5107_v25  ;;  %v6360_v25 = vld [vmem:[#allocation12 + $0xf0] sm:$0xff] }
 0x566   : > { %22311 = vmatprep.mubr.msk.f32.mxu0 %vm454_vm4, %v5108_v8  ;;  %v6361_v8 = vld [vmem:[#allocation12 + $0xf8] sm:$0xff] }
 0x569   : > { %22312 = vmatmul.mubr.msk.f32.gmra.mrb[38].mxu0 %vm454_vm4, %v5109_v26  ;;  %v27636_v26 = vld [vmem:[#allocation2 + $0x22] sm:$0xff] }
 0x56a   : > { %22314 = vmatprep.mubr.msk.f32.mxu0 %vm454_vm4, %v5110_v15  ;;  %v27640_v15 = vld [vmem:[#allocation2 + $0x2a] sm:$0xff] }
 0x56d   : > { %22315 = vmatmul.mubr.msk.f32.gmra.mrb[40].mxu0 %vm454_vm4, %v5111_v17  ;;  %v6788_v17 = vld [vmem:[#allocation12 + $0x100] sm:$0xff] }
 0x56e   : > { %22317 = vmatprep.mubr.msk.f32.mxu0 %vm454_vm4, %v5112_v53  ;;  %v6789_v53 = vld [vmem:[#allocation12 + $0x108] sm:$0xff] }
 0x571   : > { %22318 = vmatmul.mubr.msk.f32.gmra.mrb[42].mxu0 %vm454_vm4, %v5113_v20  ;;  %v27644_v20 = vld [vmem:[#allocation2 + $0x32] sm:$0xff] }
 0x572   : > { %22320 = vmatprep.mubr.msk.f32.mxu0 %vm454_vm4, %v5114_v7  ;;  %v27648_v7 = vpack.c.bf16 %v6789_v53, %v6788_v17  ;;  %v27731_v17 = vld [vmem:[#allocation2 + $0xda] sm:$0xff]  ;;  %v5911_v53 = vld [vmem:[#allocation2 + $0xe2] sm:$0xff] }
 0x575   : > { %22321 = vmatmul.mubr.msk.f32.gmra.mrb[44].mxu0 %vm454_vm4, %v5115_v49  ;;  %v27650_v49 = vld [vmem:[#allocation2 + $0x3a] sm:$0xff] }
 0x576   : > { %22323 = vmatprep.mubr.msk.f32.mxu0 %vm454_vm4, %v5116_v16  ;;  %v27654_v16 = vld [vmem:[#allocation2 + $0x42] sm:$0xff] }
 0x579   : > { %22324 = vmatmul.mubr.msk.f32.gmra.mrb[46].mxu0 %vm454_vm4, %v5117_v27  ;;  %v27659_v27 = vld [vmem:[#allocation2 + $0x4a] sm:$0xff] }
 0x57a   : > { %22326 = vmatprep.mubr.msk.f32.mxu0 %vm454_vm4, %v5118_v29  ;;  %v27663_v29 = vld [vmem:[#allocation2 + $0x52] sm:$0xff] }
 0x57d   : > { %22327 = vmatmul.mubr.msk.f32.gmra.mrb[48].mxu0 %vm454_vm4, %v5119_v30  ;;  %v27667_v30 = vld [vmem:[#allocation2 + $0x5a] sm:$0xff] }
 0x57e   : > { %22329 = vmatprep.mubr.msk.f32.mxu0 %vm454_vm4, %v5120_v31  ;;  %v27671_v31 = vld [vmem:[#allocation2 + $0x62] sm:$0xff] }
 0x581   : > { %22330 = vmatmul.mubr.msk.f32.gmra.mrb[50].mxu0 %vm454_vm4, %v5121_v5  ;;  %v27675_v5 = vld [vmem:[#allocation2 + $0x6a] sm:$0xff] }
 0x582   : > { %22332 = vmatprep.mubr.msk.f32.mxu0 %vm454_vm4, %v5122_v42  ;;  %v27679_v42 = vld [vmem:[#allocation2 + $0x72] sm:$0xff] }
 0x585   : > { %22333 = vmatmul.mubr.msk.f32.gmra.mrb[52].mxu0 %vm454_vm4, %v5123_v6  ;;  %v27687_v6 = vld [vmem:[#allocation2 + $0x82] sm:$0xff] }
 0x586   : > { %22351 = vmatprep.mubr.msk.f32.mxu0 %vm454_vm4, %v5883_v50  ;;  %v27683_v50 = vld [vmem:[#allocation2 + $0x7a] sm:$0xff] }
 0x589   : > { %22352 = vmatmul.mubr.msk.f32.vlgmr.msra.gmra.mrb[18].mxu0 %vm454_vm4, %v5884_v23  ;;  %v27699_v23 = vld [vmem:[#allocation2 + $0x9a] sm:$0xff] }
 0x58a   : > { %24286 = vmatpush3.bf16.msra.mxu0 %v27593_v32  ;;  %22354 = vmatprep.mubr.msk.f32.mxu0 %vm454_vm4, %v27627_v3  ;;  %v24295_v32 = vpack.c.bf16 %v6361_v8, %v6360_v25  ;;  %v27719_v25 = vld [vmem:[#allocation2 + $0xc2] sm:$0xff]  ;;  %v27723_v8 = vld [vmem:[#allocation2 + $0xca] sm:$0xff] }
 0x58b   : > { %24288 = vmatprep.subr.bf16.mxu0 %v24287_v2 }
 0x58d   : > { %22355 = vmatmul.mubr.msk.f32.gmra.mrb[20].mxu0 %vm454_vm4, %v27632_v34 }
 0x58e   : > { %22357 = vmatprep.mubr.msk.f32.mxu0 %vm454_vm4, %v27636_v26  ;;  %24290 = vmatpush3.bf16.msra.mxu0 %v24287_v2  ;;  %v27703_v2 = vld [vmem:[#allocation2 + $0xa2] sm:$0xff] }
 0x58f   : > { %24292 = vmatprep.subr.bf16.mxu0 %v24291_v33 }
 0x591   : > { %22358 = vmatmul.mubr.msk.f32.gmra.mrb[22].mxu0 %vm454_vm4, %v27640_v15 }
 0x592   : > { %22360 = vmatprep.mubr.msk.f32.mxu0 %vm454_vm4, %v27644_v20  ;;  %24294 = vmatpush3.bf16.msra.mxu0 %v24291_v33  ;;  %v27715_v33 = vld [vmem:[#allocation2 + $0xba] sm:$0xff] }
 0x593   : > { %24296 = vmatprep.subr.bf16.mxu0 %v24295_v32 }
 0x595   : > { %22361 = vmatmul.mubr.msk.f32.gmra.mrb[24].mxu0 %vm454_vm4, %v27650_v49 }
 0x596   : > { %22363 = vmatprep.mubr.msk.f32.mxu0 %vm454_vm4, %v27654_v16  ;;  %24298 = vmatpush3.bf16.msra.mxu0 %v24295_v32  ;;  %v27727_v32 = vld [vmem:[#allocation2 + $0xd2] sm:$0xff] }
 0x597   : > { %24300 = vmatprep.subr.bf16.mxu0 %v27648_v7 }
 0x599   : > { %22364 = vmatmul.mubr.msk.f32.gmra.mrb[26].mxu0 %vm454_vm4, %v27659_v27 }
 0x59a   : > { %22366 = vmatprep.mubr.msk.f32.mxu0 %vm454_vm4, %v27663_v29 }
 0x59d   : > { %22367 = vmatmul.mubr.msk.f32.gmra.mrb[28].mxu0 %vm454_vm4, %v27667_v30 }
 0x59e   : > { %22369 = vmatprep.mubr.msk.f32.mxu0 %vm454_vm4, %v27671_v31 }
 0x5a1   : > { %22370 = vmatmul.mubr.msk.f32.gmra.mrb[30].mxu0 %vm454_vm4, %v27675_v5 }
 0x5a2   : > { %22372 = vmatprep.mubr.msk.f32.mxu0 %vm454_vm4, %v27679_v42 }
 0x5a5   : > { %22373 = vmatmul.mubr.msk.f32.gmra.mrb[32].mxu0 %vm454_vm4, %v27683_v50 }
 0x5a6   : > { %22375 = vmatprep.mubr.msk.f32.mxu0 %vm454_vm4, %v27687_v6 }
 0x5a9   : > { %22376 = vmatmul.mubr.msk.f32.gmra.mrb[34].mxu0 %vm454_vm4, %v27691_v11 }
 0x5aa   : > { %22378 = vmatprep.mubr.msk.f32.mxu0 %vm454_vm4, %v27695_v4 }
 0x5ad   : > { %22379 = vmatmul.mubr.msk.f32.gmra.mrb[36].mxu0 %vm454_vm4, %v27699_v23 }
 0x5ae   : > { %22381 = vmatprep.mubr.msk.f32.mxu0 %vm454_vm4, %v27703_v2 }
 0x5b1   : > { %22382 = vmatmul.mubr.msk.f32.gmra.mrb[38].mxu0 %vm454_vm4, %v27707_v0 }
 0x5b2   : > { %22384 = vmatprep.mubr.msk.f32.mxu0 %vm454_vm4, %v27711_v24 }
 0x5b5   : > { %22385 = vmatmul.mubr.msk.f32.gmra.mrb[40].mxu0 %vm454_vm4, %v27715_v33 }
 0x5b6   : > { %22387 = vmatprep.mubr.msk.f32.mxu0 %vm454_vm4, %v27719_v25 }
 0x5b9   : > { %22388 = vmatmul.mubr.msk.f32.gmra.mrb[42].mxu0 %vm454_vm4, %v27723_v8 }
 0x5ba   : > { %22390 = vmatprep.mubr.msk.f32.mxu0 %vm454_vm4, %v27727_v32 }
 0x5bd   : > { %22391 = vmatmul.mubr.msk.f32.gmra.mrb[44].mxu0 %vm454_vm4, %v27731_v17 }
 0x5be   : > { %22393 = vmatprep.mubr.msk.f32.mxu0 %vm454_vm4, %v5911_v53 }
 0x5c1   : > { %22394 = vmatmul.mubr.msk.f32.gmra.mrb[46].mxu0 %vm454_vm4, %v5912_v12 }
 0x5c2   : > { %22396 = vmatprep.mubr.msk.f32.mxu0 %vm454_vm4, %v5913_v19 }
 0x5c5   : > { %22397 = vmatmul.mubr.msk.f32.gmra.mrb[48].mxu0 %vm454_vm4, %v5914_v28 }
 0x5c6   : > { %22399 = vmatprep.mubr.msk.f32.mxu0 %vm454_vm4, %v5915_v21 }
 0x5c9   : > { %22400 = vmatmul.mubr.msk.f32.gmra.mrb[50].mxu0 %vm454_vm4, %v5916_v14 }
 0x5ca   : > { %22402 = vmatprep.mubr.msk.f32.mxu0 %vm454_vm4, %v5917_v22 }
 0x5cd   : > { %22403 = vmatmul.mubr.msk.f32.gmra.mrb[52].mxu0 %vm454_vm4, %v5918_v62 }
 0x5ce   : > { %22421 = vmatprep.mubr.msk.f32.mxu0 %vm454_vm4, %v27627_v3  ;;  %v7223_v3 = vld [vmem:[#allocation12 + $0x148] sm:$0xff] }
 0x5cf   : > { %v24315_v13 = vpack.c.bf16 %v7223_v3, %v7222_v43  ;;  %v6777_v43 = vld [vmem:[#allocation2 + $0xe3] sm:$0xff]  ;;  %v6778_v3 = vld [vmem:[#allocation2 + $0xeb] sm:$0xff] }
 0x5d1   : > { %22422 = vmatmul.mubr.msk.f32.vlgmr.msra.gmra.mrb[18].mxu0 %vm454_vm4, %v27632_v34  ;;  %v7228_v34 = vld [vmem:[#allocation12 + $0x170] sm:$0xff] }
 0x5d2   : > { %24302 = vmatpush3.bf16.msra.mxu0 %v27648_v7  ;;  %22424 = vmatprep.mubr.msk.f32.mxu0 %vm454_vm4, %v27636_v26  ;;  %v7229_v26 = vld [vmem:[#allocation12 + $0x178] sm:$0xff]  ;;  %v6756_v7 = vld [vmem:[#allocation2 + $0x3b] sm:$0xff] }
 0x5d3   : > { %24304 = vmatprep.subr.bf16.mxu0 %v24303_v35 }
 0x5d5   : > { %22425 = vmatmul.mubr.msk.f32.gmra.mrb[20].mxu0 %vm454_vm4, %v27640_v15  ;;  %v6755_v15 = vld [vmem:[#allocation2 + $0x33] sm:$0xff] }
 0x5d6   : > { %22427 = vmatprep.mubr.msk.f32.mxu0 %vm454_vm4, %v27644_v20  ;;  %24306 = vmatpush3.bf16.msra.mxu0 %v24303_v35  ;;  %v6751_v35 = vld [vmem:[#allocation2 + $0x13] sm:$0xff]  ;;  %v24327_v20 = vpack.c.bf16 %v7229_v26, %v7228_v34  ;;  %v7661_v26 = vld [vmem:[#allocation12 + $0x1a8] sm:$0xff] }
 0x5d7   : > { %24308 = vmatprep.subr.bf16.mxu0 %v24307_v10  ;;  %v7660_v34 = vld [vmem:[#allocation12 + $0x1a0] sm:$0xff] }
 0x5d9   : > { %22428 = vmatmul.mubr.msk.f32.gmra.mrb[22].mxu0 %vm454_vm4, %v27650_v49  ;;  %v7656_v49 = vld [vmem:[#allocation12 + $0x180] sm:$0xff] }
 0x5da   : > { %22430 = vmatprep.mubr.msk.f32.mxu0 %vm454_vm4, %v27654_v16  ;;  %24310 = vmatpush3.bf16.msra.mxu0 %v24307_v10  ;;  %v7224_v10 = vld [vmem:[#allocation12 + $0x150] sm:$0xff]  ;;  %v7657_v16 = vld [vmem:[#allocation12 + $0x188] sm:$0xff] }
 0x5db   : > { %24312 = vmatprep.subr.bf16.mxu0 %v24311_v44 }
 0x5dd   : > { %22431 = vmatmul.mubr.msk.f32.gmra.mrb[24].mxu0 %vm454_vm4, %v27659_v27  ;;  %v6757_v27 = vld [vmem:[#allocation2 + $0x43] sm:$0xff] }
 0x5de   : > { %22433 = vmatprep.mubr.msk.f32.mxu0 %vm454_vm4, %v27663_v29  ;;  %24314 = vmatpush3.bf16.msra.mxu0 %v24311_v44  ;;  %v27813_v29 = vpack.c.bf16 %v7657_v16, %v7656_v49  ;;  %v6776_v44 = vld [vmem:[#allocation2 + $0xdb] sm:$0xff]  ;;  %v7662_v49 = vld [vmem:[#allocation12 + $0x1b0] sm:$0xff]  ;;  %v7663_v16 = vld [vmem:[#allocation12 + $0x1b8] sm:$0xff] }
 0x5df   : > { %24316 = vmatprep.subr.bf16.mxu0 %v24315_v13 }
 0x5e1   : > { %22434 = vmatmul.mubr.msk.f32.gmra.mrb[26].mxu0 %vm454_vm4, %v27667_v30  ;;  %v6758_v30 = vld [vmem:[#allocation2 + $0x4b] sm:$0xff] }
 0x5e2   : > { %22436 = vmatprep.mubr.msk.f32.mxu0 %vm454_vm4, %v27671_v31  ;;  %v6759_v31 = vld [vmem:[#allocation2 + $0x53] sm:$0xff] }
 0x5e5   : > { %22437 = vmatmul.mubr.msk.f32.gmra.mrb[28].mxu0 %vm454_vm4, %v27675_v5  ;;  %v6760_v5 = vld [vmem:[#allocation2 + $0x5b] sm:$0xff] }
 0x5e6   : > { %22439 = vmatprep.mubr.msk.f32.mxu0 %vm454_vm4, %v27679_v42  ;;  %v6761_v42 = vld [vmem:[#allocation2 + $0x63] sm:$0xff] }
 0x5e9   : > { %22440 = vmatmul.mubr.msk.f32.gmra.mrb[30].mxu0 %vm454_vm4, %v27683_v50  ;;  %v6762_v50 = vld [vmem:[#allocation2 + $0x6b] sm:$0xff] }
 0x5ea   : > { %22442 = vmatprep.mubr.msk.f32.mxu0 %vm454_vm4, %v27687_v6  ;;  %v6763_v6 = vld [vmem:[#allocation2 + $0x73] sm:$0xff] }
 0x5ed   : > { %22443 = vmatmul.mubr.msk.f32.gmra.mrb[32].mxu0 %vm454_vm4, %v27691_v11  ;;  %v6764_v11 = vld [vmem:[#allocation2 + $0x7b] sm:$0xff] }
 0x5ee   : > { %22445 = vmatprep.mubr.msk.f32.mxu0 %vm454_vm4, %v27695_v4  ;;  %v6765_v4 = vld [vmem:[#allocation2 + $0x83] sm:$0xff] }
 0x5f1   : > { %22446 = vmatmul.mubr.msk.f32.gmra.mrb[34].mxu0 %vm454_vm4, %v27699_v23  ;;  %v6766_v23 = vld [vmem:[#allocation2 + $0x8b] sm:$0xff] }
 0x5f2   : > { %22448 = vmatprep.mubr.msk.f32.mxu0 %vm454_vm4, %v27703_v2  ;;  %v6767_v2 = vld [vmem:[#allocation2 + $0x93] sm:$0xff] }
 0x5f5   : > { %22449 = vmatmul.mubr.msk.f32.gmra.mrb[36].mxu0 %vm454_vm4, %v27707_v0  ;;  %v6768_v0 = vld [vmem:[#allocation2 + $0x9b] sm:$0xff] }
 0x5f6   : > { %22451 = vmatprep.mubr.msk.f32.mxu0 %vm454_vm4, %v27711_v24  ;;  %v6769_v24 = vld [vmem:[#allocation2 + $0xa3] sm:$0xff] }
 0x5f9   : > { %22452 = vmatmul.mubr.msk.f32.gmra.mrb[38].mxu0 %vm454_vm4, %v27715_v33  ;;  %v6770_v33 = vld [vmem:[#allocation2 + $0xab] sm:$0xff] }
 0x5fa   : > { %22454 = vmatprep.mubr.msk.f32.mxu0 %vm454_vm4, %v27719_v25  ;;  %v6771_v25 = vld [vmem:[#allocation2 + $0xb3] sm:$0xff] }
 0x5fd   : > { %22455 = vmatmul.mubr.msk.f32.gmra.mrb[40].mxu0 %vm454_vm4, %v27723_v8  ;;  %v6772_v8 = vld [vmem:[#allocation2 + $0xbb] sm:$0xff] }
 0x5fe   : > { %22457 = vmatprep.mubr.msk.f32.mxu0 %vm454_vm4, %v27727_v32  ;;  %v6773_v32 = vld [vmem:[#allocation2 + $0xc3] sm:$0xff] }
 0x601   : > { %22458 = vmatmul.mubr.msk.f32.gmra.mrb[42].mxu0 %vm454_vm4, %v27731_v17  ;;  %v6774_v17 = vld [vmem:[#allocation2 + $0xcb] sm:$0xff] }
 0x602   : > { %22460 = vmatprep.mubr.msk.f32.mxu0 %vm454_vm4, %v5911_v53  ;;  %v6775_v53 = vld [vmem:[#allocation2 + $0xd3] sm:$0xff] }
 0x605   : > { %22461 = vmatmul.mubr.msk.f32.gmra.mrb[44].mxu0 %vm454_vm4, %v5912_v12  ;;  %v7227_v12 = vld [vmem:[#allocation12 + $0x168] sm:$0xff] }
 0x606   : > { %22463 = vmatprep.mubr.msk.f32.mxu0 %vm454_vm4, %v5913_v19  ;;  %v6752_v19 = vld [vmem:[#allocation2 + $0x1b] sm:$0xff] }
 0x609   : > { %22464 = vmatmul.mubr.msk.f32.gmra.mrb[46].mxu0 %vm454_vm4, %v5914_v28  ;;  %v24319_v28 = vpack.c.bf16 %v7225_v18, %v7224_v10  ;;  %v6782_v10 = vld [vmem:[#allocation2 + $0x10b] sm:$0xff]  ;;  %v6783_v18 = vld [vmem:[#allocation2 + $0x113] sm:$0xff] }
 0x60a   : > { %22466 = vmatprep.mubr.msk.f32.mxu0 %vm454_vm4, %v5915_v21  ;;  %v7226_v21 = vld [vmem:[#allocation12 + $0x160] sm:$0xff] }
 0x60d   : > { %22467 = vmatmul.mubr.msk.f32.gmra.mrb[48].mxu0 %vm454_vm4, %v5916_v14  ;;  %v6754_v14 = vld [vmem:[#allocation2 + $0x2b] sm:$0xff] }
 0x60e   : > { %22469 = vmatprep.mubr.msk.f32.mxu0 %vm454_vm4, %v5917_v22  ;;  %v6753_v22 = vld [vmem:[#allocation2 + $0x23] sm:$0xff] }
 0x611   : > { %22470 = vmatmul.mubr.msk.f32.gmra.mrb[50].mxu0 %vm454_vm4, %v5918_v62  ;;  %v24323_v62 = vpack.c.bf16 %v7227_v12, %v7226_v21  ;;  %v7658_v21 = vld [vmem:[#allocation12 + $0x190] sm:$0xff]  ;;  %v7659_v12 = vld [vmem:[#allocation12 + $0x198] sm:$0xff] }
 0x612   : > { %22472 = vmatprep.mubr.msk.f32.mxu0 %vm454_vm4, %v6351_v1  ;;  %v6780_v1 = vld [vmem:[#allocation2 + $0xfb] sm:$0xff] }
 0x615   : > { %22473 = vmatmul.mubr.msk.f32.gmra.mrb[52].mxu0 %vm454_vm4, %v6352_v9  ;;  %v6781_v9 = vld [vmem:[#allocation2 + $0x103] sm:$0xff] }
 0x616   : > { %22491 = vmatprep.mubr.msk.f32.mxu0 %vm454_vm4, %v6751_v35  ;;  %v6784_v35 = vld [vmem:[#allocation2 + $0x11b] sm:$0xff] }
 0x619   : > { %22492 = vmatmul.mubr.msk.f32.vlgmr.msra.gmra.mrb[18].mxu0 %vm454_vm4, %v6752_v19  ;;  %v6786_v19 = vld [vmem:[#allocation2 + $0x12b] sm:$0xff] }
 0x61a   : > { %24318 = vmatpush3.bf16.msra.mxu0 %v24315_v13  ;;  %22494 = vmatprep.mubr.msk.f32.mxu0 %vm454_vm4, %v6753_v22  ;;  %v6779_v13 = vld [vmem:[#allocation2 + $0xf3] sm:$0xff] }
 0x61b   : > { %24320 = vmatprep.subr.bf16.mxu0 %v24319_v28  ;;  %v7185_v22 = vld [vmem:[#allocation2 + $0x14] sm:$0xff] }
 0x61d   : > { %22495 = vmatmul.mubr.msk.f32.gmra.mrb[20].mxu0 %vm454_vm4, %v6754_v14  ;;  %v7186_v14 = vld [vmem:[#allocation2 + $0x1c] sm:$0xff] }
 0x61e   : > { %22497 = vmatprep.mubr.msk.f32.mxu0 %vm454_vm4, %v6755_v15  ;;  %24322 = vmatpush3.bf16.msra.mxu0 %v24319_v28  ;;  %v6785_v28 = vld [vmem:[#allocation2 + $0x123] sm:$0xff] }
 0x61f   : > { %24324 = vmatprep.subr.bf16.mxu0 %v24323_v62  ;;  %v27847_v15 = vld [vmem:[#allocation2 + $0x24] sm:$0xff] }
 0x621   : > { %22498 = vmatmul.mubr.msk.f32.gmra.mrb[22].mxu0 %vm454_vm4, %v6756_v7  ;;  %v27852_v7 = vld [vmem:[#allocation2 + $0x2c] sm:$0xff] }
 0x622   : > { %22500 = vmatprep.mubr.msk.f32.mxu0 %vm454_vm4, %v6757_v27  ;;  %24326 = vmatpush3.bf16.msra.mxu0 %v24323_v62  ;;  %v24335_v62 = vpack.c.bf16 %v7659_v12, %v7658_v21  ;;  %v27856_v27 = vld [vmem:[#allocation2 + $0x34] sm:$0xff]  ;;  %v7216_v21 = vld [vmem:[#allocation2 + $0x10c] sm:$0xff] }
 0x623   : > { %24328 = vmatprep.subr.bf16.mxu0 %v24327_v20  ;;  %v7217_v12 = vld [vmem:[#allocation2 + $0x114] sm:$0xff] }
 0x625   : > { %22501 = vmatmul.mubr.msk.f32.gmra.mrb[24].mxu0 %vm454_vm4, %v6758_v30  ;;  %v27860_v30 = vld [vmem:[#allocation2 + $0x3c] sm:$0xff] }
 0x626   : > { %22503 = vmatprep.mubr.msk.f32.mxu0 %vm454_vm4, %v6759_v31  ;;  %24330 = vmatpush3.bf16.msra.mxu0 %v24327_v20  ;;  %v24339_v20 = vpack.c.bf16 %v7661_v26, %v7660_v34  ;;  %v8090_v31 = vld [vmem:[#allocation12 + $0x1c0] sm:$0xff]  ;;  %v8092_v34 = vld [vmem:[#allocation12 + $0x1d0] sm:$0xff]  ;;  %v8093_v26 = vld [vmem:[#allocation12 + $0x1d8] sm:$0xff] }
 0x627   : > { %24332 = vmatprep.subr.bf16.mxu0 %v27813_v29 }
 0x629   : > { %22504 = vmatmul.mubr.msk.f32.gmra.mrb[26].mxu0 %vm454_vm4, %v6760_v5  ;;  %v8091_v5 = vld [vmem:[#allocation12 + $0x1c8] sm:$0xff] }
 0x62a   : > { %22506 = vmatprep.mubr.msk.f32.mxu0 %vm454_vm4, %v6761_v42  ;;  %v27864_v42 = vld [vmem:[#allocation2 + $0x44] sm:$0xff] }
 0x62d   : > { %22507 = vmatmul.mubr.msk.f32.gmra.mrb[28].mxu0 %vm454_vm4, %v6762_v50  ;;  %v27868_v50 = vpack.c.bf16 %v8091_v5, %v8090_v31  ;;  %v8096_v31 = vld [vmem:[#allocation12 + $0x1f0] sm:$0xff]  ;;  %v8097_v5 = vld [vmem:[#allocation12 + $0x1f8] sm:$0xff] }
 0x62e   : > { %22509 = vmatprep.mubr.msk.f32.mxu0 %vm454_vm4, %v6763_v6  ;;  %v27870_v6 = vld [vmem:[#allocation2 + $0x4c] sm:$0xff] }
 0x631   : > { %22510 = vmatmul.mubr.msk.f32.gmra.mrb[30].mxu0 %vm454_vm4, %v6764_v11  ;;  %v27874_v11 = vld [vmem:[#allocation2 + $0x54] sm:$0xff] }
 0x632   : > { %22512 = vmatprep.mubr.msk.f32.mxu0 %vm454_vm4, %v6765_v4  ;;  %v27879_v4 = vld [vmem:[#allocation2 + $0x5c] sm:$0xff] }
 0x635   : > { %22513 = vmatmul.mubr.msk.f32.gmra.mrb[32].mxu0 %vm454_vm4, %v6766_v23  ;;  %v27883_v23 = vld [vmem:[#allocation2 + $0x64] sm:$0xff] }
 0x636   : > { %22515 = vmatprep.mubr.msk.f32.mxu0 %vm454_vm4, %v6767_v2  ;;  %v27887_v2 = vld [vmem:[#allocation2 + $0x6c] sm:$0xff] }
 0x639   : > { %22516 = vmatmul.mubr.msk.f32.gmra.mrb[34].mxu0 %vm454_vm4, %v6768_v0  ;;  %v27891_v0 = vld [vmem:[#allocation2 + $0x74] sm:$0xff] }
 0x63a   : > { %22518 = vmatprep.mubr.msk.f32.mxu0 %vm454_vm4, %v6769_v24  ;;  %v27895_v24 = vld [vmem:[#allocation2 + $0x7c] sm:$0xff] }
 0x63d   : > { %22519 = vmatmul.mubr.msk.f32.gmra.mrb[36].mxu0 %vm454_vm4, %v6770_v33  ;;  %v27899_v33 = vld [vmem:[#allocation2 + $0x84] sm:$0xff] }
 0x63e   : > { %22521 = vmatprep.mubr.msk.f32.mxu0 %vm454_vm4, %v6771_v25  ;;  %v27903_v25 = vld [vmem:[#allocation2 + $0x8c] sm:$0xff] }
 0x641   : > { %22522 = vmatmul.mubr.msk.f32.gmra.mrb[38].mxu0 %vm454_vm4, %v6772_v8  ;;  %v27907_v8 = vld [vmem:[#allocation2 + $0x94] sm:$0xff] }
 0x642   : > { %22524 = vmatprep.mubr.msk.f32.mxu0 %vm454_vm4, %v6773_v32  ;;  %v27911_v32 = vld [vmem:[#allocation2 + $0x9c] sm:$0xff] }
 0x645   : > { %22525 = vmatmul.mubr.msk.f32.gmra.mrb[40].mxu0 %vm454_vm4, %v6774_v17  ;;  %v27915_v17 = vld [vmem:[#allocation2 + $0xa4] sm:$0xff] }
 0x646   : > { %22527 = vmatprep.mubr.msk.f32.mxu0 %vm454_vm4, %v6775_v53  ;;  %v27919_v53 = vld [vmem:[#allocation2 + $0xac] sm:$0xff] }
 0x649   : > { %22528 = vmatmul.mubr.msk.f32.gmra.mrb[42].mxu0 %vm454_vm4, %v6776_v44  ;;  %v27923_v44 = vld [vmem:[#allocation2 + $0xb4] sm:$0xff] }
 0x64a   : > { %22530 = vmatprep.mubr.msk.f32.mxu0 %vm454_vm4, %v6777_v43  ;;  %v27927_v43 = vld [vmem:[#allocation2 + $0xbc] sm:$0xff] }
 0x64d   : > { %22531 = vmatmul.mubr.msk.f32.gmra.mrb[44].mxu0 %vm454_vm4, %v6778_v3  ;;  %v27931_v3 = vld [vmem:[#allocation2 + $0xc4] sm:$0xff] }
 0x64e   : > { %22533 = vmatprep.mubr.msk.f32.mxu0 %vm454_vm4, %v6779_v13  ;;  %v27935_v13 = vld [vmem:[#allocation2 + $0xcc] sm:$0xff] }
 0x651   : > { %22534 = vmatmul.mubr.msk.f32.gmra.mrb[46].mxu0 %vm454_vm4, %v6780_v1  ;;  %v27939_v1 = vld [vmem:[#allocation2 + $0xd4] sm:$0xff] }
 0x652   : > { %22536 = vmatprep.mubr.msk.f32.mxu0 %vm454_vm4, %v6781_v9  ;;  %v27943_v9 = vld [vmem:[#allocation2 + $0xdc] sm:$0xff] }
 0x655   : > { %22537 = vmatmul.mubr.msk.f32.gmra.mrb[48].mxu0 %vm454_vm4, %v6782_v10  ;;  %v27947_v10 = vld [vmem:[#allocation2 + $0xe4] sm:$0xff] }
 0x656   : > { %22539 = vmatprep.mubr.msk.f32.mxu0 %vm454_vm4, %v6783_v18  ;;  %v27951_v18 = vld [vmem:[#allocation2 + $0xec] sm:$0xff] }
 0x659   : > { %22540 = vmatmul.mubr.msk.f32.gmra.mrb[50].mxu0 %vm454_vm4, %v6784_v35  ;;  %v7213_v35 = vld [vmem:[#allocation2 + $0xf4] sm:$0xff] }
 0x65a   : > { %22542 = vmatprep.mubr.msk.f32.mxu0 %vm454_vm4, %v6785_v28  ;;  %v7214_v28 = vld [vmem:[#allocation2 + $0xfc] sm:$0xff] }
 0x65d   : > { %22543 = vmatmul.mubr.msk.f32.gmra.mrb[52].mxu0 %vm454_vm4, %v6786_v19  ;;  %v7215_v19 = vld [vmem:[#allocation2 + $0x104] sm:$0xff] }
 0x65e   : > { %22561 = vmatprep.mubr.msk.f32.mxu0 %vm454_vm4, %v7185_v22  ;;  %v7218_v22 = vld [vmem:[#allocation2 + $0x11c] sm:$0xff] }
 0x661   : > { %22562 = vmatmul.mubr.msk.f32.vlgmr.msra.gmra.mrb[18].mxu0 %vm454_vm4, %v7186_v14  ;;  %v7220_v14 = vld [vmem:[#allocation2 + $0x12c] sm:$0xff] }
 0x662   : > { %24334 = vmatpush3.bf16.msra.mxu0 %v27813_v29  ;;  %22564 = vmatprep.mubr.msk.f32.mxu0 %vm454_vm4, %v27847_v15  ;;  %v24343_v29 = vpack.c.bf16 %v7663_v16, %v7662_v49  ;;  %v8094_v49 = vld [vmem:[#allocation12 + $0x1e0] sm:$0xff]  ;;  %v8095_v16 = vld [vmem:[#allocation12 + $0x1e8] sm:$0xff] }
 0x663   : > { %24336 = vmatprep.subr.bf16.mxu0 %v24335_v62 }
 0x665   : > { %22565 = vmatmul.mubr.msk.f32.gmra.mrb[20].mxu0 %vm454_vm4, %v27852_v7 }
 0x666   : > { %22567 = vmatprep.mubr.msk.f32.mxu0 %vm454_vm4, %v27856_v27  ;;  %24338 = vmatpush3.bf16.msra.mxu0 %v24335_v62  ;;  %v7219_v62 = vld [vmem:[#allocation2 + $0x124] sm:$0xff] }
 0x667   : > { %24340 = vmatprep.subr.bf16.mxu0 %v24339_v20 }
 0x669   : > { %22568 = vmatmul.mubr.msk.f32.gmra.mrb[22].mxu0 %vm454_vm4, %v27860_v30 }
 0x66a   : > { %22570 = vmatprep.mubr.msk.f32.mxu0 %vm454_vm4, %v27864_v42  ;;  %24342 = vmatpush3.bf16.msra.mxu0 %v24339_v20  ;;  %v24351_v20 = vpack.c.bf16 %v8093_v26, %v8092_v34  ;;  %v8524_v34 = vld [vmem:[#allocation12 + $0x200] sm:$0xff]  ;;  %v9371_v26 = vld [vmem:[#allocation13 + $0x78] sm:$0xff] }
 0x66b   : > { %24344 = vmatprep.subr.bf16.mxu0 %v24343_v29 }
 0x66d   : > { %22571 = vmatmul.mubr.msk.f32.gmra.mrb[24].mxu0 %vm454_vm4, %v27870_v6 }
 0x66e   : > { %22573 = vmatprep.mubr.msk.f32.mxu0 %vm454_vm4, %v27874_v11  ;;  %24346 = vmatpush3.bf16.msra.mxu0 %v24343_v29  ;;  %v24355_v29 = vpack.c.bf16 %v8095_v16, %v8094_v49  ;;  %v8065_v49 = vld [vmem:[#allocation2 + $0x85] sm:$0xff] }
 0x66f   : > { %24348 = vmatprep.subr.bf16.mxu0 %v27868_v50 }
 0x671   : > { %22574 = vmatmul.mubr.msk.f32.gmra.mrb[26].mxu0 %vm454_vm4, %v27879_v4 }
 0x672   : > { %22576 = vmatprep.mubr.msk.f32.mxu0 %vm454_vm4, %v27883_v23 }
 0x675   : > { %22577 = vmatmul.mubr.msk.f32.gmra.mrb[28].mxu0 %vm454_vm4, %v27887_v2 }
 0x676   : > { %22579 = vmatprep.mubr.msk.f32.mxu0 %vm454_vm4, %v27891_v0 }
 0x679   : > { %22580 = vmatmul.mubr.msk.f32.gmra.mrb[30].mxu0 %vm454_vm4, %v27895_v24 }
 0x67a   : > { %22582 = vmatprep.mubr.msk.f32.mxu0 %vm454_vm4, %v27899_v33 }
 0x67d   : > { %22583 = vmatmul.mubr.msk.f32.gmra.mrb[32].mxu0 %vm454_vm4, %v27903_v25 }
 0x67e   : > { %22585 = vmatprep.mubr.msk.f32.mxu0 %vm454_vm4, %v27907_v8 }
 0x681   : > { %22586 = vmatmul.mubr.msk.f32.gmra.mrb[34].mxu0 %vm454_vm4, %v27911_v32 }
 0x682   : > { %22588 = vmatprep.mubr.msk.f32.mxu0 %vm454_vm4, %v27915_v17 }
 0x685   : > { %22589 = vmatmul.mubr.msk.f32.gmra.mrb[36].mxu0 %vm454_vm4, %v27919_v53 }
 0x686   : > { %22591 = vmatprep.mubr.msk.f32.mxu0 %vm454_vm4, %v27923_v44 }
 0x689   : > { %22592 = vmatmul.mubr.msk.f32.gmra.mrb[38].mxu0 %vm454_vm4, %v27927_v43 }
 0x68a   : > { %22594 = vmatprep.mubr.msk.f32.mxu0 %vm454_vm4, %v27931_v3 }
 0x68d   : > { %22595 = vmatmul.mubr.msk.f32.gmra.mrb[40].mxu0 %vm454_vm4, %v27935_v13 }
 0x68e   : > { %22597 = vmatprep.mubr.msk.f32.mxu0 %vm454_vm4, %v27939_v1 }
 0x691   : > { %22598 = vmatmul.mubr.msk.f32.gmra.mrb[42].mxu0 %vm454_vm4, %v27943_v9 }
 0x692   : > { %22600 = vmatprep.mubr.msk.f32.mxu0 %vm454_vm4, %v27947_v10 }
 0x695   : > { %22601 = vmatmul.mubr.msk.f32.gmra.mrb[44].mxu0 %vm454_vm4, %v27951_v18 }
 0x696   : > { %22603 = vmatprep.mubr.msk.f32.mxu0 %vm454_vm4, %v7213_v35 }
 0x699   : > { %22604 = vmatmul.mubr.msk.f32.gmra.mrb[46].mxu0 %vm454_vm4, %v7214_v28 }
 0x69a   : > { %22606 = vmatprep.mubr.msk.f32.mxu0 %vm454_vm4, %v7215_v19 }
 0x69d   : > { %22607 = vmatmul.mubr.msk.f32.gmra.mrb[48].mxu0 %vm454_vm4, %v7216_v21 }
 0x69e   : > { %22609 = vmatprep.mubr.msk.f32.mxu0 %vm454_vm4, %v7217_v12 }
 0x6a1   : > { %22610 = vmatmul.mubr.msk.f32.gmra.mrb[50].mxu0 %vm454_vm4, %v7218_v22 }
 0x6a2   : > { %22612 = vmatprep.mubr.msk.f32.mxu0 %vm454_vm4, %v7219_v62 }
 0x6a5   : > { %22613 = vmatmul.mubr.msk.f32.gmra.mrb[52].mxu0 %vm454_vm4, %v7220_v14 }
 0x6a6   : > { %22631 = vmatprep.mubr.msk.f32.mxu0 %vm454_vm4, %v27847_v15  ;;  %v24359_v15 = vpack.c.bf16 %v8097_v5, %v8096_v31  ;;  %v8067_v31 = vld [vmem:[#allocation2 + $0x95] sm:$0xff]  ;;  %v8068_v5 = vld [vmem:[#allocation2 + $0x9d] sm:$0xff] }
 0x6a9   : > { %22632 = vmatmul.mubr.msk.f32.vlgmr.msra.gmra.mrb[18].mxu0 %vm454_vm4, %v27852_v7  ;;  %v8525_v7 = vld [vmem:[#allocation12 + $0x208] sm:$0xff] }
 0x6aa   : > { %24350 = vmatpush3.bf16.msra.mxu0 %v27868_v50  ;;  %22634 = vmatprep.mubr.msk.f32.mxu0 %vm454_vm4, %v27856_v27  ;;  %v24363_v27 = vpack.c.bf16 %v8525_v7, %v8524_v34  ;;  %v8526_v50 = vld [vmem:[#allocation12 + $0x210] sm:$0xff]  ;;  %v8071_v7 = vld [vmem:[#allocation2 + $0xb5] sm:$0xff] }
 0x6ab   : > { %24352 = vmatprep.subr.bf16.mxu0 %v24351_v20  ;;  %v8070_v34 = vld [vmem:[#allocation2 + $0xad] sm:$0xff] }
 0x6ad   : > { %22635 = vmatmul.mubr.msk.f32.gmra.mrb[20].mxu0 %vm454_vm4, %v27860_v30  ;;  %v7653_v30 = vld [vmem:[#allocation2 + $0x134] sm:$0xff] }
 0x6ae   : > { %22637 = vmatprep.mubr.msk.f32.mxu0 %vm454_vm4, %v27864_v42  ;;  %24354 = vmatpush3.bf16.msra.mxu0 %v24351_v20  ;;  %v7654_v42 = vld [vmem:[#allocation2 + $0x13c] sm:$0xff] }
 0x6af   : > { %24356 = vmatprep.subr.bf16.mxu0 %v24355_v29  ;;  %v8064_v20 = vld [vmem:[#allocation2 + $0x7d] sm:$0xff] }
 0x6b1   : > { %22638 = vmatmul.mubr.msk.f32.gmra.mrb[22].mxu0 %vm454_vm4, %v27870_v6  ;;  %v8527_v6 = vld [vmem:[#allocation12 + $0x218] sm:$0xff] }
 0x6b2   : > { %22640 = vmatprep.mubr.msk.f32.mxu0 %vm454_vm4, %v27874_v11  ;;  %24358 = vmatpush3.bf16.msra.mxu0 %v24355_v29  ;;  %v8053_v11 = vld [vmem:[#allocation2 + $0x25] sm:$0xff]  ;;  %v8066_v29 = vld [vmem:[#allocation2 + $0x8d] sm:$0xff] }
 0x6b3   : > { %24360 = vmatprep.subr.bf16.mxu0 %v24359_v15 }
 0x6b5   : > { %22641 = vmatmul.mubr.msk.f32.gmra.mrb[24].mxu0 %vm454_vm4, %v27879_v4  ;;  %v24367_v4 = vpack.c.bf16 %v8527_v6, %v8526_v50  ;;  %v8075_v50 = vld [vmem:[#allocation2 + $0xd5] sm:$0xff]  ;;  %v8076_v6 = vld [vmem:[#allocation2 + $0xdd] sm:$0xff] }
 0x6b6   : > { %22643 = vmatprep.mubr.msk.f32.mxu0 %vm454_vm4, %v27883_v23  ;;  %24362 = vmatpush3.bf16.msra.mxu0 %v24359_v15  ;;  %v8054_v23 = vld [vmem:[#allocation2 + $0x2d] sm:$0xff]  ;;  %v8069_v15 = vld [vmem:[#allocation2 + $0xa5] sm:$0xff] }
 0x6b7   : > { %24364 = vmatprep.subr.bf16.mxu0 %v24363_v27 }
 0x6b9   : > { %22644 = vmatmul.mubr.msk.f32.gmra.mrb[26].mxu0 %vm454_vm4, %v27887_v2  ;;  %v8528_v2 = vld [vmem:[#allocation12 + $0x220] sm:$0xff] }
 0x6ba   : > { %22646 = vmatprep.mubr.msk.f32.mxu0 %vm454_vm4, %v27891_v0  ;;  %v8529_v0 = vld [vmem:[#allocation12 + $0x228] sm:$0xff] }
 0x6bd   : > { %22647 = vmatmul.mubr.msk.f32.gmra.mrb[28].mxu0 %vm454_vm4, %v27895_v24  ;;  %v8055_v24 = vld [vmem:[#allocation2 + $0x35] sm:$0xff] }
 0x6be   : > { %22649 = vmatprep.mubr.msk.f32.mxu0 %vm454_vm4, %v27899_v33  ;;  %v24371_v33 = vpack.c.bf16 %v8529_v0, %v8528_v2  ;;  %v8080_v2 = vld [vmem:[#allocation2 + $0xfd] sm:$0xff]  ;;  %v8081_v0 = vld [vmem:[#allocation2 + $0x105] sm:$0xff] }
 0x6c1   : > { %22650 = vmatmul.mubr.msk.f32.gmra.mrb[30].mxu0 %vm454_vm4, %v27903_v25  ;;  %v8056_v25 = vld [vmem:[#allocation2 + $0x3d] sm:$0xff] }
 0x6c2   : > { %22652 = vmatprep.mubr.msk.f32.mxu0 %vm454_vm4, %v27907_v8  ;;  %v8530_v8 = vld [vmem:[#allocation12 + $0x230] sm:$0xff] }
 0x6c5   : > { %22653 = vmatmul.mubr.msk.f32.gmra.mrb[32].mxu0 %vm454_vm4, %v27911_v32  ;;  %v8531_v32 = vld [vmem:[#allocation12 + $0x238] sm:$0xff] }
 0x6c6   : > { %22655 = vmatprep.mubr.msk.f32.mxu0 %vm454_vm4, %v27915_v17  ;;  %v8057_v17 = vld [vmem:[#allocation2 + $0x45] sm:$0xff] }
 0x6c9   : > { %22656 = vmatmul.mubr.msk.f32.gmra.mrb[34].mxu0 %vm454_vm4, %v27919_v53  ;;  %v24375_v53 = vpack.c.bf16 %v8531_v32, %v8530_v8  ;;  %v8085_v8 = vld [vmem:[#allocation2 + $0x125] sm:$0xff]  ;;  %v8087_v32 = vld [vmem:[#allocation2 + $0x135] sm:$0xff] }
 0x6ca   : > { %22658 = vmatprep.mubr.msk.f32.mxu0 %vm454_vm4, %v27923_v44  ;;  %v8058_v44 = vld [vmem:[#allocation2 + $0x4d] sm:$0xff] }
 0x6cd   : > { %22659 = vmatmul.mubr.msk.f32.gmra.mrb[36].mxu0 %vm454_vm4, %v27927_v43  ;;  %v8059_v43 = vld [vmem:[#allocation2 + $0x55] sm:$0xff] }
 0x6ce   : > { %22661 = vmatprep.mubr.msk.f32.mxu0 %vm454_vm4, %v27931_v3  ;;  %v8060_v3 = vld [vmem:[#allocation2 + $0x5d] sm:$0xff] }
 0x6d1   : > { %22662 = vmatmul.mubr.msk.f32.gmra.mrb[38].mxu0 %vm454_vm4, %v27935_v13  ;;  %v8061_v13 = vld [vmem:[#allocation2 + $0x65] sm:$0xff] }
 0x6d2   : > { %22664 = vmatprep.mubr.msk.f32.mxu0 %vm454_vm4, %v27939_v1  ;;  %v9364_v1 = vld [vmem:[#allocation13 + $0x40] sm:$0xff] }
 0x6d5   : > { %22665 = vmatmul.mubr.msk.f32.gmra.mrb[40].mxu0 %vm454_vm4, %v27943_v9  ;;  %v9365_v9 = vld [vmem:[#allocation13 + $0x48] sm:$0xff] }
 0x6d6   : > { %22667 = vmatprep.mubr.msk.f32.mxu0 %vm454_vm4, %v27947_v10  ;;  %v9366_v10 = vld [vmem:[#allocation13 + $0x50] sm:$0xff] }
 0x6d9   : > { %22668 = vmatmul.mubr.msk.f32.gmra.mrb[42].mxu0 %vm454_vm4, %v27951_v18  ;;  %v24379_v18 = vpack.c.bf16 %v9365_v9, %v9364_v1  ;;  %v8491_v1 = vld [vmem:[#allocation2 + $0x46] sm:$0xff]  ;;  %v8492_v9 = vld [vmem:[#allocation2 + $0x4e] sm:$0xff] }
 0x6da   : > { %22670 = vmatprep.mubr.msk.f32.mxu0 %vm454_vm4, %v7213_v35  ;;  %v9367_v35 = vld [vmem:[#allocation13 + $0x58] sm:$0xff] }
 0x6db   : > { %24380 = vmatprep.subr.bf16.mxu1 %v24379_v18 }
 0x6dc   : > { %24382 = vmatpush3.bf16.msra.mxu1 %v24379_v18  ;;  %v8494_v18 = vld [vmem:[#allocation2 + $0x5e] sm:$0xff] }
 0x6dd   : > { %22671 = vmatmul.mubr.msk.f32.gmra.mrb[44].mxu0 %vm454_vm4, %v7214_v28  ;;  %v24383_v28 = vpack.c.bf16 %v9367_v35, %v9366_v10  ;;  %v8493_v10 = vld [vmem:[#allocation2 + $0x56] sm:$0xff]  ;;  %v8495_v35 = vld [vmem:[#allocation2 + $0x66] sm:$0xff] }
 0x6de   : > { %22673 = vmatprep.mubr.msk.f32.mxu0 %vm454_vm4, %v7215_v19  ;;  %v9368_v19 = vld [vmem:[#allocation13 + $0x60] sm:$0xff] }
 0x6df   : > { %24384 = vmatprep.subr.bf16.mxu1 %v24383_v28 }
 0x6e0   : > { %24386 = vmatpush3.bf16.msra.mxu1 %v24383_v28  ;;  %v8496_v28 = vld [vmem:[#allocation2 + $0x6e] sm:$0xff] }
 0x6e1   : > { %22674 = vmatmul.mubr.msk.f32.gmra.mrb[46].mxu0 %vm454_vm4, %v7216_v21  ;;  %v9369_v21 = vld [vmem:[#allocation13 + $0x68] sm:$0xff] }
 0x6e2   : > { %22676 = vmatprep.mubr.msk.f32.mxu0 %vm454_vm4, %v7217_v12  ;;  %v8062_v12 = vld [vmem:[#allocation2 + $0x6d] sm:$0xff] }
 0x6e5   : > { %22677 = vmatmul.mubr.msk.f32.gmra.mrb[48].mxu0 %vm454_vm4, %v7218_v22  ;;  %v8063_v22 = vld [vmem:[#allocation2 + $0x75] sm:$0xff] }
 0x6e6   : > { %22679 = vmatprep.mubr.msk.f32.mxu0 %vm454_vm4, %v7219_v62  ;;  %v24387_v62 = vpack.c.bf16 %v9369_v21, %v9368_v19  ;;  %v8497_v19 = vld [vmem:[#allocation2 + $0x76] sm:$0xff]  ;;  %v8498_v21 = vld [vmem:[#allocation2 + $0x7e] sm:$0xff] }
 0x6e8   : > { %24388 = vmatprep.subr.bf16.mxu1 %v24387_v62 }
 0x6e9   : > { %22680 = vmatmul.mubr.msk.f32.gmra.mrb[50].mxu0 %vm454_vm4, %v7220_v14  ;;  %v9370_v14 = vld [vmem:[#allocation13 + $0x70] sm:$0xff]  ;;  %24390 = vmatpush3.bf16.msra.mxu1 %v24387_v62  ;;  %v8501_v62 = vld [vmem:[#allocation2 + $0x96] sm:$0xff] }
 0x6ea   : > { %22682 = vmatprep.mubr.msk.f32.mxu0 %vm454_vm4, %v7653_v30  ;;  %v24391_v16 = vpack.c.bf16 %v9371_v26, %v9370_v14  ;;  %v8073_v30 = vld [vmem:[#allocation2 + $0xc5] sm:$0xff] }
 0x6eb   : > { %v8502_v14 = vld [vmem:[#allocation2 + $0x9e] sm:$0xff]  ;;  %v8503_v26 = vld [vmem:[#allocation2 + $0xa6] sm:$0xff] }
 0x6ec   : > { %24392 = vmatprep.subr.bf16.mxu1 %v24391_v16 }
 0x6ed   : > { %22683 = vmatmul.mubr.msk.f32.gmra.mrb[52].mxu0 %vm454_vm4, %v7654_v42  ;;  %24394 = vmatpush3.bf16.msra.mxu1 %v24391_v16  ;;  %v8074_v42 = vld [vmem:[#allocation2 + $0xcd] sm:$0xff]  ;;  %v8506_v16 = vld [vmem:[#allocation2 + $0xbe] sm:$0xff] }
 0x6ee   : > { %22701 = vmatprep.mubr.msk.f32.mxu0 %vm454_vm4, %v8053_v11  ;;  %v8077_v11 = vld [vmem:[#allocation2 + $0xe5] sm:$0xff] }
 0x6f1   : > { %22702 = vmatmul.mubr.msk.f32.vlgmr.msra.gmra.mrb[18].mxu0 %vm454_vm4, %v8054_v23  ;;  %v8079_v23 = vld [vmem:[#allocation2 + $0xf5] sm:$0xff] }
 0x6f2   : > { %24366 = vmatpush3.bf16.msra.mxu0 %v24363_v27  ;;  %22704 = vmatprep.mubr.msk.f32.mxu0 %vm454_vm4, %v8055_v24  ;;  %v8072_v27 = vld [vmem:[#allocation2 + $0xbd] sm:$0xff]  ;;  %v8082_v24 = vld [vmem:[#allocation2 + $0x10d] sm:$0xff] }
 0x6f3   : > { %24368 = vmatprep.subr.bf16.mxu0 %v24367_v4 }
 0x6f5   : > { %22705 = vmatmul.mubr.msk.f32.gmra.mrb[20].mxu0 %vm454_vm4, %v8056_v25  ;;  %v8084_v25 = vld [vmem:[#allocation2 + $0x11d] sm:$0xff] }
 0x6f6   : > { %22707 = vmatprep.mubr.msk.f32.mxu0 %vm454_vm4, %v8057_v17  ;;  %24370 = vmatpush3.bf16.msra.mxu0 %v24367_v4  ;;  %v8078_v4 = vld [vmem:[#allocation2 + $0xed] sm:$0xff] }
 0x6f7   : > { %24372 = vmatprep.subr.bf16.mxu0 %v24371_v33  ;;  %v8086_v17 = vld [vmem:[#allocation2 + $0x12d] sm:$0xff] }
 0x6f9   : > { %22708 = vmatmul.mubr.msk.f32.gmra.mrb[22].mxu0 %vm454_vm4, %v8058_v44  ;;  %v8487_v44 = vld [vmem:[#allocation2 + $0x26] sm:$0xff] }
 0x6fa   : > { %22710 = vmatprep.mubr.msk.f32.mxu0 %vm454_vm4, %v8059_v43  ;;  %24374 = vmatpush3.bf16.msra.mxu0 %v24371_v33  ;;  %v8083_v33 = vld [vmem:[#allocation2 + $0x115] sm:$0xff] }
 0x6fb   : > { %24376 = vmatprep.subr.bf16.mxu0 %v24375_v53  ;;  %v8488_v43 = vld [vmem:[#allocation2 + $0x2e] sm:$0xff] }
 0x6fd   : > { %22711 = vmatmul.mubr.msk.f32.gmra.mrb[24].mxu0 %vm454_vm4, %v8060_v3  ;;  %v8489_v3 = vld [vmem:[#allocation2 + $0x36] sm:$0xff] }
 0x6fe   : > { %22713 = vmatprep.mubr.msk.f32.mxu0 %vm454_vm4, %v8061_v13  ;;  %24378 = vmatpush3.bf16.msra.mxu0 %v24375_v53  ;;  %v8088_v53 = vld [vmem:[#allocation2 + $0x13d] sm:$0xff] }
 0x6ff   : > { %v8490_v13 = vld [vmem:[#allocation2 + $0x3e] sm:$0xff] }
 0x701   : > { %22714 = vmatmul.mubr.msk.f32.gmra.mrb[26].mxu0 %vm454_vm4, %v8062_v12  ;;  %v8499_v12 = vld [vmem:[#allocation2 + $0x86] sm:$0xff] }
 0x702   : > { %22716 = vmatprep.mubr.msk.f32.mxu0 %vm454_vm4, %v8063_v22  ;;  %v8500_v22 = vld [vmem:[#allocation2 + $0x8e] sm:$0xff] }
 0x705   : > { %22717 = vmatmul.mubr.msk.f32.gmra.mrb[28].mxu0 %vm454_vm4, %v8064_v20  ;;  %v8504_v20 = vld [vmem:[#allocation2 + $0xae] sm:$0xff] }
 0x706   : > { %22719 = vmatprep.mubr.msk.f32.mxu0 %vm454_vm4, %v8065_v49  ;;  %v8505_v49 = vld [vmem:[#allocation2 + $0xb6] sm:$0xff] }
 0x709   : > { %22720 = vmatmul.mubr.msk.f32.gmra.mrb[30].mxu0 %vm454_vm4, %v8066_v29  ;;  %v8507_v29 = vld [vmem:[#allocation2 + $0xc6] sm:$0xff] }
 0x70a   : > { %22722 = vmatprep.mubr.msk.f32.mxu0 %vm454_vm4, %v8067_v31  ;;  %v8508_v31 = vld [vmem:[#allocation2 + $0xce] sm:$0xff] }
 0x70d   : > { %22723 = vmatmul.mubr.msk.f32.gmra.mrb[32].mxu0 %vm454_vm4, %v8068_v5  ;;  %v8509_v5 = vld [vmem:[#allocation2 + $0xd6] sm:$0xff] }
 0x70e   : > { %22725 = vmatprep.mubr.msk.f32.mxu0 %vm454_vm4, %v8069_v15  ;;  %v8510_v15 = vld [vmem:[#allocation2 + $0xde] sm:$0xff] }
 0x711   : > { %22726 = vmatmul.mubr.msk.f32.gmra.mrb[34].mxu0 %vm454_vm4, %v8070_v34  ;;  %v8511_v34 = vld [vmem:[#allocation2 + $0xe6] sm:$0xff] }
 0x712   : > { %22728 = vmatprep.mubr.msk.f32.mxu0 %vm454_vm4, %v8071_v7  ;;  %v8512_v7 = vld [vmem:[#allocation2 + $0xee] sm:$0xff] }
 0x715   : > { %22729 = vmatmul.mubr.msk.f32.gmra.mrb[36].mxu0 %vm454_vm4, %v8072_v27  ;;  %v8513_v27 = vld [vmem:[#allocation2 + $0xf6] sm:$0xff] }
 0x716   : > { %22731 = vmatprep.mubr.msk.f32.mxu0 %vm454_vm4, %v8073_v30  ;;  %v8514_v30 = vld [vmem:[#allocation2 + $0xfe] sm:$0xff] }
 0x719   : > { %22732 = vmatmul.mubr.msk.f32.gmra.mrb[38].mxu0 %vm454_vm4, %v8074_v42  ;;  %v8515_v42 = vld [vmem:[#allocation2 + $0x106] sm:$0xff] }
 0x71a   : > { %22734 = vmatprep.mubr.msk.f32.mxu0 %vm454_vm4, %v8075_v50  ;;  %v8516_v50 = vld [vmem:[#allocation2 + $0x10e] sm:$0xff] }
 0x71d   : > { %22735 = vmatmul.mubr.msk.f32.gmra.mrb[40].mxu0 %vm454_vm4, %v8076_v6  ;;  %v8517_v6 = vld [vmem:[#allocation2 + $0x116] sm:$0xff] }
 0x71e   : > { %22737 = vmatprep.mubr.msk.f32.mxu0 %vm454_vm4, %v8077_v11  ;;  %v8518_v11 = vld [vmem:[#allocation2 + $0x11e] sm:$0xff] }
 0x721   : > { %22738 = vmatmul.mubr.msk.f32.gmra.mrb[42].mxu0 %vm454_vm4, %v8078_v4  ;;  %v8519_v4 = vld [vmem:[#allocation2 + $0x126] sm:$0xff] }
 0x722   : > { %22740 = vmatprep.mubr.msk.f32.mxu0 %vm454_vm4, %v8079_v23  ;;  %v8521_v23 = vld [vmem:[#allocation2 + $0x136] sm:$0xff] }
 0x725   : > { %22741 = vmatmul.mubr.msk.f32.gmra.mrb[44].mxu0 %vm454_vm4, %v8080_v2  ;;  %v8520_v2 = vld [vmem:[#allocation2 + $0x12e] sm:$0xff] }
 0x726   : > { %22743 = vmatprep.mubr.msk.f32.mxu0 %vm454_vm4, %v8081_v0  ;;  %v8522_v0 = vld [vmem:[#allocation2 + $0x13e] sm:$0xff] }
 0x729   : > { %22744 = vmatmul.mubr.msk.f32.gmra.mrb[46].mxu0 %vm454_vm4, %v8082_v24  ;;  %v9327_v24 = vld [vmem:[#allocation2 + $0x1] sm:$0xff] }
 0x72a   : > { %22746 = vmatprep.mubr.msk.f32.mxu0 %vm454_vm4, %v8083_v33  ;;  %v9319_v33 = vld [vmem:[#allocation13] sm:$0xff]  ;;  %22841 = vmatprep.mubr.msk.f32.mxu1 %vm454_vm4, %v9327_v24 }
 0x72d   : > { %22747 = vmatmul.mubr.msk.f32.gmra.mrb[48].mxu0 %vm454_vm4, %v8084_v25  ;;  %v9320_v25 = vld [vmem:[#allocation13 + $0x8] sm:$0xff] }
 0x72e   : > { %22749 = vmatprep.mubr.msk.f32.mxu0 %vm454_vm4, %v8085_v8  ;;  %v24395_v8 = vpack.c.bf16 %v9320_v25, %v9319_v33 }
 0x730   : > { %24396 = vmatprep.subr.bf16.mxu1 %v24395_v8 }
 0x731   : > { %22750 = vmatmul.mubr.msk.f32.gmra.mrb[50].mxu0 %vm454_vm4, %v8086_v17  ;;  %v9321_v17 = vld [vmem:[#allocation13 + $0x10] sm:$0xff] }
 0x732   : > { %22752 = vmatprep.mubr.msk.f32.mxu0 %vm454_vm4, %v8087_v32  ;;  %v9328_v32 = vld [vmem:[#allocation2 + $0x9] sm:$0xff] }
 0x733   : > { %22842 = vmatmul.mubr.msk.f32.vlgmr.msra.gmra.mrb[54].mxu1 %vm454_vm4, %v9328_v32 }
 0x734   : > { %24398 = vmatpush3.bf16.msra.mxu1 %v24395_v8 }
 0x735   : > { %22753 = vmatmul.mubr.msk.f32.gmra.mrb[52].mxu0 %vm454_vm4, %v8088_v53  ;;  %v9322_v53 = vld [vmem:[#allocation13 + $0x18] sm:$0xff] }
 0x736   : > { %22771 = vmatprep.mubr.msk.f32.mxu0 %vm454_vm4, %v8487_v44  ;;  %v24399_v44 = vpack.c.bf16 %v9322_v53, %v9321_v17 }
 0x738   : > { %24400 = vmatprep.subr.bf16.mxu1 %v24399_v44 }
 0x739   : > { %22772 = vmatmul.mubr.msk.f32.vlgmr.msra.gmra.mrb[18].mxu0 %vm454_vm4, %v8488_v43  ;;  %24402 = vmatpush3.bf16.msra.mxu1 %v24399_v44  ;;  %v9323_v43 = vld [vmem:[#allocation13 + $0x20] sm:$0xff] }
 0x73a   : > { %22774 = vmatprep.mubr.msk.f32.mxu0 %vm454_vm4, %v8489_v3  ;;  %v9324_v3 = vld [vmem:[#allocation13 + $0x28] sm:$0xff] }
 0x73d   : > { %22775 = vmatmul.mubr.msk.f32.gmra.mrb[20].mxu0 %vm454_vm4, %v8490_v13  ;;  %v24403_v13 = vpack.c.bf16 %v9324_v3, %v9323_v43 }
 0x73e   : > { %22777 = vmatprep.mubr.msk.f32.mxu0 %vm454_vm4, %v8491_v1  ;;  %v9325_v1 = vld [vmem:[#allocation13 + $0x30] sm:$0xff] }
 0x73f   : > { %24404 = vmatprep.subr.bf16.mxu1 %v24403_v13 }
 0x740   : > { %24406 = vmatpush3.bf16.msra.mxu1 %v24403_v13 }
 0x741   : > { %22778 = vmatmul.mubr.msk.f32.gmra.mrb[22].mxu0 %vm454_vm4, %v8492_v9  ;;  %v9326_v9 = vld [vmem:[#allocation13 + $0x38] sm:$0xff] }
 0x742   : > { %22780 = vmatprep.mubr.msk.f32.mxu0 %vm454_vm4, %v8493_v10  ;;  %v24407_v10 = vpack.c.bf16 %v9326_v9, %v9325_v1 }
 0x744   : > { %24408 = vmatprep.subr.bf16.mxu1 %v24407_v10 }
 0x745   : > { %22781 = vmatmul.mubr.msk.f32.gmra.mrb[24].mxu0 %vm454_vm4, %v8494_v18  ;;  %24410 = vmatpush3.bf16.msra.mxu1 %v24407_v10  ;;  %v10115_v18 = vld [vmem:[#allocation13 + $0x80] sm:$0xff] }
 0x746   : > { %22783 = vmatprep.mubr.msk.f32.mxu0 %vm454_vm4, %v8495_v35  ;;  %v10116_v35 = vld [vmem:[#allocation13 + $0x88] sm:$0xff] }
 0x749   : > { %22784 = vmatmul.mubr.msk.f32.gmra.mrb[26].mxu0 %vm454_vm4, %v8496_v28  ;;  %v28100_v28 = vpack.c.bf16 %v10116_v35, %v10115_v18 }
 0x74a   : > { %22786 = vmatprep.mubr.msk.f32.mxu0 %vm454_vm4, %v8497_v19 }
 0x74b   : > { %24412 = vmatprep.subr.bf16.mxu1 %v28100_v28 }
 0x74d   : > { %22787 = vmatmul.mubr.msk.f32.gmra.mrb[28].mxu0 %vm454_vm4, %v8498_v21  ;;  %v28103_v21 = vstv %s8921_s17 }
 0x74e   : > { %22789 = vmatprep.mubr.msk.f32.mxu0 %vm454_vm4, %v8499_v12 }
 0x751   : > { %22790 = vmatmul.mubr.msk.f32.gmra.mrb[30].mxu0 %vm454_vm4, %v8500_v22 }
 0x752   : > { %22792 = vmatprep.mubr.msk.f32.mxu0 %vm454_vm4, %v8501_v62 }
 0x755   : > { %22793 = vmatmul.mubr.msk.f32.gmra.mrb[32].mxu0 %vm454_vm4, %v8502_v14  ;;  %v30491_v14 = vmov 0.0  }
 0x756   : > { %22795 = vmatprep.mubr.msk.f32.mxu0 %vm454_vm4, %v8503_v26 }
 0x759   : > { %22796 = vmatmul.mubr.msk.f32.gmra.mrb[34].mxu0 %vm454_vm4, %v8504_v20 }
 0x75a   : > { %22798 = vmatprep.mubr.msk.f32.mxu0 %vm454_vm4, %v8505_v49 }
 0x75d   : > { %22799 = vmatmul.mubr.msk.f32.gmra.mrb[36].mxu0 %vm454_vm4, %v8506_v16 }
 0x75e   : > { %22801 = vmatprep.mubr.msk.f32.mxu0 %vm454_vm4, %v8507_v29 }
 0x761   : > { %22802 = vmatmul.mubr.msk.f32.gmra.mrb[38].mxu0 %vm454_vm4, %v8508_v31 }
 0x762   : > { %22804 = vmatprep.mubr.msk.f32.mxu0 %vm454_vm4, %v8509_v5 }
 0x765   : > { %22805 = vmatmul.mubr.msk.f32.gmra.mrb[40].mxu0 %vm454_vm4, %v8510_v15 }
 0x766   : > { %22807 = vmatprep.mubr.msk.f32.mxu0 %vm454_vm4, %v8511_v34 }
 0x769   : > { %22808 = vmatmul.mubr.msk.f32.gmra.mrb[42].mxu0 %vm454_vm4, %v8512_v7 }
 0x76a   : > { %22810 = vmatprep.mubr.msk.f32.mxu0 %vm454_vm4, %v8513_v27 }
 0x76d   : > { %22811 = vmatmul.mubr.msk.f32.gmra.mrb[44].mxu0 %vm454_vm4, %v8514_v30 }
 0x76e   : > { %22813 = vmatprep.mubr.msk.f32.mxu0 %vm454_vm4, %v8515_v42 }
 0x771   : > { %22814 = vmatmul.mubr.msk.f32.gmra.mrb[46].mxu0 %vm454_vm4, %v8516_v50 }
 0x772   : > { %22816 = vmatprep.mubr.msk.f32.mxu0 %vm454_vm4, %v8517_v6 }
 0x775   : > { %22817 = vmatmul.mubr.msk.f32.gmra.mrb[48].mxu0 %vm454_vm4, %v8518_v11 }
 0x776   : > { %22819 = vmatprep.mubr.msk.f32.mxu0 %vm454_vm4, %v8519_v4 }
 0x779   : > { %22820 = vmatmul.mubr.msk.f32.gmra.mrb[50].mxu0 %vm454_vm4, %v8520_v2 }
 0x77a   : > { %22822 = vmatprep.mubr.msk.f32.mxu0 %vm454_vm4, %v8521_v23 }
 0x77d   : > { %22823 = vmatmul.mubr.msk.f32.gmra.mrb[52].mxu0 %vm454_vm4, %v8522_v0 }
 0x80c   : > { %v22773_v19 = vpop.f32.mrb[18].mxu0 }
 0x80d   : > { %vm8959_vm7 = vcmp.lt.f32.partialorder %v22773_v19, 0.0  ;;  %v9067_v12 = vand.u32 2147483647, %v22773_v19  ;;  %v8706_v22 = vpop.f32.mrb[19].mxu0  ;;  %vm8923_vm9 = vcmp.gt.f32.partialorder %v22773_v19, 0.0 }
 0x80e   : > { %vm8958_vm8 = vcmp.lt.f32.partialorder %v8706_v22, 0.0  ;;  %v9066_v62 = vand.u32 2147483647, %v8706_v22  ;;  %v8995_v26 = vsel %vm8959_vm7, -1.0, %v30491_v14  ;;  %vm8922_vm10 = vcmp.gt.f32.partialorder %v8706_v22, 0.0 }
 0x80f   : > { %v9104_v20 = vsub.f32 %v9067_v12, %v28103_v21  ;;  %v8994_v49 = vsel %vm8958_vm8, -1.0, %v30491_v14  ;;  %v9031_v34 = vsel %vm8923_vm9, 1.0, %v8995_v26 }
 0x810   : > { %v9103_v16 = vsub.f32 %v9066_v62, %v28103_v21  ;;  %v22776_v29 = vpop.f32.mrb[20].mxu0  ;;  %v9030_v42 = vsel %vm8922_vm10, 1.0, %v8994_v49 }
 0x811   : > { %v9140_v31 = vmax.f32 %v9104_v20, 0.0  ;;  %vm8925_vm11 = vcmp.gt.f32.partialorder %v22776_v29, 0.0  ;;  %vm8961_vm12 = vcmp.lt.f32.partialorder %v22776_v29, 0.0  ;;  %v9069_v5 = vand.u32 2147483647, %v22776_v29  ;;  %v8716_v15 = vpop.f32.mrb[21].mxu0 }
 0x812   : > { %v9139_v7 = vmax.f32 %v9103_v16, 0.0  ;;  %v8997_v27 = vsel %vm8961_vm12, -1.0, %v30491_v14  ;;  %vm8960_vm13 = vcmp.lt.f32.partialorder %v8716_v15, 0.0  ;;  %vm8924_vm14 = vcmp.gt.f32.partialorder %v8716_v15, 0.0 }
 0x813   : > { %v9176_v30 = vmul.f32 %v9140_v31, %v9031_v34  ;;  %v9106_v50 = vsub.f32 %v9069_v5, %v28103_v21  ;;  %v9033_v11 = vsel %vm8925_vm11, 1.0, %v8997_v27  ;;  %v8996_v4 = vsel %vm8960_vm13, -1.0, %v30491_v14 }
 0x814   : > { %v9175_v6 = vmul.f32 %v9139_v7, %v9030_v42  ;;  %v9068_v23 = vand.u32 2147483647, %v8716_v15  ;;  %v22779_v2 = vpop.f32.mrb[22].mxu0  ;;  %v9032_v44 = vsel %vm8924_vm14, 1.0, %v8996_v4 }
 0x815   : > { %v9212_v0 = vmul.f32 %v9176_v30, %v26783_v38  ;;  %v9142_v24 = vmax.f32 %v9106_v50, 0.0  ;;  %vm8927_vm15 = vcmp.gt.f32.partialorder %v22779_v2, 0.0  ;;  %vm8963_vm0 = vcmp.lt.f32.partialorder %v22779_v2, 0.0  ;;  %v8726_v33 = vpop.f32.mrb[23].mxu0 }
 0x816   : > { %v9211_v25 = vmul.f32 %v9175_v6, %v26779_v36  ;;  %v9105_v8 = vsub.f32 %v9068_v23, %v28103_v21  ;;  %v8999_v32 = vsel %vm8963_vm0, -1.0, %v30491_v14  ;;  %v9071_v17 = vand.u32 2147483647, %v22779_v2 }
 0x817   : > { %9248 = vst.msk [vmem:[#allocation2 + $0x1b] sm:$0xff] %vm454_vm4, %v9212_v0  ;;  %v9178_v53 = vmul.f32 %v9142_v24, %v9033_v11  ;;  %vm8926_vm1 = vcmp.gt.f32.partialorder %v8726_v33, 0.0  ;;  %vm8962_vm2 = vcmp.lt.f32.partialorder %v8726_v33, 0.0  ;;  %v9070_v1 = vand.u32 2147483647, %v8726_v33 }
 0x818   : > { %9247 = vst.msk [vmem:[#allocation2 + $0x13] sm:$0xff] %vm454_vm4, %v9211_v25  ;;  %v9141_v43 = vmax.f32 %v9105_v8, 0.0  ;;  %v9108_v3 = vsub.f32 %v9071_v17, %v28103_v21  ;;  %v8998_v13 = vsel %vm8962_vm2, -1.0, %v30491_v14  ;;  %v22782_v9 = vpop.f32.mrb[24].mxu0  ;;  %v9035_v18 = vsel %vm8927_vm15, 1.0, %v8999_v32 }
 0x819   : > { %v9214_v10 = vmul.f32 %v9178_v53, %v26785_v39  ;;  %vm8929_vm3 = vcmp.gt.f32.partialorder %v22782_v9, 0.0  ;;  %vm8965_vm5 = vcmp.lt.f32.partialorder %v22782_v9, 0.0  ;;  %v8736_v35 = vpop.f32.mrb[25].mxu0  ;;  %v9107_v22 = vsub.f32 %v9070_v1, %v28103_v21 }
 0x81a   : > { %v9177_v19 = vmul.f32 %v9141_v43, %v9032_v44  ;;  %v9144_v12 = vmax.f32 %v9108_v3, 0.0  ;;  %v9001_v62 = vsel %vm8965_vm5, -1.0, %v30491_v14  ;;  %v9034_v26 = vsel %vm8926_vm1, 1.0, %v8998_v13 }
 0x81b   : > { %9250 = vst.msk [vmem:[#allocation2 + $0x2b] sm:$0xff] %vm454_vm4, %v9214_v10  ;;  %v9073_v20 = vand.u32 2147483647, %v22782_v9  ;;  %vm8928_vm6 = vcmp.gt.f32.partialorder %v8736_v35, 0.0  ;;  %vm8964_vm7 = vcmp.lt.f32.partialorder %v8736_v35, 0.0  ;;  %v9143_v29 = vmax.f32 %v9107_v22, 0.0 }
 0x81c   : > { %v9213_v49 = vmul.f32 %v9177_v19, %v26781_v37  ;;  %v9180_v16 = vmul.f32 %v9144_v12, %v9035_v18  ;;  %v9000_v31 = vsel %vm8964_vm7, -1.0, %v30491_v14  ;;  %v22785_v5 = vpop.f32.mrb[26].mxu0  ;;  %v9037_v15 = vsel %vm8929_vm3, 1.0, %v9001_v62 }
 0x81d   : > { %v9110_v34 = vsub.f32 %v9073_v20, %v28103_v21  ;;  %v9036_v7 = vsel %vm8928_vm6, 1.0, %v9000_v31  ;;  %v9072_v27 = vand.u32 2147483647, %v8736_v35  ;;  %v8746_v30 = vpop.f32.mrb[27].mxu0  ;;  %v9179_v50 = vmul.f32 %v9143_v29, %v9034_v26 }
 0x81e   : > { %9249 = vst.msk [vmem:[#allocation2 + $0x23] sm:$0xff] %vm454_vm4, %v9213_v49  ;;  %v9216_v42 = vmul.f32 %v9180_v16, %v26789_v41  ;;  %vm8967_vm8 = vcmp.lt.f32.partialorder %v22785_v5, 0.0  ;;  %v9075_v6 = vand.u32 2147483647, %v22785_v5  ;;  %vm8931_vm9 = vcmp.gt.f32.partialorder %v22785_v5, 0.0 }
 0x81f   : > { %v9146_v11 = vmax.f32 %v9110_v34, 0.0  ;;  %v9109_v4 = vsub.f32 %v9072_v27, %v28103_v21  ;;  %v9003_v23 = vsel %vm8967_vm8, -1.0, %v30491_v14  ;;  %v9329_v2 = vld [vmem:[#allocation2 + $0x11] sm:$0xff]  ;;  %v9330_v0 = vld [vmem:[#allocation2 + $0x19] sm:$0xff]  ;;  %v9215_v24 = vmul.f32 %v9179_v50, %v26787_v40 }
 0x820   : > { %9252 = vst.msk [vmem:[#allocation2 + $0x3b] sm:$0xff] %vm454_vm4, %v9216_v42  ;;  %v9112_v33 = vsub.f32 %v9075_v6, %v28103_v21  ;;  %vm8930_vm10 = vcmp.gt.f32.partialorder %v8746_v30, 0.0  ;;  %vm8966_vm11 = vcmp.lt.f32.partialorder %v8746_v30, 0.0  ;;  %v22788_v25 = vpop.f32.mrb[28].mxu0  ;;  %22844 = vmatprep.mubr.msk.f32.mxu1 %vm454_vm4, %v9329_v2  ;;  %v9074_v53 = vand.u32 2147483647, %v8746_v30 }
 0x821   : > { %v9182_v8 = vmul.f32 %v9146_v11, %v9037_v15  ;;  %v9145_v32 = vmax.f32 %v9109_v4, 0.0  ;;  %v9002_v17 = vsel %vm8966_vm11, -1.0, %v30491_v14  ;;  %v8756_v44 = vpop.f32.mrb[29].mxu0  ;;  %22845 = vmatmul.mubr.msk.f32.gmra.mrb[56].mxu1 %vm454_vm4, %v9330_v0  ;;  %9251 = vst.msk [vmem:[#allocation2 + $0x33] sm:$0xff] %vm454_vm4, %v9215_v24  ;;  %v9039_v43 = vsel %vm8931_vm9, 1.0, %v9003_v23 }
 0x822   : > { %v9148_v3 = vmax.f32 %v9112_v33, 0.0  ;;  %vm8933_vm12 = vcmp.gt.f32.partialorder %v22788_v25, 0.0  ;;  %vm8969_vm13 = vcmp.lt.f32.partialorder %v22788_v25, 0.0  ;;  %v9111_v9 = vsub.f32 %v9074_v53, %v28103_v21 }
 0x823   : > { %v9218_v13 = vmul.f32 %v9182_v8, %v26793_v46  ;;  %v9181_v1 = vmul.f32 %v9145_v32, %v9036_v7  ;;  %v9005_v10 = vsel %vm8969_vm13, -1.0, %v30491_v14  ;;  %v9038_v35 = vsel %vm8930_vm10, 1.0, %v9002_v17 }
 0x824   : > { %v9184_v18 = vmul.f32 %v9148_v3, %v9039_v43  ;;  %v9077_v19 = vand.u32 2147483647, %v22788_v25  ;;  %vm8932_vm14 = vcmp.gt.f32.partialorder %v8756_v44, 0.0  ;;  %v22791_v12 = vpop.f32.mrb[30].mxu0  ;;  %v9147_v62 = vmax.f32 %v9111_v9, 0.0 }
 0x825   : > { %9254 = vst.msk [vmem:[#allocation2 + $0x4b] sm:$0xff] %vm454_vm4, %v9218_v13  ;;  %v9217_v22 = vmul.f32 %v9181_v1, %v26791_v45  ;;  %vm8968_vm15 = vcmp.lt.f32.partialorder %v8756_v44, 0.0  ;;  %v9076_v26 = vand.u32 2147483647, %v8756_v44  ;;  %v9331_v20 = vld [vmem:[#allocation2 + $0x21] sm:$0xff]  ;;  %v8766_v49 = vpop.f32.mrb[31].mxu0 }
 0x826   : > { %v9220_v16 = vmul.f32 %v9184_v18, %v26797_v48  ;;  %v9041_v29 = vsel %vm8933_vm12, 1.0, %v9005_v10  ;;  %v9114_v31 = vsub.f32 %v9077_v19, %v28103_v21  ;;  %v9004_v5 = vsel %vm8968_vm15, -1.0, %v30491_v14  ;;  %22847 = vmatprep.mubr.msk.f32.mxu1 %vm454_vm4, %v9331_v20  ;;  %v9332_v15 = vld [vmem:[#allocation2 + $0x29] sm:$0xff] }
 0x827   : > { %9253 = vst.msk [vmem:[#allocation2 + $0x43] sm:$0xff] %vm454_vm4, %v9217_v22  ;;  %v9183_v34 = vmul.f32 %v9147_v62, %v9038_v35  ;;  %v9113_v7 = vsub.f32 %v9076_v26, %v28103_v21  ;;  %vm8935_vm0 = vcmp.gt.f32.partialorder %v22791_v12, 0.0  ;;  %vm8971_vm1 = vcmp.lt.f32.partialorder %v22791_v12, 0.0  ;;  %22848 = vmatmul.mubr.msk.f32.gmra.mrb[58].mxu1 %vm454_vm4, %v9332_v15 }
 0x828   : > { %9256 = vst.msk [vmem:[#allocation2 + $0x5b] sm:$0xff] %vm454_vm4, %v9220_v16  ;;  %v9150_v27 = vmax.f32 %v9114_v31, 0.0  ;;  %v9040_v30 = vsel %vm8932_vm14, 1.0, %v9004_v5  ;;  %v9007_v42 = vsel %vm8971_vm1, -1.0, %v30491_v14  ;;  %v9079_v50 = vand.u32 2147483647, %v22791_v12 }
 0x829   : > { %v22794_v6 = vpop.f32.mrb[32].mxu0  ;;  %v9219_v11 = vmul.f32 %v9183_v34, %v26795_v47  ;;  %v9149_v4 = vmax.f32 %v9113_v7, 0.0  ;;  %vm8934_vm2 = vcmp.gt.f32.partialorder %v8766_v49, 0.0  ;;  %vm8970_vm3 = vcmp.lt.f32.partialorder %v8766_v49, 0.0  ;;  %v9333_v23 = vld [vmem:[#allocation2 + $0x31] sm:$0xff]  ;;  %v9334_v0 = vld [vmem:[#allocation2 + $0x39] sm:$0xff] }
 0x82a   : > { %v8776_v2 = vpop.f32.mrb[33].mxu0  ;;  %v9186_v24 = vmul.f32 %v9150_v27, %v9041_v29  ;;  %v9116_v33 = vsub.f32 %v9079_v50, %v28103_v21  ;;  %v9006_v25 = vsel %vm8970_vm3, -1.0, %v30491_v14  ;;  %v9078_v8 = vand.u32 2147483647, %v8766_v49  ;;  %22850 = vmatprep.mubr.msk.f32.mxu1 %vm454_vm4, %v9333_v23 }
 0x82b   : > { %9255 = vst.msk [vmem:[#allocation2 + $0x53] sm:$0xff] %vm454_vm4, %v9219_v11  ;;  %v9185_v32 = vmul.f32 %v9149_v4, %v9040_v30  ;;  %v9043_v17 = vsel %vm8935_vm0, 1.0, %v9007_v42  ;;  %vm8937_vm5 = vcmp.gt.f32.partialorder %v22794_v6, 0.0  ;;  %vm8973_vm6 = vcmp.lt.f32.partialorder %v22794_v6, 0.0  ;;  %22851 = vmatmul.mubr.msk.f32.gmra.mrb[60].mxu1 %vm454_vm4, %v9334_v0 }
 0x82c   : > { %v9222_v53 = vmul.f32 %v9186_v24, %v26801_v52  ;;  %v9152_v44 = vmax.f32 %v9116_v33, 0.0  ;;  %v9115_v43 = vsub.f32 %v9078_v8, %v28103_v21  ;;  %v9009_v3 = vsel %vm8973_vm6, -1.0, %v30491_v14  ;;  %v22797_v13 = vpop.f32.mrb[34].mxu0 }
 0x82d   : > { %v9221_v1 = vmul.f32 %v9185_v32, %v26799_v51  ;;  %v9042_v9 = vsel %vm8934_vm2, 1.0, %v9006_v25  ;;  %v9081_v10 = vand.u32 2147483647, %v22794_v6  ;;  %vm8936_vm7 = vcmp.gt.f32.partialorder %v8776_v2, 0.0  ;;  %v8786_v18 = vpop.f32.mrb[35].mxu0 }
 0x82e   : > { %9258 = vst.msk [vmem:[#allocation2 + $0x6b] sm:$0xff] %vm454_vm4, %v9222_v53  ;;  %v9188_v35 = vmul.f32 %v9152_v44, %v9043_v17  ;;  %v9151_v19 = vmax.f32 %v9115_v43, 0.0  ;;  %vm8972_vm8 = vcmp.lt.f32.partialorder %v8776_v2, 0.0  ;;  %v9080_v12 = vand.u32 2147483647, %v8776_v2  ;;  %v9335_v22 = vld [vmem:[#allocation2 + $0x41] sm:$0xff] }
 0x82f   : > { %v9336_v62 = vld [vmem:[#allocation2 + $0x49] sm:$0xff]  ;;  %9257 = vst.msk [vmem:[#allocation2 + $0x63] sm:$0xff] %vm454_vm4, %v9221_v1  ;;  %v9045_v26 = vsel %vm8937_vm5, 1.0, %v9009_v3  ;;  %v9118_v20 = vsub.f32 %v9081_v10, %v28103_v21  ;;  %v9008_v49 = vsel %vm8972_vm8, -1.0, %v30491_v14  ;;  %vm8975_vm9 = vcmp.lt.f32.partialorder %v22797_v13, 0.0  ;;  %22853 = vmatprep.mubr.msk.f32.mxu1 %vm454_vm4, %v9335_v22 }
 0x830   : > { %v9224_v16 = vmul.f32 %v9188_v35, %v26808_v55  ;;  %v9187_v29 = vmul.f32 %v9151_v19, %v9042_v9  ;;  %v9117_v31 = vsub.f32 %v9080_v12, %v28103_v21  ;;  %vm8939_vm10 = vcmp.gt.f32.partialorder %v22797_v13, 0.0  ;;  %22854 = vmatmul.mubr.msk.f32.gmra.mrb[62].mxu1 %vm454_vm4, %v9336_v62  ;;  %v22800_v5 = vpop.f32.mrb[36].mxu0 }
 0x831   : > { %v9154_v15 = vmax.f32 %v9118_v20, 0.0  ;;  %v9044_v34 = vsel %vm8936_vm7, 1.0, %v9008_v49  ;;  %v9011_v7 = vsel %vm8975_vm9, -1.0, %v30491_v14  ;;  %v9083_v27 = vand.u32 2147483647, %v22797_v13  ;;  %v8796_v30 = vpop.f32.mrb[37].mxu0 }
 0x832   : > { %9260 = vst.msk [vmem:[#allocation2 + $0x7b] sm:$0xff] %vm454_vm4, %v9224_v16  ;;  %v9223_v42 = vmul.f32 %v9187_v29, %v26806_v54  ;;  %v9153_v50 = vmax.f32 %v9117_v31, 0.0  ;;  %vm8938_vm11 = vcmp.gt.f32.partialorder %v8786_v18, 0.0  ;;  %vm8974_vm12 = vcmp.lt.f32.partialorder %v8786_v18, 0.0  ;;  %v9337_v6 = vld [vmem:[#allocation2 + $0x51] sm:$0xff]  ;;  %v9338_v11 = vld [vmem:[#allocation2 + $0x59] sm:$0xff] }
 0x833   : > { %v9190_v4 = vmul.f32 %v9154_v15, %v9045_v26  ;;  %v9120_v23 = vsub.f32 %v9083_v27, %v28103_v21  ;;  %v9010_v0 = vsel %vm8974_vm12, -1.0, %v30491_v14  ;;  %v9082_v2 = vand.u32 2147483647, %v8786_v18  ;;  %22856 = vmatprep.mubr.msk.f32.mxu1 %vm454_vm4, %v9337_v6 }
 0x834   : > { %9259 = vst.msk [vmem:[#allocation2 + $0x73] sm:$0xff] %vm454_vm4, %v9223_v42  ;;  %v9189_v24 = vmul.f32 %v9153_v50, %v9044_v34  ;;  %v9047_v33 = vsel %vm8939_vm10, 1.0, %v9011_v7  ;;  %vm8941_vm13 = vcmp.gt.f32.partialorder %v22800_v5, 0.0  ;;  %vm8977_vm14 = vcmp.lt.f32.partialorder %v22800_v5, 0.0  ;;  %22857 = vmatmul.mubr.msk.f32.gmra.mrb[64].mxu1 %vm454_vm4, %v9338_v11  ;;  %v22803_v25 = vpop.f32.mrb[38].mxu0 }
 0x835   : > { %v9226_v8 = vmul.f32 %v9190_v4, %v26812_v57  ;;  %v9156_v32 = vmax.f32 %v9120_v23, 0.0  ;;  %v9119_v17 = vsub.f32 %v9082_v2, %v28103_v21  ;;  %v9013_v53 = vsel %vm8977_vm14, -1.0, %v30491_v14  ;;  %v8806_v44 = vpop.f32.mrb[39].mxu0 }
 0x836   : > { %v9225_v43 = vmul.f32 %v9189_v24, %v26810_v56  ;;  %v9046_v3 = vsel %vm8938_vm11, 1.0, %v9010_v0  ;;  %v9085_v1 = vand.u32 2147483647, %v22800_v5  ;;  %vm8940_vm15 = vcmp.gt.f32.partialorder %v8796_v30, 0.0  ;;  %v9339_v13 = vld [vmem:[#allocation2 + $0x61] sm:$0xff]  ;;  %v9340_v9 = vld [vmem:[#allocation2 + $0x69] sm:$0xff] }
 0x837   : > { %9262 = vst.msk [vmem:[#allocation2 + $0x8b] sm:$0xff] %vm454_vm4, %v9226_v8  ;;  %v9192_v10 = vmul.f32 %v9156_v32, %v9047_v33  ;;  %v9155_v35 = vmax.f32 %v9119_v17, 0.0  ;;  %vm8976_vm0 = vcmp.lt.f32.partialorder %v8796_v30, 0.0  ;;  %v9084_v19 = vand.u32 2147483647, %v8796_v30  ;;  %22859 = vmatprep.mubr.msk.f32.mxu1 %vm454_vm4, %v9339_v13 }
 0x838   : > { %9261 = vst.msk [vmem:[#allocation2 + $0x83] sm:$0xff] %vm454_vm4, %v9225_v43  ;;  %v9049_v12 = vsel %vm8941_vm13, 1.0, %v9013_v53  ;;  %v9122_v22 = vsub.f32 %v9085_v1, %v28103_v21  ;;  %v9012_v18 = vsel %vm8976_vm0, -1.0, %v30491_v14  ;;  %vm8979_vm1 = vcmp.lt.f32.partialorder %v22803_v25, 0.0  ;;  %22860 = vmatmul.mubr.msk.f32.gmra.mrb[66].mxu1 %vm454_vm4, %v9340_v9  ;;  %v22806_v62 = vpop.f32.mrb[40].mxu0 }
 0x839   : > { %v9228_v26 = vmul.f32 %v9192_v10, %v26816_v59  ;;  %v9191_v20 = vmul.f32 %v9155_v35, %v9046_v3  ;;  %v9121_v49 = vsub.f32 %v9084_v19, %v28103_v21  ;;  %vm8943_vm2 = vcmp.gt.f32.partialorder %v22803_v25, 0.0  ;;  %v8816_v16 = vpop.f32.mrb[41].mxu0 }
 0x83a   : > { %v9158_v29 = vmax.f32 %v9122_v22, 0.0  ;;  %v9048_v31 = vsel %vm8940_vm15, 1.0, %v9012_v18  ;;  %v9015_v5 = vsel %vm8979_vm1, -1.0, %v30491_v14  ;;  %v9087_v15 = vand.u32 2147483647, %v22803_v25 }
 0x83b   : > { %9264 = vst.msk [vmem:[#allocation2 + $0x9b] sm:$0xff] %vm454_vm4, %v9228_v26  ;;  %v9227_v34 = vmul.f32 %v9191_v20, %v26814_v58  ;;  %v9157_v7 = vmax.f32 %v9121_v49, 0.0  ;;  %vm8942_vm3 = vcmp.gt.f32.partialorder %v8806_v44, 0.0  ;;  %vm8978_vm5 = vcmp.lt.f32.partialorder %v8806_v44, 0.0  ;;  %v9341_v27 = vld [vmem:[#allocation2 + $0x71] sm:$0xff]  ;;  %v9342_v42 = vld [vmem:[#allocation2 + $0x79] sm:$0xff] }
 0x83c   : > { %v9194_v50 = vmul.f32 %v9158_v29, %v9049_v12  ;;  %v9124_v6 = vsub.f32 %v9087_v15, %v28103_v21  ;;  %v9014_v11 = vsel %vm8978_vm5, -1.0, %v30491_v14  ;;  %v9086_v4 = vand.u32 2147483647, %v8806_v44  ;;  %22862 = vmatprep.mubr.msk.f32.mxu1 %vm454_vm4, %v9341_v27  ;;  %v22809_v30 = vpop.f32.mrb[42].mxu0 }
 0x83d   : > { %9263 = vst.msk [vmem:[#allocation2 + $0x93] sm:$0xff] %vm454_vm4, %v9227_v34  ;;  %v9193_v23 = vmul.f32 %v9157_v7, %v9048_v31  ;;  %v9051_v0 = vsel %vm8943_vm2, 1.0, %v9015_v5  ;;  %vm8945_vm6 = vcmp.gt.f32.partialorder %v22806_v62, 0.0  ;;  %vm8981_vm7 = vcmp.lt.f32.partialorder %v22806_v62, 0.0  ;;  %22863 = vmatmul.mubr.msk.f32.gmra.mrb[68].mxu1 %vm454_vm4, %v9342_v42  ;;  %v8826_v2 = vpop.f32.mrb[43].mxu0  ;;  %v30492_v31 = vld [vmem:[#allocation25_spill] sm:$0xff] }
 0x83e   : > { %v9230_v24 = vmul.f32 %v9194_v50, %v26820_v61  ;;  %v9160_v33 = vmax.f32 %v9124_v6, 0.0  ;;  %v9123_v8 = vsub.f32 %v9086_v4, %v28103_v21  ;;  %v9017_v32 = vsel %vm8981_vm7, -1.0, %v30491_v14 }
 0x83f   : > { %v9229_v17 = vmul.f32 %v9193_v23, %v26818_v60  ;;  %v9050_v53 = vsel %vm8942_vm3, 1.0, %v9014_v11  ;;  %v9089_v43 = vand.u32 2147483647, %v22806_v62  ;;  %vm8944_vm8 = vcmp.gt.f32.partialorder %v8816_v16, 0.0  ;;  %v9343_v25 = vld [vmem:[#allocation2 + $0x81] sm:$0xff]  ;;  %v9344_v3 = vld [vmem:[#allocation2 + $0x89] sm:$0xff] }
 0x840   : > { %9266 = vst.msk [vmem:[#allocation2 + $0xab] sm:$0xff] %vm454_vm4, %v9230_v24  ;;  %v9196_v1 = vmul.f32 %v9160_v33, %v9051_v0  ;;  %v9159_v13 = vmax.f32 %v9123_v8, 0.0  ;;  %vm8980_vm9 = vcmp.lt.f32.partialorder %v8816_v16, 0.0  ;;  %v9088_v9 = vand.u32 2147483647, %v8816_v16  ;;  %22865 = vmatprep.mubr.msk.f32.mxu1 %vm454_vm4, %v9343_v25  ;;  %v22812_v10 = vpop.f32.mrb[44].mxu0 }
 0x841   : > { %9265 = vst.msk [vmem:[#allocation2 + $0xa3] sm:$0xff] %vm454_vm4, %v9229_v17  ;;  %v9053_v35 = vsel %vm8945_vm6, 1.0, %v9017_v32  ;;  %v9126_v44 = vsub.f32 %v9089_v43, %v28103_v21  ;;  %v9016_v19 = vsel %vm8980_vm9, -1.0, %v30491_v14  ;;  %vm8983_vm10 = vcmp.lt.f32.partialorder %v22809_v30, 0.0  ;;  %22866 = vmatmul.mubr.msk.f32.gmra.mrb[70].mxu1 %vm454_vm4, %v9344_v3  ;;  %v8836_v12 = vpop.f32.mrb[45].mxu0  ;;  %v30493_v0 = vld [vmem:[#allocation27_spill] sm:$0xff] }
 0x842   : > { %v9232_v22 = vmul.f32 %v9196_v1, %v26824_v63  ;;  %v9195_v18 = vmul.f32 %v9159_v13, %v9050_v53  ;;  %v9125_v26 = vsub.f32 %v9088_v9, %v28103_v21  ;;  %vm8947_vm11 = vcmp.gt.f32.partialorder %v22809_v30, 0.0  ;;  %v30494_v17 = vld [vmem:[#allocation26_spill] sm:$0xff] }
 0x843   : > { %v9162_v20 = vmax.f32 %v9126_v44, 0.0  ;;  %v9052_v49 = vsel %vm8944_vm8, 1.0, %v9016_v19  ;;  %v9019_v62 = vsel %vm8983_vm10, -1.0, %v30491_v14  ;;  %v9091_v29 = vand.u32 2147483647, %v22809_v30 }
 0x844   : > { %9268 = vst.msk [vmem:[#allocation2 + $0xbb] sm:$0xff] %vm454_vm4, %v9232_v22  ;;  %v9231_v5 = vmul.f32 %v9195_v18, %v30492_v31  ;;  %v9161_v15 = vmax.f32 %v9125_v26, 0.0  ;;  %vm8946_vm12 = vcmp.gt.f32.partialorder %v8826_v2, 0.0  ;;  %vm8982_vm13 = vcmp.lt.f32.partialorder %v8826_v2, 0.0  ;;  %v9345_v34 = vld [vmem:[#allocation2 + $0x91] sm:$0xff]  ;;  %v9346_v7 = vld [vmem:[#allocation2 + $0x99] sm:$0xff] }
 0x845   : > { %v22815_v27 = vpop.f32.mrb[46].mxu0  ;;  %v9198_v42 = vmul.f32 %v9162_v20, %v9053_v35  ;;  %v9128_v50 = vsub.f32 %v9091_v29, %v28103_v21  ;;  %v9018_v6 = vsel %vm8982_vm13, -1.0, %v30491_v14  ;;  %v9090_v16 = vand.u32 2147483647, %v8826_v2  ;;  %22868 = vmatprep.mubr.msk.f32.mxu1 %vm454_vm4, %v9345_v34  ;;  %v30495_v18 = vld [vmem:[#allocation29_spill] sm:$0xff]  ;;  %v30496_v34 = vld [vmem:[#allocation28_spill] sm:$0xff] }
 0x846   : > { %v28236_v11 = vpop.f32.mrb[47].mxu0  ;;  %9267 = vst.msk [vmem:[#allocation2 + $0xb3] sm:$0xff] %vm454_vm4, %v9231_v5  ;;  %v9197_v4 = vmul.f32 %v9161_v15, %v9052_v49  ;;  %v9055_v23 = vsel %vm8947_vm11, 1.0, %v9019_v62  ;;  %vm8949_vm14 = vcmp.gt.f32.partialorder %v22812_v10, 0.0  ;;  %vm8985_vm15 = vcmp.lt.f32.partialorder %v22812_v10, 0.0  ;;  %22869 = vmatmul.mubr.msk.f32.gmra.mrb[72].mxu1 %vm454_vm4, %v9346_v7  ;;  %v10990_v31 = vld [vmem:[#allocation13 + $0x138] sm:$0xff] }
 0x847   : > { %v9234_v24 = vmul.f32 %v9198_v42, %v30493_v0  ;;  %v9164_v33 = vmax.f32 %v9128_v50, 0.0  ;;  %v9127_v8 = vsub.f32 %v9090_v16, %v28103_v21  ;;  %v9021_v32 = vsel %vm8985_vm15, -1.0, %v30491_v14  ;;  %v10989_v0 = vld [vmem:[#allocation13 + $0x130] sm:$0xff] }
 0x848   : > { %v9233_v53 = vmul.f32 %v9197_v4, %v30494_v17  ;;  %v9054_v43 = vsel %vm8946_vm12, 1.0, %v9018_v6  ;;  %v9093_v25 = vand.u32 2147483647, %v22812_v10  ;;  %vm8948_vm0 = vcmp.gt.f32.partialorder %v8836_v12, 0.0  ;;  %v9347_v3 = vld [vmem:[#allocation2 + $0xa1] sm:$0xff]  ;;  %v9348_v30 = vld [vmem:[#allocation2 + $0xa9] sm:$0xff] }
 0x849   : > { %9270 = vst.msk [vmem:[#allocation2 + $0xcb] sm:$0xff] %vm454_vm4, %v9234_v24  ;;  %v9200_v1 = vmul.f32 %v9164_v33, %v9055_v23  ;;  %v9163_v13 = vmax.f32 %v9127_v8, 0.0  ;;  %vm8984_vm1 = vcmp.lt.f32.partialorder %v8836_v12, 0.0  ;;  %v9092_v9 = vand.u32 2147483647, %v8836_v12  ;;  %22871 = vmatprep.mubr.msk.f32.mxu1 %vm454_vm4, %v9347_v3  ;;  %v22818_v35 = vpop.f32.mrb[48].mxu0 }
 0x84a   : > { %9269 = vst.msk [vmem:[#allocation2 + $0xc3] sm:$0xff] %vm454_vm4, %v9233_v53  ;;  %v9057_v44 = vsel %vm8949_vm14, 1.0, %v9021_v32  ;;  %v9130_v2 = vsub.f32 %v9093_v25, %v28103_v21  ;;  %v9020_v19 = vsel %vm8984_vm1, -1.0, %v30491_v14  ;;  %vm8987_vm2 = vcmp.lt.f32.partialorder %v22815_v27, 0.0  ;;  %22872 = vmatmul.mubr.msk.f32.gmra.mrb[74].mxu1 %vm454_vm4, %v9348_v30  ;;  %v8856_v22 = vpop.f32.mrb[49].mxu0  ;;  %v30497_v32 = vld [vmem:[#allocation31_spill] sm:$0xff] }
 0x84b   : > { %v9236_v26 = vmul.f32 %v9200_v1, %v30495_v18  ;;  %v9199_v20 = vmul.f32 %v9163_v13, %v9054_v43  ;;  %v9129_v49 = vsub.f32 %v9092_v9, %v28103_v21  ;;  %vm8951_vm3 = vcmp.gt.f32.partialorder %v22815_v27, 0.0  ;;  %v30498_v1 = vld [vmem:[#allocation30_spill] sm:$0xff]  ;;  %v10988_v18 = vld [vmem:[#allocation13 + $0x128] sm:$0xff] }
 0x84c   : > { %v9166_v62 = vmax.f32 %v9130_v2, 0.0  ;;  %v9056_v29 = vsel %vm8948_vm0, 1.0, %v9020_v19  ;;  %v9023_v10 = vsel %vm8987_vm2, -1.0, %v30491_v14  ;;  %v9095_v5 = vand.u32 2147483647, %v22815_v27  ;;  %v28257_v15 = vpop.f32.mrb[50].mxu0 }
 0x84d   : > { %9272 = vst.msk [vmem:[#allocation2 + $0xdb] sm:$0xff] %vm454_vm4, %v9236_v26  ;;  %v9235_v7 = vmul.f32 %v9199_v20, %v30496_v34  ;;  %v9165_v42 = vmax.f32 %v9129_v49, 0.0  ;;  %vm8950_vm5 = vcmp.gt.f32.partialorder %v28236_v11, 0.0  ;;  %vm8986_vm6 = vcmp.lt.f32.partialorder %v28236_v11, 0.0  ;;  %v9349_v50 = vld [vmem:[#allocation2 + $0xb1] sm:$0xff]  ;;  %v9350_v6 = vld [vmem:[#allocation2 + $0xb9] sm:$0xff] }
 0x84e   : > { %v28263_v16 = vpop.f32.mrb[51].mxu0  ;;  %v9202_v12 = vmul.f32 %v9166_v62, %v9057_v44  ;;  %v9132_v4 = vsub.f32 %v9095_v5, %v28103_v21  ;;  %v9022_v23 = vsel %vm8986_vm6, -1.0, %v30491_v14  ;;  %v9094_v24 = vand.u32 2147483647, %v28236_v11  ;;  %22874 = vmatprep.mubr.msk.f32.mxu1 %vm454_vm4, %v9349_v50  ;;  %v10987_v34 = vld [vmem:[#allocation13 + $0x120] sm:$0xff] }
 0x84f   : > { %9271 = vst.msk [vmem:[#allocation2 + $0xd3] sm:$0xff] %vm454_vm4, %v9235_v7  ;;  %v9201_v33 = vmul.f32 %v9165_v42, %v9056_v29  ;;  %v9059_v8 = vsel %vm8951_vm3, 1.0, %v9023_v10  ;;  %vm8953_vm7 = vcmp.gt.f32.partialorder %v22818_v35, 0.0  ;;  %vm8989_vm8 = vcmp.lt.f32.partialorder %v22818_v35, 0.0  ;;  %22875 = vmatmul.mubr.msk.f32.gmra.mrb[76].mxu1 %vm454_vm4, %v9350_v6  ;;  %v30499_v10 = vld [vmem:[#allocation33_spill] sm:$0xff] }
 0x850   : > { %v9238_v53 = vmul.f32 %v9202_v12, %v30497_v32  ;;  %v9168_v43 = vmax.f32 %v9132_v4, 0.0  ;;  %v9131_v25 = vsub.f32 %v9094_v24, %v28103_v21  ;;  %v9025_v3 = vsel %vm8989_vm8, -1.0, %v30491_v14  ;;  %v28275_v30 = vpop.f32.mrb[52].mxu0  ;;  %v30500_v4 = vld [vmem:[#allocation32_spill] sm:$0xff] }
 0x851   : > { %v9237_v13 = vmul.f32 %v9201_v33, %v30498_v1  ;;  %v9058_v9 = vsel %vm8950_vm5, 1.0, %v9022_v23  ;;  %v9097_v27 = vand.u32 2147483647, %v22818_v35  ;;  %vm8952_vm9 = vcmp.gt.f32.partialorder %v8856_v22, 0.0  ;;  %v9351_v44 = vld [vmem:[#allocation2 + $0xc1] sm:$0xff]  ;;  %v9352_v2 = vld [vmem:[#allocation2 + $0xc9] sm:$0xff] }
 0x852   : > { %9274 = vst.msk [vmem:[#allocation2 + $0xeb] sm:$0xff] %vm454_vm4, %v9238_v53  ;;  %v9204_v19 = vmul.f32 %v9168_v43, %v9059_v8  ;;  %v9167_v26 = vmax.f32 %v9131_v25, 0.0  ;;  %vm8988_vm10 = vcmp.lt.f32.partialorder %v8856_v22, 0.0  ;;  %v9096_v20 = vand.u32 2147483647, %v8856_v22  ;;  %22877 = vmatprep.mubr.msk.f32.mxu1 %vm454_vm4, %v9351_v44  ;;  %v28282_v49 = vpop.f32.mrb[53].mxu0 }
 0x853   : > { %9273 = vst.msk [vmem:[#allocation2 + $0xe3] sm:$0xff] %vm454_vm4, %v9237_v13  ;;  %v9061_v62 = vsel %vm8953_vm7, 1.0, %v9025_v3  ;;  %v9134_v11 = vsub.f32 %v9097_v27, %v28103_v21  ;;  %v9024_v29 = vsel %vm8988_vm10, -1.0, %v30491_v14  ;;  %vm8991_vm11 = vcmp.lt.f32.partialorder %v28257_v15, 0.0  ;;  %22878 = vmatmul.mubr.msk.f32.gmra.mrb[78].mxu1 %vm454_vm4, %v9352_v2  ;;  %v30501_v13 = vld [vmem:[#allocation35_spill] sm:$0xff]  ;;  %v30502_v2 = vld [vmem:[#allocation34_spill] sm:$0xff] }
 0x854   : > { %v9240_v5 = vmul.f32 %v9204_v19, %v30499_v10  ;;  %v9203_v7 = vmul.f32 %v9167_v26, %v9058_v9  ;;  %v9133_v42 = vsub.f32 %v9096_v20, %v28103_v21  ;;  %vm8955_vm12 = vcmp.gt.f32.partialorder %v28257_v15, 0.0  ;;  %v10985_v10 = vld [vmem:[#allocation13 + $0x110] sm:$0xff]  ;;  %v10986_v1 = vld [vmem:[#allocation13 + $0x118] sm:$0xff] }
 0x855   : > { %v9170_v50 = vmax.f32 %v9134_v11, 0.0  ;;  %v9060_v6 = vsel %vm8952_vm9, 1.0, %v9024_v29  ;;  %v9027_v35 = vsel %vm8991_vm11, -1.0, %v30491_v14  ;;  %v9099_v12 = vand.u32 2147483647, %v28257_v15 }
 0x856   : > { %9276 = vst.msk [vmem:[#allocation2 + $0xfb] sm:$0xff] %vm454_vm4, %v9240_v5  ;;  %v9239_v23 = vmul.f32 %v9203_v7, %v30500_v4  ;;  %v9169_v24 = vmax.f32 %v9133_v42, 0.0  ;;  %vm8954_vm13 = vcmp.gt.f32.partialorder %v28263_v16, 0.0  ;;  %vm8990_vm14 = vcmp.lt.f32.partialorder %v28263_v16, 0.0  ;;  %v9353_v33 = vld [vmem:[#allocation2 + $0xd1] sm:$0xff]  ;;  %v9354_v8 = vld [vmem:[#allocation2 + $0xd9] sm:$0xff] }
 0x857   : > { %v9206_v53 = vmul.f32 %v9170_v50, %v9061_v62  ;;  %v9136_v43 = vsub.f32 %v9099_v12, %v28103_v21  ;;  %v9026_v22 = vsel %vm8990_vm14, -1.0, %v30491_v14  ;;  %v9098_v25 = vand.u32 2147483647, %v28263_v16  ;;  %22880 = vmatprep.mubr.msk.f32.mxu1 %vm454_vm4, %v9353_v33  ;;  %v30503_v50 = vld [vmem:[#allocation37_spill] sm:$0xff]  ;;  %v30504_v33 = vld [vmem:[#allocation36_spill] sm:$0xff] }
 0x858   : > { %9275 = vst.msk [vmem:[#allocation2 + $0xf3] sm:$0xff] %vm454_vm4, %v9239_v23  ;;  %v9205_v3 = vmul.f32 %v9169_v24, %v9060_v6  ;;  %22881 = vmatmul.mubr.msk.f32.gmra.mrb[80].mxu1 %vm454_vm4, %v9354_v8  ;;  %vm8993_vm15 = vcmp.lt.f32.partialorder %v28275_v30, 0.0  ;;  %v9063_v26 = vsel %vm8955_vm12, 1.0, %v9027_v35  ;;  %v9062_v20 = vsel %vm8954_vm13, 1.0, %v9026_v22 }
 0x859   : > { %v9242_v9 = vmul.f32 %v9206_v53, %v30501_v13  ;;  %v9172_v27 = vmax.f32 %v9136_v43, 0.0  ;;  %v9135_v44 = vsub.f32 %v9098_v25, %v28103_v21  ;;  %v9101_v62 = vand.u32 2147483647, %v28275_v30 }
 0x85a   : > { %v9241_v19 = vmul.f32 %v9205_v3, %v30502_v2  ;;  %v9355_v11 = vld [vmem:[#allocation2 + $0xe1] sm:$0xff]  ;;  %v9356_v29 = vld [vmem:[#allocation2 + $0xe9] sm:$0xff]  ;;  %vm8992_vm0 = vcmp.lt.f32.partialorder %v28282_v49, 0.0  ;;  %v9100_v42 = vand.u32 2147483647, %v28282_v49  ;;  %vm8957_vm1 = vcmp.gt.f32.partialorder %v28275_v30, 0.0 }
 0x85b   : > { %9278 = vst.msk [vmem:[#allocation2 + $0x10b] sm:$0xff] %vm454_vm4, %v9242_v9  ;;  %v9208_v5 = vmul.f32 %v9172_v27, %v9063_v26  ;;  %v9171_v7 = vmax.f32 %v9135_v44, 0.0  ;;  %22883 = vmatprep.mubr.msk.f32.mxu1 %vm454_vm4, %v9355_v11  ;;  %v9029_v15 = vsel %vm8993_vm15, -1.0, %v30491_v14  ;;  %v9138_v16 = vsub.f32 %v9101_v62, %v28103_v21  ;;  %v30506_v9 = vld [vmem:[#allocation38_spill] sm:$0xff]  ;;  %v9283_v62 = vld [vmem:[#allocation2] sm:$0xff]  ;;  %v10117_v11 = vld [vmem:[#allocation13 + $0x90] sm:$0xff] }
 0x85c   : > { %9277 = vst.msk [vmem:[#allocation2 + $0x103] sm:$0xff] %vm454_vm4, %v9241_v19  ;;  %vm8956_vm2 = vcmp.gt.f32.partialorder %v28282_v49, 0.0  ;;  %22884 = vmatmul.mubr.msk.f32.gmra.mrb[82].mxu1 %vm454_vm4, %v9356_v29  ;;  %v9028_v12 = vsel %vm8992_vm0, -1.0, %v30491_v14  ;;  %v9137_v23 = vsub.f32 %v9100_v42, %v28103_v21  ;;  %v9065_v8 = vsel %vm8957_vm1, 1.0, %v9029_v15  ;;  %v30505_v14 = vld [vmem:[#allocation39_spill] sm:$0xff]  ;;  %v10118_v29 = vld [vmem:[#allocation13 + $0x98] sm:$0xff] }
 0x85d   : > { %v9244_v6 = vmul.f32 %v9208_v5, %v30503_v50  ;;  %v9207_v35 = vmul.f32 %v9171_v7, %v9062_v20  ;;  %v9174_v24 = vmax.f32 %v9138_v16, 0.0  ;;  %v9064_v49 = vsel %vm8956_vm2, 1.0, %v9028_v12  ;;  %v9284_v5 = vld [vmem:[#allocation2 + $0x8] sm:$0xff]  ;;  %v10119_v42 = vld [vmem:[#allocation13 + $0xa0] sm:$0xff]  ;;  %v10120_v15 = vld [vmem:[#allocation13 + $0xa8] sm:$0xff] }
 0x85e   : > { %v9173_v53 = vmax.f32 %v9137_v23, 0.0  ;;  %v24415_v7 = vpack.c.bf16 %v10118_v29, %v10117_v11  ;;  %v9285_v16 = vld [vmem:[#allocation2 + $0x10] sm:$0xff]  ;;  %v10121_v12 = vld [vmem:[#allocation13 + $0xb0] sm:$0xff]  ;;  %v24447_v32 = vpack.c.bf16 %v10986_v1, %v10985_v10  ;;  %v24451_v17 = vpack.c.bf16 %v10988_v18, %v10987_v34  ;;  %v11417_v10 = vld [vmem:[#allocation13 + $0x140] sm:$0xff] }
 0x85f   : > { %9280 = vst.msk [vmem:[#allocation2 + $0x11b] sm:$0xff] %vm454_vm4, %v9244_v6  ;;  %v9243_v30 = vmul.f32 %v9207_v35, %v30504_v33  ;;  %v9357_v43 = vld [vmem:[#allocation2 + $0xf1] sm:$0xff]  ;;  %v9358_v22 = vld [vmem:[#allocation2 + $0xf9] sm:$0xff]  ;;  %v9210_v25 = vmul.f32 %v9174_v24, %v9065_v8  ;;  %v24419_v6 = vpack.c.bf16 %v10120_v15, %v10119_v42  ;;  %v9288_v8 = vld [vmem:[#allocation2 + $0x28] sm:$0xff]  ;;  %v24455_v1 = vpack.c.bf16 %v10990_v31, %v10989_v0 }
 0x860   : > { %22886 = vmatprep.mubr.msk.f32.mxu1 %vm454_vm4, %v9357_v43  ;;  %v9209_v3 = vmul.f32 %v9173_v53, %v9064_v49  ;;  %v9286_v35 = vld [vmem:[#allocation2 + $0x18] sm:$0xff]  ;;  %v10122_v23 = vld [vmem:[#allocation13 + $0xb8] sm:$0xff]  ;;  %v9287_v24 = vld [vmem:[#allocation2 + $0x20] sm:$0xff] }
 0x861   : > { %9279 = vst.msk [vmem:[#allocation2 + $0x113] sm:$0xff] %vm454_vm4, %v9243_v30  ;;  %22887 = vmatmul.mubr.msk.f32.gmra.mrb[84].mxu1 %vm454_vm4, %v9358_v22  ;;  %v9246_v21 = vmul.f32 %v9210_v25, %v30505_v14  ;;  %v24423_v30 = vpack.c.bf16 %v10122_v23, %v10121_v12  ;;  %v10549_v53 = vld [vmem:[#allocation13 + $0xc0] sm:$0xff]  ;;  %v10550_v43 = vld [vmem:[#allocation13 + $0xc8] sm:$0xff]  ;;  %v9300_v11 = vld [vmem:[#allocation2 + $0x88] sm:$0xff] }
 0x862   : > { %v9245_v27 = vmul.f32 %v9209_v3, %v30506_v9  ;;  %v28349_v22 = vpack.c.bf16 %v10550_v43, %v10549_v53  ;;  %v9290_v25 = vld [vmem:[#allocation2 + $0x38] sm:$0xff]  ;;  %v9291_v49 = vld [vmem:[#allocation2 + $0x40] sm:$0xff]  ;;  %v9292_v3 = vld [vmem:[#allocation2 + $0x48] sm:$0xff] }
 0x863   : > { %v9359_v44 = vld [vmem:[#allocation2 + $0x101] sm:$0xff]  ;;  %v9360_v19 = vld [vmem:[#allocation2 + $0x109] sm:$0xff]  ;;  %9282 = vst.msk [vmem:[#allocation2 + $0x12b] sm:$0xff] %vm454_vm4, %v9246_v21  ;;  %v9310_v23 = vld [vmem:[#allocation2 + $0xd8] sm:$0xff] }
 0x864   : > { %22889 = vmatprep.mubr.msk.f32.mxu1 %vm454_vm4, %v9359_v44  ;;  %9281 = vst.msk [vmem:[#allocation2 + $0x123] sm:$0xff] %vm454_vm4, %v9245_v27  ;;  %v9293_v21 = vld [vmem:[#allocation2 + $0x50] sm:$0xff]  ;;  %v9294_v27 = vld [vmem:[#allocation2 + $0x58] sm:$0xff]  ;;  %v9295_v44 = vld [vmem:[#allocation2 + $0x60] sm:$0xff] }
 0x865   : > { %22890 = vmatmul.mubr.msk.f32.gmra.mrb[86].mxu1 %vm454_vm4, %v9360_v19  ;;  %v9296_v19 = vld [vmem:[#allocation2 + $0x68] sm:$0xff]  ;;  %v9301_v29 = vld [vmem:[#allocation2 + $0x90] sm:$0xff]  ;;  %v9314_v53 = vld [vmem:[#allocation2 + $0xf8] sm:$0xff] }
 0x866   : > { %v9304_v42 = vld [vmem:[#allocation2 + $0xa8] sm:$0xff]  ;;  %v9305_v15 = vld [vmem:[#allocation2 + $0xb0] sm:$0xff]  ;;  %v9315_v43 = vld [vmem:[#allocation2 + $0x100] sm:$0xff] }
 0x867   : > { %v9309_v12 = vld [vmem:[#allocation2 + $0xd0] sm:$0xff]  ;;  %v10109_v33 = vld [vmem:[#allocation2 + $0xfa] sm:$0xff]  ;;  %v10110_v50 = vld [vmem:[#allocation2 + $0x102] sm:$0xff] }
 0x868   : > { %v9361_v26 = vld [vmem:[#allocation2 + $0x111] sm:$0xff]  ;;  %v9362_v20 = vld [vmem:[#allocation2 + $0x119] sm:$0xff] }
 0x869   : > { %22892 = vmatprep.mubr.msk.f32.mxu1 %vm454_vm4, %v9361_v26  ;;  %v9297_v26 = vld [vmem:[#allocation2 + $0x70] sm:$0xff]  ;;  %v10113_v4 = vld [vmem:[#allocation2 + $0x11a] sm:$0xff] }
 0x86a   : > { %22893 = vmatmul.mubr.msk.f32.gmra.mrb[88].mxu1 %vm454_vm4, %v9362_v20  ;;  %v9298_v20 = vld [vmem:[#allocation2 + $0x78] sm:$0xff]  ;;  %v10107_v9 = vld [vmem:[#allocation2 + $0xea] sm:$0xff] }
 0x86b   : > { %22911 = vmatprep.mubr.msk.f32.mxu1 %vm454_vm4, %v9283_v62  ;;  %v9299_v62 = vld [vmem:[#allocation2 + $0x80] sm:$0xff]  ;;  %v10108_v14 = vld [vmem:[#allocation2 + $0xf2] sm:$0xff]  ;;  %v10111_v2 = vld [vmem:[#allocation2 + $0x10a] sm:$0xff] }
 0x86c   : > { %v10112_v13 = vld [vmem:[#allocation2 + $0x112] sm:$0xff]  ;;  %v10546_v31 = vld [vmem:[#allocation2 + $0x122] sm:$0xff]  ;;  %v10547_v0 = vld [vmem:[#allocation2 + $0x12a] sm:$0xff] }
 0x86d   : > { %v11420_v34 = vld [vmem:[#allocation13 + $0x158] sm:$0xff] }
 0x86e   : > { %22912 = vmatmul.mubr.msk.f32.vlgmr.msra.gmra.mrb[54].mxu1 %vm454_vm4, %v9284_v5  ;;  %v9302_v5 = vld [vmem:[#allocation2 + $0x98] sm:$0xff] }
 0x86f   : > { %24414 = vmatpush3.bf16.msra.mxu1 %v28100_v28  ;;  %22914 = vmatprep.mubr.msk.f32.mxu1 %vm454_vm4, %v9285_v16  ;;  %v9289_v28 = vld [vmem:[#allocation2 + $0x30] sm:$0xff]  ;;  %v9306_v16 = vld [vmem:[#allocation2 + $0xb8] sm:$0xff] }
 0x870   : > { %24416 = vmatprep.subr.bf16.mxu1 %v24415_v7 }
 0x872   : > { %22915 = vmatmul.mubr.msk.f32.gmra.mrb[56].mxu1 %vm454_vm4, %v9286_v35  ;;  %v9308_v35 = vld [vmem:[#allocation2 + $0xc8] sm:$0xff] }
 0x873   : > { %22917 = vmatprep.mubr.msk.f32.mxu1 %vm454_vm4, %v9287_v24  ;;  %24418 = vmatpush3.bf16.msra.mxu1 %v24415_v7  ;;  %v9303_v7 = vld [vmem:[#allocation2 + $0xa0] sm:$0xff] }
 0x874   : > { %24420 = vmatprep.subr.bf16.mxu1 %v24419_v6  ;;  %v9311_v24 = vld [vmem:[#allocation2 + $0xe0] sm:$0xff] }
 0x876   : > { %22918 = vmatmul.mubr.msk.f32.gmra.mrb[58].mxu1 %vm454_vm4, %v9288_v8  ;;  %v9313_v8 = vld [vmem:[#allocation2 + $0xf0] sm:$0xff] }
 0x877   : > { %22920 = vmatprep.mubr.msk.f32.mxu1 %vm454_vm4, %v9289_v28  ;;  %24422 = vmatpush3.bf16.msra.mxu1 %v24419_v6  ;;  %v9307_v6 = vld [vmem:[#allocation2 + $0xc0] sm:$0xff]  ;;  %v9316_v28 = vld [vmem:[#allocation2 + $0x108] sm:$0xff] }
 0x878   : > { %24424 = vmatprep.subr.bf16.mxu1 %v24423_v30 }
 0x87a   : > { %22921 = vmatmul.mubr.msk.f32.gmra.mrb[60].mxu1 %vm454_vm4, %v9290_v25  ;;  %v9317_v25 = vld [vmem:[#allocation2 + $0x110] sm:$0xff] }
 0x87b   : > { %22923 = vmatprep.mubr.msk.f32.mxu1 %vm454_vm4, %v9291_v49  ;;  %24426 = vmatpush3.bf16.msra.mxu1 %v24423_v30  ;;  %v9312_v30 = vld [vmem:[#allocation2 + $0xe8] sm:$0xff] }
 0x87c   : > { %24428 = vmatprep.subr.bf16.mxu1 %v28349_v22  ;;  %v10078_v49 = vld [vmem:[#allocation2 + $0x2] sm:$0xff] }
 0x87e   : > { %22924 = vmatmul.mubr.msk.f32.gmra.mrb[62].mxu1 %vm454_vm4, %v9292_v3  ;;  %v9318_v3 = vld [vmem:[#allocation2 + $0x118] sm:$0xff] }
 0x87f   : > { %22926 = vmatprep.mubr.msk.f32.mxu1 %vm454_vm4, %v9293_v21  ;;  %v10551_v21 = vld [vmem:[#allocation13 + $0xd0] sm:$0xff] }
 0x882   : > { %22927 = vmatmul.mubr.msk.f32.gmra.mrb[64].mxu1 %vm454_vm4, %v9294_v27  ;;  %v10552_v27 = vld [vmem:[#allocation13 + $0xd8] sm:$0xff] }
 0x883   : > { %22929 = vmatprep.mubr.msk.f32.mxu1 %vm454_vm4, %v9295_v44  ;;  %v10079_v44 = vld [vmem:[#allocation2 + $0xa] sm:$0xff] }
 0x886   : > { %22930 = vmatmul.mubr.msk.f32.gmra.mrb[66].mxu1 %vm454_vm4, %v9296_v19  ;;  %v24431_v19 = vpack.c.bf16 %v10552_v27, %v10551_v21  ;;  %v28447_v21 = vld [vmem:[#allocation2 + $0x8a] sm:$0xff]  ;;  %v28451_v27 = vld [vmem:[#allocation2 + $0x92] sm:$0xff] }
 0x887   : > { %22932 = vmatprep.mubr.msk.f32.mxu1 %vm454_vm4, %v9297_v26  ;;  %v10553_v26 = vld [vmem:[#allocation13 + $0xe0] sm:$0xff] }
 0x88a   : > { %22933 = vmatmul.mubr.msk.f32.gmra.mrb[68].mxu1 %vm454_vm4, %v9298_v20  ;;  %v10554_v20 = vld [vmem:[#allocation13 + $0xe8] sm:$0xff] }
 0x88b   : > { %22935 = vmatprep.mubr.msk.f32.mxu1 %vm454_vm4, %v9299_v62  ;;  %v28383_v62 = vld [vmem:[#allocation2 + $0x12] sm:$0xff] }
 0x88e   : > { %22936 = vmatmul.mubr.msk.f32.gmra.mrb[70].mxu1 %vm454_vm4, %v9300_v11  ;;  %v24435_v11 = vpack.c.bf16 %v10554_v20, %v10553_v26  ;;  %v28463_v26 = vld [vmem:[#allocation2 + $0xaa] sm:$0xff]  ;;  %v28467_v20 = vld [vmem:[#allocation2 + $0xb2] sm:$0xff] }
 0x88f   : > { %22938 = vmatprep.mubr.msk.f32.mxu1 %vm454_vm4, %v9301_v29  ;;  %v28388_v29 = vld [vmem:[#allocation2 + $0x1a] sm:$0xff] }
 0x892   : > { %22939 = vmatmul.mubr.msk.f32.gmra.mrb[72].mxu1 %vm454_vm4, %v9302_v5  ;;  %v10555_v5 = vld [vmem:[#allocation13 + $0xf0] sm:$0xff] }
 0x893   : > { %22941 = vmatprep.mubr.msk.f32.mxu1 %vm454_vm4, %v9303_v7  ;;  %v10556_v7 = vld [vmem:[#allocation13 + $0xf8] sm:$0xff] }
 0x896   : > { %22942 = vmatmul.mubr.msk.f32.gmra.mrb[74].mxu1 %vm454_vm4, %v9304_v42  ;;  %v28392_v42 = vld [vmem:[#allocation2 + $0x22] sm:$0xff] }
 0x897   : > { %22944 = vmatprep.mubr.msk.f32.mxu1 %vm454_vm4, %v9305_v15  ;;  %v28396_v15 = vld [vmem:[#allocation2 + $0x2a] sm:$0xff] }
 0x89a   : > { %22945 = vmatmul.mubr.msk.f32.gmra.mrb[76].mxu1 %vm454_vm4, %v9306_v16  ;;  %v10983_v16 = vld [vmem:[#allocation13 + $0x100] sm:$0xff] }
 0x89b   : > { %22947 = vmatprep.mubr.msk.f32.mxu1 %vm454_vm4, %v9307_v6  ;;  %v10984_v6 = vld [vmem:[#allocation13 + $0x108] sm:$0xff] }
 0x89e   : > { %22948 = vmatmul.mubr.msk.f32.gmra.mrb[78].mxu1 %vm454_vm4, %v9308_v35  ;;  %v28400_v35 = vld [vmem:[#allocation2 + $0x32] sm:$0xff] }
 0x89f   : > { %22950 = vmatprep.mubr.msk.f32.mxu1 %vm454_vm4, %v9309_v12  ;;  %v28404_v12 = vpack.c.bf16 %v10984_v6, %v10983_v16  ;;  %v28487_v16 = vld [vmem:[#allocation2 + $0xda] sm:$0xff]  ;;  %v10106_v6 = vld [vmem:[#allocation2 + $0xe2] sm:$0xff] }
 0x8a2   : > { %22951 = vmatmul.mubr.msk.f32.gmra.mrb[80].mxu1 %vm454_vm4, %v9310_v23  ;;  %v28406_v23 = vld [vmem:[#allocation2 + $0x3a] sm:$0xff] }
 0x8a3   : > { %22953 = vmatprep.mubr.msk.f32.mxu1 %vm454_vm4, %v9311_v24  ;;  %v28410_v24 = vld [vmem:[#allocation2 + $0x42] sm:$0xff] }
 0x8a6   : > { %22954 = vmatmul.mubr.msk.f32.gmra.mrb[82].mxu1 %vm454_vm4, %v9312_v30  ;;  %v28415_v30 = vld [vmem:[#allocation2 + $0x4a] sm:$0xff] }
 0x8a7   : > { %22956 = vmatprep.mubr.msk.f32.mxu1 %vm454_vm4, %v9313_v8  ;;  %v28419_v8 = vld [vmem:[#allocation2 + $0x52] sm:$0xff] }
 0x8aa   : > { %22957 = vmatmul.mubr.msk.f32.gmra.mrb[84].mxu1 %vm454_vm4, %v9314_v53  ;;  %v28423_v53 = vld [vmem:[#allocation2 + $0x5a] sm:$0xff] }
 0x8ab   : > { %22959 = vmatprep.mubr.msk.f32.mxu1 %vm454_vm4, %v9315_v43  ;;  %v28427_v43 = vld [vmem:[#allocation2 + $0x62] sm:$0xff] }
 0x8ae   : > { %22960 = vmatmul.mubr.msk.f32.gmra.mrb[86].mxu1 %vm454_vm4, %v9316_v28  ;;  %v28431_v28 = vld [vmem:[#allocation2 + $0x6a] sm:$0xff] }
 0x8af   : > { %22962 = vmatprep.mubr.msk.f32.mxu1 %vm454_vm4, %v9317_v25  ;;  %v28435_v25 = vld [vmem:[#allocation2 + $0x72] sm:$0xff] }
 0x8b2   : > { %22963 = vmatmul.mubr.msk.f32.gmra.mrb[88].mxu1 %vm454_vm4, %v9318_v3  ;;  %v28443_v3 = vld [vmem:[#allocation2 + $0x82] sm:$0xff] }
 0x8b3   : > { %22981 = vmatprep.mubr.msk.f32.mxu1 %vm454_vm4, %v10078_v49  ;;  %v28439_v49 = vld [vmem:[#allocation2 + $0x7a] sm:$0xff] }
 0x8b6   : > { %22982 = vmatmul.mubr.msk.f32.vlgmr.msra.gmra.mrb[54].mxu1 %vm454_vm4, %v10079_v44  ;;  %v28455_v44 = vld [vmem:[#allocation2 + $0x9a] sm:$0xff] }
 0x8b7   : > { %24430 = vmatpush3.bf16.msra.mxu1 %v28349_v22  ;;  %22984 = vmatprep.mubr.msk.f32.mxu1 %vm454_vm4, %v28383_v62  ;;  %v24439_v22 = vpack.c.bf16 %v10556_v7, %v10555_v5  ;;  %v28475_v5 = vld [vmem:[#allocation2 + $0xc2] sm:$0xff]  ;;  %v28479_v7 = vld [vmem:[#allocation2 + $0xca] sm:$0xff] }
 0x8b8   : > { %24432 = vmatprep.subr.bf16.mxu1 %v24431_v19 }
 0x8ba   : > { %22985 = vmatmul.mubr.msk.f32.gmra.mrb[56].mxu1 %vm454_vm4, %v28388_v29 }
 0x8bb   : > { %22987 = vmatprep.mubr.msk.f32.mxu1 %vm454_vm4, %v28392_v42  ;;  %24434 = vmatpush3.bf16.msra.mxu1 %v24431_v19  ;;  %v28459_v19 = vld [vmem:[#allocation2 + $0xa2] sm:$0xff] }
 0x8bc   : > { %24436 = vmatprep.subr.bf16.mxu1 %v24435_v11 }
 0x8be   : > { %22988 = vmatmul.mubr.msk.f32.gmra.mrb[58].mxu1 %vm454_vm4, %v28396_v15 }
 0x8bf   : > { %22990 = vmatprep.mubr.msk.f32.mxu1 %vm454_vm4, %v28400_v35  ;;  %24438 = vmatpush3.bf16.msra.mxu1 %v24435_v11  ;;  %v28471_v11 = vld [vmem:[#allocation2 + $0xba] sm:$0xff] }
 0x8c0   : > { %24440 = vmatprep.subr.bf16.mxu1 %v24439_v22 }
 0x8c2   : > { %22991 = vmatmul.mubr.msk.f32.gmra.mrb[60].mxu1 %vm454_vm4, %v28406_v23 }
 0x8c3   : > { %22993 = vmatprep.mubr.msk.f32.mxu1 %vm454_vm4, %v28410_v24  ;;  %24442 = vmatpush3.bf16.msra.mxu1 %v24439_v22  ;;  %v28483_v22 = vld [vmem:[#allocation2 + $0xd2] sm:$0xff] }
 0x8c4   : > { %24444 = vmatprep.subr.bf16.mxu1 %v28404_v12 }
 0x8c6   : > { %22994 = vmatmul.mubr.msk.f32.gmra.mrb[62].mxu1 %vm454_vm4, %v28415_v30 }
 0x8c7   : > { %22996 = vmatprep.mubr.msk.f32.mxu1 %vm454_vm4, %v28419_v8 }
 0x8ca   : > { %22997 = vmatmul.mubr.msk.f32.gmra.mrb[64].mxu1 %vm454_vm4, %v28423_v53 }
 0x8cb   : > { %22999 = vmatprep.mubr.msk.f32.mxu1 %vm454_vm4, %v28427_v43 }
 0x8ce   : > { %23000 = vmatmul.mubr.msk.f32.gmra.mrb[66].mxu1 %vm454_vm4, %v28431_v28 }
 0x8cf   : > { %23002 = vmatprep.mubr.msk.f32.mxu1 %vm454_vm4, %v28435_v25 }
 0x8d2   : > { %23003 = vmatmul.mubr.msk.f32.gmra.mrb[68].mxu1 %vm454_vm4, %v28439_v49 }
 0x8d3   : > { %23005 = vmatprep.mubr.msk.f32.mxu1 %vm454_vm4, %v28443_v3 }
 0x8d6   : > { %23006 = vmatmul.mubr.msk.f32.gmra.mrb[70].mxu1 %vm454_vm4, %v28447_v21 }
 0x8d7   : > { %23008 = vmatprep.mubr.msk.f32.mxu1 %vm454_vm4, %v28451_v27 }
 0x8da   : > { %23009 = vmatmul.mubr.msk.f32.gmra.mrb[72].mxu1 %vm454_vm4, %v28455_v44 }
 0x8db   : > { %23011 = vmatprep.mubr.msk.f32.mxu1 %vm454_vm4, %v28459_v19 }
 0x8de   : > { %23012 = vmatmul.mubr.msk.f32.gmra.mrb[74].mxu1 %vm454_vm4, %v28463_v26 }
 0x8df   : > { %23014 = vmatprep.mubr.msk.f32.mxu1 %vm454_vm4, %v28467_v20 }
 0x8e2   : > { %23015 = vmatmul.mubr.msk.f32.gmra.mrb[76].mxu1 %vm454_vm4, %v28471_v11 }
 0x8e3   : > { %23017 = vmatprep.mubr.msk.f32.mxu1 %vm454_vm4, %v28475_v5 }
 0x8e6   : > { %23018 = vmatmul.mubr.msk.f32.gmra.mrb[78].mxu1 %vm454_vm4, %v28479_v7 }
 0x8e7   : > { %23020 = vmatprep.mubr.msk.f32.mxu1 %vm454_vm4, %v28483_v22 }
 0x8ea   : > { %23021 = vmatmul.mubr.msk.f32.gmra.mrb[80].mxu1 %vm454_vm4, %v28487_v16 }
 0x8eb   : > { %23023 = vmatprep.mubr.msk.f32.mxu1 %vm454_vm4, %v10106_v6 }
 0x8ee   : > { %23024 = vmatmul.mubr.msk.f32.gmra.mrb[82].mxu1 %vm454_vm4, %v10107_v9 }
 0x8ef   : > { %23026 = vmatprep.mubr.msk.f32.mxu1 %vm454_vm4, %v10108_v14 }
 0x8f2   : > { %23027 = vmatmul.mubr.msk.f32.gmra.mrb[84].mxu1 %vm454_vm4, %v10109_v33 }
 0x8f3   : > { %23029 = vmatprep.mubr.msk.f32.mxu1 %vm454_vm4, %v10110_v50 }
 0x8f6   : > { %23030 = vmatmul.mubr.msk.f32.gmra.mrb[86].mxu1 %vm454_vm4, %v10111_v2 }
 0x8f7   : > { %23032 = vmatprep.mubr.msk.f32.mxu1 %vm454_vm4, %v10112_v13 }
 0x8fa   : > { %23033 = vmatmul.mubr.msk.f32.gmra.mrb[88].mxu1 %vm454_vm4, %v10113_v4 }
 0x8fb   : > { %23051 = vmatprep.mubr.msk.f32.mxu1 %vm454_vm4, %v28383_v62  ;;  %v11418_v62 = vld [vmem:[#allocation13 + $0x148] sm:$0xff] }
 0x8fc   : > { %v24459_v18 = vpack.c.bf16 %v11418_v62, %v11417_v10  ;;  %v10972_v10 = vld [vmem:[#allocation2 + $0xe3] sm:$0xff]  ;;  %v10973_v62 = vld [vmem:[#allocation2 + $0xeb] sm:$0xff] }
 0x8fe   : > { %23052 = vmatmul.mubr.msk.f32.vlgmr.msra.gmra.mrb[54].mxu1 %vm454_vm4, %v28388_v29  ;;  %v11423_v29 = vld [vmem:[#allocation13 + $0x170] sm:$0xff] }
 0x8ff   : > { %24446 = vmatpush3.bf16.msra.mxu1 %v28404_v12  ;;  %23054 = vmatprep.mubr.msk.f32.mxu1 %vm454_vm4, %v28392_v42  ;;  %v11424_v42 = vld [vmem:[#allocation13 + $0x178] sm:$0xff]  ;;  %v10951_v12 = vld [vmem:[#allocation2 + $0x3b] sm:$0xff] }
 0x900   : > { %24448 = vmatprep.subr.bf16.mxu1 %v24447_v32 }
 0x902   : > { %23055 = vmatmul.mubr.msk.f32.gmra.mrb[56].mxu1 %vm454_vm4, %v28396_v15  ;;  %v10950_v15 = vld [vmem:[#allocation2 + $0x33] sm:$0xff] }
 0x903   : > { %23057 = vmatprep.mubr.msk.f32.mxu1 %vm454_vm4, %v28400_v35  ;;  %24450 = vmatpush3.bf16.msra.mxu1 %v24447_v32  ;;  %v10946_v32 = vld [vmem:[#allocation2 + $0x13] sm:$0xff]  ;;  %v24471_v35 = vpack.c.bf16 %v11424_v42, %v11423_v29  ;;  %v11856_v42 = vld [vmem:[#allocation13 + $0x1a8] sm:$0xff] }
 0x904   : > { %24452 = vmatprep.subr.bf16.mxu1 %v24451_v17  ;;  %v11855_v29 = vld [vmem:[#allocation13 + $0x1a0] sm:$0xff] }
 0x906   : > { %23058 = vmatmul.mubr.msk.f32.gmra.mrb[58].mxu1 %vm454_vm4, %v28406_v23  ;;  %v11851_v23 = vld [vmem:[#allocation13 + $0x180] sm:$0xff] }
 0x907   : > { %23060 = vmatprep.mubr.msk.f32.mxu1 %vm454_vm4, %v28410_v24  ;;  %24454 = vmatpush3.bf16.msra.mxu1 %v24451_v17  ;;  %v11419_v17 = vld [vmem:[#allocation13 + $0x150] sm:$0xff]  ;;  %v11852_v24 = vld [vmem:[#allocation13 + $0x188] sm:$0xff] }
 0x908   : > { %24456 = vmatprep.subr.bf16.mxu1 %v24455_v1 }
 0x90a   : > { %23061 = vmatmul.mubr.msk.f32.gmra.mrb[60].mxu1 %vm454_vm4, %v28415_v30  ;;  %v10952_v30 = vld [vmem:[#allocation2 + $0x43] sm:$0xff] }
 0x90b   : > { %23063 = vmatprep.mubr.msk.f32.mxu1 %vm454_vm4, %v28419_v8  ;;  %24458 = vmatpush3.bf16.msra.mxu1 %v24455_v1  ;;  %v28569_v8 = vpack.c.bf16 %v11852_v24, %v11851_v23  ;;  %v10971_v1 = vld [vmem:[#allocation2 + $0xdb] sm:$0xff]  ;;  %v11857_v23 = vld [vmem:[#allocation13 + $0x1b0] sm:$0xff]  ;;  %v11858_v24 = vld [vmem:[#allocation13 + $0x1b8] sm:$0xff] }
 0x90c   : > { %24460 = vmatprep.subr.bf16.mxu1 %v24459_v18 }
 0x90e   : > { %23064 = vmatmul.mubr.msk.f32.gmra.mrb[62].mxu1 %vm454_vm4, %v28423_v53  ;;  %v10953_v53 = vld [vmem:[#allocation2 + $0x4b] sm:$0xff] }
 0x90f   : > { %23066 = vmatprep.mubr.msk.f32.mxu1 %vm454_vm4, %v28427_v43  ;;  %v10954_v43 = vld [vmem:[#allocation2 + $0x53] sm:$0xff] }
 0x912   : > { %23067 = vmatmul.mubr.msk.f32.gmra.mrb[64].mxu1 %vm454_vm4, %v28431_v28  ;;  %v10955_v28 = vld [vmem:[#allocation2 + $0x5b] sm:$0xff] }
 0x913   : > { %23069 = vmatprep.mubr.msk.f32.mxu1 %vm454_vm4, %v28435_v25  ;;  %v10956_v25 = vld [vmem:[#allocation2 + $0x63] sm:$0xff] }
 0x916   : > { %23070 = vmatmul.mubr.msk.f32.gmra.mrb[66].mxu1 %vm454_vm4, %v28439_v49  ;;  %v10957_v49 = vld [vmem:[#allocation2 + $0x6b] sm:$0xff] }
 0x917   : > { %23072 = vmatprep.mubr.msk.f32.mxu1 %vm454_vm4, %v28443_v3  ;;  %v10958_v3 = vld [vmem:[#allocation2 + $0x73] sm:$0xff] }
 0x91a   : > { %23073 = vmatmul.mubr.msk.f32.gmra.mrb[68].mxu1 %vm454_vm4, %v28447_v21  ;;  %v10959_v21 = vld [vmem:[#allocation2 + $0x7b] sm:$0xff] }
 0x91b   : > { %23075 = vmatprep.mubr.msk.f32.mxu1 %vm454_vm4, %v28451_v27  ;;  %v10960_v27 = vld [vmem:[#allocation2 + $0x83] sm:$0xff] }
 0x91e   : > { %23076 = vmatmul.mubr.msk.f32.gmra.mrb[70].mxu1 %vm454_vm4, %v28455_v44  ;;  %v10961_v44 = vld [vmem:[#allocation2 + $0x8b] sm:$0xff] }
 0x91f   : > { %23078 = vmatprep.mubr.msk.f32.mxu1 %vm454_vm4, %v28459_v19  ;;  %v10962_v19 = vld [vmem:[#allocation2 + $0x93] sm:$0xff] }
 0x922   : > { %23079 = vmatmul.mubr.msk.f32.gmra.mrb[72].mxu1 %vm454_vm4, %v28463_v26  ;;  %v10963_v26 = vld [vmem:[#allocation2 + $0x9b] sm:$0xff] }
 0x923   : > { %23081 = vmatprep.mubr.msk.f32.mxu1 %vm454_vm4, %v28467_v20  ;;  %v10964_v20 = vld [vmem:[#allocation2 + $0xa3] sm:$0xff] }
 0x926   : > { %23082 = vmatmul.mubr.msk.f32.gmra.mrb[74].mxu1 %vm454_vm4, %v28471_v11  ;;  %v10965_v11 = vld [vmem:[#allocation2 + $0xab] sm:$0xff] }
 0x927   : > { %23084 = vmatprep.mubr.msk.f32.mxu1 %vm454_vm4, %v28475_v5  ;;  %v10966_v5 = vld [vmem:[#allocation2 + $0xb3] sm:$0xff] }
 0x92a   : > { %23085 = vmatmul.mubr.msk.f32.gmra.mrb[76].mxu1 %vm454_vm4, %v28479_v7  ;;  %v10967_v7 = vld [vmem:[#allocation2 + $0xbb] sm:$0xff] }
 0x92b   : > { %23087 = vmatprep.mubr.msk.f32.mxu1 %vm454_vm4, %v28483_v22  ;;  %v10968_v22 = vld [vmem:[#allocation2 + $0xc3] sm:$0xff] }
 0x92e   : > { %23088 = vmatmul.mubr.msk.f32.gmra.mrb[78].mxu1 %vm454_vm4, %v28487_v16  ;;  %v10969_v16 = vld [vmem:[#allocation2 + $0xcb] sm:$0xff] }
 0x92f   : > { %23090 = vmatprep.mubr.msk.f32.mxu1 %vm454_vm4, %v10106_v6  ;;  %v10970_v6 = vld [vmem:[#allocation2 + $0xd3] sm:$0xff] }
 0x932   : > { %23091 = vmatmul.mubr.msk.f32.gmra.mrb[80].mxu1 %vm454_vm4, %v10107_v9  ;;  %v11422_v9 = vld [vmem:[#allocation13 + $0x168] sm:$0xff] }
 0x933   : > { %23093 = vmatprep.mubr.msk.f32.mxu1 %vm454_vm4, %v10108_v14  ;;  %v10947_v14 = vld [vmem:[#allocation2 + $0x1b] sm:$0xff] }
 0x936   : > { %23094 = vmatmul.mubr.msk.f32.gmra.mrb[82].mxu1 %vm454_vm4, %v10109_v33  ;;  %v24463_v33 = vpack.c.bf16 %v11420_v34, %v11419_v17  ;;  %v10977_v17 = vld [vmem:[#allocation2 + $0x10b] sm:$0xff]  ;;  %v10978_v34 = vld [vmem:[#allocation2 + $0x113] sm:$0xff] }
 0x937   : > { %23096 = vmatprep.mubr.msk.f32.mxu1 %vm454_vm4, %v10110_v50  ;;  %v11421_v50 = vld [vmem:[#allocation13 + $0x160] sm:$0xff] }
 0x93a   : > { %23097 = vmatmul.mubr.msk.f32.gmra.mrb[84].mxu1 %vm454_vm4, %v10111_v2  ;;  %v10949_v2 = vld [vmem:[#allocation2 + $0x2b] sm:$0xff] }
 0x93b   : > { %23099 = vmatprep.mubr.msk.f32.mxu1 %vm454_vm4, %v10112_v13  ;;  %v10948_v13 = vld [vmem:[#allocation2 + $0x23] sm:$0xff] }
 0x93e   : > { %23100 = vmatmul.mubr.msk.f32.gmra.mrb[86].mxu1 %vm454_vm4, %v10113_v4  ;;  %v24467_v4 = vpack.c.bf16 %v11422_v9, %v11421_v50  ;;  %v11853_v50 = vld [vmem:[#allocation13 + $0x190] sm:$0xff]  ;;  %v11854_v9 = vld [vmem:[#allocation13 + $0x198] sm:$0xff] }
 0x93f   : > { %23102 = vmatprep.mubr.msk.f32.mxu1 %vm454_vm4, %v10546_v31  ;;  %v10975_v31 = vld [vmem:[#allocation2 + $0xfb] sm:$0xff] }
 0x942   : > { %23103 = vmatmul.mubr.msk.f32.gmra.mrb[88].mxu1 %vm454_vm4, %v10547_v0  ;;  %v10976_v0 = vld [vmem:[#allocation2 + $0x103] sm:$0xff] }
 0x943   : > { %23121 = vmatprep.mubr.msk.f32.mxu1 %vm454_vm4, %v10946_v32  ;;  %v10979_v32 = vld [vmem:[#allocation2 + $0x11b] sm:$0xff] }
 0x946   : > { %23122 = vmatmul.mubr.msk.f32.vlgmr.msra.gmra.mrb[54].mxu1 %vm454_vm4, %v10947_v14  ;;  %v10981_v14 = vld [vmem:[#allocation2 + $0x12b] sm:$0xff] }
 0x947   : > { %24462 = vmatpush3.bf16.msra.mxu1 %v24459_v18  ;;  %23124 = vmatprep.mubr.msk.f32.mxu1 %vm454_vm4, %v10948_v13  ;;  %v10974_v18 = vld [vmem:[#allocation2 + $0xf3] sm:$0xff] }
 0x948   : > { %24464 = vmatprep.subr.bf16.mxu1 %v24463_v33  ;;  %v11380_v13 = vld [vmem:[#allocation2 + $0x14] sm:$0xff] }
 0x94a   : > { %23125 = vmatmul.mubr.msk.f32.gmra.mrb[56].mxu1 %vm454_vm4, %v10949_v2  ;;  %v11381_v2 = vld [vmem:[#allocation2 + $0x1c] sm:$0xff] }
 0x94b   : > { %23127 = vmatprep.mubr.msk.f32.mxu1 %vm454_vm4, %v10950_v15  ;;  %24466 = vmatpush3.bf16.msra.mxu1 %v24463_v33  ;;  %v10980_v33 = vld [vmem:[#allocation2 + $0x123] sm:$0xff] }
 0x94c   : > { %24468 = vmatprep.subr.bf16.mxu1 %v24467_v4  ;;  %v28603_v15 = vld [vmem:[#allocation2 + $0x24] sm:$0xff] }
 0x94e   : > { %23128 = vmatmul.mubr.msk.f32.gmra.mrb[58].mxu1 %vm454_vm4, %v10951_v12  ;;  %v28608_v12 = vld [vmem:[#allocation2 + $0x2c] sm:$0xff] }
 0x94f   : > { %23130 = vmatprep.mubr.msk.f32.mxu1 %vm454_vm4, %v10952_v30  ;;  %24470 = vmatpush3.bf16.msra.mxu1 %v24467_v4  ;;  %v24479_v4 = vpack.c.bf16 %v11854_v9, %v11853_v50  ;;  %v28612_v30 = vld [vmem:[#allocation2 + $0x34] sm:$0xff]  ;;  %v11411_v50 = vld [vmem:[#allocation2 + $0x10c] sm:$0xff] }
 0x950   : > { %24472 = vmatprep.subr.bf16.mxu1 %v24471_v35  ;;  %v11412_v9 = vld [vmem:[#allocation2 + $0x114] sm:$0xff] }
 0x952   : > { %23131 = vmatmul.mubr.msk.f32.gmra.mrb[60].mxu1 %vm454_vm4, %v10953_v53  ;;  %v28616_v53 = vld [vmem:[#allocation2 + $0x3c] sm:$0xff] }
 0x953   : > { %23133 = vmatprep.mubr.msk.f32.mxu1 %vm454_vm4, %v10954_v43  ;;  %24474 = vmatpush3.bf16.msra.mxu1 %v24471_v35  ;;  %v24483_v35 = vpack.c.bf16 %v11856_v42, %v11855_v29  ;;  %v12285_v43 = vld [vmem:[#allocation13 + $0x1c0] sm:$0xff]  ;;  %v12287_v29 = vld [vmem:[#allocation13 + $0x1d0] sm:$0xff]  ;;  %v12288_v42 = vld [vmem:[#allocation13 + $0x1d8] sm:$0xff] }
 0x954   : > { %24476 = vmatprep.subr.bf16.mxu1 %v28569_v8 }
 0x956   : > { %23134 = vmatmul.mubr.msk.f32.gmra.mrb[62].mxu1 %vm454_vm4, %v10955_v28  ;;  %v12286_v28 = vld [vmem:[#allocation13 + $0x1c8] sm:$0xff] }
 0x957   : > { %23136 = vmatprep.mubr.msk.f32.mxu1 %vm454_vm4, %v10956_v25  ;;  %v28620_v25 = vld [vmem:[#allocation2 + $0x44] sm:$0xff] }
 0x95a   : > { %23137 = vmatmul.mubr.msk.f32.gmra.mrb[64].mxu1 %vm454_vm4, %v10957_v49  ;;  %v28624_v49 = vpack.c.bf16 %v12286_v28, %v12285_v43  ;;  %v12291_v43 = vld [vmem:[#allocation13 + $0x1f0] sm:$0xff]  ;;  %v12292_v28 = vld [vmem:[#allocation13 + $0x1f8] sm:$0xff] }
 0x95b   : > { %23139 = vmatprep.mubr.msk.f32.mxu1 %vm454_vm4, %v10958_v3  ;;  %v28626_v3 = vld [vmem:[#allocation2 + $0x4c] sm:$0xff] }
 0x95e   : > { %23140 = vmatmul.mubr.msk.f32.gmra.mrb[66].mxu1 %vm454_vm4, %v10959_v21  ;;  %v28630_v21 = vld [vmem:[#allocation2 + $0x54] sm:$0xff] }
 0x95f   : > { %23142 = vmatprep.mubr.msk.f32.mxu1 %vm454_vm4, %v10960_v27  ;;  %v28635_v27 = vld [vmem:[#allocation2 + $0x5c] sm:$0xff] }
 0x962   : > { %23143 = vmatmul.mubr.msk.f32.gmra.mrb[68].mxu1 %vm454_vm4, %v10961_v44  ;;  %v28639_v44 = vld [vmem:[#allocation2 + $0x64] sm:$0xff] }
 0x963   : > { %23145 = vmatprep.mubr.msk.f32.mxu1 %vm454_vm4, %v10962_v19  ;;  %v28643_v19 = vld [vmem:[#allocation2 + $0x6c] sm:$0xff] }
 0x966   : > { %23146 = vmatmul.mubr.msk.f32.gmra.mrb[70].mxu1 %vm454_vm4, %v10963_v26  ;;  %v28647_v26 = vld [vmem:[#allocation2 + $0x74] sm:$0xff] }
 0x967   : > { %23148 = vmatprep.mubr.msk.f32.mxu1 %vm454_vm4, %v10964_v20  ;;  %v28651_v20 = vld [vmem:[#allocation2 + $0x7c] sm:$0xff] }
 0x96a   : > { %23149 = vmatmul.mubr.msk.f32.gmra.mrb[72].mxu1 %vm454_vm4, %v10965_v11  ;;  %v28655_v11 = vld [vmem:[#allocation2 + $0x84] sm:$0xff] }
 0x96b   : > { %23151 = vmatprep.mubr.msk.f32.mxu1 %vm454_vm4, %v10966_v5  ;;  %v28659_v5 = vld [vmem:[#allocation2 + $0x8c] sm:$0xff] }
 0x96e   : > { %23152 = vmatmul.mubr.msk.f32.gmra.mrb[74].mxu1 %vm454_vm4, %v10967_v7  ;;  %v28663_v7 = vld [vmem:[#allocation2 + $0x94] sm:$0xff] }
 0x96f   : > { %23154 = vmatprep.mubr.msk.f32.mxu1 %vm454_vm4, %v10968_v22  ;;  %v28667_v22 = vld [vmem:[#allocation2 + $0x9c] sm:$0xff] }
 0x972   : > { %23155 = vmatmul.mubr.msk.f32.gmra.mrb[76].mxu1 %vm454_vm4, %v10969_v16  ;;  %v28671_v16 = vld [vmem:[#allocation2 + $0xa4] sm:$0xff] }
 0x973   : > { %23157 = vmatprep.mubr.msk.f32.mxu1 %vm454_vm4, %v10970_v6  ;;  %v28675_v6 = vld [vmem:[#allocation2 + $0xac] sm:$0xff] }
 0x976   : > { %23158 = vmatmul.mubr.msk.f32.gmra.mrb[78].mxu1 %vm454_vm4, %v10971_v1  ;;  %v28679_v1 = vld [vmem:[#allocation2 + $0xb4] sm:$0xff] }
 0x977   : > { %23160 = vmatprep.mubr.msk.f32.mxu1 %vm454_vm4, %v10972_v10  ;;  %v28683_v10 = vld [vmem:[#allocation2 + $0xbc] sm:$0xff] }
 0x97a   : > { %23161 = vmatmul.mubr.msk.f32.gmra.mrb[80].mxu1 %vm454_vm4, %v10973_v62  ;;  %v28687_v62 = vld [vmem:[#allocation2 + $0xc4] sm:$0xff] }
 0x97b   : > { %23163 = vmatprep.mubr.msk.f32.mxu1 %vm454_vm4, %v10974_v18  ;;  %v28691_v18 = vld [vmem:[#allocation2 + $0xcc] sm:$0xff] }
 0x97e   : > { %23164 = vmatmul.mubr.msk.f32.gmra.mrb[82].mxu1 %vm454_vm4, %v10975_v31  ;;  %v28695_v31 = vld [vmem:[#allocation2 + $0xd4] sm:$0xff] }
 0x97f   : > { %23166 = vmatprep.mubr.msk.f32.mxu1 %vm454_vm4, %v10976_v0  ;;  %v28699_v0 = vld [vmem:[#allocation2 + $0xdc] sm:$0xff] }
 0x982   : > { %23167 = vmatmul.mubr.msk.f32.gmra.mrb[84].mxu1 %vm454_vm4, %v10977_v17  ;;  %v28703_v17 = vld [vmem:[#allocation2 + $0xe4] sm:$0xff] }
 0x983   : > { %23169 = vmatprep.mubr.msk.f32.mxu1 %vm454_vm4, %v10978_v34  ;;  %v28707_v34 = vld [vmem:[#allocation2 + $0xec] sm:$0xff] }
 0x986   : > { %23170 = vmatmul.mubr.msk.f32.gmra.mrb[86].mxu1 %vm454_vm4, %v10979_v32  ;;  %v11408_v32 = vld [vmem:[#allocation2 + $0xf4] sm:$0xff] }
 0x987   : > { %23172 = vmatprep.mubr.msk.f32.mxu1 %vm454_vm4, %v10980_v33  ;;  %v11409_v33 = vld [vmem:[#allocation2 + $0xfc] sm:$0xff] }
 0x98a   : > { %23173 = vmatmul.mubr.msk.f32.gmra.mrb[88].mxu1 %vm454_vm4, %v10981_v14  ;;  %v11410_v14 = vld [vmem:[#allocation2 + $0x104] sm:$0xff] }
 0x98b   : > { %23191 = vmatprep.mubr.msk.f32.mxu1 %vm454_vm4, %v11380_v13  ;;  %v11413_v13 = vld [vmem:[#allocation2 + $0x11c] sm:$0xff] }
 0x98e   : > { %23192 = vmatmul.mubr.msk.f32.vlgmr.msra.gmra.mrb[54].mxu1 %vm454_vm4, %v11381_v2  ;;  %v11415_v2 = vld [vmem:[#allocation2 + $0x12c] sm:$0xff] }
 0x98f   : > { %24478 = vmatpush3.bf16.msra.mxu1 %v28569_v8  ;;  %23194 = vmatprep.mubr.msk.f32.mxu1 %vm454_vm4, %v28603_v15  ;;  %v24487_v8 = vpack.c.bf16 %v11858_v24, %v11857_v23  ;;  %v12289_v23 = vld [vmem:[#allocation13 + $0x1e0] sm:$0xff]  ;;  %v12290_v24 = vld [vmem:[#allocation13 + $0x1e8] sm:$0xff] }
 0x990   : > { %24480 = vmatprep.subr.bf16.mxu1 %v24479_v4 }
 0x992   : > { %23195 = vmatmul.mubr.msk.f32.gmra.mrb[56].mxu1 %vm454_vm4, %v28608_v12 }
 0x993   : > { %23197 = vmatprep.mubr.msk.f32.mxu1 %vm454_vm4, %v28612_v30  ;;  %24482 = vmatpush3.bf16.msra.mxu1 %v24479_v4  ;;  %v11414_v4 = vld [vmem:[#allocation2 + $0x124] sm:$0xff] }
 0x994   : > { %24484 = vmatprep.subr.bf16.mxu1 %v24483_v35 }
 0x996   : > { %23198 = vmatmul.mubr.msk.f32.gmra.mrb[58].mxu1 %vm454_vm4, %v28616_v53 }
 0x997   : > { %23200 = vmatprep.mubr.msk.f32.mxu1 %vm454_vm4, %v28620_v25  ;;  %24486 = vmatpush3.bf16.msra.mxu1 %v24483_v35  ;;  %v24495_v35 = vpack.c.bf16 %v12288_v42, %v12287_v29  ;;  %v12719_v29 = vld [vmem:[#allocation13 + $0x200] sm:$0xff]  ;;  %v13312_v42 = vld [vmem:[#allocation15 + $0x78] sm:$0xff] }
 0x998   : > { %24488 = vmatprep.subr.bf16.mxu1 %v24487_v8 }
 0x99a   : > { %23201 = vmatmul.mubr.msk.f32.gmra.mrb[60].mxu1 %vm454_vm4, %v28626_v3 }
 0x99b   : > { %23203 = vmatprep.mubr.msk.f32.mxu1 %vm454_vm4, %v28630_v21  ;;  %24490 = vmatpush3.bf16.msra.mxu1 %v24487_v8  ;;  %v24499_v8 = vpack.c.bf16 %v12290_v24, %v12289_v23  ;;  %v12260_v23 = vld [vmem:[#allocation2 + $0x85] sm:$0xff] }
 0x99c   : > { %24492 = vmatprep.subr.bf16.mxu1 %v28624_v49 }
 0x99e   : > { %23204 = vmatmul.mubr.msk.f32.gmra.mrb[62].mxu1 %vm454_vm4, %v28635_v27 }
 0x99f   : > { %23206 = vmatprep.mubr.msk.f32.mxu1 %vm454_vm4, %v28639_v44 }
 0x9a2   : > { %23207 = vmatmul.mubr.msk.f32.gmra.mrb[64].mxu1 %vm454_vm4, %v28643_v19 }
 0x9a3   : > { %23209 = vmatprep.mubr.msk.f32.mxu1 %vm454_vm4, %v28647_v26 }
 0x9a6   : > { %23210 = vmatmul.mubr.msk.f32.gmra.mrb[66].mxu1 %vm454_vm4, %v28651_v20 }
 0x9a7   : > { %23212 = vmatprep.mubr.msk.f32.mxu1 %vm454_vm4, %v28655_v11 }
 0x9aa   : > { %23213 = vmatmul.mubr.msk.f32.gmra.mrb[68].mxu1 %vm454_vm4, %v28659_v5 }
 0x9ab   : > { %23215 = vmatprep.mubr.msk.f32.mxu1 %vm454_vm4, %v28663_v7 }
 0x9ae   : > { %23216 = vmatmul.mubr.msk.f32.gmra.mrb[70].mxu1 %vm454_vm4, %v28667_v22 }
 0x9af   : > { %23218 = vmatprep.mubr.msk.f32.mxu1 %vm454_vm4, %v28671_v16 }
 0x9b2   : > { %23219 = vmatmul.mubr.msk.f32.gmra.mrb[72].mxu1 %vm454_vm4, %v28675_v6 }
 0x9b3   : > { %23221 = vmatprep.mubr.msk.f32.mxu1 %vm454_vm4, %v28679_v1 }
 0x9b6   : > { %23222 = vmatmul.mubr.msk.f32.gmra.mrb[74].mxu1 %vm454_vm4, %v28683_v10 }
 0x9b7   : > { %23224 = vmatprep.mubr.msk.f32.mxu1 %vm454_vm4, %v28687_v62 }
 0x9ba   : > { %23225 = vmatmul.mubr.msk.f32.gmra.mrb[76].mxu1 %vm454_vm4, %v28691_v18 }
 0x9bb   : > { %23227 = vmatprep.mubr.msk.f32.mxu1 %vm454_vm4, %v28695_v31 }
 0x9be   : > { %23228 = vmatmul.mubr.msk.f32.gmra.mrb[78].mxu1 %vm454_vm4, %v28699_v0 }
 0x9bf   : > { %23230 = vmatprep.mubr.msk.f32.mxu1 %vm454_vm4, %v28703_v17 }
 0x9c2   : > { %23231 = vmatmul.mubr.msk.f32.gmra.mrb[80].mxu1 %vm454_vm4, %v28707_v34 }
 0x9c3   : > { %23233 = vmatprep.mubr.msk.f32.mxu1 %vm454_vm4, %v11408_v32 }
 0x9c6   : > { %23234 = vmatmul.mubr.msk.f32.gmra.mrb[82].mxu1 %vm454_vm4, %v11409_v33 }
 0x9c7   : > { %23236 = vmatprep.mubr.msk.f32.mxu1 %vm454_vm4, %v11410_v14 }
 0x9ca   : > { %23237 = vmatmul.mubr.msk.f32.gmra.mrb[84].mxu1 %vm454_vm4, %v11411_v50 }
 0x9cb   : > { %23239 = vmatprep.mubr.msk.f32.mxu1 %vm454_vm4, %v11412_v9 }
 0x9ce   : > { %23240 = vmatmul.mubr.msk.f32.gmra.mrb[86].mxu1 %vm454_vm4, %v11413_v13 }
 0x9cf   : > { %23242 = vmatprep.mubr.msk.f32.mxu1 %vm454_vm4, %v11414_v4 }
 0x9d2   : > { %23243 = vmatmul.mubr.msk.f32.gmra.mrb[88].mxu1 %vm454_vm4, %v11415_v2 }
 0x9d3   : > { %23261 = vmatprep.mubr.msk.f32.mxu1 %vm454_vm4, %v28603_v15  ;;  %v24503_v15 = vpack.c.bf16 %v12292_v28, %v12291_v43  ;;  %v12262_v43 = vld [vmem:[#allocation2 + $0x95] sm:$0xff]  ;;  %v12263_v28 = vld [vmem:[#allocation2 + $0x9d] sm:$0xff] }
 0x9d6   : > { %23262 = vmatmul.mubr.msk.f32.vlgmr.msra.gmra.mrb[54].mxu1 %vm454_vm4, %v28608_v12  ;;  %v12720_v12 = vld [vmem:[#allocation13 + $0x208] sm:$0xff] }
 0x9d7   : > { %24494 = vmatpush3.bf16.msra.mxu1 %v28624_v49  ;;  %23264 = vmatprep.mubr.msk.f32.mxu1 %vm454_vm4, %v28612_v30  ;;  %v24507_v30 = vpack.c.bf16 %v12720_v12, %v12719_v29  ;;  %v12721_v49 = vld [vmem:[#allocation13 + $0x210] sm:$0xff]  ;;  %v12266_v12 = vld [vmem:[#allocation2 + $0xb5] sm:$0xff] }
 0x9d8   : > { %24496 = vmatprep.subr.bf16.mxu1 %v24495_v35  ;;  %v12265_v29 = vld [vmem:[#allocation2 + $0xad] sm:$0xff] }
 0x9da   : > { %23265 = vmatmul.mubr.msk.f32.gmra.mrb[56].mxu1 %vm454_vm4, %v28616_v53  ;;  %v11848_v53 = vld [vmem:[#allocation2 + $0x134] sm:$0xff] }
 0x9db   : > { %23267 = vmatprep.mubr.msk.f32.mxu1 %vm454_vm4, %v28620_v25  ;;  %24498 = vmatpush3.bf16.msra.mxu1 %v24495_v35  ;;  %v11849_v25 = vld [vmem:[#allocation2 + $0x13c] sm:$0xff] }
 0x9dc   : > { %24500 = vmatprep.subr.bf16.mxu1 %v24499_v8  ;;  %v12259_v35 = vld [vmem:[#allocation2 + $0x7d] sm:$0xff] }
 0x9de   : > { %23268 = vmatmul.mubr.msk.f32.gmra.mrb[58].mxu1 %vm454_vm4, %v28626_v3  ;;  %v12722_v3 = vld [vmem:[#allocation13 + $0x218] sm:$0xff] }
 0x9df   : > { %23270 = vmatprep.mubr.msk.f32.mxu1 %vm454_vm4, %v28630_v21  ;;  %24502 = vmatpush3.bf16.msra.mxu1 %v24499_v8  ;;  %v12248_v21 = vld [vmem:[#allocation2 + $0x25] sm:$0xff]  ;;  %v12261_v8 = vld [vmem:[#allocation2 + $0x8d] sm:$0xff] }
 0x9e0   : > { %24504 = vmatprep.subr.bf16.mxu1 %v24503_v15 }
 0x9e2   : > { %23271 = vmatmul.mubr.msk.f32.gmra.mrb[60].mxu1 %vm454_vm4, %v28635_v27  ;;  %v24511_v27 = vpack.c.bf16 %v12722_v3, %v12721_v49  ;;  %v12270_v49 = vld [vmem:[#allocation2 + $0xd5] sm:$0xff]  ;;  %v12271_v3 = vld [vmem:[#allocation2 + $0xdd] sm:$0xff] }
 0x9e3   : > { %23273 = vmatprep.mubr.msk.f32.mxu1 %vm454_vm4, %v28639_v44  ;;  %24506 = vmatpush3.bf16.msra.mxu1 %v24503_v15  ;;  %v12249_v44 = vld [vmem:[#allocation2 + $0x2d] sm:$0xff]  ;;  %v12264_v15 = vld [vmem:[#allocation2 + $0xa5] sm:$0xff] }
 0x9e4   : > { %24508 = vmatprep.subr.bf16.mxu1 %v24507_v30 }
 0x9e6   : > { %23274 = vmatmul.mubr.msk.f32.gmra.mrb[62].mxu1 %vm454_vm4, %v28643_v19  ;;  %v12723_v19 = vld [vmem:[#allocation13 + $0x220] sm:$0xff] }
 0x9e7   : > { %23276 = vmatprep.mubr.msk.f32.mxu1 %vm454_vm4, %v28647_v26  ;;  %v12724_v26 = vld [vmem:[#allocation13 + $0x228] sm:$0xff] }
 0x9ea   : > { %23277 = vmatmul.mubr.msk.f32.gmra.mrb[64].mxu1 %vm454_vm4, %v28651_v20  ;;  %v12250_v20 = vld [vmem:[#allocation2 + $0x35] sm:$0xff] }
 0x9eb   : > { %23279 = vmatprep.mubr.msk.f32.mxu1 %vm454_vm4, %v28655_v11  ;;  %v24515_v11 = vpack.c.bf16 %v12724_v26, %v12723_v19  ;;  %v12275_v19 = vld [vmem:[#allocation2 + $0xfd] sm:$0xff]  ;;  %v12276_v26 = vld [vmem:[#allocation2 + $0x105] sm:$0xff] }
 0x9ee   : > { %23280 = vmatmul.mubr.msk.f32.gmra.mrb[66].mxu1 %vm454_vm4, %v28659_v5  ;;  %v12251_v5 = vld [vmem:[#allocation2 + $0x3d] sm:$0xff] }
 0x9ef   : > { %23282 = vmatprep.mubr.msk.f32.mxu1 %vm454_vm4, %v28663_v7  ;;  %v12725_v7 = vld [vmem:[#allocation13 + $0x230] sm:$0xff] }
 0x9f2   : > { %23283 = vmatmul.mubr.msk.f32.gmra.mrb[68].mxu1 %vm454_vm4, %v28667_v22  ;;  %v12726_v22 = vld [vmem:[#allocation13 + $0x238] sm:$0xff] }
 0x9f3   : > { %23285 = vmatprep.mubr.msk.f32.mxu1 %vm454_vm4, %v28671_v16  ;;  %v12252_v16 = vld [vmem:[#allocation2 + $0x45] sm:$0xff] }
 0x9f6   : > { %23286 = vmatmul.mubr.msk.f32.gmra.mrb[70].mxu1 %vm454_vm4, %v28675_v6  ;;  %v24519_v6 = vpack.c.bf16 %v12726_v22, %v12725_v7  ;;  %v12280_v7 = vld [vmem:[#allocation2 + $0x125] sm:$0xff]  ;;  %v12282_v22 = vld [vmem:[#allocation2 + $0x135] sm:$0xff] }
 0x9f7   : > { %23288 = vmatprep.mubr.msk.f32.mxu1 %vm454_vm4, %v28679_v1  ;;  %v12253_v1 = vld [vmem:[#allocation2 + $0x4d] sm:$0xff] }
 0x9fa   : > { %23289 = vmatmul.mubr.msk.f32.gmra.mrb[72].mxu1 %vm454_vm4, %v28683_v10  ;;  %v12254_v10 = vld [vmem:[#allocation2 + $0x55] sm:$0xff] }
 0x9fb   : > { %23291 = vmatprep.mubr.msk.f32.mxu1 %vm454_vm4, %v28687_v62  ;;  %v12255_v62 = vld [vmem:[#allocation2 + $0x5d] sm:$0xff] }
 0x9fe   : > { %23292 = vmatmul.mubr.msk.f32.gmra.mrb[74].mxu1 %vm454_vm4, %v28691_v18  ;;  %v12256_v18 = vld [vmem:[#allocation2 + $0x65] sm:$0xff] }
 0x9ff   : > { %23294 = vmatprep.mubr.msk.f32.mxu1 %vm454_vm4, %v28695_v31  ;;  %v13305_v31 = vld [vmem:[#allocation15 + $0x40] sm:$0xff] }
 0xa02   : > { %23295 = vmatmul.mubr.msk.f32.gmra.mrb[76].mxu1 %vm454_vm4, %v28699_v0  ;;  %v13306_v0 = vld [vmem:[#allocation15 + $0x48] sm:$0xff] }
 0xa03   : > { %23297 = vmatprep.mubr.msk.f32.mxu1 %vm454_vm4, %v28703_v17  ;;  %v13307_v17 = vld [vmem:[#allocation15 + $0x50] sm:$0xff] }
 0xa06   : > { %23298 = vmatmul.mubr.msk.f32.gmra.mrb[78].mxu1 %vm454_vm4, %v28707_v34  ;;  %v24523_v34 = vpack.c.bf16 %v13306_v0, %v13305_v31  ;;  %v12686_v31 = vld [vmem:[#allocation2 + $0x46] sm:$0xff]  ;;  %v12687_v0 = vld [vmem:[#allocation2 + $0x4e] sm:$0xff] }
 0xa07   : > { %23300 = vmatprep.mubr.msk.f32.mxu1 %vm454_vm4, %v11408_v32  ;;  %v13308_v32 = vld [vmem:[#allocation15 + $0x58] sm:$0xff] }
 0xa08   : > { %24524 = vmatprep.subr.bf16.mxu0 %v24523_v34 }
 0xa09   : > { %24526 = vmatpush3.bf16.msra.mxu0 %v24523_v34  ;;  %v12689_v34 = vld [vmem:[#allocation2 + $0x5e] sm:$0xff] }
 0xa0a   : > { %23301 = vmatmul.mubr.msk.f32.gmra.mrb[80].mxu1 %vm454_vm4, %v11409_v33  ;;  %v24527_v33 = vpack.c.bf16 %v13308_v32, %v13307_v17  ;;  %v12688_v17 = vld [vmem:[#allocation2 + $0x56] sm:$0xff]  ;;  %v12690_v32 = vld [vmem:[#allocation2 + $0x66] sm:$0xff] }
 0xa0b   : > { %23303 = vmatprep.mubr.msk.f32.mxu1 %vm454_vm4, %v11410_v14  ;;  %v13309_v14 = vld [vmem:[#allocation15 + $0x60] sm:$0xff] }
 0xa0c   : > { %24528 = vmatprep.subr.bf16.mxu0 %v24527_v33 }
 0xa0d   : > { %24530 = vmatpush3.bf16.msra.mxu0 %v24527_v33  ;;  %v12691_v33 = vld [vmem:[#allocation2 + $0x6e] sm:$0xff] }
 0xa0e   : > { %23304 = vmatmul.mubr.msk.f32.gmra.mrb[82].mxu1 %vm454_vm4, %v11411_v50  ;;  %v13310_v50 = vld [vmem:[#allocation15 + $0x68] sm:$0xff] }
 0xa0f   : > { %23306 = vmatprep.mubr.msk.f32.mxu1 %vm454_vm4, %v11412_v9  ;;  %v12257_v9 = vld [vmem:[#allocation2 + $0x6d] sm:$0xff] }
 0xa12   : > { %23307 = vmatmul.mubr.msk.f32.gmra.mrb[84].mxu1 %vm454_vm4, %v11413_v13  ;;  %v12258_v13 = vld [vmem:[#allocation2 + $0x75] sm:$0xff] }
 0xa13   : > { %23309 = vmatprep.mubr.msk.f32.mxu1 %vm454_vm4, %v11414_v4  ;;  %v24531_v4 = vpack.c.bf16 %v13310_v50, %v13309_v14  ;;  %v12692_v14 = vld [vmem:[#allocation2 + $0x76] sm:$0xff]  ;;  %v12693_v50 = vld [vmem:[#allocation2 + $0x7e] sm:$0xff] }
 0xa15   : > { %24532 = vmatprep.subr.bf16.mxu0 %v24531_v4 }
 0xa16   : > { %23310 = vmatmul.mubr.msk.f32.gmra.mrb[86].mxu1 %vm454_vm4, %v11415_v2  ;;  %v13311_v2 = vld [vmem:[#allocation15 + $0x70] sm:$0xff]  ;;  %24534 = vmatpush3.bf16.msra.mxu0 %v24531_v4  ;;  %v12696_v4 = vld [vmem:[#allocation2 + $0x96] sm:$0xff] }
 0xa17   : > { %23312 = vmatprep.mubr.msk.f32.mxu1 %vm454_vm4, %v11848_v53  ;;  %v24535_v24 = vpack.c.bf16 %v13312_v42, %v13311_v2  ;;  %v12268_v53 = vld [vmem:[#allocation2 + $0xc5] sm:$0xff] }
 0xa18   : > { %v12697_v2 = vld [vmem:[#allocation2 + $0x9e] sm:$0xff]  ;;  %v12698_v42 = vld [vmem:[#allocation2 + $0xa6] sm:$0xff] }
 0xa19   : > { %24536 = vmatprep.subr.bf16.mxu0 %v24535_v24 }
 0xa1a   : > { %23313 = vmatmul.mubr.msk.f32.gmra.mrb[88].mxu1 %vm454_vm4, %v11849_v25  ;;  %24538 = vmatpush3.bf16.msra.mxu0 %v24535_v24  ;;  %v12269_v25 = vld [vmem:[#allocation2 + $0xcd] sm:$0xff]  ;;  %v12701_v24 = vld [vmem:[#allocation2 + $0xbe] sm:$0xff] }
 0xa1b   : > { %23331 = vmatprep.mubr.msk.f32.mxu1 %vm454_vm4, %v12248_v21  ;;  %v12272_v21 = vld [vmem:[#allocation2 + $0xe5] sm:$0xff] }
 0xa1e   : > { %23332 = vmatmul.mubr.msk.f32.vlgmr.msra.gmra.mrb[54].mxu1 %vm454_vm4, %v12249_v44  ;;  %v12274_v44 = vld [vmem:[#allocation2 + $0xf5] sm:$0xff] }
 0xa1f   : > { %24510 = vmatpush3.bf16.msra.mxu1 %v24507_v30  ;;  %23334 = vmatprep.mubr.msk.f32.mxu1 %vm454_vm4, %v12250_v20  ;;  %v12267_v30 = vld [vmem:[#allocation2 + $0xbd] sm:$0xff]  ;;  %v12277_v20 = vld [vmem:[#allocation2 + $0x10d] sm:$0xff] }
 0xa20   : > { %24512 = vmatprep.subr.bf16.mxu1 %v24511_v27 }
 0xa22   : > { %23335 = vmatmul.mubr.msk.f32.gmra.mrb[56].mxu1 %vm454_vm4, %v12251_v5  ;;  %v12279_v5 = vld [vmem:[#allocation2 + $0x11d] sm:$0xff] }
 0xa23   : > { %23337 = vmatprep.mubr.msk.f32.mxu1 %vm454_vm4, %v12252_v16  ;;  %24514 = vmatpush3.bf16.msra.mxu1 %v24511_v27  ;;  %v12273_v27 = vld [vmem:[#allocation2 + $0xed] sm:$0xff] }
 0xa24   : > { %24516 = vmatprep.subr.bf16.mxu1 %v24515_v11  ;;  %v12281_v16 = vld [vmem:[#allocation2 + $0x12d] sm:$0xff] }
 0xa26   : > { %23338 = vmatmul.mubr.msk.f32.gmra.mrb[58].mxu1 %vm454_vm4, %v12253_v1  ;;  %v12682_v1 = vld [vmem:[#allocation2 + $0x26] sm:$0xff] }
 0xa27   : > { %23340 = vmatprep.mubr.msk.f32.mxu1 %vm454_vm4, %v12254_v10  ;;  %24518 = vmatpush3.bf16.msra.mxu1 %v24515_v11  ;;  %v12278_v11 = vld [vmem:[#allocation2 + $0x115] sm:$0xff] }
 0xa28   : > { %24520 = vmatprep.subr.bf16.mxu1 %v24519_v6  ;;  %v12683_v10 = vld [vmem:[#allocation2 + $0x2e] sm:$0xff] }
 0xa2a   : > { %23341 = vmatmul.mubr.msk.f32.gmra.mrb[60].mxu1 %vm454_vm4, %v12255_v62  ;;  %v12684_v62 = vld [vmem:[#allocation2 + $0x36] sm:$0xff] }
 0xa2b   : > { %23343 = vmatprep.mubr.msk.f32.mxu1 %vm454_vm4, %v12256_v18  ;;  %24522 = vmatpush3.bf16.msra.mxu1 %v24519_v6  ;;  %v12283_v6 = vld [vmem:[#allocation2 + $0x13d] sm:$0xff] }
 0xa2c   : > { %v12685_v18 = vld [vmem:[#allocation2 + $0x3e] sm:$0xff] }
 0xa2e   : > { %23344 = vmatmul.mubr.msk.f32.gmra.mrb[62].mxu1 %vm454_vm4, %v12257_v9  ;;  %v12694_v9 = vld [vmem:[#allocation2 + $0x86] sm:$0xff] }
 0xa2f   : > { %23346 = vmatprep.mubr.msk.f32.mxu1 %vm454_vm4, %v12258_v13  ;;  %v12695_v13 = vld [vmem:[#allocation2 + $0x8e] sm:$0xff] }
 0xa32   : > { %23347 = vmatmul.mubr.msk.f32.gmra.mrb[64].mxu1 %vm454_vm4, %v12259_v35  ;;  %v12699_v35 = vld [vmem:[#allocation2 + $0xae] sm:$0xff] }
 0xa33   : > { %23349 = vmatprep.mubr.msk.f32.mxu1 %vm454_vm4, %v12260_v23  ;;  %v12700_v23 = vld [vmem:[#allocation2 + $0xb6] sm:$0xff] }
 0xa36   : > { %23350 = vmatmul.mubr.msk.f32.gmra.mrb[66].mxu1 %vm454_vm4, %v12261_v8  ;;  %v12702_v8 = vld [vmem:[#allocation2 + $0xc6] sm:$0xff] }
 0xa37   : > { %23352 = vmatprep.mubr.msk.f32.mxu1 %vm454_vm4, %v12262_v43  ;;  %v12703_v43 = vld [vmem:[#allocation2 + $0xce] sm:$0xff] }
 0xa3a   : > { %23353 = vmatmul.mubr.msk.f32.gmra.mrb[68].mxu1 %vm454_vm4, %v12263_v28  ;;  %v12704_v28 = vld [vmem:[#allocation2 + $0xd6] sm:$0xff] }
 0xa3b   : > { %23355 = vmatprep.mubr.msk.f32.mxu1 %vm454_vm4, %v12264_v15  ;;  %v12705_v15 = vld [vmem:[#allocation2 + $0xde] sm:$0xff] }
 0xa3e   : > { %23356 = vmatmul.mubr.msk.f32.gmra.mrb[70].mxu1 %vm454_vm4, %v12265_v29  ;;  %v12706_v29 = vld [vmem:[#allocation2 + $0xe6] sm:$0xff] }
 0xa3f   : > { %23358 = vmatprep.mubr.msk.f32.mxu1 %vm454_vm4, %v12266_v12  ;;  %v12707_v12 = vld [vmem:[#allocation2 + $0xee] sm:$0xff] }
 0xa42   : > { %23359 = vmatmul.mubr.msk.f32.gmra.mrb[72].mxu1 %vm454_vm4, %v12267_v30  ;;  %v12708_v30 = vld [vmem:[#allocation2 + $0xf6] sm:$0xff] }
 0xa43   : > { %23361 = vmatprep.mubr.msk.f32.mxu1 %vm454_vm4, %v12268_v53  ;;  %v12709_v53 = vld [vmem:[#allocation2 + $0xfe] sm:$0xff] }
 0xa46   : > { %23362 = vmatmul.mubr.msk.f32.gmra.mrb[74].mxu1 %vm454_vm4, %v12269_v25  ;;  %v12710_v25 = vld [vmem:[#allocation2 + $0x106] sm:$0xff] }
 0xa47   : > { %23364 = vmatprep.mubr.msk.f32.mxu1 %vm454_vm4, %v12270_v49  ;;  %v12711_v49 = vld [vmem:[#allocation2 + $0x10e] sm:$0xff] }
 0xa4a   : > { %23365 = vmatmul.mubr.msk.f32.gmra.mrb[76].mxu1 %vm454_vm4, %v12271_v3  ;;  %v12712_v3 = vld [vmem:[#allocation2 + $0x116] sm:$0xff] }
 0xa4b   : > { %23367 = vmatprep.mubr.msk.f32.mxu1 %vm454_vm4, %v12272_v21  ;;  %v12713_v21 = vld [vmem:[#allocation2 + $0x11e] sm:$0xff] }
 0xa4e   : > { %23368 = vmatmul.mubr.msk.f32.gmra.mrb[78].mxu1 %vm454_vm4, %v12273_v27  ;;  %v12714_v27 = vld [vmem:[#allocation2 + $0x126] sm:$0xff] }
 0xa4f   : > { %23370 = vmatprep.mubr.msk.f32.mxu1 %vm454_vm4, %v12274_v44  ;;  %v12716_v44 = vld [vmem:[#allocation2 + $0x136] sm:$0xff] }
 0xa52   : > { %23371 = vmatmul.mubr.msk.f32.gmra.mrb[80].mxu1 %vm454_vm4, %v12275_v19  ;;  %v12715_v19 = vld [vmem:[#allocation2 + $0x12e] sm:$0xff] }
 0xa53   : > { %23373 = vmatprep.mubr.msk.f32.mxu1 %vm454_vm4, %v12276_v26  ;;  %v12717_v26 = vld [vmem:[#allocation2 + $0x13e] sm:$0xff] }
 0xa56   : > { %23374 = vmatmul.mubr.msk.f32.gmra.mrb[82].mxu1 %vm454_vm4, %v12277_v20  ;;  %v13268_v20 = vld [vmem:[#allocation2 + $0x1] sm:$0xff] }
 0xa57   : > { %23376 = vmatprep.mubr.msk.f32.mxu1 %vm454_vm4, %v12278_v11  ;;  %v13260_v11 = vld [vmem:[#allocation15] sm:$0xff]  ;;  %23471 = vmatprep.mubr.msk.f32.mxu0 %vm454_vm4, %v13268_v20 }
 0xa5a   : > { %23377 = vmatmul.mubr.msk.f32.gmra.mrb[84].mxu1 %vm454_vm4, %v12279_v5  ;;  %v13261_v5 = vld [vmem:[#allocation15 + $0x8] sm:$0xff] }
 0xa5b   : > { %23379 = vmatprep.mubr.msk.f32.mxu1 %vm454_vm4, %v12280_v7  ;;  %v24539_v7 = vpack.c.bf16 %v13261_v5, %v13260_v11 }
 0xa5d   : > { %24540 = vmatprep.subr.bf16.mxu0 %v24539_v7 }
 0xa5e   : > { %23380 = vmatmul.mubr.msk.f32.gmra.mrb[86].mxu1 %vm454_vm4, %v12281_v16  ;;  %v13262_v16 = vld [vmem:[#allocation15 + $0x10] sm:$0xff] }
 0xa5f   : > { %23382 = vmatprep.mubr.msk.f32.mxu1 %vm454_vm4, %v12282_v22  ;;  %v13269_v22 = vld [vmem:[#allocation2 + $0x9] sm:$0xff] }
 0xa60   : > { %23472 = vmatmul.mubr.msk.f32.vlgmr.msra.gmra.mrb[54].mxu0 %vm454_vm4, %v13269_v22 }
 0xa61   : > { %24542 = vmatpush3.bf16.msra.mxu0 %v24539_v7 }
 0xa62   : > { %23383 = vmatmul.mubr.msk.f32.gmra.mrb[88].mxu1 %vm454_vm4, %v12283_v6  ;;  %v13263_v6 = vld [vmem:[#allocation15 + $0x18] sm:$0xff] }
 0xa63   : > { %23401 = vmatprep.mubr.msk.f32.mxu1 %vm454_vm4, %v12682_v1  ;;  %v24543_v1 = vpack.c.bf16 %v13263_v6, %v13262_v16 }
 0xa65   : > { %24544 = vmatprep.subr.bf16.mxu0 %v24543_v1 }
 0xa66   : > { %23402 = vmatmul.mubr.msk.f32.vlgmr.msra.gmra.mrb[54].mxu1 %vm454_vm4, %v12683_v10  ;;  %24546 = vmatpush3.bf16.msra.mxu0 %v24543_v1  ;;  %v13264_v10 = vld [vmem:[#allocation15 + $0x20] sm:$0xff] }
 0xa67   : > { %23404 = vmatprep.mubr.msk.f32.mxu1 %vm454_vm4, %v12684_v62  ;;  %v13265_v62 = vld [vmem:[#allocation15 + $0x28] sm:$0xff] }
 0xa6a   : > { %23405 = vmatmul.mubr.msk.f32.gmra.mrb[56].mxu1 %vm454_vm4, %v12685_v18  ;;  %v24547_v18 = vpack.c.bf16 %v13265_v62, %v13264_v10 }
 0xa6b   : > { %23407 = vmatprep.mubr.msk.f32.mxu1 %vm454_vm4, %v12686_v31  ;;  %v13266_v31 = vld [vmem:[#allocation15 + $0x30] sm:$0xff] }
 0xa6c   : > { %24548 = vmatprep.subr.bf16.mxu0 %v24547_v18 }
 0xa6d   : > { %24550 = vmatpush3.bf16.msra.mxu0 %v24547_v18 }
 0xa6e   : > { %23408 = vmatmul.mubr.msk.f32.gmra.mrb[58].mxu1 %vm454_vm4, %v12687_v0  ;;  %v13267_v0 = vld [vmem:[#allocation15 + $0x38] sm:$0xff] }
 0xa6f   : > { %23410 = vmatprep.mubr.msk.f32.mxu1 %vm454_vm4, %v12688_v17  ;;  %v24551_v17 = vpack.c.bf16 %v13267_v0, %v13266_v31 }
 0xa71   : > { %24552 = vmatprep.subr.bf16.mxu0 %v24551_v17 }
 0xa72   : > { %23411 = vmatmul.mubr.msk.f32.gmra.mrb[60].mxu1 %vm454_vm4, %v12689_v34  ;;  %24554 = vmatpush3.bf16.msra.mxu0 %v24551_v17  ;;  %v14056_v34 = vld [vmem:[#allocation15 + $0x80] sm:$0xff] }
 0xa73   : > { %23413 = vmatprep.mubr.msk.f32.mxu1 %vm454_vm4, %v12690_v32  ;;  %v14057_v32 = vld [vmem:[#allocation15 + $0x88] sm:$0xff] }
 0xa76   : > { %23414 = vmatmul.mubr.msk.f32.gmra.mrb[62].mxu1 %vm454_vm4, %v12691_v33  ;;  %v28856_v33 = vpack.c.bf16 %v14057_v32, %v14056_v34 }
 0xa77   : > { %23416 = vmatprep.mubr.msk.f32.mxu1 %vm454_vm4, %v12692_v14 }
 0xa78   : > { %24556 = vmatprep.subr.bf16.mxu0 %v28856_v33 }
 0xa7a   : > { %23417 = vmatmul.mubr.msk.f32.gmra.mrb[64].mxu1 %vm454_vm4, %v12693_v50 }
 0xa7b   : > { %23419 = vmatprep.mubr.msk.f32.mxu1 %vm454_vm4, %v12694_v9 }
 0xa7e   : > { %23420 = vmatmul.mubr.msk.f32.gmra.mrb[66].mxu1 %vm454_vm4, %v12695_v13 }
 0xa7f   : > { %23422 = vmatprep.mubr.msk.f32.mxu1 %vm454_vm4, %v12696_v4 }
 0xa82   : > { %23423 = vmatmul.mubr.msk.f32.gmra.mrb[68].mxu1 %vm454_vm4, %v12697_v2 }
 0xa83   : > { %23425 = vmatprep.mubr.msk.f32.mxu1 %vm454_vm4, %v12698_v42 }
 0xa86   : > { %23426 = vmatmul.mubr.msk.f32.gmra.mrb[70].mxu1 %vm454_vm4, %v12699_v35 }
 0xa87   : > { %23428 = vmatprep.mubr.msk.f32.mxu1 %vm454_vm4, %v12700_v23 }
 0xa8a   : > { %23429 = vmatmul.mubr.msk.f32.gmra.mrb[72].mxu1 %vm454_vm4, %v12701_v24 }
 0xa8b   : > { %23431 = vmatprep.mubr.msk.f32.mxu1 %vm454_vm4, %v12702_v8 }
 0xa8e   : > { %23432 = vmatmul.mubr.msk.f32.gmra.mrb[74].mxu1 %vm454_vm4, %v12703_v43 }
 0xa8f   : > { %23434 = vmatprep.mubr.msk.f32.mxu1 %vm454_vm4, %v12704_v28 }
 0xa92   : > { %23435 = vmatmul.mubr.msk.f32.gmra.mrb[76].mxu1 %vm454_vm4, %v12705_v15 }
 0xa93   : > { %23437 = vmatprep.mubr.msk.f32.mxu1 %vm454_vm4, %v12706_v29 }
 0xa96   : > { %23438 = vmatmul.mubr.msk.f32.gmra.mrb[78].mxu1 %vm454_vm4, %v12707_v12 }
 0xa97   : > { %23440 = vmatprep.mubr.msk.f32.mxu1 %vm454_vm4, %v12708_v30 }
 0xa9a   : > { %23441 = vmatmul.mubr.msk.f32.gmra.mrb[80].mxu1 %vm454_vm4, %v12709_v53 }
 0xa9b   : > { %23443 = vmatprep.mubr.msk.f32.mxu1 %vm454_vm4, %v12710_v25 }
 0xa9e   : > { %23444 = vmatmul.mubr.msk.f32.gmra.mrb[82].mxu1 %vm454_vm4, %v12711_v49 }
 0xa9f   : > { %23446 = vmatprep.mubr.msk.f32.mxu1 %vm454_vm4, %v12712_v3 }
 0xaa2   : > { %23447 = vmatmul.mubr.msk.f32.gmra.mrb[84].mxu1 %vm454_vm4, %v12713_v21 }
 0xaa3   : > { %23449 = vmatprep.mubr.msk.f32.mxu1 %vm454_vm4, %v12714_v27 }
 0xaa6   : > { %23450 = vmatmul.mubr.msk.f32.gmra.mrb[86].mxu1 %vm454_vm4, %v12715_v19 }
 0xaa7   : > { %23452 = vmatprep.mubr.msk.f32.mxu1 %vm454_vm4, %v12716_v44 }
 0xaaa   : > { %23453 = vmatmul.mubr.msk.f32.gmra.mrb[88].mxu1 %vm454_vm4, %v12717_v26 }
 0xb39   : > { %v23403_v14 = vpop.f32.mrb[54].mxu1 }
 0xb3a   : > { %v13117_v50 = vmax.f32 %v23403_v14, 0.0  ;;  %v12901_v9 = vpop.f32.mrb[55].mxu1 }
 0xb3b   : > { %v13116_v13 = vmax.f32 %v12901_v9, 0.0 }
 0xb3c   : > { %v13153_v4 = vmul.f32 %v13117_v50, %v26783_v38 }
 0xb3d   : > { %v13152_v2 = vmul.f32 %v13116_v13, %v26779_v36  ;;  %v23406_v42 = vpop.f32.mrb[56].mxu1 }
 0xb3e   : > { %13189 = vst.msk [vmem:[#allocation2 + $0x1b] sm:$0xff] %vm454_vm4, %v13153_v4  ;;  %v13119_v35 = vmax.f32 %v23406_v42, 0.0  ;;  %v12911_v23 = vpop.f32.mrb[57].mxu1 }
 0xb3f   : > { %13188 = vst.msk [vmem:[#allocation2 + $0x13] sm:$0xff] %vm454_vm4, %v13152_v2  ;;  %v13118_v24 = vmax.f32 %v12911_v23, 0.0 }
 0xb40   : > { %v13155_v8 = vmul.f32 %v13119_v35, %v26785_v39 }
 0xb41   : > { %v13154_v43 = vmul.f32 %v13118_v24, %v26781_v37  ;;  %v23409_v28 = vpop.f32.mrb[58].mxu1 }
 0xb42   : > { %13191 = vst.msk [vmem:[#allocation2 + $0x2b] sm:$0xff] %vm454_vm4, %v13155_v8  ;;  %v13121_v15 = vmax.f32 %v23409_v28, 0.0  ;;  %v12921_v29 = vpop.f32.mrb[59].mxu1 }
 0xb43   : > { %13190 = vst.msk [vmem:[#allocation2 + $0x23] sm:$0xff] %vm454_vm4, %v13154_v43  ;;  %v13120_v12 = vmax.f32 %v12921_v29, 0.0 }
 0xb44   : > { %v13157_v30 = vmul.f32 %v13121_v15, %v26789_v41 }
 0xb45   : > { %v13156_v53 = vmul.f32 %v13120_v12, %v26787_v40  ;;  %v23412_v25 = vpop.f32.mrb[60].mxu1 }
 0xb46   : > { %13193 = vst.msk [vmem:[#allocation2 + $0x3b] sm:$0xff] %vm454_vm4, %v13157_v30  ;;  %v13123_v49 = vmax.f32 %v23412_v25, 0.0  ;;  %v12931_v3 = vpop.f32.mrb[61].mxu1  ;;  %v13270_v21 = vld [vmem:[#allocation2 + $0x11] sm:$0xff]  ;;  %v13271_v27 = vld [vmem:[#allocation2 + $0x19] sm:$0xff] }
 0xb47   : > { %13192 = vst.msk [vmem:[#allocation2 + $0x33] sm:$0xff] %vm454_vm4, %v13156_v53  ;;  %v13122_v44 = vmax.f32 %v12931_v3, 0.0  ;;  %23474 = vmatprep.mubr.msk.f32.mxu0 %vm454_vm4, %v13270_v21 }
 0xb48   : > { %v13159_v19 = vmul.f32 %v13123_v49, %v26793_v46  ;;  %23475 = vmatmul.mubr.msk.f32.gmra.mrb[56].mxu0 %vm454_vm4, %v13271_v27 }
 0xb49   : > { %v13158_v26 = vmul.f32 %v13122_v44, %v26791_v45  ;;  %v23415_v20 = vpop.f32.mrb[62].mxu1 }
 0xb4a   : > { %13195 = vst.msk [vmem:[#allocation2 + $0x4b] sm:$0xff] %vm454_vm4, %v13159_v19  ;;  %v13125_v11 = vmax.f32 %v23415_v20, 0.0  ;;  %v12941_v5 = vpop.f32.mrb[63].mxu1  ;;  %v13272_v7 = vld [vmem:[#allocation2 + $0x21] sm:$0xff]  ;;  %v13273_v22 = vld [vmem:[#allocation2 + $0x29] sm:$0xff] }
 0xb4b   : > { %13194 = vst.msk [vmem:[#allocation2 + $0x43] sm:$0xff] %vm454_vm4, %v13158_v26  ;;  %v13124_v16 = vmax.f32 %v12941_v5, 0.0  ;;  %23477 = vmatprep.mubr.msk.f32.mxu0 %vm454_vm4, %v13272_v7 }
 0xb4c   : > { %v13161_v6 = vmul.f32 %v13125_v11, %v26797_v48  ;;  %23478 = vmatmul.mubr.msk.f32.gmra.mrb[58].mxu0 %vm454_vm4, %v13273_v22 }
 0xb4d   : > { %v13160_v1 = vmul.f32 %v13124_v16, %v26795_v47  ;;  %v23418_v10 = vpop.f32.mrb[64].mxu1 }
 0xb4e   : > { %13197 = vst.msk [vmem:[#allocation2 + $0x5b] sm:$0xff] %vm454_vm4, %v13161_v6  ;;  %v13127_v62 = vmax.f32 %v23418_v10, 0.0  ;;  %v12951_v18 = vpop.f32.mrb[65].mxu1  ;;  %v13274_v31 = vld [vmem:[#allocation2 + $0x31] sm:$0xff]  ;;  %v13275_v0 = vld [vmem:[#allocation2 + $0x39] sm:$0xff] }
 0xb4f   : > { %13196 = vst.msk [vmem:[#allocation2 + $0x53] sm:$0xff] %vm454_vm4, %v13160_v1  ;;  %v13126_v17 = vmax.f32 %v12951_v18, 0.0  ;;  %23480 = vmatprep.mubr.msk.f32.mxu0 %vm454_vm4, %v13274_v31 }
 0xb50   : > { %v13163_v34 = vmul.f32 %v13127_v62, %v26801_v52  ;;  %23481 = vmatmul.mubr.msk.f32.gmra.mrb[60].mxu0 %vm454_vm4, %v13275_v0 }
 0xb51   : > { %v13162_v32 = vmul.f32 %v13126_v17, %v26799_v51  ;;  %v23421_v14 = vpop.f32.mrb[66].mxu1  ;;  %v30507_v17 = vld [vmem:[#allocation25_spill] sm:$0xff] }
 0xb52   : > { %13199 = vst.msk [vmem:[#allocation2 + $0x6b] sm:$0xff] %vm454_vm4, %v13163_v34  ;;  %v13129_v50 = vmax.f32 %v23421_v14, 0.0  ;;  %v12961_v9 = vpop.f32.mrb[67].mxu1  ;;  %v13276_v13 = vld [vmem:[#allocation2 + $0x41] sm:$0xff]  ;;  %v13277_v4 = vld [vmem:[#allocation2 + $0x49] sm:$0xff] }
 0xb53   : > { %13198 = vst.msk [vmem:[#allocation2 + $0x63] sm:$0xff] %vm454_vm4, %v13162_v32  ;;  %v13128_v2 = vmax.f32 %v12961_v9, 0.0  ;;  %23483 = vmatprep.mubr.msk.f32.mxu0 %vm454_vm4, %v13276_v13 }
 0xb54   : > { %v13165_v42 = vmul.f32 %v13129_v50, %v26808_v55  ;;  %23484 = vmatmul.mubr.msk.f32.gmra.mrb[62].mxu0 %vm454_vm4, %v13277_v4 }
 0xb55   : > { %v13164_v35 = vmul.f32 %v13128_v2, %v26806_v54  ;;  %v23424_v23 = vpop.f32.mrb[68].mxu1  ;;  %v30508_v2 = vld [vmem:[#allocation27_spill] sm:$0xff] }
 0xb56   : > { %13201 = vst.msk [vmem:[#allocation2 + $0x7b] sm:$0xff] %vm454_vm4, %v13165_v42  ;;  %v13131_v24 = vmax.f32 %v23424_v23, 0.0  ;;  %v12971_v8 = vpop.f32.mrb[69].mxu1  ;;  %v13278_v43 = vld [vmem:[#allocation2 + $0x51] sm:$0xff]  ;;  %v13279_v28 = vld [vmem:[#allocation2 + $0x59] sm:$0xff] }
 0xb57   : > { %13200 = vst.msk [vmem:[#allocation2 + $0x73] sm:$0xff] %vm454_vm4, %v13164_v35  ;;  %v13130_v15 = vmax.f32 %v12971_v8, 0.0  ;;  %23486 = vmatprep.mubr.msk.f32.mxu0 %vm454_vm4, %v13278_v43  ;;  %v30509_v35 = vld [vmem:[#allocation26_spill] sm:$0xff] }
 0xb58   : > { %v13167_v29 = vmul.f32 %v13131_v24, %v26812_v57  ;;  %23487 = vmatmul.mubr.msk.f32.gmra.mrb[64].mxu0 %vm454_vm4, %v13279_v28 }
 0xb59   : > { %v13166_v12 = vmul.f32 %v13130_v15, %v26810_v56  ;;  %v23427_v30 = vpop.f32.mrb[70].mxu1 }
 0xb5a   : > { %13203 = vst.msk [vmem:[#allocation2 + $0x8b] sm:$0xff] %vm454_vm4, %v13167_v29  ;;  %v13133_v53 = vmax.f32 %v23427_v30, 0.0  ;;  %v12981_v25 = vpop.f32.mrb[71].mxu1  ;;  %v13280_v49 = vld [vmem:[#allocation2 + $0x61] sm:$0xff]  ;;  %v13281_v3 = vld [vmem:[#allocation2 + $0x69] sm:$0xff] }
 0xb5b   : > { %13202 = vst.msk [vmem:[#allocation2 + $0x83] sm:$0xff] %vm454_vm4, %v13166_v12  ;;  %v13132_v21 = vmax.f32 %v12981_v25, 0.0  ;;  %23489 = vmatprep.mubr.msk.f32.mxu0 %vm454_vm4, %v13280_v49  ;;  %v30510_v12 = vld [vmem:[#allocation29_spill] sm:$0xff] }
 0xb5c   : > { %v13169_v27 = vmul.f32 %v13133_v53, %v26816_v59  ;;  %23490 = vmatmul.mubr.msk.f32.gmra.mrb[66].mxu0 %vm454_vm4, %v13281_v3  ;;  %v30511_v53 = vld [vmem:[#allocation28_spill] sm:$0xff] }
 0xb5d   : > { %v13168_v44 = vmul.f32 %v13132_v21, %v26814_v58  ;;  %v23430_v19 = vpop.f32.mrb[72].mxu1 }
 0xb5e   : > { %13205 = vst.msk [vmem:[#allocation2 + $0x9b] sm:$0xff] %vm454_vm4, %v13169_v27  ;;  %v13135_v26 = vmax.f32 %v23430_v19, 0.0  ;;  %v12991_v20 = vpop.f32.mrb[73].mxu1  ;;  %v13282_v11 = vld [vmem:[#allocation2 + $0x71] sm:$0xff]  ;;  %v13283_v5 = vld [vmem:[#allocation2 + $0x79] sm:$0xff] }
 0xb5f   : > { %13204 = vst.msk [vmem:[#allocation2 + $0x93] sm:$0xff] %vm454_vm4, %v13168_v44  ;;  %v13134_v7 = vmax.f32 %v12991_v20, 0.0  ;;  %23492 = vmatprep.mubr.msk.f32.mxu0 %vm454_vm4, %v13282_v11  ;;  %v30513_v11 = vld [vmem:[#allocation30_spill] sm:$0xff] }
 0xb60   : > { %v13171_v22 = vmul.f32 %v13135_v26, %v26820_v61  ;;  %23493 = vmatmul.mubr.msk.f32.gmra.mrb[68].mxu0 %vm454_vm4, %v13283_v5  ;;  %v30512_v26 = vld [vmem:[#allocation31_spill] sm:$0xff] }
 0xb61   : > { %v13170_v16 = vmul.f32 %v13134_v7, %v26818_v60  ;;  %v23433_v6 = vpop.f32.mrb[74].mxu1 }
 0xb62   : > { %13207 = vst.msk [vmem:[#allocation2 + $0xab] sm:$0xff] %vm454_vm4, %v13171_v22  ;;  %v13137_v1 = vmax.f32 %v23433_v6, 0.0  ;;  %v13001_v10 = vpop.f32.mrb[75].mxu1  ;;  %v13284_v62 = vld [vmem:[#allocation2 + $0x81] sm:$0xff]  ;;  %v13285_v18 = vld [vmem:[#allocation2 + $0x89] sm:$0xff] }
 0xb63   : > { %13206 = vst.msk [vmem:[#allocation2 + $0xa3] sm:$0xff] %vm454_vm4, %v13170_v16  ;;  %v13136_v31 = vmax.f32 %v13001_v10, 0.0  ;;  %23495 = vmatprep.mubr.msk.f32.mxu0 %vm454_vm4, %v13284_v62  ;;  %v30514_v62 = vld [vmem:[#allocation33_spill] sm:$0xff] }
 0xb64   : > { %v13173_v0 = vmul.f32 %v13137_v1, %v26824_v63  ;;  %23496 = vmatmul.mubr.msk.f32.gmra.mrb[70].mxu0 %vm454_vm4, %v13285_v18 }
 0xb65   : > { %v13172_v34 = vmul.f32 %v13136_v31, %v30507_v17  ;;  %v23436_v32 = vpop.f32.mrb[76].mxu1  ;;  %v30515_v31 = vld [vmem:[#allocation32_spill] sm:$0xff]  ;;  %v14931_v17 = vld [vmem:[#allocation15 + $0x138] sm:$0xff] }
 0xb66   : > { %13209 = vst.msk [vmem:[#allocation2 + $0xbb] sm:$0xff] %vm454_vm4, %v13173_v0  ;;  %v13139_v14 = vmax.f32 %v23436_v32, 0.0  ;;  %v13011_v50 = vpop.f32.mrb[77].mxu1  ;;  %v13286_v9 = vld [vmem:[#allocation2 + $0x91] sm:$0xff]  ;;  %v13287_v13 = vld [vmem:[#allocation2 + $0x99] sm:$0xff] }
 0xb67   : > { %13208 = vst.msk [vmem:[#allocation2 + $0xb3] sm:$0xff] %vm454_vm4, %v13172_v34  ;;  %v13138_v4 = vmax.f32 %v13011_v50, 0.0  ;;  %23498 = vmatprep.mubr.msk.f32.mxu0 %vm454_vm4, %v13286_v9 }
 0xb68   : > { %v13175_v42 = vmul.f32 %v13139_v14, %v30508_v2  ;;  %23499 = vmatmul.mubr.msk.f32.gmra.mrb[72].mxu0 %vm454_vm4, %v13287_v13  ;;  %v14930_v2 = vld [vmem:[#allocation15 + $0x130] sm:$0xff] }
 0xb69   : > { %v13174_v23 = vmul.f32 %v13138_v4, %v30509_v35  ;;  %v23439_v24 = vpop.f32.mrb[78].mxu1  ;;  %v30516_v4 = vld [vmem:[#allocation35_spill] sm:$0xff] }
 0xb6a   : > { %13211 = vst.msk [vmem:[#allocation2 + $0xcb] sm:$0xff] %vm454_vm4, %v13175_v42  ;;  %v13141_v8 = vmax.f32 %v23439_v24, 0.0  ;;  %v13021_v43 = vpop.f32.mrb[79].mxu1  ;;  %v13288_v28 = vld [vmem:[#allocation2 + $0xa1] sm:$0xff]  ;;  %v13289_v15 = vld [vmem:[#allocation2 + $0xa9] sm:$0xff] }
 0xb6b   : > { %13210 = vst.msk [vmem:[#allocation2 + $0xc3] sm:$0xff] %vm454_vm4, %v13174_v23  ;;  %v13140_v29 = vmax.f32 %v13021_v43, 0.0  ;;  %23501 = vmatprep.mubr.msk.f32.mxu0 %vm454_vm4, %v13288_v28  ;;  %v30517_v23 = vld [vmem:[#allocation34_spill] sm:$0xff] }
 0xb6c   : > { %v13177_v30 = vmul.f32 %v13141_v8, %v30510_v12  ;;  %23502 = vmatmul.mubr.msk.f32.gmra.mrb[74].mxu0 %vm454_vm4, %v13289_v15  ;;  %v14929_v12 = vld [vmem:[#allocation15 + $0x128] sm:$0xff] }
 0xb6d   : > { %v13176_v25 = vmul.f32 %v13140_v29, %v30511_v53  ;;  %v23442_v49 = vpop.f32.mrb[80].mxu1  ;;  %v14928_v53 = vld [vmem:[#allocation15 + $0x120] sm:$0xff] }
 0xb6e   : > { %13213 = vst.msk [vmem:[#allocation2 + $0xdb] sm:$0xff] %vm454_vm4, %v13177_v30  ;;  %v13143_v3 = vmax.f32 %v23442_v49, 0.0  ;;  %v13031_v21 = vpop.f32.mrb[81].mxu1  ;;  %v13290_v27 = vld [vmem:[#allocation2 + $0xb1] sm:$0xff]  ;;  %v13291_v44 = vld [vmem:[#allocation2 + $0xb9] sm:$0xff]  ;;  %v24595_v35 = vpack.c.bf16 %v14929_v12, %v14928_v53 }
 0xb6f   : > { %13212 = vst.msk [vmem:[#allocation2 + $0xd3] sm:$0xff] %vm454_vm4, %v13176_v25  ;;  %v13142_v19 = vmax.f32 %v13031_v21, 0.0  ;;  %23504 = vmatprep.mubr.msk.f32.mxu0 %vm454_vm4, %v13290_v27  ;;  %v30518_v25 = vld [vmem:[#allocation37_spill] sm:$0xff]  ;;  %v15361_v53 = vld [vmem:[#allocation15 + $0x158] sm:$0xff] }
 0xb70   : > { %v13179_v20 = vmul.f32 %v13143_v3, %v30512_v26  ;;  %23505 = vmatmul.mubr.msk.f32.gmra.mrb[76].mxu0 %vm454_vm4, %v13291_v44  ;;  %v30519_v3 = vld [vmem:[#allocation36_spill] sm:$0xff] }
 0xb71   : > { %v13178_v5 = vmul.f32 %v13142_v19, %v30513_v11  ;;  %v23445_v7 = vpop.f32.mrb[82].mxu1  ;;  %v14927_v11 = vld [vmem:[#allocation15 + $0x118] sm:$0xff] }
 0xb72   : > { %13215 = vst.msk [vmem:[#allocation2 + $0xeb] sm:$0xff] %vm454_vm4, %v13179_v20  ;;  %v13145_v22 = vmax.f32 %v23445_v7, 0.0  ;;  %v13041_v16 = vpop.f32.mrb[83].mxu1  ;;  %v13292_v6 = vld [vmem:[#allocation2 + $0xc1] sm:$0xff]  ;;  %v13293_v1 = vld [vmem:[#allocation2 + $0xc9] sm:$0xff] }
 0xb73   : > { %13214 = vst.msk [vmem:[#allocation2 + $0xe3] sm:$0xff] %vm454_vm4, %v13178_v5  ;;  %v13144_v10 = vmax.f32 %v13041_v16, 0.0  ;;  %23507 = vmatprep.mubr.msk.f32.mxu0 %vm454_vm4, %v13292_v6  ;;  %v30521_v6 = vld [vmem:[#allocation38_spill] sm:$0xff] }
 0xb74   : > { %v13181_v18 = vmul.f32 %v13145_v22, %v30514_v62  ;;  %23508 = vmatmul.mubr.msk.f32.gmra.mrb[78].mxu0 %vm454_vm4, %v13293_v1  ;;  %v30520_v22 = vld [vmem:[#allocation39_spill] sm:$0xff]  ;;  %v14926_v62 = vld [vmem:[#allocation15 + $0x110] sm:$0xff] }
 0xb75   : > { %v13180_v0 = vmul.f32 %v13144_v10, %v30515_v31  ;;  %v23448_v34 = vpop.f32.mrb[84].mxu1  ;;  %v24591_v26 = vpack.c.bf16 %v14927_v11, %v14926_v62  ;;  %v24599_v11 = vpack.c.bf16 %v14931_v17, %v14930_v2  ;;  %v15358_v62 = vld [vmem:[#allocation15 + $0x140] sm:$0xff] }
 0xb76   : > { %13217 = vst.msk [vmem:[#allocation2 + $0xfb] sm:$0xff] %vm454_vm4, %v13181_v18  ;;  %v13147_v32 = vmax.f32 %v23448_v34, 0.0  ;;  %v13051_v14 = vpop.f32.mrb[85].mxu1  ;;  %v13294_v50 = vld [vmem:[#allocation2 + $0xd1] sm:$0xff]  ;;  %v13295_v9 = vld [vmem:[#allocation2 + $0xd9] sm:$0xff] }
 0xb77   : > { %13216 = vst.msk [vmem:[#allocation2 + $0xf3] sm:$0xff] %vm454_vm4, %v13180_v0  ;;  %v13146_v13 = vmax.f32 %v13051_v14, 0.0  ;;  %23510 = vmatprep.mubr.msk.f32.mxu0 %vm454_vm4, %v13294_v50  ;;  %v14058_v14 = vld [vmem:[#allocation15 + $0x90] sm:$0xff]  ;;  %v14059_v50 = vld [vmem:[#allocation15 + $0x98] sm:$0xff] }
 0xb78   : > { %v13183_v42 = vmul.f32 %v13147_v32, %v30516_v4  ;;  %23511 = vmatmul.mubr.msk.f32.gmra.mrb[80].mxu0 %vm454_vm4, %v13295_v9  ;;  %v13224_v32 = vld [vmem:[#allocation2] sm:$0xff]  ;;  %v13225_v9 = vld [vmem:[#allocation2 + $0x8] sm:$0xff] }
 0xb79   : > { %v13182_v24 = vmul.f32 %v13146_v13, %v30517_v23  ;;  %v23451_v8 = vpop.f32.mrb[86].mxu1  ;;  %v24559_v13 = vpack.c.bf16 %v14059_v50, %v14058_v14  ;;  %v13241_v14 = vld [vmem:[#allocation2 + $0x88] sm:$0xff]  ;;  %v13242_v50 = vld [vmem:[#allocation2 + $0x90] sm:$0xff] }
 0xb7a   : > { %13219 = vst.msk [vmem:[#allocation2 + $0x10b] sm:$0xff] %vm454_vm4, %v13183_v42  ;;  %v13149_v43 = vmax.f32 %v23451_v8, 0.0  ;;  %v13061_v28 = vpop.f32.mrb[87].mxu1  ;;  %v13296_v15 = vld [vmem:[#allocation2 + $0xe1] sm:$0xff]  ;;  %v13297_v29 = vld [vmem:[#allocation2 + $0xe9] sm:$0xff]  ;;  %v14060_v42 = vld [vmem:[#allocation15 + $0xa0] sm:$0xff] }
 0xb7b   : > { %13218 = vst.msk [vmem:[#allocation2 + $0x103] sm:$0xff] %vm454_vm4, %v13182_v24  ;;  %v13148_v30 = vmax.f32 %v13061_v28, 0.0  ;;  %23513 = vmatprep.mubr.msk.f32.mxu0 %vm454_vm4, %v13296_v15  ;;  %v14061_v24 = vld [vmem:[#allocation15 + $0xa8] sm:$0xff]  ;;  %v13226_v8 = vld [vmem:[#allocation2 + $0x10] sm:$0xff]  ;;  %v13227_v28 = vld [vmem:[#allocation2 + $0x18] sm:$0xff] }
 0xb7c   : > { %v13185_v49 = vmul.f32 %v13149_v43, %v30518_v25  ;;  %23514 = vmatmul.mubr.msk.f32.gmra.mrb[82].mxu0 %vm454_vm4, %v13297_v29  ;;  %v24563_v43 = vpack.c.bf16 %v14061_v24, %v14060_v42  ;;  %v14062_v15 = vld [vmem:[#allocation15 + $0xb0] sm:$0xff]  ;;  %v14063_v29 = vld [vmem:[#allocation15 + $0xb8] sm:$0xff] }
 0xb7d   : > { %v13184_v21 = vmul.f32 %v13148_v30, %v30519_v3  ;;  %v23454_v27 = vpop.f32.mrb[88].mxu1  ;;  %v13228_v30 = vld [vmem:[#allocation2 + $0x20] sm:$0xff]  ;;  %v13245_v42 = vld [vmem:[#allocation2 + $0xa8] sm:$0xff]  ;;  %v13246_v24 = vld [vmem:[#allocation2 + $0xb0] sm:$0xff] }
 0xb7e   : > { %13221 = vst.msk [vmem:[#allocation2 + $0x11b] sm:$0xff] %vm454_vm4, %v13185_v49  ;;  %v13151_v44 = vmax.f32 %v23454_v27, 0.0  ;;  %v13071_v19 = vpop.f32.mrb[89].mxu1  ;;  %v13298_v20 = vld [vmem:[#allocation2 + $0xf1] sm:$0xff]  ;;  %v13299_v5 = vld [vmem:[#allocation2 + $0xf9] sm:$0xff]  ;;  %v24567_v49 = vpack.c.bf16 %v14063_v29, %v14062_v15 }
 0xb7f   : > { %13220 = vst.msk [vmem:[#allocation2 + $0x113] sm:$0xff] %vm454_vm4, %v13184_v21  ;;  %v13150_v7 = vmax.f32 %v13071_v19, 0.0  ;;  %23516 = vmatprep.mubr.msk.f32.mxu0 %vm454_vm4, %v13298_v20  ;;  %v13229_v21 = vld [vmem:[#allocation2 + $0x28] sm:$0xff]  ;;  %v14490_v27 = vld [vmem:[#allocation15 + $0xc0] sm:$0xff]  ;;  %v13250_v15 = vld [vmem:[#allocation2 + $0xd0] sm:$0xff] }
 0xb80   : > { %v13187_v16 = vmul.f32 %v13151_v44, %v30520_v22  ;;  %23517 = vmatmul.mubr.msk.f32.gmra.mrb[84].mxu0 %vm454_vm4, %v13299_v5  ;;  %v14491_v44 = vld [vmem:[#allocation15 + $0xc8] sm:$0xff]  ;;  %v13231_v20 = vld [vmem:[#allocation2 + $0x38] sm:$0xff] }
 0xb81   : > { %v13186_v1 = vmul.f32 %v13150_v7, %v30521_v6  ;;  %v28973_v19 = vpack.c.bf16 %v14491_v44, %v14490_v27  ;;  %v13232_v5 = vld [vmem:[#allocation2 + $0x40] sm:$0xff]  ;;  %v13233_v7 = vld [vmem:[#allocation2 + $0x48] sm:$0xff]  ;;  %v13251_v29 = vld [vmem:[#allocation2 + $0xd8] sm:$0xff] }
 0xb82   : > { %13223 = vst.msk [vmem:[#allocation2 + $0x12b] sm:$0xff] %vm454_vm4, %v13187_v16  ;;  %v13300_v10 = vld [vmem:[#allocation2 + $0x101] sm:$0xff]  ;;  %v13301_v18 = vld [vmem:[#allocation2 + $0x109] sm:$0xff]  ;;  %v13255_v27 = vld [vmem:[#allocation2 + $0xf8] sm:$0xff] }
 0xb83   : > { %13222 = vst.msk [vmem:[#allocation2 + $0x123] sm:$0xff] %vm454_vm4, %v13186_v1  ;;  %23519 = vmatprep.mubr.msk.f32.mxu0 %vm454_vm4, %v13300_v10  ;;  %v13234_v16 = vld [vmem:[#allocation2 + $0x50] sm:$0xff]  ;;  %v13235_v1 = vld [vmem:[#allocation2 + $0x58] sm:$0xff]  ;;  %v13236_v10 = vld [vmem:[#allocation2 + $0x60] sm:$0xff] }
 0xb84   : > { %23520 = vmatmul.mubr.msk.f32.gmra.mrb[86].mxu0 %vm454_vm4, %v13301_v18  ;;  %v13237_v18 = vld [vmem:[#allocation2 + $0x68] sm:$0xff]  ;;  %v13256_v44 = vld [vmem:[#allocation2 + $0x100] sm:$0xff]  ;;  %v14049_v22 = vld [vmem:[#allocation2 + $0xf2] sm:$0xff] }
 0xb85   : > { %v14048_v6 = vld [vmem:[#allocation2 + $0xea] sm:$0xff]  ;;  %v14050_v3 = vld [vmem:[#allocation2 + $0xfa] sm:$0xff]  ;;  %v14051_v25 = vld [vmem:[#allocation2 + $0x102] sm:$0xff] }
 0xb86   : > { %v13302_v0 = vld [vmem:[#allocation2 + $0x111] sm:$0xff]  ;;  %v13303_v34 = vld [vmem:[#allocation2 + $0x119] sm:$0xff] }
 0xb87   : > { %23522 = vmatprep.mubr.msk.f32.mxu0 %vm454_vm4, %v13302_v0  ;;  %v13238_v0 = vld [vmem:[#allocation2 + $0x70] sm:$0xff]  ;;  %v14054_v31 = vld [vmem:[#allocation2 + $0x11a] sm:$0xff] }
 0xb88   : > { %23523 = vmatmul.mubr.msk.f32.gmra.mrb[88].mxu0 %vm454_vm4, %v13303_v34  ;;  %v13239_v34 = vld [vmem:[#allocation2 + $0x78] sm:$0xff]  ;;  %v14052_v23 = vld [vmem:[#allocation2 + $0x10a] sm:$0xff] }
 0xb89   : > { %23541 = vmatprep.mubr.msk.f32.mxu0 %vm454_vm4, %v13224_v32  ;;  %v13240_v32 = vld [vmem:[#allocation2 + $0x80] sm:$0xff]  ;;  %v14053_v4 = vld [vmem:[#allocation2 + $0x112] sm:$0xff] }
 0xb8a   : > { %v14487_v17 = vld [vmem:[#allocation2 + $0x122] sm:$0xff]  ;;  %v14488_v2 = vld [vmem:[#allocation2 + $0x12a] sm:$0xff] }
 0xb8c   : > { %23542 = vmatmul.mubr.msk.f32.vlgmr.msra.gmra.mrb[54].mxu0 %vm454_vm4, %v13225_v9  ;;  %v13243_v9 = vld [vmem:[#allocation2 + $0x98] sm:$0xff] }
 0xb8d   : > { %24558 = vmatpush3.bf16.msra.mxu0 %v28856_v33  ;;  %23544 = vmatprep.mubr.msk.f32.mxu0 %vm454_vm4, %v13226_v8  ;;  %v13230_v33 = vld [vmem:[#allocation2 + $0x30] sm:$0xff]  ;;  %v13247_v8 = vld [vmem:[#allocation2 + $0xb8] sm:$0xff] }
 0xb8e   : > { %24560 = vmatprep.subr.bf16.mxu0 %v24559_v13 }
 0xb90   : > { %23545 = vmatmul.mubr.msk.f32.gmra.mrb[56].mxu0 %vm454_vm4, %v13227_v28  ;;  %v13249_v28 = vld [vmem:[#allocation2 + $0xc8] sm:$0xff] }
 0xb91   : > { %23547 = vmatprep.mubr.msk.f32.mxu0 %vm454_vm4, %v13228_v30  ;;  %24562 = vmatpush3.bf16.msra.mxu0 %v24559_v13  ;;  %v13244_v13 = vld [vmem:[#allocation2 + $0xa0] sm:$0xff] }
 0xb92   : > { %24564 = vmatprep.subr.bf16.mxu0 %v24563_v43  ;;  %v13252_v30 = vld [vmem:[#allocation2 + $0xe0] sm:$0xff] }
 0xb94   : > { %23548 = vmatmul.mubr.msk.f32.gmra.mrb[58].mxu0 %vm454_vm4, %v13229_v21  ;;  %v13254_v21 = vld [vmem:[#allocation2 + $0xf0] sm:$0xff] }
 0xb95   : > { %23550 = vmatprep.mubr.msk.f32.mxu0 %vm454_vm4, %v13230_v33  ;;  %24566 = vmatpush3.bf16.msra.mxu0 %v24563_v43  ;;  %v13248_v43 = vld [vmem:[#allocation2 + $0xc0] sm:$0xff]  ;;  %v13257_v33 = vld [vmem:[#allocation2 + $0x108] sm:$0xff] }
 0xb96   : > { %24568 = vmatprep.subr.bf16.mxu0 %v24567_v49 }
 0xb98   : > { %23551 = vmatmul.mubr.msk.f32.gmra.mrb[60].mxu0 %vm454_vm4, %v13231_v20  ;;  %v13258_v20 = vld [vmem:[#allocation2 + $0x110] sm:$0xff] }
 0xb99   : > { %23553 = vmatprep.mubr.msk.f32.mxu0 %vm454_vm4, %v13232_v5  ;;  %24570 = vmatpush3.bf16.msra.mxu0 %v24567_v49  ;;  %v13253_v49 = vld [vmem:[#allocation2 + $0xe8] sm:$0xff] }
 0xb9a   : > { %24572 = vmatprep.subr.bf16.mxu0 %v28973_v19  ;;  %v14019_v5 = vld [vmem:[#allocation2 + $0x2] sm:$0xff] }
 0xb9c   : > { %23554 = vmatmul.mubr.msk.f32.gmra.mrb[62].mxu0 %vm454_vm4, %v13233_v7  ;;  %v13259_v7 = vld [vmem:[#allocation2 + $0x118] sm:$0xff] }
 0xb9d   : > { %23556 = vmatprep.mubr.msk.f32.mxu0 %vm454_vm4, %v13234_v16  ;;  %v14492_v16 = vld [vmem:[#allocation15 + $0xd0] sm:$0xff] }
 0xba0   : > { %23557 = vmatmul.mubr.msk.f32.gmra.mrb[64].mxu0 %vm454_vm4, %v13235_v1  ;;  %v14493_v1 = vld [vmem:[#allocation15 + $0xd8] sm:$0xff] }
 0xba1   : > { %23559 = vmatprep.mubr.msk.f32.mxu0 %vm454_vm4, %v13236_v10  ;;  %v14020_v10 = vld [vmem:[#allocation2 + $0xa] sm:$0xff] }
 0xba4   : > { %23560 = vmatmul.mubr.msk.f32.gmra.mrb[66].mxu0 %vm454_vm4, %v13237_v18  ;;  %v24575_v18 = vpack.c.bf16 %v14493_v1, %v14492_v16  ;;  %v29071_v16 = vld [vmem:[#allocation2 + $0x8a] sm:$0xff]  ;;  %v29075_v1 = vld [vmem:[#allocation2 + $0x92] sm:$0xff] }
 0xba5   : > { %23562 = vmatprep.mubr.msk.f32.mxu0 %vm454_vm4, %v13238_v0  ;;  %v14494_v0 = vld [vmem:[#allocation15 + $0xe0] sm:$0xff] }
 0xba8   : > { %23563 = vmatmul.mubr.msk.f32.gmra.mrb[68].mxu0 %vm454_vm4, %v13239_v34  ;;  %v14495_v34 = vld [vmem:[#allocation15 + $0xe8] sm:$0xff] }
 0xba9   : > { %23565 = vmatprep.mubr.msk.f32.mxu0 %vm454_vm4, %v13240_v32  ;;  %v29007_v32 = vld [vmem:[#allocation2 + $0x12] sm:$0xff] }
 0xbac   : > { %23566 = vmatmul.mubr.msk.f32.gmra.mrb[70].mxu0 %vm454_vm4, %v13241_v14  ;;  %v24579_v14 = vpack.c.bf16 %v14495_v34, %v14494_v0  ;;  %v29087_v0 = vld [vmem:[#allocation2 + $0xaa] sm:$0xff]  ;;  %v29091_v34 = vld [vmem:[#allocation2 + $0xb2] sm:$0xff] }
 0xbad   : > { %23568 = vmatprep.mubr.msk.f32.mxu0 %vm454_vm4, %v13242_v50  ;;  %v29012_v50 = vld [vmem:[#allocation2 + $0x1a] sm:$0xff] }
 0xbb0   : > { %23569 = vmatmul.mubr.msk.f32.gmra.mrb[72].mxu0 %vm454_vm4, %v13243_v9  ;;  %v14496_v9 = vld [vmem:[#allocation15 + $0xf0] sm:$0xff] }
 0xbb1   : > { %23571 = vmatprep.mubr.msk.f32.mxu0 %vm454_vm4, %v13244_v13  ;;  %v14497_v13 = vld [vmem:[#allocation15 + $0xf8] sm:$0xff] }
 0xbb4   : > { %23572 = vmatmul.mubr.msk.f32.gmra.mrb[74].mxu0 %vm454_vm4, %v13245_v42  ;;  %v29016_v42 = vld [vmem:[#allocation2 + $0x22] sm:$0xff] }
 0xbb5   : > { %23574 = vmatprep.mubr.msk.f32.mxu0 %vm454_vm4, %v13246_v24  ;;  %v29020_v24 = vld [vmem:[#allocation2 + $0x2a] sm:$0xff] }
 0xbb8   : > { %23575 = vmatmul.mubr.msk.f32.gmra.mrb[76].mxu0 %vm454_vm4, %v13247_v8  ;;  %v14924_v8 = vld [vmem:[#allocation15 + $0x100] sm:$0xff] }
 0xbb9   : > { %23577 = vmatprep.mubr.msk.f32.mxu0 %vm454_vm4, %v13248_v43  ;;  %v14925_v43 = vld [vmem:[#allocation15 + $0x108] sm:$0xff] }
 0xbbc   : > { %23578 = vmatmul.mubr.msk.f32.gmra.mrb[78].mxu0 %vm454_vm4, %v13249_v28  ;;  %v29024_v28 = vld [vmem:[#allocation2 + $0x32] sm:$0xff] }
 0xbbd   : > { %23580 = vmatprep.mubr.msk.f32.mxu0 %vm454_vm4, %v13250_v15  ;;  %v29028_v15 = vpack.c.bf16 %v14925_v43, %v14924_v8  ;;  %v29111_v8 = vld [vmem:[#allocation2 + $0xda] sm:$0xff]  ;;  %v14047_v43 = vld [vmem:[#allocation2 + $0xe2] sm:$0xff] }
 0xbc0   : > { %23581 = vmatmul.mubr.msk.f32.gmra.mrb[80].mxu0 %vm454_vm4, %v13251_v29  ;;  %v29030_v29 = vld [vmem:[#allocation2 + $0x3a] sm:$0xff] }
 0xbc1   : > { %23583 = vmatprep.mubr.msk.f32.mxu0 %vm454_vm4, %v13252_v30  ;;  %v29034_v30 = vld [vmem:[#allocation2 + $0x42] sm:$0xff] }
 0xbc4   : > { %23584 = vmatmul.mubr.msk.f32.gmra.mrb[82].mxu0 %vm454_vm4, %v13253_v49  ;;  %v29039_v49 = vld [vmem:[#allocation2 + $0x4a] sm:$0xff] }
 0xbc5   : > { %23586 = vmatprep.mubr.msk.f32.mxu0 %vm454_vm4, %v13254_v21  ;;  %v29043_v21 = vld [vmem:[#allocation2 + $0x52] sm:$0xff] }
 0xbc8   : > { %23587 = vmatmul.mubr.msk.f32.gmra.mrb[84].mxu0 %vm454_vm4, %v13255_v27  ;;  %v29047_v27 = vld [vmem:[#allocation2 + $0x5a] sm:$0xff] }
 0xbc9   : > { %23589 = vmatprep.mubr.msk.f32.mxu0 %vm454_vm4, %v13256_v44  ;;  %v29051_v44 = vld [vmem:[#allocation2 + $0x62] sm:$0xff] }
 0xbcc   : > { %23590 = vmatmul.mubr.msk.f32.gmra.mrb[86].mxu0 %vm454_vm4, %v13257_v33  ;;  %v29055_v33 = vld [vmem:[#allocation2 + $0x6a] sm:$0xff] }
 0xbcd   : > { %23592 = vmatprep.mubr.msk.f32.mxu0 %vm454_vm4, %v13258_v20  ;;  %v29059_v20 = vld [vmem:[#allocation2 + $0x72] sm:$0xff] }
 0xbd0   : > { %23593 = vmatmul.mubr.msk.f32.gmra.mrb[88].mxu0 %vm454_vm4, %v13259_v7  ;;  %v29067_v7 = vld [vmem:[#allocation2 + $0x82] sm:$0xff] }
 0xbd1   : > { %23611 = vmatprep.mubr.msk.f32.mxu0 %vm454_vm4, %v14019_v5  ;;  %v29063_v5 = vld [vmem:[#allocation2 + $0x7a] sm:$0xff] }
 0xbd4   : > { %23612 = vmatmul.mubr.msk.f32.vlgmr.msra.gmra.mrb[54].mxu0 %vm454_vm4, %v14020_v10  ;;  %v29079_v10 = vld [vmem:[#allocation2 + $0x9a] sm:$0xff] }
 0xbd5   : > { %24574 = vmatpush3.bf16.msra.mxu0 %v28973_v19  ;;  %23614 = vmatprep.mubr.msk.f32.mxu0 %vm454_vm4, %v29007_v32  ;;  %v24583_v19 = vpack.c.bf16 %v14497_v13, %v14496_v9  ;;  %v29099_v9 = vld [vmem:[#allocation2 + $0xc2] sm:$0xff]  ;;  %v29103_v13 = vld [vmem:[#allocation2 + $0xca] sm:$0xff] }
 0xbd6   : > { %24576 = vmatprep.subr.bf16.mxu0 %v24575_v18 }
 0xbd8   : > { %23615 = vmatmul.mubr.msk.f32.gmra.mrb[56].mxu0 %vm454_vm4, %v29012_v50 }
 0xbd9   : > { %23617 = vmatprep.mubr.msk.f32.mxu0 %vm454_vm4, %v29016_v42  ;;  %24578 = vmatpush3.bf16.msra.mxu0 %v24575_v18  ;;  %v29083_v18 = vld [vmem:[#allocation2 + $0xa2] sm:$0xff] }
 0xbda   : > { %24580 = vmatprep.subr.bf16.mxu0 %v24579_v14 }
 0xbdc   : > { %23618 = vmatmul.mubr.msk.f32.gmra.mrb[58].mxu0 %vm454_vm4, %v29020_v24 }
 0xbdd   : > { %23620 = vmatprep.mubr.msk.f32.mxu0 %vm454_vm4, %v29024_v28  ;;  %24582 = vmatpush3.bf16.msra.mxu0 %v24579_v14  ;;  %v29095_v14 = vld [vmem:[#allocation2 + $0xba] sm:$0xff] }
 0xbde   : > { %24584 = vmatprep.subr.bf16.mxu0 %v24583_v19 }
 0xbe0   : > { %23621 = vmatmul.mubr.msk.f32.gmra.mrb[60].mxu0 %vm454_vm4, %v29030_v29 }
 0xbe1   : > { %23623 = vmatprep.mubr.msk.f32.mxu0 %vm454_vm4, %v29034_v30  ;;  %24586 = vmatpush3.bf16.msra.mxu0 %v24583_v19  ;;  %v29107_v19 = vld [vmem:[#allocation2 + $0xd2] sm:$0xff] }
 0xbe2   : > { %24588 = vmatprep.subr.bf16.mxu0 %v29028_v15 }
 0xbe4   : > { %23624 = vmatmul.mubr.msk.f32.gmra.mrb[62].mxu0 %vm454_vm4, %v29039_v49 }
 0xbe5   : > { %23626 = vmatprep.mubr.msk.f32.mxu0 %vm454_vm4, %v29043_v21 }
 0xbe8   : > { %23627 = vmatmul.mubr.msk.f32.gmra.mrb[64].mxu0 %vm454_vm4, %v29047_v27 }
 0xbe9   : > { %23629 = vmatprep.mubr.msk.f32.mxu0 %vm454_vm4, %v29051_v44 }
 0xbec   : > { %23630 = vmatmul.mubr.msk.f32.gmra.mrb[66].mxu0 %vm454_vm4, %v29055_v33 }
 0xbed   : > { %23632 = vmatprep.mubr.msk.f32.mxu0 %vm454_vm4, %v29059_v20 }
 0xbf0   : > { %23633 = vmatmul.mubr.msk.f32.gmra.mrb[68].mxu0 %vm454_vm4, %v29063_v5 }
 0xbf1   : > { %23635 = vmatprep.mubr.msk.f32.mxu0 %vm454_vm4, %v29067_v7 }
 0xbf4   : > { %23636 = vmatmul.mubr.msk.f32.gmra.mrb[70].mxu0 %vm454_vm4, %v29071_v16 }
 0xbf5   : > { %23638 = vmatprep.mubr.msk.f32.mxu0 %vm454_vm4, %v29075_v1 }
 0xbf8   : > { %23639 = vmatmul.mubr.msk.f32.gmra.mrb[72].mxu0 %vm454_vm4, %v29079_v10 }
 0xbf9   : > { %23641 = vmatprep.mubr.msk.f32.mxu0 %vm454_vm4, %v29083_v18 }
 0xbfc   : > { %23642 = vmatmul.mubr.msk.f32.gmra.mrb[74].mxu0 %vm454_vm4, %v29087_v0 }
 0xbfd   : > { %23644 = vmatprep.mubr.msk.f32.mxu0 %vm454_vm4, %v29091_v34 }
 0xc00   : > { %23645 = vmatmul.mubr.msk.f32.gmra.mrb[76].mxu0 %vm454_vm4, %v29095_v14 }
 0xc01   : > { %23647 = vmatprep.mubr.msk.f32.mxu0 %vm454_vm4, %v29099_v9 }
 0xc04   : > { %23648 = vmatmul.mubr.msk.f32.gmra.mrb[78].mxu0 %vm454_vm4, %v29103_v13 }
 0xc05   : > { %23650 = vmatprep.mubr.msk.f32.mxu0 %vm454_vm4, %v29107_v19 }
 0xc08   : > { %23651 = vmatmul.mubr.msk.f32.gmra.mrb[80].mxu0 %vm454_vm4, %v29111_v8 }
 0xc09   : > { %23653 = vmatprep.mubr.msk.f32.mxu0 %vm454_vm4, %v14047_v43 }
 0xc0c   : > { %23654 = vmatmul.mubr.msk.f32.gmra.mrb[82].mxu0 %vm454_vm4, %v14048_v6 }
 0xc0d   : > { %23656 = vmatprep.mubr.msk.f32.mxu0 %vm454_vm4, %v14049_v22 }
 0xc10   : > { %23657 = vmatmul.mubr.msk.f32.gmra.mrb[84].mxu0 %vm454_vm4, %v14050_v3 }
 0xc11   : > { %23659 = vmatprep.mubr.msk.f32.mxu0 %vm454_vm4, %v14051_v25 }
 0xc14   : > { %23660 = vmatmul.mubr.msk.f32.gmra.mrb[86].mxu0 %vm454_vm4, %v14052_v23 }
 0xc15   : > { %23662 = vmatprep.mubr.msk.f32.mxu0 %vm454_vm4, %v14053_v4 }
 0xc18   : > { %23663 = vmatmul.mubr.msk.f32.gmra.mrb[88].mxu0 %vm454_vm4, %v14054_v31 }
 0xc19   : > { %23681 = vmatprep.mubr.msk.f32.mxu0 %vm454_vm4, %v29007_v32  ;;  %v15359_v32 = vld [vmem:[#allocation15 + $0x148] sm:$0xff] }
 0xc1a   : > { %v24603_v12 = vpack.c.bf16 %v15359_v32, %v15358_v62  ;;  %v14913_v62 = vld [vmem:[#allocation2 + $0xe3] sm:$0xff]  ;;  %v14914_v32 = vld [vmem:[#allocation2 + $0xeb] sm:$0xff] }
 0xc1c   : > { %23682 = vmatmul.mubr.msk.f32.vlgmr.msra.gmra.mrb[54].mxu0 %vm454_vm4, %v29012_v50  ;;  %v15364_v50 = vld [vmem:[#allocation15 + $0x170] sm:$0xff] }
 0xc1d   : > { %24590 = vmatpush3.bf16.msra.mxu0 %v29028_v15  ;;  %23684 = vmatprep.mubr.msk.f32.mxu0 %vm454_vm4, %v29016_v42  ;;  %v15365_v42 = vld [vmem:[#allocation15 + $0x178] sm:$0xff]  ;;  %v14892_v15 = vld [vmem:[#allocation2 + $0x3b] sm:$0xff] }
 0xc1e   : > { %24592 = vmatprep.subr.bf16.mxu0 %v24591_v26 }
 0xc20   : > { %23685 = vmatmul.mubr.msk.f32.gmra.mrb[56].mxu0 %vm454_vm4, %v29020_v24  ;;  %v14891_v24 = vld [vmem:[#allocation2 + $0x33] sm:$0xff] }
 0xc21   : > { %23687 = vmatprep.mubr.msk.f32.mxu0 %vm454_vm4, %v29024_v28  ;;  %24594 = vmatpush3.bf16.msra.mxu0 %v24591_v26  ;;  %v14887_v26 = vld [vmem:[#allocation2 + $0x13] sm:$0xff]  ;;  %v24615_v28 = vpack.c.bf16 %v15365_v42, %v15364_v50  ;;  %v15797_v42 = vld [vmem:[#allocation15 + $0x1a8] sm:$0xff] }
 0xc22   : > { %24596 = vmatprep.subr.bf16.mxu0 %v24595_v35  ;;  %v15796_v50 = vld [vmem:[#allocation15 + $0x1a0] sm:$0xff] }
 0xc24   : > { %23688 = vmatmul.mubr.msk.f32.gmra.mrb[58].mxu0 %vm454_vm4, %v29030_v29  ;;  %v15792_v29 = vld [vmem:[#allocation15 + $0x180] sm:$0xff] }
 0xc25   : > { %23690 = vmatprep.mubr.msk.f32.mxu0 %vm454_vm4, %v29034_v30  ;;  %24598 = vmatpush3.bf16.msra.mxu0 %v24595_v35  ;;  %v15360_v35 = vld [vmem:[#allocation15 + $0x150] sm:$0xff]  ;;  %v15793_v30 = vld [vmem:[#allocation15 + $0x188] sm:$0xff] }
 0xc26   : > { %24600 = vmatprep.subr.bf16.mxu0 %v24599_v11 }
 0xc28   : > { %23691 = vmatmul.mubr.msk.f32.gmra.mrb[60].mxu0 %vm454_vm4, %v29039_v49  ;;  %v14893_v49 = vld [vmem:[#allocation2 + $0x43] sm:$0xff] }
 0xc29   : > { %23693 = vmatprep.mubr.msk.f32.mxu0 %vm454_vm4, %v29043_v21  ;;  %24602 = vmatpush3.bf16.msra.mxu0 %v24599_v11  ;;  %v29193_v21 = vpack.c.bf16 %v15793_v30, %v15792_v29  ;;  %v14912_v11 = vld [vmem:[#allocation2 + $0xdb] sm:$0xff]  ;;  %v15798_v29 = vld [vmem:[#allocation15 + $0x1b0] sm:$0xff]  ;;  %v15799_v30 = vld [vmem:[#allocation15 + $0x1b8] sm:$0xff] }
 0xc2a   : > { %24604 = vmatprep.subr.bf16.mxu0 %v24603_v12 }
 0xc2c   : > { %23694 = vmatmul.mubr.msk.f32.gmra.mrb[62].mxu0 %vm454_vm4, %v29047_v27  ;;  %v14894_v27 = vld [vmem:[#allocation2 + $0x4b] sm:$0xff] }
 0xc2d   : > { %23696 = vmatprep.mubr.msk.f32.mxu0 %vm454_vm4, %v29051_v44  ;;  %v14895_v44 = vld [vmem:[#allocation2 + $0x53] sm:$0xff] }
 0xc30   : > { %23697 = vmatmul.mubr.msk.f32.gmra.mrb[64].mxu0 %vm454_vm4, %v29055_v33  ;;  %v14896_v33 = vld [vmem:[#allocation2 + $0x5b] sm:$0xff] }
 0xc31   : > { %23699 = vmatprep.mubr.msk.f32.mxu0 %vm454_vm4, %v29059_v20  ;;  %v14897_v20 = vld [vmem:[#allocation2 + $0x63] sm:$0xff] }
 0xc34   : > { %23700 = vmatmul.mubr.msk.f32.gmra.mrb[66].mxu0 %vm454_vm4, %v29063_v5  ;;  %v14898_v5 = vld [vmem:[#allocation2 + $0x6b] sm:$0xff] }
 0xc35   : > { %23702 = vmatprep.mubr.msk.f32.mxu0 %vm454_vm4, %v29067_v7  ;;  %v14899_v7 = vld [vmem:[#allocation2 + $0x73] sm:$0xff] }
 0xc38   : > { %23703 = vmatmul.mubr.msk.f32.gmra.mrb[68].mxu0 %vm454_vm4, %v29071_v16  ;;  %v14900_v16 = vld [vmem:[#allocation2 + $0x7b] sm:$0xff] }
 0xc39   : > { %23705 = vmatprep.mubr.msk.f32.mxu0 %vm454_vm4, %v29075_v1  ;;  %v14901_v1 = vld [vmem:[#allocation2 + $0x83] sm:$0xff] }
 0xc3c   : > { %23706 = vmatmul.mubr.msk.f32.gmra.mrb[70].mxu0 %vm454_vm4, %v29079_v10  ;;  %v14902_v10 = vld [vmem:[#allocation2 + $0x8b] sm:$0xff] }
 0xc3d   : > { %23708 = vmatprep.mubr.msk.f32.mxu0 %vm454_vm4, %v29083_v18  ;;  %v14903_v18 = vld [vmem:[#allocation2 + $0x93] sm:$0xff] }
 0xc40   : > { %23709 = vmatmul.mubr.msk.f32.gmra.mrb[72].mxu0 %vm454_vm4, %v29087_v0  ;;  %v14904_v0 = vld [vmem:[#allocation2 + $0x9b] sm:$0xff] }
 0xc41   : > { %23711 = vmatprep.mubr.msk.f32.mxu0 %vm454_vm4, %v29091_v34  ;;  %v14905_v34 = vld [vmem:[#allocation2 + $0xa3] sm:$0xff] }
 0xc44   : > { %23712 = vmatmul.mubr.msk.f32.gmra.mrb[74].mxu0 %vm454_vm4, %v29095_v14  ;;  %v14906_v14 = vld [vmem:[#allocation2 + $0xab] sm:$0xff] }
 0xc45   : > { %23714 = vmatprep.mubr.msk.f32.mxu0 %vm454_vm4, %v29099_v9  ;;  %v14907_v9 = vld [vmem:[#allocation2 + $0xb3] sm:$0xff] }
 0xc48   : > { %23715 = vmatmul.mubr.msk.f32.gmra.mrb[76].mxu0 %vm454_vm4, %v29103_v13  ;;  %v14908_v13 = vld [vmem:[#allocation2 + $0xbb] sm:$0xff] }
 0xc49   : > { %23717 = vmatprep.mubr.msk.f32.mxu0 %vm454_vm4, %v29107_v19  ;;  %v14909_v19 = vld [vmem:[#allocation2 + $0xc3] sm:$0xff] }
 0xc4c   : > { %23718 = vmatmul.mubr.msk.f32.gmra.mrb[78].mxu0 %vm454_vm4, %v29111_v8  ;;  %v14910_v8 = vld [vmem:[#allocation2 + $0xcb] sm:$0xff] }
 0xc4d   : > { %23720 = vmatprep.mubr.msk.f32.mxu0 %vm454_vm4, %v14047_v43  ;;  %v14911_v43 = vld [vmem:[#allocation2 + $0xd3] sm:$0xff] }
 0xc50   : > { %23721 = vmatmul.mubr.msk.f32.gmra.mrb[80].mxu0 %vm454_vm4, %v14048_v6  ;;  %v15363_v6 = vld [vmem:[#allocation15 + $0x168] sm:$0xff] }
 0xc51   : > { %23723 = vmatprep.mubr.msk.f32.mxu0 %vm454_vm4, %v14049_v22  ;;  %v14888_v22 = vld [vmem:[#allocation2 + $0x1b] sm:$0xff] }
 0xc54   : > { %23724 = vmatmul.mubr.msk.f32.gmra.mrb[82].mxu0 %vm454_vm4, %v14050_v3  ;;  %v24607_v3 = vpack.c.bf16 %v15361_v53, %v15360_v35  ;;  %v14918_v35 = vld [vmem:[#allocation2 + $0x10b] sm:$0xff]  ;;  %v14919_v53 = vld [vmem:[#allocation2 + $0x113] sm:$0xff] }
 0xc55   : > { %23726 = vmatprep.mubr.msk.f32.mxu0 %vm454_vm4, %v14051_v25  ;;  %v15362_v25 = vld [vmem:[#allocation15 + $0x160] sm:$0xff] }
 0xc58   : > { %23727 = vmatmul.mubr.msk.f32.gmra.mrb[84].mxu0 %vm454_vm4, %v14052_v23  ;;  %v14890_v23 = vld [vmem:[#allocation2 + $0x2b] sm:$0xff] }
 0xc59   : > { %23729 = vmatprep.mubr.msk.f32.mxu0 %vm454_vm4, %v14053_v4  ;;  %v14889_v4 = vld [vmem:[#allocation2 + $0x23] sm:$0xff] }
 0xc5c   : > { %23730 = vmatmul.mubr.msk.f32.gmra.mrb[86].mxu0 %vm454_vm4, %v14054_v31  ;;  %v24611_v31 = vpack.c.bf16 %v15363_v6, %v15362_v25  ;;  %v15794_v25 = vld [vmem:[#allocation15 + $0x190] sm:$0xff]  ;;  %v15795_v6 = vld [vmem:[#allocation15 + $0x198] sm:$0xff] }
 0xc5d   : > { %23732 = vmatprep.mubr.msk.f32.mxu0 %vm454_vm4, %v14487_v17  ;;  %v14916_v17 = vld [vmem:[#allocation2 + $0xfb] sm:$0xff] }
 0xc60   : > { %23733 = vmatmul.mubr.msk.f32.gmra.mrb[88].mxu0 %vm454_vm4, %v14488_v2  ;;  %v14917_v2 = vld [vmem:[#allocation2 + $0x103] sm:$0xff] }
 0xc61   : > { %23751 = vmatprep.mubr.msk.f32.mxu0 %vm454_vm4, %v14887_v26  ;;  %v14920_v26 = vld [vmem:[#allocation2 + $0x11b] sm:$0xff] }
 0xc64   : > { %23752 = vmatmul.mubr.msk.f32.vlgmr.msra.gmra.mrb[54].mxu0 %vm454_vm4, %v14888_v22  ;;  %v14922_v22 = vld [vmem:[#allocation2 + $0x12b] sm:$0xff] }
 0xc65   : > { %24606 = vmatpush3.bf16.msra.mxu0 %v24603_v12  ;;  %23754 = vmatprep.mubr.msk.f32.mxu0 %vm454_vm4, %v14889_v4  ;;  %v14915_v12 = vld [vmem:[#allocation2 + $0xf3] sm:$0xff] }
 0xc66   : > { %24608 = vmatprep.subr.bf16.mxu0 %v24607_v3  ;;  %v15321_v4 = vld [vmem:[#allocation2 + $0x14] sm:$0xff] }
 0xc68   : > { %23755 = vmatmul.mubr.msk.f32.gmra.mrb[56].mxu0 %vm454_vm4, %v14890_v23  ;;  %v15322_v23 = vld [vmem:[#allocation2 + $0x1c] sm:$0xff] }
 0xc69   : > { %23757 = vmatprep.mubr.msk.f32.mxu0 %vm454_vm4, %v14891_v24  ;;  %24610 = vmatpush3.bf16.msra.mxu0 %v24607_v3  ;;  %v14921_v3 = vld [vmem:[#allocation2 + $0x123] sm:$0xff] }
 0xc6a   : > { %24612 = vmatprep.subr.bf16.mxu0 %v24611_v31  ;;  %v29227_v24 = vld [vmem:[#allocation2 + $0x24] sm:$0xff] }
 0xc6c   : > { %23758 = vmatmul.mubr.msk.f32.gmra.mrb[58].mxu0 %vm454_vm4, %v14892_v15  ;;  %v29232_v15 = vld [vmem:[#allocation2 + $0x2c] sm:$0xff] }
 0xc6d   : > { %23760 = vmatprep.mubr.msk.f32.mxu0 %vm454_vm4, %v14893_v49  ;;  %24614 = vmatpush3.bf16.msra.mxu0 %v24611_v31  ;;  %v24623_v31 = vpack.c.bf16 %v15795_v6, %v15794_v25  ;;  %v29236_v49 = vld [vmem:[#allocation2 + $0x34] sm:$0xff]  ;;  %v15352_v25 = vld [vmem:[#allocation2 + $0x10c] sm:$0xff] }
 0xc6e   : > { %24616 = vmatprep.subr.bf16.mxu0 %v24615_v28  ;;  %v15353_v6 = vld [vmem:[#allocation2 + $0x114] sm:$0xff] }
 0xc70   : > { %23761 = vmatmul.mubr.msk.f32.gmra.mrb[60].mxu0 %vm454_vm4, %v14894_v27  ;;  %v29240_v27 = vld [vmem:[#allocation2 + $0x3c] sm:$0xff] }
 0xc71   : > { %23763 = vmatprep.mubr.msk.f32.mxu0 %vm454_vm4, %v14895_v44  ;;  %24618 = vmatpush3.bf16.msra.mxu0 %v24615_v28  ;;  %v24627_v28 = vpack.c.bf16 %v15797_v42, %v15796_v50  ;;  %v16226_v44 = vld [vmem:[#allocation15 + $0x1c0] sm:$0xff]  ;;  %v16228_v50 = vld [vmem:[#allocation15 + $0x1d0] sm:$0xff]  ;;  %v16229_v42 = vld [vmem:[#allocation15 + $0x1d8] sm:$0xff] }
 0xc72   : > { %24620 = vmatprep.subr.bf16.mxu0 %v29193_v21 }
 0xc74   : > { %23764 = vmatmul.mubr.msk.f32.gmra.mrb[62].mxu0 %vm454_vm4, %v14896_v33  ;;  %v16227_v33 = vld [vmem:[#allocation15 + $0x1c8] sm:$0xff] }
 0xc75   : > { %23766 = vmatprep.mubr.msk.f32.mxu0 %vm454_vm4, %v14897_v20  ;;  %v29244_v20 = vld [vmem:[#allocation2 + $0x44] sm:$0xff] }
 0xc78   : > { %23767 = vmatmul.mubr.msk.f32.gmra.mrb[64].mxu0 %vm454_vm4, %v14898_v5  ;;  %v29248_v5 = vpack.c.bf16 %v16227_v33, %v16226_v44  ;;  %v16232_v44 = vld [vmem:[#allocation15 + $0x1f0] sm:$0xff]  ;;  %v16233_v33 = vld [vmem:[#allocation15 + $0x1f8] sm:$0xff] }
 0xc79   : > { %23769 = vmatprep.mubr.msk.f32.mxu0 %vm454_vm4, %v14899_v7  ;;  %v29250_v7 = vld [vmem:[#allocation2 + $0x4c] sm:$0xff] }
 0xc7c   : > { %23770 = vmatmul.mubr.msk.f32.gmra.mrb[66].mxu0 %vm454_vm4, %v14900_v16  ;;  %v29254_v16 = vld [vmem:[#allocation2 + $0x54] sm:$0xff] }
 0xc7d   : > { %23772 = vmatprep.mubr.msk.f32.mxu0 %vm454_vm4, %v14901_v1  ;;  %v29259_v1 = vld [vmem:[#allocation2 + $0x5c] sm:$0xff] }
 0xc80   : > { %23773 = vmatmul.mubr.msk.f32.gmra.mrb[68].mxu0 %vm454_vm4, %v14902_v10  ;;  %v29263_v10 = vld [vmem:[#allocation2 + $0x64] sm:$0xff] }
 0xc81   : > { %23775 = vmatprep.mubr.msk.f32.mxu0 %vm454_vm4, %v14903_v18  ;;  %v29267_v18 = vld [vmem:[#allocation2 + $0x6c] sm:$0xff] }
 0xc84   : > { %23776 = vmatmul.mubr.msk.f32.gmra.mrb[70].mxu0 %vm454_vm4, %v14904_v0  ;;  %v29271_v0 = vld [vmem:[#allocation2 + $0x74] sm:$0xff] }
 0xc85   : > { %23778 = vmatprep.mubr.msk.f32.mxu0 %vm454_vm4, %v14905_v34  ;;  %v29275_v34 = vld [vmem:[#allocation2 + $0x7c] sm:$0xff] }
 0xc88   : > { %23779 = vmatmul.mubr.msk.f32.gmra.mrb[72].mxu0 %vm454_vm4, %v14906_v14  ;;  %v29279_v14 = vld [vmem:[#allocation2 + $0x84] sm:$0xff] }
 0xc89   : > { %23781 = vmatprep.mubr.msk.f32.mxu0 %vm454_vm4, %v14907_v9  ;;  %v29283_v9 = vld [vmem:[#allocation2 + $0x8c] sm:$0xff] }
 0xc8c   : > { %23782 = vmatmul.mubr.msk.f32.gmra.mrb[74].mxu0 %vm454_vm4, %v14908_v13  ;;  %v29287_v13 = vld [vmem:[#allocation2 + $0x94] sm:$0xff] }
 0xc8d   : > { %23784 = vmatprep.mubr.msk.f32.mxu0 %vm454_vm4, %v14909_v19  ;;  %v29291_v19 = vld [vmem:[#allocation2 + $0x9c] sm:$0xff] }
 0xc90   : > { %23785 = vmatmul.mubr.msk.f32.gmra.mrb[76].mxu0 %vm454_vm4, %v14910_v8  ;;  %v29295_v8 = vld [vmem:[#allocation2 + $0xa4] sm:$0xff] }
 0xc91   : > { %23787 = vmatprep.mubr.msk.f32.mxu0 %vm454_vm4, %v14911_v43  ;;  %v29299_v43 = vld [vmem:[#allocation2 + $0xac] sm:$0xff] }
 0xc94   : > { %23788 = vmatmul.mubr.msk.f32.gmra.mrb[78].mxu0 %vm454_vm4, %v14912_v11  ;;  %v29303_v11 = vld [vmem:[#allocation2 + $0xb4] sm:$0xff] }
 0xc95   : > { %23790 = vmatprep.mubr.msk.f32.mxu0 %vm454_vm4, %v14913_v62  ;;  %v29307_v62 = vld [vmem:[#allocation2 + $0xbc] sm:$0xff] }
 0xc98   : > { %23791 = vmatmul.mubr.msk.f32.gmra.mrb[80].mxu0 %vm454_vm4, %v14914_v32  ;;  %v29311_v32 = vld [vmem:[#allocation2 + $0xc4] sm:$0xff] }
 0xc99   : > { %23793 = vmatprep.mubr.msk.f32.mxu0 %vm454_vm4, %v14915_v12  ;;  %v29315_v12 = vld [vmem:[#allocation2 + $0xcc] sm:$0xff] }
 0xc9c   : > { %23794 = vmatmul.mubr.msk.f32.gmra.mrb[82].mxu0 %vm454_vm4, %v14916_v17  ;;  %v29319_v17 = vld [vmem:[#allocation2 + $0xd4] sm:$0xff] }
 0xc9d   : > { %23796 = vmatprep.mubr.msk.f32.mxu0 %vm454_vm4, %v14917_v2  ;;  %v29323_v2 = vld [vmem:[#allocation2 + $0xdc] sm:$0xff] }
 0xca0   : > { %23797 = vmatmul.mubr.msk.f32.gmra.mrb[84].mxu0 %vm454_vm4, %v14918_v35  ;;  %v29327_v35 = vld [vmem:[#allocation2 + $0xe4] sm:$0xff] }
 0xca1   : > { %23799 = vmatprep.mubr.msk.f32.mxu0 %vm454_vm4, %v14919_v53  ;;  %v29331_v53 = vld [vmem:[#allocation2 + $0xec] sm:$0xff] }
 0xca4   : > { %23800 = vmatmul.mubr.msk.f32.gmra.mrb[86].mxu0 %vm454_vm4, %v14920_v26  ;;  %v15349_v26 = vld [vmem:[#allocation2 + $0xf4] sm:$0xff] }
 0xca5   : > { %23802 = vmatprep.mubr.msk.f32.mxu0 %vm454_vm4, %v14921_v3  ;;  %v15350_v3 = vld [vmem:[#allocation2 + $0xfc] sm:$0xff] }
 0xca8   : > { %23803 = vmatmul.mubr.msk.f32.gmra.mrb[88].mxu0 %vm454_vm4, %v14922_v22  ;;  %v15351_v22 = vld [vmem:[#allocation2 + $0x104] sm:$0xff] }
 0xca9   : > { %23821 = vmatprep.mubr.msk.f32.mxu0 %vm454_vm4, %v15321_v4  ;;  %v15354_v4 = vld [vmem:[#allocation2 + $0x11c] sm:$0xff] }
 0xcac   : > { %23822 = vmatmul.mubr.msk.f32.vlgmr.msra.gmra.mrb[54].mxu0 %vm454_vm4, %v15322_v23  ;;  %v15356_v23 = vld [vmem:[#allocation2 + $0x12c] sm:$0xff] }
 0xcad   : > { %24622 = vmatpush3.bf16.msra.mxu0 %v29193_v21  ;;  %23824 = vmatprep.mubr.msk.f32.mxu0 %vm454_vm4, %v29227_v24  ;;  %v24631_v21 = vpack.c.bf16 %v15799_v30, %v15798_v29  ;;  %v16230_v29 = vld [vmem:[#allocation15 + $0x1e0] sm:$0xff]  ;;  %v16231_v30 = vld [vmem:[#allocation15 + $0x1e8] sm:$0xff] }
 0xcae   : > { %24624 = vmatprep.subr.bf16.mxu0 %v24623_v31 }
 0xcb0   : > { %23825 = vmatmul.mubr.msk.f32.gmra.mrb[56].mxu0 %vm454_vm4, %v29232_v15 }
 0xcb1   : > { %23827 = vmatprep.mubr.msk.f32.mxu0 %vm454_vm4, %v29236_v49  ;;  %24626 = vmatpush3.bf16.msra.mxu0 %v24623_v31  ;;  %v15355_v31 = vld [vmem:[#allocation2 + $0x124] sm:$0xff] }
 0xcb2   : > { %24628 = vmatprep.subr.bf16.mxu0 %v24627_v28 }
 0xcb4   : > { %23828 = vmatmul.mubr.msk.f32.gmra.mrb[58].mxu0 %vm454_vm4, %v29240_v27 }
 0xcb5   : > { %23830 = vmatprep.mubr.msk.f32.mxu0 %vm454_vm4, %v29244_v20  ;;  %24630 = vmatpush3.bf16.msra.mxu0 %v24627_v28  ;;  %v24639_v28 = vpack.c.bf16 %v16229_v42, %v16228_v50  ;;  %v16660_v50 = vld [vmem:[#allocation15 + $0x200] sm:$0xff]  ;;  %v16210_v42 = vld [vmem:[#allocation2 + $0xcd] sm:$0xff] }
 0xcb6   : > { %24632 = vmatprep.subr.bf16.mxu0 %v24631_v21 }
 0xcb8   : > { %23831 = vmatmul.mubr.msk.f32.gmra.mrb[60].mxu0 %vm454_vm4, %v29250_v7 }
 0xcb9   : > { %23833 = vmatprep.mubr.msk.f32.mxu0 %vm454_vm4, %v29254_v16  ;;  %24634 = vmatpush3.bf16.msra.mxu0 %v24631_v21  ;;  %v24643_v21 = vpack.c.bf16 %v16231_v30, %v16230_v29  ;;  %v16212_v29 = vld [vmem:[#allocation2 + $0xdd] sm:$0xff]  ;;  %v16213_v30 = vld [vmem:[#allocation2 + $0xe5] sm:$0xff] }
 0xcba   : > { %24636 = vmatprep.subr.bf16.mxu0 %v29248_v5 }
 0xcbc   : > { %23834 = vmatmul.mubr.msk.f32.gmra.mrb[62].mxu0 %vm454_vm4, %v29259_v1 }
 0xcbd   : > { %23836 = vmatprep.mubr.msk.f32.mxu0 %vm454_vm4, %v29263_v10 }
 0xcc0   : > { %23837 = vmatmul.mubr.msk.f32.gmra.mrb[64].mxu0 %vm454_vm4, %v29267_v18 }
 0xcc1   : > { %23839 = vmatprep.mubr.msk.f32.mxu0 %vm454_vm4, %v29271_v0 }
 0xcc4   : > { %23840 = vmatmul.mubr.msk.f32.gmra.mrb[66].mxu0 %vm454_vm4, %v29275_v34 }
 0xcc5   : > { %23842 = vmatprep.mubr.msk.f32.mxu0 %vm454_vm4, %v29279_v14 }
 0xcc8   : > { %23843 = vmatmul.mubr.msk.f32.gmra.mrb[68].mxu0 %vm454_vm4, %v29283_v9 }
 0xcc9   : > { %23845 = vmatprep.mubr.msk.f32.mxu0 %vm454_vm4, %v29287_v13 }
 0xccc   : > { %23846 = vmatmul.mubr.msk.f32.gmra.mrb[70].mxu0 %vm454_vm4, %v29291_v19 }
 0xccd   : > { %23848 = vmatprep.mubr.msk.f32.mxu0 %vm454_vm4, %v29295_v8 }
 0xcd0   : > { %23849 = vmatmul.mubr.msk.f32.gmra.mrb[72].mxu0 %vm454_vm4, %v29299_v43 }
 0xcd1   : > { %23851 = vmatprep.mubr.msk.f32.mxu0 %vm454_vm4, %v29303_v11 }
 0xcd4   : > { %23852 = vmatmul.mubr.msk.f32.gmra.mrb[74].mxu0 %vm454_vm4, %v29307_v62 }
 0xcd5   : > { %23854 = vmatprep.mubr.msk.f32.mxu0 %vm454_vm4, %v29311_v32 }
 0xcd8   : > { %23855 = vmatmul.mubr.msk.f32.gmra.mrb[76].mxu0 %vm454_vm4, %v29315_v12 }
 0xcd9   : > { %23857 = vmatprep.mubr.msk.f32.mxu0 %vm454_vm4, %v29319_v17 }
 0xcdc   : > { %23858 = vmatmul.mubr.msk.f32.gmra.mrb[78].mxu0 %vm454_vm4, %v29323_v2 }
 0xcdd   : > { %23860 = vmatprep.mubr.msk.f32.mxu0 %vm454_vm4, %v29327_v35 }
 0xce0   : > { %23861 = vmatmul.mubr.msk.f32.gmra.mrb[80].mxu0 %vm454_vm4, %v29331_v53 }
 0xce1   : > { %23863 = vmatprep.mubr.msk.f32.mxu0 %vm454_vm4, %v15349_v26 }
 0xce4   : > { %23864 = vmatmul.mubr.msk.f32.gmra.mrb[82].mxu0 %vm454_vm4, %v15350_v3 }
 0xce5   : > { %23866 = vmatprep.mubr.msk.f32.mxu0 %vm454_vm4, %v15351_v22 }
 0xce8   : > { %23867 = vmatmul.mubr.msk.f32.gmra.mrb[84].mxu0 %vm454_vm4, %v15352_v25 }
 0xce9   : > { %23869 = vmatprep.mubr.msk.f32.mxu0 %vm454_vm4, %v15353_v6 }
 0xcec   : > { %23870 = vmatmul.mubr.msk.f32.gmra.mrb[86].mxu0 %vm454_vm4, %v15354_v4 }
 0xced   : > { %23872 = vmatprep.mubr.msk.f32.mxu0 %vm454_vm4, %v15355_v31 }
 0xcf0   : > { %23873 = vmatmul.mubr.msk.f32.gmra.mrb[88].mxu0 %vm454_vm4, %v15356_v23 }
 0xcf1   : > { %23891 = vmatprep.mubr.msk.f32.mxu0 %vm454_vm4, %v29227_v24  ;;  %v24647_v24 = vpack.c.bf16 %v16233_v33, %v16232_v44  ;;  %v16215_v44 = vld [vmem:[#allocation2 + $0xf5] sm:$0xff]  ;;  %v16216_v33 = vld [vmem:[#allocation2 + $0xfd] sm:$0xff] }
 0xcf4   : > { %23892 = vmatmul.mubr.msk.f32.vlgmr.msra.gmra.mrb[54].mxu0 %vm454_vm4, %v29232_v15  ;;  %v16661_v15 = vld [vmem:[#allocation15 + $0x208] sm:$0xff] }
 0xcf5   : > { %24638 = vmatpush3.bf16.msra.mxu0 %v29248_v5  ;;  %23894 = vmatprep.mubr.msk.f32.mxu0 %vm454_vm4, %v29236_v49  ;;  %v24651_v49 = vpack.c.bf16 %v16661_v15, %v16660_v50  ;;  %v16662_v5 = vld [vmem:[#allocation15 + $0x210] sm:$0xff]  ;;  %v16219_v15 = vld [vmem:[#allocation2 + $0x115] sm:$0xff] }
 0xcf6   : > { %24640 = vmatprep.subr.bf16.mxu0 %v24639_v28  ;;  %v16218_v50 = vld [vmem:[#allocation2 + $0x10d] sm:$0xff] }
 0xcf8   : > { %23895 = vmatmul.mubr.msk.f32.gmra.mrb[56].mxu0 %vm454_vm4, %v29240_v27  ;;  %v15789_v27 = vld [vmem:[#allocation2 + $0x134] sm:$0xff] }
 0xcf9   : > { %23897 = vmatprep.mubr.msk.f32.mxu0 %vm454_vm4, %v29244_v20  ;;  %24642 = vmatpush3.bf16.msra.mxu0 %v24639_v28  ;;  %v15790_v20 = vld [vmem:[#allocation2 + $0x13c] sm:$0xff] }
 0xcfa   : > { %24644 = vmatprep.subr.bf16.mxu0 %v24643_v21  ;;  %v16211_v28 = vld [vmem:[#allocation2 + $0xd5] sm:$0xff] }
 0xcfc   : > { %23898 = vmatmul.mubr.msk.f32.gmra.mrb[58].mxu0 %vm454_vm4, %v29250_v7  ;;  %v16663_v7 = vld [vmem:[#allocation15 + $0x218] sm:$0xff] }
 0xcfd   : > { %23900 = vmatprep.mubr.msk.f32.mxu0 %vm454_vm4, %v29254_v16  ;;  %24646 = vmatpush3.bf16.msra.mxu0 %v24643_v21  ;;  %v16189_v16 = vld [vmem:[#allocation2 + $0x25] sm:$0xff]  ;;  %v16214_v21 = vld [vmem:[#allocation2 + $0xed] sm:$0xff] }
 0xcfe   : > { %24648 = vmatprep.subr.bf16.mxu0 %v24647_v24 }
 0xd00   : > { %23901 = vmatmul.mubr.msk.f32.gmra.mrb[60].mxu0 %vm454_vm4, %v29259_v1  ;;  %v24655_v1 = vpack.c.bf16 %v16663_v7, %v16662_v5  ;;  %v16222_v5 = vld [vmem:[#allocation2 + $0x12d] sm:$0xff]  ;;  %v16224_v7 = vld [vmem:[#allocation2 + $0x13d] sm:$0xff] }
 0xd01   : > { %23903 = vmatprep.mubr.msk.f32.mxu0 %vm454_vm4, %v29263_v10  ;;  %24650 = vmatpush3.bf16.msra.mxu0 %v24647_v24  ;;  %v16190_v10 = vld [vmem:[#allocation2 + $0x2d] sm:$0xff]  ;;  %v16217_v24 = vld [vmem:[#allocation2 + $0x105] sm:$0xff] }
 0xd02   : > { %24652 = vmatprep.subr.bf16.mxu0 %v24651_v49 }
 0xd04   : > { %23904 = vmatmul.mubr.msk.f32.gmra.mrb[62].mxu0 %vm454_vm4, %v29267_v18  ;;  %v16664_v18 = vld [vmem:[#allocation15 + $0x220] sm:$0xff] }
 0xd05   : > { %23906 = vmatprep.mubr.msk.f32.mxu0 %vm454_vm4, %v29271_v0  ;;  %v16665_v0 = vld [vmem:[#allocation15 + $0x228] sm:$0xff] }
 0xd08   : > { %23907 = vmatmul.mubr.msk.f32.gmra.mrb[64].mxu0 %vm454_vm4, %v29275_v34  ;;  %v16191_v34 = vld [vmem:[#allocation2 + $0x35] sm:$0xff] }
 0xd09   : > { %23909 = vmatprep.mubr.msk.f32.mxu0 %vm454_vm4, %v29279_v14  ;;  %v24659_v14 = vpack.c.bf16 %v16665_v0, %v16664_v18  ;;  %v16626_v18 = vld [vmem:[#allocation2 + $0x3e] sm:$0xff]  ;;  %v16627_v0 = vld [vmem:[#allocation2 + $0x46] sm:$0xff] }
 0xd0c   : > { %23910 = vmatmul.mubr.msk.f32.gmra.mrb[66].mxu0 %vm454_vm4, %v29283_v9  ;;  %v16192_v9 = vld [vmem:[#allocation2 + $0x3d] sm:$0xff] }
 0xd0d   : > { %23912 = vmatprep.mubr.msk.f32.mxu0 %vm454_vm4, %v29287_v13  ;;  %v16666_v13 = vld [vmem:[#allocation15 + $0x230] sm:$0xff] }
 0xd10   : > { %23913 = vmatmul.mubr.msk.f32.gmra.mrb[68].mxu0 %vm454_vm4, %v29291_v19  ;;  %v16667_v19 = vld [vmem:[#allocation15 + $0x238] sm:$0xff] }
 0xd11   : > { %23915 = vmatprep.mubr.msk.f32.mxu0 %vm454_vm4, %v29295_v8  ;;  %v16193_v8 = vld [vmem:[#allocation2 + $0x45] sm:$0xff] }
 0xd14   : > { %23916 = vmatmul.mubr.msk.f32.gmra.mrb[70].mxu0 %vm454_vm4, %v29299_v43  ;;  %v24663_v43 = vpack.c.bf16 %v16667_v19, %v16666_v13  ;;  %v16631_v13 = vld [vmem:[#allocation2 + $0x66] sm:$0xff]  ;;  %v16632_v19 = vld [vmem:[#allocation2 + $0x6e] sm:$0xff] }
 0xd15   : > { %23918 = vmatprep.mubr.msk.f32.mxu0 %vm454_vm4, %v29303_v11  ;;  %v16194_v11 = vld [vmem:[#allocation2 + $0x4d] sm:$0xff] }
 0xd18   : > { %23919 = vmatmul.mubr.msk.f32.gmra.mrb[72].mxu0 %vm454_vm4, %v29307_v62  ;;  %v16195_v62 = vld [vmem:[#allocation2 + $0x55] sm:$0xff] }
 0xd19   : > { %23921 = vmatprep.mubr.msk.f32.mxu0 %vm454_vm4, %v29311_v32  ;;  %v16196_v32 = vld [vmem:[#allocation2 + $0x5d] sm:$0xff] }
 0xd1c   : > { %23922 = vmatmul.mubr.msk.f32.gmra.mrb[74].mxu0 %vm454_vm4, %v29315_v12  ;;  %v16197_v12 = vld [vmem:[#allocation2 + $0x65] sm:$0xff] }
 0xd1d   : > { %23924 = vmatprep.mubr.msk.f32.mxu0 %vm454_vm4, %v29319_v17  ;;  %v16198_v17 = vld [vmem:[#allocation2 + $0x6d] sm:$0xff] }
 0xd20   : > { %23925 = vmatmul.mubr.msk.f32.gmra.mrb[76].mxu0 %vm454_vm4, %v29323_v2  ;;  %v16199_v2 = vld [vmem:[#allocation2 + $0x75] sm:$0xff] }
 0xd21   : > { %23927 = vmatprep.mubr.msk.f32.mxu0 %vm454_vm4, %v29327_v35  ;;  %v16200_v35 = vld [vmem:[#allocation2 + $0x7d] sm:$0xff] }
 0xd24   : > { %23928 = vmatmul.mubr.msk.f32.gmra.mrb[78].mxu0 %vm454_vm4, %v29331_v53  ;;  %v16201_v53 = vld [vmem:[#allocation2 + $0x85] sm:$0xff] }
 0xd25   : > { %23930 = vmatprep.mubr.msk.f32.mxu0 %vm454_vm4, %v15349_v26  ;;  %v16202_v26 = vld [vmem:[#allocation2 + $0x8d] sm:$0xff] }
 0xd28   : > { %23931 = vmatmul.mubr.msk.f32.gmra.mrb[80].mxu0 %vm454_vm4, %v15350_v3  ;;  %v16203_v3 = vld [vmem:[#allocation2 + $0x95] sm:$0xff] }
 0xd29   : > { %23933 = vmatprep.mubr.msk.f32.mxu0 %vm454_vm4, %v15351_v22  ;;  %v16204_v22 = vld [vmem:[#allocation2 + $0x9d] sm:$0xff] }
 0xd2c   : > { %23934 = vmatmul.mubr.msk.f32.gmra.mrb[82].mxu0 %vm454_vm4, %v15352_v25  ;;  %v16205_v25 = vld [vmem:[#allocation2 + $0xa5] sm:$0xff] }
 0xd2d   : > { %23936 = vmatprep.mubr.msk.f32.mxu0 %vm454_vm4, %v15353_v6  ;;  %v16206_v6 = vld [vmem:[#allocation2 + $0xad] sm:$0xff] }
 0xd30   : > { %23937 = vmatmul.mubr.msk.f32.gmra.mrb[84].mxu0 %vm454_vm4, %v15354_v4  ;;  %v16207_v4 = vld [vmem:[#allocation2 + $0xb5] sm:$0xff] }
 0xd31   : > { %23939 = vmatprep.mubr.msk.f32.mxu0 %vm454_vm4, %v15355_v31  ;;  %v16208_v31 = vld [vmem:[#allocation2 + $0xbd] sm:$0xff] }
 0xd34   : > { %23940 = vmatmul.mubr.msk.f32.gmra.mrb[86].mxu0 %vm454_vm4, %v15356_v23  ;;  %v16209_v23 = vld [vmem:[#allocation2 + $0xc5] sm:$0xff] }
 0xd35   : > { %23942 = vmatprep.mubr.msk.f32.mxu0 %vm454_vm4, %v15789_v27  ;;  %v16221_v27 = vld [vmem:[#allocation2 + $0x125] sm:$0xff] }
 0xd38   : > { %23943 = vmatmul.mubr.msk.f32.gmra.mrb[88].mxu0 %vm454_vm4, %v15790_v20  ;;  %v16223_v20 = vld [vmem:[#allocation2 + $0x135] sm:$0xff] }
 0xd39   : > { %23961 = vmatprep.mubr.msk.f32.mxu0 %vm454_vm4, %v16189_v16  ;;  %v16623_v16 = vld [vmem:[#allocation2 + $0x26] sm:$0xff] }
 0xd3c   : > { %23962 = vmatmul.mubr.msk.f32.vlgmr.msra.gmra.mrb[54].mxu0 %vm454_vm4, %v16190_v10  ;;  %v16625_v10 = vld [vmem:[#allocation2 + $0x36] sm:$0xff] }
 0xd3d   : > { %24654 = vmatpush3.bf16.msra.mxu0 %v24651_v49  ;;  %23964 = vmatprep.mubr.msk.f32.mxu0 %vm454_vm4, %v16191_v34  ;;  %v16220_v49 = vld [vmem:[#allocation2 + $0x11d] sm:$0xff]  ;;  %v16628_v34 = vld [vmem:[#allocation2 + $0x4e] sm:$0xff] }
 0xd3e   : > { %24656 = vmatprep.subr.bf16.mxu0 %v24655_v1 }
 0xd40   : > { %23965 = vmatmul.mubr.msk.f32.gmra.mrb[56].mxu0 %vm454_vm4, %v16192_v9  ;;  %v16630_v9 = vld [vmem:[#allocation2 + $0x5e] sm:$0xff] }
 0xd41   : > { %23967 = vmatprep.mubr.msk.f32.mxu0 %vm454_vm4, %v16193_v8  ;;  %24658 = vmatpush3.bf16.msra.mxu0 %v24655_v1  ;;  %v16624_v1 = vld [vmem:[#allocation2 + $0x2e] sm:$0xff]  ;;  %v16633_v8 = vld [vmem:[#allocation2 + $0x76] sm:$0xff] }
 0xd42   : > { %24660 = vmatprep.subr.bf16.mxu0 %v24659_v14 }
 0xd44   : > { %23968 = vmatmul.mubr.msk.f32.gmra.mrb[58].mxu0 %vm454_vm4, %v16194_v11  ;;  %v16635_v11 = vld [vmem:[#allocation2 + $0x86] sm:$0xff] }
 0xd45   : > { %23970 = vmatprep.mubr.msk.f32.mxu0 %vm454_vm4, %v16195_v62  ;;  %24662 = vmatpush3.bf16.msra.mxu0 %v24659_v14  ;;  %v16629_v14 = vld [vmem:[#allocation2 + $0x56] sm:$0xff]  ;;  %v16636_v62 = vld [vmem:[#allocation2 + $0x8e] sm:$0xff] }
 0xd46   : > { %24664 = vmatprep.subr.bf16.mxu0 %v24663_v43 }
 0xd48   : > { %23971 = vmatmul.mubr.msk.f32.gmra.mrb[60].mxu0 %vm454_vm4, %v16196_v32  ;;  %v16637_v32 = vld [vmem:[#allocation2 + $0x96] sm:$0xff] }
 0xd49   : > { %23973 = vmatprep.mubr.msk.f32.mxu0 %vm454_vm4, %v16197_v12  ;;  %24666 = vmatpush3.bf16.msra.mxu0 %v24663_v43  ;;  %v16634_v43 = vld [vmem:[#allocation2 + $0x7e] sm:$0xff] }
 0xd4a   : > { %v16638_v12 = vld [vmem:[#allocation2 + $0x9e] sm:$0xff] }
 0xd4c   : > { %23974 = vmatmul.mubr.msk.f32.gmra.mrb[62].mxu0 %vm454_vm4, %v16198_v17  ;;  %v16639_v17 = vld [vmem:[#allocation2 + $0xa6] sm:$0xff] }
 0xd4d   : > { %23976 = vmatprep.mubr.msk.f32.mxu0 %vm454_vm4, %v16199_v2  ;;  %v16640_v2 = vld [vmem:[#allocation2 + $0xae] sm:$0xff] }
 0xd50   : > { %23977 = vmatmul.mubr.msk.f32.gmra.mrb[64].mxu0 %vm454_vm4, %v16200_v35  ;;  %v16641_v35 = vld [vmem:[#allocation2 + $0xb6] sm:$0xff] }
 0xd51   : > { %23979 = vmatprep.mubr.msk.f32.mxu0 %vm454_vm4, %v16201_v53  ;;  %v16642_v53 = vld [vmem:[#allocation2 + $0xbe] sm:$0xff] }
 0xd54   : > { %23980 = vmatmul.mubr.msk.f32.gmra.mrb[66].mxu0 %vm454_vm4, %v16202_v26  ;;  %v16643_v26 = vld [vmem:[#allocation2 + $0xc6] sm:$0xff] }
 0xd55   : > { %23982 = vmatprep.mubr.msk.f32.mxu0 %vm454_vm4, %v16203_v3  ;;  %v16644_v3 = vld [vmem:[#allocation2 + $0xce] sm:$0xff] }
 0xd58   : > { %23983 = vmatmul.mubr.msk.f32.gmra.mrb[68].mxu0 %vm454_vm4, %v16204_v22  ;;  %v16645_v22 = vld [vmem:[#allocation2 + $0xd6] sm:$0xff] }
 0xd59   : > { %23985 = vmatprep.mubr.msk.f32.mxu0 %vm454_vm4, %v16205_v25  ;;  %v16646_v25 = vld [vmem:[#allocation2 + $0xde] sm:$0xff] }
 0xd5c   : > { %23986 = vmatmul.mubr.msk.f32.gmra.mrb[70].mxu0 %vm454_vm4, %v16206_v6  ;;  %v16647_v6 = vld [vmem:[#allocation2 + $0xe6] sm:$0xff] }
 0xd5d   : > { %23988 = vmatprep.mubr.msk.f32.mxu0 %vm454_vm4, %v16207_v4  ;;  %v16648_v4 = vld [vmem:[#allocation2 + $0xee] sm:$0xff] }
 0xd60   : > { %23989 = vmatmul.mubr.msk.f32.gmra.mrb[72].mxu0 %vm454_vm4, %v16208_v31  ;;  %v16649_v31 = vld [vmem:[#allocation2 + $0xf6] sm:$0xff] }
 0xd61   : > { %23991 = vmatprep.mubr.msk.f32.mxu0 %vm454_vm4, %v16209_v23  ;;  %v16650_v23 = vld [vmem:[#allocation2 + $0xfe] sm:$0xff] }
 0xd64   : > { %23992 = vmatmul.mubr.msk.f32.gmra.mrb[74].mxu0 %vm454_vm4, %v16210_v42  ;;  %v16651_v42 = vld [vmem:[#allocation2 + $0x106] sm:$0xff] }
 0xd65   : > { %23994 = vmatprep.mubr.msk.f32.mxu0 %vm454_vm4, %v16211_v28  ;;  %v16652_v28 = vld [vmem:[#allocation2 + $0x10e] sm:$0xff] }
 0xd68   : > { %23995 = vmatmul.mubr.msk.f32.gmra.mrb[76].mxu0 %vm454_vm4, %v16212_v29  ;;  %v16653_v29 = vld [vmem:[#allocation2 + $0x116] sm:$0xff] }
 0xd69   : > { %23997 = vmatprep.mubr.msk.f32.mxu0 %vm454_vm4, %v16213_v30  ;;  %v16654_v30 = vld [vmem:[#allocation2 + $0x11e] sm:$0xff] }
 0xd6c   : > { %23998 = vmatmul.mubr.msk.f32.gmra.mrb[78].mxu0 %vm454_vm4, %v16214_v21  ;;  %v16655_v21 = vld [vmem:[#allocation2 + $0x126] sm:$0xff] }
 0xd6d   : > { %24000 = vmatprep.mubr.msk.f32.mxu0 %vm454_vm4, %v16215_v44  ;;  %v16657_v44 = vld [vmem:[#allocation2 + $0x136] sm:$0xff] }
 0xd70   : > { %24001 = vmatmul.mubr.msk.f32.gmra.mrb[80].mxu0 %vm454_vm4, %v16216_v33  ;;  %v16656_v33 = vld [vmem:[#allocation2 + $0x12e] sm:$0xff] }
 0xd71   : > { %24003 = vmatprep.mubr.msk.f32.mxu0 %vm454_vm4, %v16217_v24  ;;  %v16658_v24 = vld [vmem:[#allocation2 + $0x13e] sm:$0xff] }
 0xd74   : > { %24004 = vmatmul.mubr.msk.f32.gmra.mrb[82].mxu0 %vm454_vm4, %v16218_v50  ;;  %v17129_v50 = vld [vmem:[#allocation2] sm:$0xff] }
 0xd75   : > { %24006 = vmatprep.mubr.msk.f32.mxu0 %vm454_vm4, %v16219_v15  ;;  %v29478_v15 = vld [vmem:[#allocation16] ss:$0 sm:$0xff] }
 0xd78   : > { %24007 = vmatmul.mubr.msk.f32.gmra.mrb[84].mxu0 %vm454_vm4, %v16220_v49  ;;  %v17206_v49 = vld [vmem:[#allocation2 + $0x1] sm:$0xff] }
 0xd79   : > { %24009 = vmatprep.mubr.msk.f32.mxu0 %vm454_vm4, %v16221_v27  ;;  %v29480_v27 = vld [vmem:[#allocation16 + $0x1] ss:$0 sm:$0xff] }
 0xd7c   : > { %24010 = vmatmul.mubr.msk.f32.gmra.mrb[86].mxu0 %vm454_vm4, %v16222_v5  ;;  %v17130_v5 = vld [vmem:[#allocation2 + $0x8] sm:$0xff] }
 0xd7d   : > { %24012 = vmatprep.mubr.msk.f32.mxu0 %vm454_vm4, %v16223_v20 }
 0xd80   : > { %24013 = vmatmul.mubr.msk.f32.gmra.mrb[88].mxu0 %vm454_vm4, %v16224_v7  ;;  %v17207_v7 = vld [vmem:[#allocation2 + $0x9] sm:$0xff] }
 0xd81   : > { %24031 = vmatprep.mubr.msk.f32.mxu0 %vm454_vm4, %v16623_v16 }
 0xd84   : > { %24032 = vmatmul.mubr.msk.f32.vlgmr.msra.gmra.mrb[54].mxu0 %vm454_vm4, %v16624_v1 }
 0xd85   : > { %24034 = vmatprep.mubr.msk.f32.mxu0 %vm454_vm4, %v16625_v10 }
 0xd88   : > { %24035 = vmatmul.mubr.msk.f32.gmra.mrb[56].mxu0 %vm454_vm4, %v16626_v18  ;;  %v17170_v18 = vmul.f32 %v29478_v15, %v17129_v50 }
 0xd89   : > { %24037 = vmatprep.mubr.msk.f32.mxu0 %vm454_vm4, %v16627_v0  ;;  %v17247_v0 = vmul.f32 %v29480_v27, %v17206_v49 }
 0xd8c   : > { %24038 = vmatmul.mubr.msk.f32.gmra.mrb[58].mxu0 %vm454_vm4, %v16628_v34  ;;  %v17319_v34 = vld [vmem:[#allocation2 + $0x2] sm:$0xff] }
 0xd8d   : > { %24040 = vmatprep.mubr.msk.f32.mxu0 %vm454_vm4, %v16629_v14  ;;  %v29487_v14 = vld [vmem:[#allocation16 + $0x2] ss:$0 sm:$0xff] }
 0xd90   : > { %24041 = vmatmul.mubr.msk.f32.gmra.mrb[60].mxu0 %vm454_vm4, %v16630_v9  ;;  %v17171_v9 = vmul.f32 %v29478_v15, %v17130_v5 }
 0xd91   : > { %24043 = vmatprep.mubr.msk.f32.mxu0 %vm454_vm4, %v16631_v13  ;;  %v17248_v13 = vmul.f32 %v29480_v27, %v17207_v7  ;;  %v29515_v7 = vld [vmem:[#allocation16 + $0x6] ss:$0 sm:$0xff] }
 0xd94   : > { %24044 = vmatmul.mubr.msk.f32.gmra.mrb[62].mxu0 %vm454_vm4, %v16632_v19 }
 0xd95   : > { %24046 = vmatprep.mubr.msk.f32.mxu0 %vm454_vm4, %v16633_v8 }
 0xd98   : > { %24047 = vmatmul.mubr.msk.f32.gmra.mrb[64].mxu0 %vm454_vm4, %v16634_v43 }
 0xd99   : > { %24049 = vmatprep.mubr.msk.f32.mxu0 %vm454_vm4, %v16635_v11  ;;  %v17283_v11 = vadd.f32 %v17247_v0, %v17170_v18 }
 0xd9c   : > { %24050 = vmatmul.mubr.msk.f32.gmra.mrb[66].mxu0 %vm454_vm4, %v16636_v62  ;;  %v17360_v62 = vmul.f32 %v29487_v14, %v17319_v34 }
 0xd9d   : > { %24052 = vmatprep.mubr.msk.f32.mxu0 %vm454_vm4, %v16637_v32  ;;  %v17284_v32 = vadd.f32 %v17248_v13, %v17171_v9 }
 0xda0   : > { %24053 = vmatmul.mubr.msk.f32.gmra.mrb[68].mxu0 %vm454_vm4, %v16638_v12 }
 0xda1   : > { %24055 = vmatprep.mubr.msk.f32.mxu0 %vm454_vm4, %v16639_v17 }
 0xda4   : > { %24056 = vmatmul.mubr.msk.f32.gmra.mrb[70].mxu0 %vm454_vm4, %v16640_v2 }
 0xda5   : > { %24058 = vmatprep.mubr.msk.f32.mxu0 %vm454_vm4, %v16641_v35 }
 0xda8   : > { %24059 = vmatmul.mubr.msk.f32.gmra.mrb[72].mxu0 %vm454_vm4, %v16642_v53  ;;  %v29499_v53 = vld [vmem:[#allocation16 + $0x3] ss:$0 sm:$0xff] }
 0xda9   : > { %24061 = vmatprep.mubr.msk.f32.mxu0 %vm454_vm4, %v16643_v26  ;;  %v17396_v26 = vadd.f32 %v17360_v62, %v17283_v11 }
 0xdac   : > { %24062 = vmatmul.mubr.msk.f32.gmra.mrb[74].mxu0 %vm454_vm4, %v16644_v3 }
 0xdad   : > { %24064 = vmatprep.mubr.msk.f32.mxu0 %vm454_vm4, %v16645_v22 }
 0xdb0   : > { %24065 = vmatmul.mubr.msk.f32.gmra.mrb[76].mxu0 %vm454_vm4, %v16646_v25  ;;  %v29505_v25 = vld [vmem:[#allocation16 + $0x5] ss:$0 sm:$0xff] }
 0xdb1   : > { %24067 = vmatprep.mubr.msk.f32.mxu0 %vm454_vm4, %v16647_v6 }
 0xdb4   : > { %24068 = vmatmul.mubr.msk.f32.gmra.mrb[78].mxu0 %vm454_vm4, %v16648_v4 }
 0xdb5   : > { %24070 = vmatprep.mubr.msk.f32.mxu0 %vm454_vm4, %v16649_v31 }
 0xdb8   : > { %24071 = vmatmul.mubr.msk.f32.gmra.mrb[80].mxu0 %vm454_vm4, %v16650_v23 }
 0xdb9   : > { %24073 = vmatprep.mubr.msk.f32.mxu0 %vm454_vm4, %v16651_v42 }
 0xdbc   : > { %24074 = vmatmul.mubr.msk.f32.gmra.mrb[82].mxu0 %vm454_vm4, %v16652_v28 }
 0xdbd   : > { %24076 = vmatprep.mubr.msk.f32.mxu0 %vm454_vm4, %v16653_v29 }
 0xdc0   : > { %24077 = vmatmul.mubr.msk.f32.gmra.mrb[84].mxu0 %vm454_vm4, %v16654_v30 }
 0xdc1   : > { %24079 = vmatprep.mubr.msk.f32.mxu0 %vm454_vm4, %v16655_v21 }
 0xdc4   : > { %24080 = vmatmul.mubr.msk.f32.gmra.mrb[86].mxu0 %vm454_vm4, %v16656_v33 }
 0xdc5   : > { %24082 = vmatprep.mubr.msk.f32.mxu0 %vm454_vm4, %v16657_v44 }
 0xdc8   : > { %24083 = vmatmul.mubr.msk.f32.gmra.mrb[88].mxu0 %vm454_vm4, %v16658_v24 }
 0xe57   : > { %v24033_v20 = vpop.f32.mrb[54].mxu0 }
 0xe58   : > { %v17058_v16 = vmul.f32 %v24033_v20, %v26783_v38  ;;  %v16842_v1 = vpop.f32.mrb[55].mxu0  ;;  %v17320_v38 = vld [vmem:[#allocation2 + $0xa] sm:$0xff] }
 0xe59   : > { %v17057_v10 = vmul.f32 %v16842_v1, %v26779_v36  ;;  %v17361_v12 = vmul.f32 %v29487_v14, %v17320_v38  ;;  %v29520_v1 = vld [vmem:[#allocation16 + $0x8] ss:$0 sm:$0xff] }
 0xe5a   : > { %17094 = vst.msk [vmem:[#allocation2 + $0x1b] sm:$0xff] %vm454_vm4, %v17058_v16  ;;  %v29518_v16 = vld [vmem:[#allocation16 + $0x7] ss:$0 sm:$0xff] }
 0xe5b   : > { %17093 = vst.msk [vmem:[#allocation2 + $0x13] sm:$0xff] %vm454_vm4, %v17057_v10  ;;  %v24036_v19 = vpop.f32.mrb[56].mxu0  ;;  %v17397_v6 = vadd.f32 %v17361_v12, %v17284_v32 }
 0xe5c   : > { %v17060_v8 = vmul.f32 %v24036_v19, %v26785_v39  ;;  %v16852_v36 = vpop.f32.mrb[57].mxu0 }
 0xe5d   : > { %v17059_v43 = vmul.f32 %v16852_v36, %v26781_v37  ;;  %v29502_v37 = vld [vmem:[#allocation16 + $0x4] ss:$0 sm:$0xff] }
 0xe5e   : > { %17096 = vst.msk [vmem:[#allocation2 + $0x2b] sm:$0xff] %vm454_vm4, %v17060_v8 }
 0xe5f   : > { %17095 = vst.msk [vmem:[#allocation2 + $0x23] sm:$0xff] %vm454_vm4, %v17059_v43  ;;  %v24039_v17 = vpop.f32.mrb[58].mxu0 }
 0xe60   : > { %v17062_v2 = vmul.f32 %v24039_v17, %v26789_v41  ;;  %v16862_v35 = vpop.f32.mrb[59].mxu0 }
 0xe61   : > { %v17061_v39 = vmul.f32 %v16862_v35, %v26787_v40  ;;  %v17512_v4 = vld [vmem:[#allocation2 + $0x1b] sm:$0xff] }
 0xe62   : > { %17098 = vst.msk [vmem:[#allocation2 + $0x3b] sm:$0xff] %vm454_vm4, %v17062_v2  ;;  %v17321_v3 = vld [vmem:[#allocation2 + $0x12] sm:$0xff]  ;;  %v17322_v23 = vld [vmem:[#allocation2 + $0x1a] sm:$0xff]  ;;  %v17553_v18 = vmul.f32 %v29502_v37, %v17512_v4 }
 0xe63   : > { %v17511_v22 = vld [vmem:[#allocation2 + $0x13] sm:$0xff]  ;;  %17097 = vst.msk [vmem:[#allocation2 + $0x33] sm:$0xff] %vm454_vm4, %v17061_v39  ;;  %v24042_v31 = vpop.f32.mrb[60].mxu0  ;;  %v17439_v41 = vmul.f32 %v29499_v53, %v17321_v3  ;;  %v17440_v21 = vmul.f32 %v29499_v53, %v17322_v23  ;;  %v17362_v34 = vmul.f32 %v29487_v14, %v17321_v3 }
 0xe64   : > { %v17131_v42 = vld [vmem:[#allocation2 + $0x10] sm:$0xff]  ;;  %v17064_v40 = vmul.f32 %v24042_v31, %v26793_v46  ;;  %v16872_v29 = vpop.f32.mrb[61].mxu0  ;;  %v17132_v24 = vld [vmem:[#allocation2 + $0x18] sm:$0xff]  ;;  %v17552_v5 = vmul.f32 %v29502_v37, %v17511_v22 }
 0xe65   : > { %v17208_v28 = vld [vmem:[#allocation2 + $0x11] sm:$0xff]  ;;  %v17172_v44 = vmul.f32 %v29478_v15, %v17131_v42  ;;  %v17209_v50 = vld [vmem:[#allocation2 + $0x19] sm:$0xff]  ;;  %v17063_v49 = vmul.f32 %v16872_v29, %v26791_v45  ;;  %v17475_v20 = vadd.f32 %v17439_v41, %v17396_v26  ;;  %v17476_v10 = vadd.f32 %v17440_v21, %v17397_v6 }
 0xe66   : > { %v17624_v30 = vld [vmem:[#allocation2 + $0x14] sm:$0xff]  ;;  %v17249_v33 = vmul.f32 %v29480_v27, %v17208_v28  ;;  %17100 = vst.msk [vmem:[#allocation2 + $0x4b] sm:$0xff] %vm454_vm4, %v17064_v40  ;;  %v17626_v46 = vld [vmem:[#allocation2 + $0x24] sm:$0xff]  ;;  %v17625_v38 = vld [vmem:[#allocation2 + $0x1c] sm:$0xff]  ;;  %v29527_v36 = vmul.f32 %v29478_v15, %v17132_v24  ;;  %v29530_v43 = vmul.f32 %v29480_v27, %v17209_v50  ;;  %v29544_v40 = vmul.f32 %v29487_v14, %v17322_v23 }
 0xe67   : > { %17099 = vst.msk [vmem:[#allocation2 + $0x43] sm:$0xff] %vm454_vm4, %v17063_v49  ;;  %v24045_v45 = vpop.f32.mrb[62].mxu0  ;;  %v17588_v9 = vadd.f32 %v17552_v5, %v17475_v20  ;;  %v17665_v13 = vmul.f32 %v29505_v25, %v17624_v30  ;;  %v17816_v19 = vld [vmem:[#allocation2 + $0x25] sm:$0xff]  ;;  %v17589_v12 = vadd.f32 %v17553_v18, %v17476_v10  ;;  %v17666_v17 = vmul.f32 %v29505_v25, %v17625_v38 }
 0xe68   : > { %v17285_v0 = vadd.f32 %v17249_v33, %v17172_v44  ;;  %v17323_v8 = vld [vmem:[#allocation2 + $0x22] sm:$0xff]  ;;  %v17066_v11 = vmul.f32 %v24045_v45, %v26797_v48  ;;  %v16882_v62 = vpop.f32.mrb[63].mxu0  ;;  %v17744_v22 = vmul.f32 %v29515_v7, %v17626_v46  ;;  %v17857_v48 = vmul.f32 %v29518_v16, %v17816_v19  ;;  %v17514_v10 = vld [vmem:[#allocation2 + $0x2b] sm:$0xff] }
 0xe69   : > { %v17929_v32 = vld [vmem:[#allocation2 + $0x26] sm:$0xff]  ;;  %v17065_v26 = vmul.f32 %v16882_v62, %v26795_v47  ;;  %v17701_v3 = vadd.f32 %v17665_v13, %v17588_v9  ;;  %v17441_v6 = vmul.f32 %v29499_v53, %v17323_v8  ;;  %v17702_v21 = vadd.f32 %v17666_v17, %v17589_v12 }
 0xe6a   : > { %v17398_v2 = vadd.f32 %v17362_v34, %v17285_v0  ;;  %v17133_v35 = vld [vmem:[#allocation2 + $0x20] sm:$0xff]  ;;  %17102 = vst.msk [vmem:[#allocation2 + $0x5b] sm:$0xff] %vm454_vm4, %v17066_v11  ;;  %v29539_v31 = vld [vmem:[#allocation2 + $0x2c] sm:$0xff]  ;;  %v17970_v30 = vmul.f32 %v29520_v1, %v17929_v32  ;;  %v17667_v23 = vmul.f32 %v29505_v25, %v17626_v46  ;;  %v17628_v9 = vld [vmem:[#allocation2 + $0x34] sm:$0xff]  ;;  %v17364_v38 = vmul.f32 %v29487_v14, %v17323_v8 }
 0xe6b   : > { %v17210_v39 = vld [vmem:[#allocation2 + $0x21] sm:$0xff]  ;;  %v17817_v41 = vld [vmem:[#allocation2 + $0x2d] sm:$0xff]  ;;  %v17174_v42 = vmul.f32 %v29478_v15, %v17133_v35  ;;  %17101 = vst.msk [vmem:[#allocation2 + $0x53] sm:$0xff] %vm454_vm4, %v17065_v26  ;;  %v24048_v47 = vpop.f32.mrb[64].mxu0  ;;  %v17780_v29 = vadd.f32 %v17744_v22, %v17701_v3  ;;  %v17745_v44 = vmul.f32 %v29515_v7, %v29539_v31  ;;  %v17818_v13 = vld [vmem:[#allocation2 + $0x35] sm:$0xff]  ;;  %v17555_v17 = vmul.f32 %v29502_v37, %v17514_v10 }
 0xe6c   : > { %v17513_v4 = vld [vmem:[#allocation2 + $0x23] sm:$0xff]  ;;  %v17251_v28 = vmul.f32 %v29480_v27, %v17210_v39  ;;  %v17068_v33 = vmul.f32 %v24048_v47, %v26801_v52  ;;  %v16892_v24 = vpop.f32.mrb[65].mxu0  ;;  %v17930_v50 = vld [vmem:[#allocation2 + $0x2e] sm:$0xff]  ;;  %v17477_v49 = vadd.f32 %v17441_v6, %v17398_v2  ;;  %v17858_v45 = vmul.f32 %v29518_v16, %v17817_v41  ;;  %v17931_v8 = vld [vmem:[#allocation2 + $0x36] sm:$0xff] }
 0xe6d   : > { %v17554_v20 = vmul.f32 %v29502_v37, %v17513_v4  ;;  %v29553_v5 = vld [vmem:[#allocation2 + $0x32] sm:$0xff]  ;;  %v17067_v18 = vmul.f32 %v16892_v24, %v26799_v51  ;;  %v17893_v0 = vadd.f32 %v17857_v48, %v17780_v29  ;;  %v17781_v34 = vadd.f32 %v17745_v44, %v17702_v21  ;;  %v29566_v22 = vld [vmem:[#allocation2 + $0x2a] sm:$0xff] }
 0xe6e   : > { %17104 = vst.msk [vmem:[#allocation2 + $0x6b] sm:$0xff] %vm454_vm4, %v17068_v33  ;;  %v17287_v19 = vadd.f32 %v17251_v28, %v17174_v42  ;;  %v17443_v46 = vmul.f32 %v29499_v53, %v29553_v5  ;;  %v17971_v32 = vmul.f32 %v29520_v1, %v17930_v50  ;;  %v17515_v12 = vld [vmem:[#allocation2 + $0x33] sm:$0xff]  ;;  %v17746_v26 = vmul.f32 %v29515_v7, %v17628_v9  ;;  %v29573_v47 = vld [vmem:[#allocation2 + $0x44] sm:$0xff] }
 0xe6f   : > { %v17590_v52 = vadd.f32 %v17554_v20, %v17477_v49  ;;  %17103 = vst.msk [vmem:[#allocation2 + $0x63] sm:$0xff] %vm454_vm4, %v17067_v18  ;;  %v24051_v11 = vpop.f32.mrb[66].mxu0  ;;  %v18006_v62 = vadd.f32 %v17970_v30, %v17893_v0  ;;  %v17894_v51 = vadd.f32 %v17858_v45, %v17781_v34  ;;  %v17859_v41 = vmul.f32 %v29518_v16, %v17818_v13  ;;  %v17135_v30 = vld [vmem:[#allocation2 + $0x30] sm:$0xff]  ;;  %v17933_v10 = vld [vmem:[#allocation2 + $0x46] sm:$0xff]  ;;  %v29585_v0 = vld [vmem:[#allocation2 + $0x3c] sm:$0xff] }
 0xe70   : > { %v17070_v2 = vmul.f32 %v24051_v11, %v26808_v55  ;;  %v16902_v35 = vpop.f32.mrb[67].mxu0  ;;  %v17400_v3 = vadd.f32 %v17364_v38, %v17287_v19  ;;  %v17556_v28 = vmul.f32 %v29502_v37, %v17515_v12  ;;  %v17286_v29 = vadd.f32 %v29530_v43, %v29527_v36  ;;  %v17212_v50 = vld [vmem:[#allocation2 + $0x31] sm:$0xff]  ;;  %v17820_v43 = vld [vmem:[#allocation2 + $0x45] sm:$0xff] }
 0xe71   : > { %v17703_v39 = vadd.f32 %v17667_v23, %v17590_v52  ;;  %v17069_v6 = vmul.f32 %v16902_v35, %v26806_v54  ;;  %v18042_v4 = vsel %vm454_vm4, %v18006_v62, 0.0  ;;  %v18007_v48 = vadd.f32 %v17971_v32, %v17894_v51  ;;  %v17819_v62 = vld [vmem:[#allocation2 + $0x3d] sm:$0xff]  ;;  %v17134_v51 = vld [vmem:[#allocation2 + $0x28] sm:$0xff] }
 0xe72   : > { %17106 = vst.msk [vmem:[#allocation2 + $0x7b] sm:$0xff] %vm454_vm4, %v17070_v2  ;;  %18043 = vadd.xlane.f32.xlu0 %v18042_v4  ;;  %v17479_v55 = vadd.f32 %v17443_v46, %v17400_v3  ;;  %v17972_v44 = vmul.f32 %v29520_v1, %v17931_v8  ;;  %v17669_v33 = vmul.f32 %v29505_v25, %v17628_v9  ;;  %v17517_v8 = vld [vmem:[#allocation2 + $0x43] sm:$0xff] }
 0xe73   : > { %v17782_v42 = vadd.f32 %v17746_v26, %v17703_v39  ;;  %17105 = vst.msk [vmem:[#allocation2 + $0x73] sm:$0xff] %vm454_vm4, %v17069_v6  ;;  %v24054_v54 = vpop.f32.mrb[68].mxu0  ;;  %v18045_v21 = vsel %vm454_vm4, %v18007_v48, 0.0  ;;  %v17442_v24 = vmul.f32 %v29499_v53, %v29566_v22  ;;  %v17399_v18 = vadd.f32 %v29544_v40, %v17286_v29  ;;  %v29595_v40 = vld [vmem:[#allocation2 + $0x42] sm:$0xff] }
 0xe74   : > { %v17072_v49 = vmul.f32 %v24054_v54, %v26812_v57  ;;  %18046 = vadd.xlane.f32.xlu1 %v18045_v21  ;;  %v16912_v20 = vpop.f32.mrb[69].mxu0  ;;  %v17592_v36 = vadd.f32 %v17556_v28, %v17479_v55  ;;  %v17748_v45 = vmul.f32 %v29515_v7, %v29573_v47  ;;  %v17668_v9 = vmul.f32 %v29505_v25, %v29539_v31  ;;  %v17932_v26 = vld [vmem:[#allocation2 + $0x3e] sm:$0xff]  ;;  %v17211_v3 = vld [vmem:[#allocation2 + $0x29] sm:$0xff]  ;;  %v29617_v54 = vld [vmem:[#allocation2 + $0x54] sm:$0xff] }
 0xe75   : > { %v17895_v23 = vadd.f32 %v17859_v41, %v17782_v42  ;;  %v17071_v34 = vmul.f32 %v16912_v20, %v26810_v56  ;;  %v17176_v57 = vmul.f32 %v29478_v15, %v17135_v30  ;;  %v17478_v19 = vadd.f32 %v17442_v24, %v17399_v18  ;;  %v29612_v28 = vld [vmem:[#allocation2 + $0x3a] sm:$0xff] }
 0xe76   : > { %17108 = vst.msk [vmem:[#allocation2 + $0x8b] sm:$0xff] %vm454_vm4, %v17072_v49  ;;  %v17705_v13 = vadd.f32 %v17669_v33, %v17592_v36  ;;  %v17253_v38 = vmul.f32 %v29480_v27, %v17212_v50  ;;  %v17861_v46 = vmul.f32 %v29518_v16, %v17820_v43  ;;  %v17974_v11 = vmul.f32 %v29520_v1, %v17933_v10  ;;  %v17822_v49 = vld [vmem:[#allocation2 + $0x55] sm:$0xff] }
 0xe77   : > { %v18008_v52 = vadd.f32 %v17972_v44, %v17895_v23  ;;  %17107 = vst.msk [vmem:[#allocation2 + $0x83] sm:$0xff] %vm454_vm4, %v17071_v34  ;;  %v24057_v56 = vpop.f32.mrb[70].mxu0  ;;  %v17747_v31 = vmul.f32 %v29515_v7, %v29585_v0  ;;  %v17591_v39 = vadd.f32 %v17555_v17, %v17478_v19  ;;  %v17366_v48 = vmul.f32 %v29487_v14, %v29553_v5  ;;  %v17137_v23 = vld [vmem:[#allocation2 + $0x40] sm:$0xff] }
 0xe78   : > { %v17074_v12 = vmul.f32 %v24057_v56, %v26816_v59  ;;  %v16922_v2 = vpop.f32.mrb[71].mxu0  ;;  %v17784_v35 = vadd.f32 %v17748_v45, %v17705_v13  ;;  %v17289_v4 = vadd.f32 %v17253_v38, %v17176_v57  ;;  %v17445_v41 = vmul.f32 %v29499_v53, %v29595_v40  ;;  %v17516_v34 = vld [vmem:[#allocation2 + $0x3b] sm:$0xff]  ;;  %v29635_v56 = vld [vmem:[#allocation2 + $0x52] sm:$0xff] }
 0xe79   : > { %v18048_v32 = vsel %vm454_vm4, %v18008_v52, 0.0  ;;  %v17073_v6 = vmul.f32 %v16922_v2, %v26814_v58  ;;  %v17704_v59 = vadd.f32 %v17668_v9, %v17591_v39  ;;  %v17860_v55 = vmul.f32 %v29518_v16, %v17819_v62  ;;  %v17214_v45 = vld [vmem:[#allocation2 + $0x41] sm:$0xff]  ;;  %v17821_v39 = vld [vmem:[#allocation2 + $0x4d] sm:$0xff] }
 0xe7a   : > { %18049 = vadd.xlane.f32.xlu0 %v18048_v32  ;;  %17110 = vst.msk [vmem:[#allocation2 + $0x9b] sm:$0xff] %vm454_vm4, %v17074_v12  ;;  %v17897_v42 = vadd.f32 %v17861_v46, %v17784_v35  ;;  %v17175_v17 = vmul.f32 %v29478_v15, %v17134_v51  ;;  %v17973_v58 = vmul.f32 %v29520_v1, %v17932_v26  ;;  %v30522_v26 = vld [vmem:[#allocation25_spill] sm:$0xff] }
 0xe7b   : > { %17109 = vst.msk [vmem:[#allocation2 + $0x93] sm:$0xff] %vm454_vm4, %v17073_v6  ;;  %v24060_v29 = vpop.f32.mrb[72].mxu0  ;;  %v17402_v30 = vadd.f32 %v17366_v48, %v17289_v4  ;;  %v17558_v5 = vmul.f32 %v29502_v37, %v17517_v8  ;;  %v17252_v21 = vmul.f32 %v29480_v27, %v17211_v3  ;;  %v17783_v33 = vadd.f32 %v17747_v31, %v17704_v59  ;;  %v17136_v3 = vld [vmem:[#allocation2 + $0x38] sm:$0xff]  ;;  %v17934_v48 = vld [vmem:[#allocation2 + $0x4e] sm:$0xff] }
 0xe7c   : > { %v18010_v44 = vadd.f32 %v17974_v11, %v17897_v42  ;;  %v17076_v24 = vmul.f32 %v24060_v29, %v26820_v61  ;;  %v16932_v50 = vpop.f32.mrb[73].mxu0  ;;  %v17365_v20 = vmul.f32 %v29487_v14, %v29566_v22  ;;  %v17444_v18 = vmul.f32 %v29499_v53, %v29612_v28  ;;  %v17935_v11 = vld [vmem:[#allocation2 + $0x56] sm:$0xff]  ;;  %v29655_v29 = vld [vmem:[#allocation2 + $0x4a] sm:$0xff] }
 0xe7d   : > { %v17075_v36 = vmul.f32 %v16932_v50, %v26818_v60  ;;  %v17481_v43 = vadd.f32 %v17445_v41, %v17402_v30  ;;  %v17288_v10 = vadd.f32 %v17252_v21, %v17175_v17  ;;  %v17896_v57 = vadd.f32 %v17860_v55, %v17783_v33  ;;  %v17213_v6 = vld [vmem:[#allocation2 + $0x39] sm:$0xff]  ;;  %v29658_v21 = vld [vmem:[#allocation2 + $0x64] sm:$0xff] }
 0xe7e   : > { %v18054_v9 = vsel %vm454_vm4, %v18010_v44, 0.0  ;;  %17112 = vst.msk [vmem:[#allocation2 + $0xab] sm:$0xff] %vm454_vm4, %v17076_v24  ;;  %v17671_v61 = vmul.f32 %v29505_v25, %v29573_v47  ;;  %v17750_v22 = vmul.f32 %v29515_v7, %v29617_v54  ;;  %v17863_v52 = vmul.f32 %v29518_v16, %v17822_v49  ;;  %v29638_v47 = vld [vmem:[#allocation2 + $0x4c] sm:$0xff] }
 0xe7f   : > { %18055 = vadd.xlane.f32.xlu1 %v18054_v9  ;;  %17111 = vst.msk [vmem:[#allocation2 + $0xa3] sm:$0xff] %vm454_vm4, %v17075_v36  ;;  %v17594_v60 = vadd.f32 %v17558_v5, %v17481_v43  ;;  %v17401_v13 = vadd.f32 %v17365_v20, %v17288_v10  ;;  %v24063_v19 = vpop.f32.mrb[74].mxu0  ;;  %v17178_v38 = vmul.f32 %v29478_v15, %v17137_v23  ;;  %v17519_v59 = vld [vmem:[#allocation2 + $0x53] sm:$0xff]  ;;  %v17518_v36 = vld [vmem:[#allocation2 + $0x4b] sm:$0xff] }
 0xe80   : > { %v18009_v46 = vadd.f32 %v17973_v58, %v17896_v57  ;;  %v17557_v31 = vmul.f32 %v29502_v37, %v17516_v34  ;;  %v17078_v62 = vmul.f32 %v24063_v19, %v26824_v63  ;;  %v16942_v51 = vpop.f32.mrb[75].mxu0  ;;  %v17255_v32 = vmul.f32 %v29480_v27, %v17214_v45  ;;  %v17139_v45 = vld [vmem:[#allocation2 + $0x50] sm:$0xff]  ;;  %v17824_v19 = vld [vmem:[#allocation2 + $0x65] sm:$0xff] }
 0xe81   : > { %v17707_v12 = vadd.f32 %v17671_v61, %v17594_v60  ;;  %v17480_v2 = vadd.f32 %v17444_v18, %v17401_v13  ;;  %v17670_v35 = vmul.f32 %v29505_v25, %v29585_v0  ;;  %v17077_v8 = vmul.f32 %v16942_v51, %v30522_v26  ;;  %v17216_v60 = vld [vmem:[#allocation2 + $0x51] sm:$0xff]  ;;  %v17937_v26 = vld [vmem:[#allocation2 + $0x66] sm:$0xff] }
 0xe82   : > { %v18051_v4 = vsel %vm454_vm4, %v18009_v46, 0.0  ;;  %17114 = vst.msk [vmem:[#allocation2 + $0xbb] sm:$0xff] %vm454_vm4, %v17078_v62  ;;  %v17291_v41 = vadd.f32 %v17255_v32, %v17178_v38  ;;  %v17368_v63 = vmul.f32 %v29487_v14, %v29595_v40  ;;  %v17447_v42 = vmul.f32 %v29499_v53, %v29635_v56  ;;  %v29675_v46 = vld [vmem:[#allocation2 + $0x5c] sm:$0xff]  ;;  %v30524_v32 = vld [vmem:[#allocation26_spill] sm:$0xff] }
 0xe83   : > { %18052 = vadd.xlane.f32.xlu0 %v18051_v4  ;;  %v17786_v0 = vadd.f32 %v17750_v22, %v17707_v12  ;;  %v17976_v55 = vmul.f32 %v29520_v1, %v17935_v11  ;;  %v17593_v17 = vadd.f32 %v17557_v31, %v17480_v2  ;;  %v17749_v58 = vmul.f32 %v29515_v7, %v29638_v47  ;;  %v24066_v30 = vpop.f32.mrb[76].mxu0  ;;  %v30523_v11 = vld [vmem:[#allocation27_spill] sm:$0xff] }
 0xe84   : > { %17113 = vst.msk [vmem:[#allocation2 + $0xb3] sm:$0xff] %vm454_vm4, %v17077_v8  ;;  %v17862_v5 = vmul.f32 %v29518_v16, %v17821_v39  ;;  %v17404_v40 = vadd.f32 %v17368_v63, %v17291_v41  ;;  %v17177_v44 = vmul.f32 %v29478_v15, %v17136_v3  ;;  %v17254_v33 = vmul.f32 %v29480_v27, %v17213_v6  ;;  %v16952_v24 = vpop.f32.mrb[77].mxu0  ;;  %v17823_v6 = vld [vmem:[#allocation2 + $0x5d] sm:$0xff] }
 0xe85   : > { %v17899_v50 = vadd.f32 %v17863_v52, %v17786_v0  ;;  %v17706_v49 = vadd.f32 %v17670_v35, %v17593_v17  ;;  %v17975_v20 = vmul.f32 %v29520_v1, %v17934_v48  ;;  %v17560_v23 = vmul.f32 %v29502_v37, %v17519_v59  ;;  %v29683_v35 = vld [vmem:[#allocation2 + $0x62] sm:$0xff] }
 0xe86   : > { %v17483_v43 = vadd.f32 %v17447_v42, %v17404_v40  ;;  %v17290_v10 = vadd.f32 %v17254_v33, %v17177_v44  ;;  %v17367_v18 = vmul.f32 %v29487_v14, %v29612_v28  ;;  %v17446_v34 = vmul.f32 %v29499_v53, %v29655_v29  ;;  %v17138_v48 = vld [vmem:[#allocation2 + $0x48] sm:$0xff]  ;;  %v29699_v44 = vld [vmem:[#allocation2 + $0x5a] sm:$0xff] }
 0xe87   : > { %v18012_v9 = vadd.f32 %v17976_v55, %v17899_v50  ;;  %v17785_v57 = vadd.f32 %v17749_v58, %v17706_v49  ;;  %v17673_v61 = vmul.f32 %v29505_v25, %v29617_v54  ;;  %v17752_v22 = vmul.f32 %v29515_v7, %v29658_v21  ;;  %v29672_v52 = vpop.f32.mrb[78].mxu0  ;;  %v17215_v0 = vld [vmem:[#allocation2 + $0x49] sm:$0xff]  ;;  %v17936_v58 = vld [vmem:[#allocation2 + $0x5e] sm:$0xff] }
 0xe88   : > { %v17596_v13 = vadd.f32 %v17560_v23, %v17483_v43  ;;  %v17403_v38 = vadd.f32 %v17367_v18, %v17290_v10  ;;  %v17559_v28 = vmul.f32 %v29502_v37, %v17518_v36  ;;  %v17080_v31 = vmul.f32 %v24066_v30, %v30523_v11  ;;  %v29678_v62 = vpop.f32.mrb[79].mxu0  ;;  %v17521_v40 = vld [vmem:[#allocation2 + $0x63] sm:$0xff]  ;;  %v29707_v43 = vld [vmem:[#allocation2 + $0x74] sm:$0xff] }
 0xe89   : > { %v18060_v51 = vsel %vm454_vm4, %v18012_v9, 0.0  ;;  %v17898_v54 = vadd.f32 %v17862_v5, %v17785_v57  ;;  %v17079_v12 = vmul.f32 %v16952_v24, %v30524_v32  ;;  %v17180_v2 = vmul.f32 %v29478_v15, %v17139_v45  ;;  %v17826_v10 = vld [vmem:[#allocation2 + $0x75] sm:$0xff]  ;;  %v17218_v11 = vld [vmem:[#allocation2 + $0x61] sm:$0xff] }
 0xe8a   : > { %18061 = vadd.xlane.f32.xlu1 %v18060_v51  ;;  %v17709_v39 = vadd.f32 %v17673_v61, %v17596_v13  ;;  %v17482_v8 = vadd.f32 %v17446_v34, %v17403_v38  ;;  %v17672_v3 = vmul.f32 %v29505_v25, %v29638_v47  ;;  %17116 = vst.msk [vmem:[#allocation2 + $0xcb] sm:$0xff] %vm454_vm4, %v17080_v31  ;;  %v17520_v38 = vld [vmem:[#allocation2 + $0x5b] sm:$0xff]  ;;  %v30525_v32 = vld [vmem:[#allocation29_spill] sm:$0xff] }
 0xe8b   : > { %v17257_v4 = vmul.f32 %v29480_v27, %v17216_v60  ;;  %v18011_v41 = vadd.f32 %v17975_v20, %v17898_v54  ;;  %v17865_v63 = vmul.f32 %v29518_v16, %v17824_v19  ;;  %v17751_v42 = vmul.f32 %v29515_v7, %v29675_v46  ;;  %17115 = vst.msk [vmem:[#allocation2 + $0xc3] sm:$0xff] %vm454_vm4, %v17079_v12  ;;  %v29695_v55 = vpop.f32.mrb[80].mxu0 }
 0xe8c   : > { %v17370_v59 = vmul.f32 %v29487_v14, %v29635_v56  ;;  %v17788_v47 = vadd.f32 %v17752_v22, %v17709_v39  ;;  %v17595_v17 = vadd.f32 %v17559_v28, %v17482_v8  ;;  %v17449_v5 = vmul.f32 %v29499_v53, %v29683_v35  ;;  %v29701_v33 = vpop.f32.mrb[81].mxu0  ;;  %v17141_v28 = vld [vmem:[#allocation2 + $0x60] sm:$0xff]  ;;  %v17939_v8 = vld [vmem:[#allocation2 + $0x76] sm:$0xff] }
 0xe8d   : > { %v17293_v30 = vadd.f32 %v17257_v4, %v17180_v2  ;;  %v18057_v24 = vsel %vm454_vm4, %v18011_v41, 0.0  ;;  %v17978_v50 = vmul.f32 %v29520_v1, %v17937_v26  ;;  %v17864_v56 = vmul.f32 %v29518_v16, %v17823_v6  ;;  %v29728_v6 = vld [vmem:[#allocation2 + $0x72] sm:$0xff] }
 0xe8e   : > { %v17179_v49 = vmul.f32 %v29478_v15, %v17138_v48  ;;  %18058 = vadd.xlane.f32.xlu0 %v18057_v24  ;;  %v17901_v20 = vadd.f32 %v17865_v63, %v17788_v47  ;;  %v17708_v23 = vadd.f32 %v17672_v3, %v17595_v17  ;;  %v17256_v18 = vmul.f32 %v29480_v27, %v17215_v0  ;;  %v30526_v48 = vld [vmem:[#allocation28_spill] sm:$0xff] }
 0xe8f   : > { %v17406_v36 = vadd.f32 %v17370_v59, %v17293_v30  ;;  %v17977_v34 = vmul.f32 %v29520_v1, %v17936_v58  ;;  %v17562_v45 = vmul.f32 %v29502_v37, %v17521_v40  ;;  %v17369_v9 = vmul.f32 %v29487_v14, %v29655_v29  ;;  %v29716_v61 = vpop.f32.mrb[82].mxu0  ;;  %v17825_v58 = vld [vmem:[#allocation2 + $0x6d] sm:$0xff]  ;;  %v17140_v30 = vld [vmem:[#allocation2 + $0x58] sm:$0xff] }
 0xe90   : > { %v17448_v57 = vmul.f32 %v29499_v53, %v29699_v44  ;;  %v18014_v22 = vadd.f32 %v17978_v50, %v17901_v20  ;;  %v17787_v60 = vadd.f32 %v17751_v42, %v17708_v23  ;;  %v17292_v19 = vadd.f32 %v17256_v18, %v17179_v49  ;;  %v29718_v31 = vpop.f32.mrb[83].mxu0  ;;  %v17523_v20 = vld [vmem:[#allocation2 + $0x73] sm:$0xff]  ;;  %v29753_v18 = vld [vmem:[#allocation2 + $0x6a] sm:$0xff] }
 0xe91   : > { %v17485_v13 = vadd.f32 %v17449_v5, %v17406_v36  ;;  %v17675_v51 = vmul.f32 %v29505_v25, %v29658_v21  ;;  %v17754_v29 = vmul.f32 %v29515_v7, %v29707_v43  ;;  %v17867_v54 = vmul.f32 %v29518_v16, %v17826_v10  ;;  %v29731_v21 = vld [vmem:[#allocation2 + $0x6c] sm:$0xff]  ;;  %v17217_v5 = vld [vmem:[#allocation2 + $0x59] sm:$0xff] }
 0xe92   : > { %v17082_v12 = vmul.f32 %v29672_v52, %v30525_v32  ;;  %v18066_v2 = vsel %vm454_vm4, %v18014_v22, 0.0  ;;  %v17900_v39 = vadd.f32 %v17864_v56, %v17787_v60  ;;  %v17405_v3 = vadd.f32 %v17369_v9, %v17292_v19  ;;  %v29756_v9 = vld [vmem:[#allocation2 + $0x84] sm:$0xff] }
 0xe93   : > { %v17598_v26 = vadd.f32 %v17562_v45, %v17485_v13  ;;  %18067 = vadd.xlane.f32.xlu1 %v18066_v2  ;;  %v17561_v4 = vmul.f32 %v29502_v37, %v17520_v38  ;;  %v17081_v41 = vmul.f32 %v29678_v62, %v30526_v48  ;;  %v17182_v52 = vmul.f32 %v29478_v15, %v17141_v28  ;;  %v29738_v42 = vpop.f32.mrb[84].mxu0  ;;  %v17938_v62 = vld [vmem:[#allocation2 + $0x6e] sm:$0xff]  ;;  %v17828_v48 = vld [vmem:[#allocation2 + $0x85] sm:$0xff] }
 0xe94   : > { %17118 = vst.msk [vmem:[#allocation2 + $0xdb] sm:$0xff] %vm454_vm4, %v17082_v12  ;;  %v17259_v63 = vmul.f32 %v29480_v27, %v17218_v11  ;;  %v18013_v59 = vadd.f32 %v17977_v34, %v17900_v39  ;;  %v17484_v47 = vadd.f32 %v17448_v57, %v17405_v3  ;;  %v17674_v17 = vmul.f32 %v29505_v25, %v29675_v46  ;;  %v29742_v40 = vpop.f32.mrb[85].mxu0  ;;  %v17522_v28 = vld [vmem:[#allocation2 + $0x6b] sm:$0xff] }
 0xe95   : > { %v17711_v0 = vadd.f32 %v17675_v51, %v17598_v26  ;;  %v17980_v24 = vmul.f32 %v29520_v1, %v17939_v8  ;;  %17117 = vst.msk [vmem:[#allocation2 + $0xd3] sm:$0xff] %vm454_vm4, %v17081_v41  ;;  %v17372_v56 = vmul.f32 %v29487_v14, %v29683_v35  ;;  %v17451_v49 = vmul.f32 %v29499_v53, %v29728_v6  ;;  %v17143_v2 = vld [vmem:[#allocation2 + $0x70] sm:$0xff] }
 0xe96   : > { %v17295_v50 = vadd.f32 %v17259_v63, %v17182_v52  ;;  %v18063_v46 = vsel %vm454_vm4, %v18013_v59, 0.0  ;;  %v17597_v36 = vadd.f32 %v17561_v4, %v17484_v47  ;;  %v17753_v10 = vmul.f32 %v29515_v7, %v29731_v21  ;;  %v17220_v3 = vld [vmem:[#allocation2 + $0x71] sm:$0xff]  ;;  %v29775_v63 = vld [vmem:[#allocation2 + $0x7c] sm:$0xff] }
 0xe97   : > { %v17790_v23 = vadd.f32 %v17754_v29, %v17711_v0  ;;  %18064 = vadd.xlane.f32.xlu0 %v18063_v46  ;;  %v17866_v34 = vmul.f32 %v29518_v16, %v17825_v58  ;;  %v17181_v35 = vmul.f32 %v29478_v15, %v17140_v30  ;;  %v17258_v57 = vmul.f32 %v29480_v27, %v17217_v5  ;;  %v29760_v22 = vpop.f32.mrb[86].mxu0  ;;  %v29785_v5 = vld [vmem:[#allocation2 + $0x82] sm:$0xff] }
 0xe98   : > { %v17408_v45 = vadd.f32 %v17372_v56, %v17295_v50  ;;  %v17710_v13 = vadd.f32 %v17674_v17, %v17597_v36  ;;  %v17979_v19 = vmul.f32 %v29520_v1, %v17938_v62  ;;  %v17564_v38 = vmul.f32 %v29502_v37, %v17523_v20  ;;  %v29764_v11 = vpop.f32.mrb[87].mxu0  ;;  %v17941_v50 = vld [vmem:[#allocation2 + $0x86] sm:$0xff] }
 0xe99   : > { %v17903_v60 = vadd.f32 %v17867_v54, %v17790_v23  ;;  %v17294_v29 = vadd.f32 %v17258_v57, %v17181_v35  ;;  %v17371_v32 = vmul.f32 %v29487_v14, %v29699_v44  ;;  %v17450_v12 = vmul.f32 %v29499_v53, %v29753_v18  ;;  %v30527_v44 = vld [vmem:[#allocation31_spill] sm:$0xff]  ;;  %v17142_v46 = vld [vmem:[#allocation2 + $0x68] sm:$0xff] }
 0xe9a   : > { %v17487_v51 = vadd.f32 %v17451_v49, %v17408_v45  ;;  %v17789_v26 = vadd.f32 %v17753_v10, %v17710_v13  ;;  %v17677_v54 = vmul.f32 %v29505_v25, %v29707_v43  ;;  %v17756_v8 = vmul.f32 %v29515_v7, %v29756_v9  ;;  %v30528_v43 = vld [vmem:[#allocation30_spill] sm:$0xff]  ;;  %v17827_v49 = vld [vmem:[#allocation2 + $0x7d] sm:$0xff] }
 0xe9b   : > { %v18016_v39 = vadd.f32 %v17980_v24, %v17903_v60  ;;  %v17407_v41 = vadd.f32 %v17371_v32, %v17294_v29  ;;  %v17563_v52 = vmul.f32 %v29502_v37, %v17522_v28  ;;  %v17084_v59 = vmul.f32 %v29695_v55, %v30527_v44  ;;  %v29779_v0 = vpop.f32.mrb[88].mxu0  ;;  %v17940_v35 = vld [vmem:[#allocation2 + $0x7e] sm:$0xff] }
 0xe9c   : > { %v17600_v4 = vadd.f32 %v17564_v38, %v17487_v51  ;;  %v17902_v17 = vadd.f32 %v17866_v34, %v17789_v26  ;;  %v17083_v58 = vmul.f32 %v29701_v33, %v30528_v43  ;;  %v17184_v30 = vmul.f32 %v29478_v15, %v17143_v2  ;;  %v29787_v24 = vpop.f32.mrb[89].mxu0  ;;  %v17219_v34 = vld [vmem:[#allocation2 + $0x69] sm:$0xff]  ;;  %v29807_v2 = vld [vmem:[#allocation2 + $0x94] sm:$0xff] }
 0xe9d   : > { %v18072_v47 = vsel %vm454_vm4, %v18016_v39, 0.0  ;;  %v17486_v56 = vadd.f32 %v17450_v12, %v17407_v41  ;;  %v17676_v55 = vmul.f32 %v29505_v25, %v29731_v21  ;;  %17120 = vst.msk [vmem:[#allocation2 + $0xeb] sm:$0xff] %vm454_vm4, %v17084_v59  ;;  %v17261_v20 = vmul.f32 %v29480_v27, %v17220_v3  ;;  %v17525_v13 = vld [vmem:[#allocation2 + $0x83] sm:$0xff]  ;;  %v17830_v39 = vld [vmem:[#allocation2 + $0x95] sm:$0xff] }
 0xe9e   : > { %18073 = vadd.xlane.f32.xlu1 %v18072_v47  ;;  %v17713_v62 = vadd.f32 %v17677_v54, %v17600_v4  ;;  %v18015_v33 = vadd.f32 %v17979_v19, %v17902_v17  ;;  %v17869_v23 = vmul.f32 %v29518_v16, %v17828_v48  ;;  %v17755_v36 = vmul.f32 %v29515_v7, %v29775_v63  ;;  %v29801_v19 = vld [vmem:[#allocation2 + $0x7a] sm:$0xff] }
 0xe9f   : > { %17119 = vst.msk [vmem:[#allocation2 + $0xe3] sm:$0xff] %vm454_vm4, %v17083_v58  ;;  %v17374_v10 = vmul.f32 %v29487_v14, %v29728_v6  ;;  %v17599_v21 = vadd.f32 %v17563_v52, %v17486_v56  ;;  %v17297_v57 = vadd.f32 %v17261_v20, %v17184_v30  ;;  %v17453_v60 = vmul.f32 %v29499_v53, %v29785_v5  ;;  %v17524_v59 = vld [vmem:[#allocation2 + $0x7b] sm:$0xff] }
 0xea0   : > { %v17792_v45 = vadd.f32 %v17756_v8, %v17713_v62  ;;  %v18069_v38 = vsel %vm454_vm4, %v18015_v33, 0.0  ;;  %v17982_v28 = vmul.f32 %v29520_v1, %v17941_v50  ;;  %v17868_v51 = vmul.f32 %v29518_v16, %v17827_v49  ;;  %v17145_v47 = vld [vmem:[#allocation2 + $0x80] sm:$0xff]  ;;  %v30529_v62 = vld [vmem:[#allocation33_spill] sm:$0xff]  ;;  %v17943_v49 = vld [vmem:[#allocation2 + $0x96] sm:$0xff] }
 0xea1   : > { %v17183_v29 = vmul.f32 %v29478_v15, %v17142_v46  ;;  %18070 = vadd.xlane.f32.xlu0 %v18069_v38  ;;  %v17712_v32 = vadd.f32 %v17676_v55, %v17599_v21  ;;  %v17410_v12 = vadd.f32 %v17374_v10, %v17297_v57  ;;  %v17260_v26 = vmul.f32 %v29480_v27, %v17219_v34  ;;  %v17222_v17 = vld [vmem:[#allocation2 + $0x81] sm:$0xff]  ;;  %v29824_v46 = vld [vmem:[#allocation2 + $0x92] sm:$0xff] }
 0xea2   : > { %v17905_v6 = vadd.f32 %v17869_v23, %v17792_v45  ;;  %v17981_v54 = vmul.f32 %v29520_v1, %v17940_v35  ;;  %v17566_v8 = vmul.f32 %v29502_v37, %v17525_v13  ;;  %v17373_v3 = vmul.f32 %v29487_v14, %v29753_v18  ;;  %v30530_v23 = vld [vmem:[#allocation32_spill] sm:$0xff]  ;;  %v17829_v57 = vld [vmem:[#allocation2 + $0x8d] sm:$0xff] }
 0xea3   : > { %v17452_v4 = vmul.f32 %v29499_v53, %v29801_v19  ;;  %v17791_v41 = vadd.f32 %v17755_v36, %v17712_v32  ;;  %v17489_v52 = vadd.f32 %v17453_v60, %v17410_v12  ;;  %v17296_v44 = vadd.f32 %v17260_v26, %v17183_v29  ;;  %v17144_v60 = vld [vmem:[#allocation2 + $0x78] sm:$0xff]  ;;  %v29842_v26 = vld [vmem:[#allocation2 + $0x8a] sm:$0xff] }
 0xea4   : > { %v18018_v48 = vadd.f32 %v17982_v28, %v17905_v6  ;;  %v17679_v43 = vmul.f32 %v29505_v25, %v29756_v9  ;;  %v17758_v58 = vmul.f32 %v29515_v7, %v29807_v2  ;;  %v17871_v30 = vmul.f32 %v29518_v16, %v17830_v39  ;;  %v17639_v9 = vld [vmem:[#allocation2 + $0x8c] sm:$0xff]  ;;  %v17221_v13 = vld [vmem:[#allocation2 + $0x79] sm:$0xff] }
 0xea5   : > { %v17086_v18 = vmul.f32 %v29716_v61, %v30529_v62  ;;  %v17904_v56 = vadd.f32 %v17868_v51, %v17791_v41  ;;  %v17602_v55 = vadd.f32 %v17566_v8, %v17489_v52  ;;  %v17409_v20 = vadd.f32 %v17373_v3, %v17296_v44  ;;  %v17942_v28 = vld [vmem:[#allocation2 + $0x8e] sm:$0xff]  ;;  %v29845_v3 = vld [vmem:[#allocation2 + $0xa4] sm:$0xff] }
 0xea6   : > { %v18078_v50 = vsel %vm454_vm4, %v18018_v48, 0.0  ;;  %v17565_v33 = vmul.f32 %v29502_v37, %v17524_v59  ;;  %v17085_v36 = vmul.f32 %v29718_v31, %v30530_v23  ;;  %v17186_v10 = vmul.f32 %v29478_v15, %v17145_v47  ;;  %v17527_v6 = vld [vmem:[#allocation2 + $0x93] sm:$0xff]  ;;  %v17526_v59 = vld [vmem:[#allocation2 + $0x8b] sm:$0xff] }
 0xea7   : > { %18079 = vadd.xlane.f32.xlu1 %v18078_v50  ;;  %17122 = vst.msk [vmem:[#allocation2 + $0xfb] sm:$0xff] %vm454_vm4, %v17086_v18  ;;  %v17263_v61 = vmul.f32 %v29480_v27, %v17222_v17  ;;  %v18017_v34 = vadd.f32 %v17981_v54, %v17904_v56  ;;  %v17715_v45 = vadd.f32 %v17679_v43, %v17602_v55  ;;  %v17147_v62 = vld [vmem:[#allocation2 + $0x90] sm:$0xff]  ;;  %v17832_v55 = vld [vmem:[#allocation2 + $0xa5] sm:$0xff] }
 0xea8   : > { %v17488_v21 = vadd.f32 %v17452_v4, %v17409_v20  ;;  %v17678_v35 = vmul.f32 %v29505_v25, %v29775_v63  ;;  %v17984_v38 = vmul.f32 %v29520_v1, %v17943_v49  ;;  %17121 = vst.msk [vmem:[#allocation2 + $0xf3] sm:$0xff] %vm454_vm4, %v17085_v36  ;;  %v17376_v31 = vmul.f32 %v29487_v14, %v29785_v5  ;;  %v17224_v50 = vld [vmem:[#allocation2 + $0x91] sm:$0xff] }
 0xea9   : > { %v17299_v51 = vadd.f32 %v17263_v61, %v17186_v10  ;;  %v17455_v29 = vmul.f32 %v29499_v53, %v29824_v46  ;;  %v18075_v32 = vsel %vm454_vm4, %v18017_v34, 0.0  ;;  %v17794_v12 = vadd.f32 %v17758_v58, %v17715_v45  ;;  %v30532_v36 = vld [vmem:[#allocation34_spill] sm:$0xff]  ;;  %v29867_v10 = vld [vmem:[#allocation16] ss:$0 sm:$0xff]  ;;  %v29870_v34 = vld [vmem:[#allocation2 + $0xa2] sm:$0xff] }
 0xeaa   : > { %v17601_v63 = vadd.f32 %v17565_v33, %v17488_v21  ;;  %v17757_v39 = vmul.f32 %v29515_v7, %v17639_v9  ;;  %18076 = vadd.xlane.f32.xlu0 %v18075_v32  ;;  %v17870_v54 = vmul.f32 %v29518_v16, %v17829_v57  ;;  %v17185_v5 = vmul.f32 %v29478_v15, %v17144_v60  ;;  %v29860_v33 = vld [vmem:[#allocation2 + $0x9c] sm:$0xff] }
 0xeab   : > { %v17412_v8 = vadd.f32 %v17376_v31, %v17299_v51  ;;  %v17262_v4 = vmul.f32 %v29480_v27, %v17221_v13  ;;  %v17907_v48 = vadd.f32 %v17871_v30, %v17794_v12  ;;  %v17983_v52 = vmul.f32 %v29520_v1, %v17942_v28  ;;  %v17831_v57 = vld [vmem:[#allocation2 + $0x9d] sm:$0xff]  ;;  %v29881_v51 = vld [vmem:[#allocation16 + $0x2] ss:$0 sm:$0xff]  ;;  %v29885_v12 = vld [vmem:[#allocation16 + $0x3] ss:$0 sm:$0xff] }
 0xeac   : > { %v17714_v41 = vadd.f32 %v17678_v35, %v17601_v63  ;;  %v17568_v44 = vmul.f32 %v29502_v37, %v17527_v6  ;;  %v17375_v43 = vmul.f32 %v29487_v14, %v29801_v19  ;;  %v17454_v58 = vmul.f32 %v29499_v53, %v29842_v26  ;;  %v30531_v14 = vld [vmem:[#allocation35_spill] sm:$0xff] }
 0xead   : > { %v17491_v47 = vadd.f32 %v17455_v29, %v17412_v8  ;;  %v17298_v17 = vadd.f32 %v17262_v4, %v17185_v5  ;;  %v18020_v18 = vadd.f32 %v17984_v38, %v17907_v48  ;;  %v17681_v27 = vmul.f32 %v29505_v25, %v29807_v2  ;;  %v17944_v6 = vld [vmem:[#allocation2 + $0x9e] sm:$0xff] }
 0xeae   : > { %v17793_v15 = vadd.f32 %v17757_v39, %v17714_v41  ;;  %v17760_v30 = vmul.f32 %v29515_v7, %v29845_v3  ;;  %v17567_v20 = vmul.f32 %v29502_v37, %v17526_v59  ;;  %v17088_v53 = vmul.f32 %v29738_v42, %v30531_v14  ;;  %v17945_v37 = vld [vmem:[#allocation2 + $0xa6] sm:$0xff]  ;;  %v29874_v42 = vld [vmem:[#allocation16 + $0x1] ss:$0 sm:$0xff] }
 0xeaf   : > { %v17604_v56 = vadd.f32 %v17568_v44, %v17491_v47  ;;  %v17411_v49 = vadd.f32 %v17375_v43, %v17298_v17  ;;  %v18084_v19 = vsel %vm454_vm4, %v18020_v18, 0.0  ;;  %v17087_v2 = vmul.f32 %v29742_v40, %v30532_v36  ;;  %v17146_v40 = vld [vmem:[#allocation2 + $0x88] sm:$0xff]  ;;  %v17834_v44 = vld [vmem:[#allocation2 + $0xb5] sm:$0xff] }
 0xeb0   : > { %v17906_v23 = vadd.f32 %v17870_v54, %v17793_v15  ;;  %v17188_v61 = vmul.f32 %v29867_v10, %v17147_v62  ;;  %18085 = vadd.xlane.f32.xlu1 %v18084_v19  ;;  %v17680_v35 = vmul.f32 %v29505_v25, %v17639_v9  ;;  %17124 = vst.msk [vmem:[#allocation2 + $0x10b] sm:$0xff] %vm454_vm4, %v17088_v53  ;;  %v17223_v9 = vld [vmem:[#allocation2 + $0x89] sm:$0xff]  ;;  %v29889_v54 = vld [vmem:[#allocation2 + $0x9a] sm:$0xff] }
 0xeb1   : > { %v17717_v45 = vadd.f32 %v17681_v27, %v17604_v56  ;;  %v17490_v21 = vadd.f32 %v17454_v58, %v17411_v49  ;;  %v17265_v60 = vmul.f32 %v29874_v42, %v17224_v50  ;;  %v17873_v38 = vmul.f32 %v29518_v16, %v17832_v55  ;;  %17123 = vst.msk [vmem:[#allocation2 + $0x103] sm:$0xff] %vm454_vm4, %v17087_v2  ;;  %v17529_v39 = vld [vmem:[#allocation2 + $0xa3] sm:$0xff]  ;;  %v29899_v17 = vld [vmem:[#allocation16 + $0x4] ss:$0 sm:$0xff]  ;;  %v29906_v55 = vld [vmem:[#allocation16 + $0x5] ss:$0 sm:$0xff] }
 0xeb2   : > { %v18019_v13 = vadd.f32 %v17983_v52, %v17906_v23  ;;  %v17759_v28 = vmul.f32 %v29515_v7, %v29860_v33  ;;  %v17378_v25 = vmul.f32 %v29881_v51, %v29824_v46  ;;  %v17457_v63 = vmul.f32 %v29885_v12, %v29870_v34  ;;  %v29895_v52 = vld [vmem:[#allocation2 + $0xb4] sm:$0xff]  ;;  %v17149_v50 = vld [vmem:[#allocation2 + $0xa0] sm:$0xff]  ;;  %v29910_v49 = vld [vmem:[#allocation16 + $0x6] ss:$0 sm:$0xff] }
 0xeb3   : > { %v17796_v31 = vadd.f32 %v17760_v30, %v17717_v45  ;;  %v17603_v29 = vadd.f32 %v17567_v20, %v17490_v21  ;;  %v17301_v32 = vadd.f32 %v17265_v60, %v17188_v61  ;;  %v17986_v8 = vmul.f32 %v29520_v1, %v17945_v37  ;;  %v17528_v30 = vld [vmem:[#allocation2 + $0x9b] sm:$0xff]  ;;  %v30533_v53 = vld [vmem:[#allocation37_spill] sm:$0xff]  ;;  %v29920_v37 = vld [vmem:[#allocation2 + $0xb2] sm:$0xff] }
 0xeb4   : > { %v18081_v7 = vsel %vm454_vm4, %v18019_v13, 0.0  ;;  %v17872_v5 = vmul.f32 %v29518_v16, %v17831_v57  ;;  %v17187_v46 = vmul.f32 %v29867_v10, %v17146_v40  ;;  %v17264_v59 = vmul.f32 %v29874_v42, %v17223_v9  ;;  %v17226_v56 = vld [vmem:[#allocation2 + $0xa1] sm:$0xff]  ;;  %v29914_v20 = vld [vmem:[#allocation16 + $0x7] ss:$0 sm:$0xff]  ;;  %v17947_v61 = vld [vmem:[#allocation2 + $0xb6] sm:$0xff] }
 0xeb5   : > { %18082 = vadd.xlane.f32.xlu0 %v18081_v7  ;;  %v17909_v4 = vadd.f32 %v17873_v38, %v17796_v31  ;;  %v17716_v48 = vadd.f32 %v17680_v35, %v17603_v29  ;;  %v17414_v41 = vadd.f32 %v17378_v25, %v17301_v32  ;;  %v17985_v47 = vmul.f32 %v29520_v1, %v17944_v6  ;;  %v17643_v21 = vld [vmem:[#allocation2 + $0xac] sm:$0xff]  ;;  %v30534_v35 = vld [vmem:[#allocation36_spill] sm:$0xff]  ;;  %v17148_v9 = vld [vmem:[#allocation2 + $0x98] sm:$0xff] }
 0xeb6   : > { %v17570_v43 = vmul.f32 %v29899_v17, %v17529_v39  ;;  %v17377_v16 = vmul.f32 %v29881_v51, %v29842_v26  ;;  %v17456_v58 = vmul.f32 %v29885_v12, %v29889_v54  ;;  %v17300_v27 = vadd.f32 %v17264_v59, %v17187_v46  ;;  %v17833_v25 = vld [vmem:[#allocation2 + $0xad] sm:$0xff]  ;;  %v17225_v31 = vld [vmem:[#allocation2 + $0x99] sm:$0xff] }
 0xeb7   : > { %v18022_v62 = vadd.f32 %v17986_v8, %v17909_v4  ;;  %v17795_v18 = vadd.f32 %v17759_v28, %v17716_v48  ;;  %v17493_v15 = vadd.f32 %v17457_v63, %v17414_v41  ;;  %v17683_v1 = vmul.f32 %v29906_v55, %v29845_v3  ;;  %v29930_v29 = vld [vmem:[#allocation16 + $0x8] ss:$0 sm:$0xff]  ;;  %v17946_v32 = vld [vmem:[#allocation2 + $0xae] sm:$0xff] }
 0xeb8   : > { %v17762_v26 = vmul.f32 %v29910_v49, %v29895_v52  ;;  %v17875_v14 = vmul.f32 %v29914_v20, %v17834_v44  ;;  %v17090_v19 = vmul.f32 %v29760_v22, %v30533_v53  ;;  %v17413_v45 = vadd.f32 %v17377_v16, %v17300_v27  ;;  %v17531_v7 = vld [vmem:[#allocation2 + $0xb3] sm:$0xff]  ;;  %v29940_v4 = vld [vmem:[#allocation2 + $0xaa] sm:$0xff] }
 0xeb9   : > { %v18090_v23 = vsel %vm454_vm4, %v18022_v62, 0.0  ;;  %v17908_v36 = vadd.f32 %v17872_v5, %v17795_v18  ;;  %v17606_v2 = vadd.f32 %v17570_v43, %v17493_v15  ;;  %v17569_v3 = vmul.f32 %v29899_v17, %v17528_v30  ;;  %v29943_v44 = vld [vmem:[#allocation2 + $0xc4] sm:$0xff]  ;;  %v17228_v53 = vld [vmem:[#allocation2 + $0xb1] sm:$0xff] }
 0xeba   : > { %18091 = vadd.xlane.f32.xlu1 %v18090_v23  ;;  %17126 = vst.msk [vmem:[#allocation2 + $0x11b] sm:$0xff] %vm454_vm4, %v17090_v19  ;;  %v17089_v57 = vmul.f32 %v29764_v11, %v30534_v35  ;;  %v17190_v60 = vmul.f32 %v29867_v10, %v17149_v50  ;;  %v17267_v22 = vmul.f32 %v29874_v42, %v17226_v56  ;;  %v17530_v62 = vld [vmem:[#allocation2 + $0xab] sm:$0xff] }
 0xebb   : > { %v18021_v40 = vadd.f32 %v17985_v47, %v17908_v36  ;;  %v17719_v13 = vadd.f32 %v17683_v1, %v17606_v2  ;;  %v17492_v38 = vadd.f32 %v17456_v58, %v17413_v45  ;;  %v17682_v28 = vmul.f32 %v29906_v55, %v29860_v33  ;;  %v17151_v50 = vld [vmem:[#allocation2 + $0xb0] sm:$0xff]  ;;  %v17836_v23 = vld [vmem:[#allocation2 + $0xc5] sm:$0xff] }
 0xebc   : > { %v17988_v6 = vmul.f32 %v29930_v29, %v17947_v61  ;;  %17125 = vst.msk [vmem:[#allocation2 + $0x113] sm:$0xff] %vm454_vm4, %v17089_v57  ;;  %v17303_v11 = vadd.f32 %v17267_v22, %v17190_v60  ;;  %v17380_v63 = vmul.f32 %v29881_v51, %v29870_v34  ;;  %v17459_v39 = vmul.f32 %v29885_v12, %v29920_v37  ;;  %v29958_v61 = vld [vmem:[#allocation2 + $0xbc] sm:$0xff]  ;;  %v30536_v57 = vld [vmem:[#allocation38_spill] sm:$0xff] }
 0xebd   : > { %v18087_v33 = vsel %vm454_vm4, %v18021_v40, 0.0  ;;  %v17798_v8 = vadd.f32 %v17762_v26, %v17719_v13  ;;  %v17605_v5 = vadd.f32 %v17569_v3, %v17492_v38  ;;  %v17761_v46 = vmul.f32 %v29910_v49, %v17643_v21  ;;  %v29966_v22 = vld [vmem:[#allocation2 + $0xc2] sm:$0xff] }
 0xebe   : > { %18088 = vadd.xlane.f32.xlu0 %v18087_v33  ;;  %v17874_v48 = vmul.f32 %v29914_v20, %v17833_v25  ;;  %v17416_v41 = vadd.f32 %v17380_v63, %v17303_v11  ;;  %v17189_v34 = vmul.f32 %v29867_v10, %v17148_v9  ;;  %v17266_v59 = vmul.f32 %v29874_v42, %v17225_v31  ;;  %v17949_v13 = vld [vmem:[#allocation2 + $0xc6] sm:$0xff] }
 0xebf   : > { %v17911_v47 = vadd.f32 %v17875_v14, %v17798_v8  ;;  %v17718_v43 = vadd.f32 %v17682_v28, %v17605_v5  ;;  %v17987_v16 = vmul.f32 %v29930_v29, %v17946_v32  ;;  %v17572_v58 = vmul.f32 %v29899_v17, %v17531_v7  ;;  %v17150_v25 = vld [vmem:[#allocation2 + $0xa8] sm:$0xff]  ;;  %v29979_v8 = vld [vmem:[#allocation2 + $0xba] sm:$0xff] }
 0xec0   : > { %v17495_v18 = vadd.f32 %v17459_v39, %v17416_v41  ;;  %v17302_v15 = vadd.f32 %v17266_v59, %v17189_v34  ;;  %v17379_v27 = vmul.f32 %v29881_v51, %v29889_v54  ;;  %v17458_v30 = vmul.f32 %v29885_v12, %v29940_v4  ;;  %v30535_v54 = vld [vmem:[#allocation39_spill] sm:$0xff]  ;;  %v17227_v32 = vld [vmem:[#allocation2 + $0xa9] sm:$0xff] }
 0xec1   : > { %v18024_v56 = vadd.f32 %v17988_v6, %v17911_v47  ;;  %v17797_v1 = vadd.f32 %v17761_v46, %v17718_v43  ;;  %v17685_v26 = vmul.f32 %v29906_v55, %v29895_v52  ;;  %v17764_v14 = vmul.f32 %v29910_v49, %v29943_v44  ;;  %v17533_v33 = vld [vmem:[#allocation2 + $0xc3] sm:$0xff]  ;;  %v17648_v47 = vld [vmem:[#allocation2 + $0xd4] sm:$0xff] }
 0xec2   : > { %v17608_v19 = vadd.f32 %v17572_v58, %v17495_v18  ;;  %v17415_v36 = vadd.f32 %v17379_v27, %v17302_v15  ;;  %v17571_v2 = vmul.f32 %v29899_v17, %v17530_v62  ;;  %v17092_v45 = vmul.f32 %v29779_v0, %v30535_v54  ;;  %v17948_v34 = vld [vmem:[#allocation2 + $0xbe] sm:$0xff] }
 0xec3   : > { %v18096_v3 = vsel %vm454_vm4, %v18024_v56, 0.0  ;;  %v17910_v35 = vadd.f32 %v17874_v48, %v17797_v1  ;;  %v17091_v52 = vmul.f32 %v29787_v24, %v30536_v57  ;;  %v17192_v60 = vmul.f32 %v29867_v10, %v17151_v50  ;;  %v17532_v27 = vld [vmem:[#allocation2 + $0xbb] sm:$0xff]  ;;  %v17345_v57 = vld [vmem:[#allocation2 + $0xd2] sm:$0xff] }
 0xec4   : > { %18097 = vadd.xlane.f32.xlu1 %v18096_v3  ;;  %v17721_v40 = vadd.f32 %v17685_v26, %v17608_v19  ;;  %v17494_v38 = vadd.f32 %v17458_v30, %v17415_v36  ;;  %v17684_v28 = vmul.f32 %v29906_v55, %v17643_v21  ;;  %17128 = vst.msk [vmem:[#allocation2 + $0x12b] sm:$0xff] %vm454_vm4, %v17092_v45  ;;  %v17835_v21 = vld [vmem:[#allocation2 + $0xbd] sm:$0xff]  ;;  %v17838_v1 = vld [vmem:[#allocation2 + $0xd5] sm:$0xff] }
 0xec5   : > { %v17269_v0 = vmul.f32 %v29874_v42, %v17228_v53  ;;  %v18023_v9 = vadd.f32 %v17987_v16, %v17910_v35  ;;  %v17877_v31 = vmul.f32 %v29914_v20, %v17836_v23  ;;  %v17763_v24 = vmul.f32 %v29910_v49, %v29958_v61  ;;  %17127 = vst.msk [vmem:[#allocation2 + $0x123] sm:$0xff] %vm454_vm4, %v17091_v52  ;;  %v17153_v16 = vld [vmem:[#allocation2 + $0xc0] sm:$0xff]  ;;  %v17951_v26 = vld [vmem:[#allocation2 + $0xd6] sm:$0xff]  ;;  %v17647_v35 = vld [vmem:[#allocation2 + $0xcc] sm:$0xff] }
 0xec6   : > { %v17382_v6 = vmul.f32 %v29881_v51, %v29920_v37  ;;  %v17800_v11 = vadd.f32 %v17764_v14, %v17721_v40  ;;  %v17607_v63 = vadd.f32 %v17571_v2, %v17494_v38  ;;  %v17461_v7 = vmul.f32 %v29885_v12, %v29966_v22  ;;  %v17230_v53 = vld [vmem:[#allocation2 + $0xc1] sm:$0xff] }
 0xec7   : > { %v17305_v39 = vadd.f32 %v17269_v0, %v17192_v60  ;;  %v18093_v5 = vsel %vm454_vm4, %v18023_v9, 0.0  ;;  %v17990_v46 = vmul.f32 %v29930_v29, %v17949_v13  ;;  %v17191_v48 = vmul.f32 %v29867_v10, %v17150_v25  ;;  %v17152_v13 = vld [vmem:[#allocation2 + $0xb8] sm:$0xff]  ;;  %v17837_v9 = vld [vmem:[#allocation2 + $0xcd] sm:$0xff] }
 0xec8   : > { %18094 = vadd.xlane.f32.xlu0 %v18093_v5  ;;  %v17913_v41 = vadd.f32 %v17877_v31, %v17800_v11  ;;  %v17720_v37 = vadd.f32 %v17684_v28, %v17607_v63  ;;  %v17268_v43 = vmul.f32 %v29874_v42, %v17227_v32  ;;  %v17876_v58 = vmul.f32 %v29914_v20, %v17835_v21  ;;  %v17950_v31 = vld [vmem:[#allocation2 + $0xce] sm:$0xff] }
 0xec9   : > { %v17418_v59 = vadd.f32 %v17382_v6, %v17305_v39  ;;  %v17574_v62 = vmul.f32 %v29899_v17, %v17533_v33  ;;  %v17381_v18 = vmul.f32 %v29881_v51, %v29940_v4  ;;  %v17460_v15 = vmul.f32 %v29885_v12, %v29979_v8  ;;  %v17535_v21 = vld [vmem:[#allocation2 + $0xd3] sm:$0xff] }
 0xeca   : > { %v18026_v30 = vadd.f32 %v17990_v46, %v17913_v41  ;;  %v17799_v50 = vadd.f32 %v17763_v24, %v17720_v37  ;;  %v17304_v14 = vadd.f32 %v17268_v43, %v17191_v48  ;;  %v17989_v19 = vmul.f32 %v29930_v29, %v17948_v34  ;;  %v17229_v24 = vld [vmem:[#allocation2 + $0xb9] sm:$0xff]  ;;  %v30009_v46 = vld [vmem:[#allocation2 + $0xca] sm:$0xff] }
 0xecb   : > { %v17497_v56 = vadd.f32 %v17461_v7, %v17418_v59  ;;  %v17687_v23 = vmul.f32 %v29906_v55, %v29943_v44  ;;  %v17766_v36 = vmul.f32 %v29910_v49, %v17648_v47  ;;  %v17194_v4 = vmul.f32 %v29867_v10, %v17153_v16  ;;  %v17650_v37 = vld [vmem:[#allocation2 + $0xe4] sm:$0xff]  ;;  %v17155_v34 = vld [vmem:[#allocation2 + $0xd0] sm:$0xff] }
 0xecc   : > { %v18102_v2 = vsel %vm454_vm4, %v18026_v30, 0.0  ;;  %v17912_v54 = vadd.f32 %v17876_v58, %v17799_v50  ;;  %v17417_v3 = vadd.f32 %v17381_v18, %v17304_v14  ;;  %v17879_v52 = vmul.f32 %v29914_v20, %v17838_v1  ;;  %v17232_v18 = vld [vmem:[#allocation2 + $0xd1] sm:$0xff] }
 0xecd   : > { %v17610_v45 = vadd.f32 %v17574_v62, %v17497_v56  ;;  %18103 = vadd.xlane.f32.xlu1 %v18102_v2  ;;  %v17992_v60 = vmul.f32 %v29930_v29, %v17951_v26  ;;  %v17573_v40 = vmul.f32 %v29899_v17, %v17532_v27  ;;  %v17271_v44 = vmul.f32 %v29874_v42, %v17230_v53  ;;  %v17534_v62 = vld [vmem:[#allocation2 + $0xcb] sm:$0xff]  ;;  %v30022_v53 = vld [vmem:[#allocation2 + $0xe2] sm:$0xff] }
 0xece   : > { %v18025_v38 = vadd.f32 %v17989_v19, %v17912_v54  ;;  %v17496_v0 = vadd.f32 %v17460_v15, %v17417_v3  ;;  %v17686_v25 = vmul.f32 %v29906_v55, %v29958_v61  ;;  %v17765_v6 = vmul.f32 %v29910_v49, %v17647_v35  ;;  %v17649_v2 = vld [vmem:[#allocation2 + $0xdc] sm:$0xff] }
 0xecf   : > { %v17723_v28 = vadd.f32 %v17687_v23, %v17610_v45  ;;  %v17307_v32 = vadd.f32 %v17271_v44, %v17194_v4  ;;  %v17384_v11 = vmul.f32 %v29881_v51, %v29966_v22  ;;  %v17463_v63 = vmul.f32 %v29885_v12, %v17345_v57  ;;  %v17953_v23 = vld [vmem:[#allocation2 + $0xe6] sm:$0xff] }
 0xed0   : > { %v18099_v39 = vsel %vm454_vm4, %v18025_v38, 0.0  ;;  %v17609_v33 = vadd.f32 %v17573_v40, %v17496_v0  ;;  %v17193_v5 = vmul.f32 %v29867_v10, %v17152_v13  ;;  %v17878_v61 = vmul.f32 %v29914_v20, %v17837_v9  ;;  %v17839_v13 = vld [vmem:[#allocation2 + $0xdd] sm:$0xff] }
 0xed1   : > { %v17802_v7 = vadd.f32 %v17766_v36, %v17723_v28  ;;  %18100 = vadd.xlane.f32.xlu0 %v18099_v39  ;;  %v17991_v48 = vmul.f32 %v29930_v29, %v17950_v31  ;;  %v17420_v41 = vadd.f32 %v17384_v11, %v17307_v32  ;;  %v17270_v22 = vmul.f32 %v29874_v42, %v17229_v24  ;;  %v17952_v38 = vld [vmem:[#allocation2 + $0xde] sm:$0xff] }
 0xed2   : > { %v17722_v43 = vadd.f32 %v17686_v25, %v17609_v33  ;;  %v17576_v16 = vmul.f32 %v29899_v17, %v17535_v21  ;;  %v17689_v58 = vmul.f32 %v29906_v55, %v17648_v47  ;;  %v17383_v30 = vmul.f32 %v29881_v51, %v29979_v8  ;;  %v17840_v47 = vld [vmem:[#allocation2 + $0xe5] sm:$0xff]  ;;  %v30035_v21 = vld [vmem:[#allocation2 + $0xda] sm:$0xff] }
 0xed3   : > { %v17915_v59 = vadd.f32 %v17879_v52, %v17802_v7  ;;  %v17499_v15 = vadd.f32 %v17463_v63, %v17420_v41  ;;  %v17306_v27 = vadd.f32 %v17270_v22, %v17193_v5  ;;  %v17462_v50 = vmul.f32 %v29885_v12, %v30009_v46  ;;  %v17231_v25 = vld [vmem:[#allocation2 + $0xc9] sm:$0xff]  ;;  %v30040_v5 = vld [vmem:[#allocation2 + $0xf4] sm:$0xff] }
 0xed4   : > { %v17801_v1 = vadd.f32 %v17765_v6, %v17722_v43  ;;  %v17768_v26 = vmul.f32 %v29910_v49, %v17650_v37  ;;  %v17196_v14 = vmul.f32 %v29867_v10, %v17155_v34  ;;  %v17575_v4 = vmul.f32 %v29899_v17, %v17534_v62  ;;  %v17537_v6 = vld [vmem:[#allocation2 + $0xe3] sm:$0xff] }
 0xed5   : > { %v18028_v56 = vadd.f32 %v17992_v60, %v17915_v59  ;;  %v17612_v19 = vadd.f32 %v17576_v16, %v17499_v15  ;;  %v17419_v36 = vadd.f32 %v17383_v30, %v17306_v27  ;;  %v17273_v8 = vmul.f32 %v29874_v42, %v17232_v18  ;;  %v17154_v60 = vld [vmem:[#allocation2 + $0xc8] sm:$0xff]  ;;  %v17536_v59 = vld [vmem:[#allocation2 + $0xdb] sm:$0xff] }
 0xed6   : > { %v17914_v45 = vadd.f32 %v17878_v61, %v17801_v1  ;;  %v17688_v3 = vmul.f32 %v29906_v55, %v17647_v35  ;;  %v17386_v52 = vmul.f32 %v29881_v51, %v17345_v57  ;;  %v17465_v0 = vmul.f32 %v29885_v12, %v30022_v53  ;;  %v17157_v43 = vld [vmem:[#allocation2 + $0xe0] sm:$0xff]  ;;  %v30051_v1 = vld [vmem:[#allocation2 + $0xf2] sm:$0xff] }
 0xed7   : > { %v18108_v54 = vsel %vm454_vm4, %v18028_v56, 0.0  ;;  %v17725_v40 = vadd.f32 %v17689_v58, %v17612_v19  ;;  %v17498_v44 = vadd.f32 %v17462_v50, %v17419_v36  ;;  %v17309_v28 = vadd.f32 %v17273_v8, %v17196_v14  ;;  %v17234_v16 = vld [vmem:[#allocation2 + $0xe1] sm:$0xff]  ;;  %v17955_v14 = vld [vmem:[#allocation2 + $0xf6] sm:$0xff]  ;;  %v17651_v8 = vld [vmem:[#allocation2 + $0xec] sm:$0xff] }
 0xed8   : > { %18109 = vadd.xlane.f32.xlu1 %v18108_v54  ;;  %v18027_v9 = vadd.f32 %v17991_v48, %v17914_v45  ;;  %v17881_v31 = vmul.f32 %v29914_v20, %v17840_v47  ;;  %v17994_v24 = vmul.f32 %v29930_v29, %v17953_v23  ;;  %v17767_v35 = vmul.f32 %v29910_v49, %v17649_v2  ;;  %v17156_v45 = vld [vmem:[#allocation2 + $0xd8] sm:$0xff] }
 0xed9   : > { %v17804_v57 = vadd.f32 %v17768_v26, %v17725_v40  ;;  %v17611_v32 = vadd.f32 %v17575_v4, %v17498_v44  ;;  %v17422_v11 = vadd.f32 %v17386_v52, %v17309_v28  ;;  %v17195_v63 = vmul.f32 %v29867_v10, %v17154_v60  ;;  %v17842_v26 = vld [vmem:[#allocation2 + $0xf5] sm:$0xff]  ;;  %v17841_v52 = vld [vmem:[#allocation2 + $0xed] sm:$0xff] }
 0xeda   : > { %v18105_v39 = vsel %vm454_vm4, %v18027_v9, 0.0  ;;  %v17880_v7 = vmul.f32 %v29914_v20, %v17839_v13  ;;  %v17993_v33 = vmul.f32 %v29930_v29, %v17952_v38  ;;  %v17272_v61 = vmul.f32 %v29874_v42, %v17231_v25  ;;  %v17233_v13 = vld [vmem:[#allocation2 + $0xd9] sm:$0xff]  ;;  %v17954_v9 = vld [vmem:[#allocation2 + $0xee] sm:$0xff] }
 0xedb   : > { %18106 = vadd.xlane.f32.xlu0 %v18105_v39  ;;  %v17917_v48 = vadd.f32 %v17881_v31, %v17804_v57  ;;  %v17724_v41 = vadd.f32 %v17688_v3, %v17611_v32  ;;  %v17501_v22 = vadd.f32 %v17465_v0, %v17422_v11  ;;  %v17578_v34 = vmul.f32 %v29899_v17, %v17537_v6  ;;  %v30066_v57 = vld [vmem:[#allocation2 + $0xea] sm:$0xff] }
 0xedc   : > { %v17691_v58 = vmul.f32 %v29906_v55, %v17650_v37  ;;  %v17308_v62 = vadd.f32 %v17272_v61, %v17195_v63  ;;  %v17385_v18 = vmul.f32 %v29881_v51, %v30009_v46  ;;  %v17464_v15 = vmul.f32 %v29885_v12, %v30035_v21  ;;  %v30070_v63 = vld [vmem:[#allocation2 + $0x104] sm:$0xff] }
 0xedd   : > { %v18030_v27 = vadd.f32 %v17994_v24, %v17917_v48  ;;  %v17803_v30 = vadd.f32 %v17767_v35, %v17724_v41  ;;  %v17614_v50 = vadd.f32 %v17578_v34, %v17501_v22  ;;  %v17770_v56 = vmul.f32 %v29910_v49, %v30040_v5  ;;  %v17159_v41 = vld [vmem:[#allocation2 + $0xf0] sm:$0xff] }
 0xede   : > { %v17421_v19 = vadd.f32 %v17385_v18, %v17308_v62  ;;  %v17577_v37 = vmul.f32 %v29899_v17, %v17536_v59  ;;  %v17198_v47 = vmul.f32 %v29867_v10, %v17157_v43  ;;  %v17275_v46 = vmul.f32 %v29874_v42, %v17234_v16  ;;  %v17236_v22 = vld [vmem:[#allocation2 + $0xf1] sm:$0xff] }
 0xedf   : > { %v18114_v23 = vsel %vm454_vm4, %v18030_v27, 0.0  ;;  %v17916_v36 = vadd.f32 %v17880_v7, %v17803_v30  ;;  %v17727_v4 = vadd.f32 %v17691_v58, %v17614_v50  ;;  %v17690_v54 = vmul.f32 %v29906_v55, %v17649_v2  ;;  %v17539_v2 = vld [vmem:[#allocation2 + $0xf3] sm:$0xff]  ;;  %v17538_v58 = vld [vmem:[#allocation2 + $0xeb] sm:$0xff]  ;;  %v30083_v30 = vld [vmem:[#allocation2 + $0x102] sm:$0xff] }
 0xee0   : > { %18115 = vadd.xlane.f32.xlu1 %v18114_v23  ;;  %v17500_v3 = vadd.f32 %v17464_v15, %v17421_v19  ;;  %v17311_v60 = vadd.f32 %v17275_v46, %v17198_v47  ;;  %v17388_v40 = vmul.f32 %v29881_v51, %v30022_v53  ;;  %v17467_v44 = vmul.f32 %v29885_v12, %v30051_v1 }
 0xee1   : > { %v18029_v38 = vadd.f32 %v17993_v33, %v17916_v36  ;;  %v17806_v28 = vadd.f32 %v17770_v56, %v17727_v4  ;;  %v17883_v0 = vmul.f32 %v29914_v20, %v17842_v26  ;;  %v17996_v25 = vmul.f32 %v29930_v29, %v17955_v14  ;;  %v17844_v56 = vld [vmem:[#allocation2 + $0x105] sm:$0xff] }
 0xee2   : > { %v17613_v31 = vadd.f32 %v17577_v37, %v17500_v3  ;;  %v17769_v24 = vmul.f32 %v29910_v49, %v17651_v8  ;;  %v17424_v35 = vadd.f32 %v17388_v40, %v17311_v60  ;;  %v17197_v6 = vmul.f32 %v29867_v10, %v17156_v45  ;;  %v17957_v26 = vld [vmem:[#allocation2 + $0x106] sm:$0xff] }
 0xee3   : > { %v18111_v53 = vsel %vm454_vm4, %v18029_v38, 0.0  ;;  %v17919_v32 = vadd.f32 %v17883_v0, %v17806_v28  ;;  %v17882_v11 = vmul.f32 %v29914_v20, %v17841_v52  ;;  %v17274_v39 = vmul.f32 %v29874_v42, %v17233_v13  ;;  %v17158_v36 = vld [vmem:[#allocation2 + $0xe8] sm:$0xff]  ;;  %v17956_v28 = vld [vmem:[#allocation2 + $0xfe] sm:$0xff] }
 0xee4   : > { %18112 = vadd.xlane.f32.xlu0 %v18111_v53  ;;  %v17726_v7 = vadd.f32 %v17690_v54, %v17613_v31  ;;  %v17995_v33 = vmul.f32 %v29930_v29, %v17954_v9  ;;  %v17503_v61 = vadd.f32 %v17467_v44, %v17424_v35  ;;  %v17580_v48 = vmul.f32 %v29899_v17, %v17539_v2  ;;  %v17843_v54 = vld [vmem:[#allocation2 + $0xfd] sm:$0xff]  ;;  %v17235_v60 = vld [vmem:[#allocation2 + $0xe9] sm:$0xff] }
 0xee5   : > { %v18032_v34 = vadd.f32 %v17996_v25, %v17919_v32  ;;  %v17310_v59 = vadd.f32 %v17274_v39, %v17197_v6  ;;  %v17387_v43 = vmul.f32 %v29881_v51, %v30035_v21  ;;  %v17466_v16 = vmul.f32 %v29885_v12, %v30066_v57  ;;  %v17541_v0 = vld [vmem:[#allocation2 + $0x103] sm:$0xff]  ;;  %v30098_v31 = vld [vmem:[#allocation2 + $0xfa] sm:$0xff] }
 0xee6   : > { %v17805_v62 = vadd.f32 %v17769_v24, %v17726_v7  ;;  %v17616_v18 = vadd.f32 %v17580_v48, %v17503_v61  ;;  %v17693_v15 = vmul.f32 %v29906_v55, %v30040_v5  ;;  %v17772_v27 = vmul.f32 %v29910_v49, %v30070_v63  ;;  %v17653_v5 = vld [vmem:[#allocation2 + $0xfc] sm:$0xff]  ;;  %v30102_v6 = vld [vmem:[#allocation2 + $0x114] sm:$0xff] }
 0xee7   : > { %v18120_v50 = vsel %vm454_vm4, %v18032_v34, 0.0  ;;  %v17423_v14 = vadd.f32 %v17387_v43, %v17310_v59  ;;  %v17200_v21 = vmul.f32 %v29867_v10, %v17159_v41  ;;  %v17277_v19 = vmul.f32 %v29874_v42, %v17236_v22  ;;  %v17238_v61 = vld [vmem:[#allocation2 + $0x101] sm:$0xff] }
 0xee8   : > { %18121 = vadd.xlane.f32.xlu1 %v18120_v50  ;;  %v17918_v37 = vadd.f32 %v17882_v11, %v17805_v62  ;;  %v17729_v47 = vadd.f32 %v17693_v15, %v17616_v18  ;;  %v17579_v46 = vmul.f32 %v29899_v17, %v17538_v58  ;;  %v17692_v23 = vmul.f32 %v29906_v55, %v17651_v8  ;;  %v17540_v59 = vld [vmem:[#allocation2 + $0xfb] sm:$0xff]  ;;  %v30115_v18 = vld [vmem:[#allocation2 + $0x112] sm:$0xff] }
 0xee9   : > { %v17502_v4 = vadd.f32 %v17466_v16, %v17423_v14  ;;  %v17313_v45 = vadd.f32 %v17277_v19, %v17200_v21  ;;  %v17390_v3 = vmul.f32 %v29881_v51, %v30051_v1  ;;  %v17469_v52 = vmul.f32 %v29885_v12, %v30083_v30  ;;  %v17959_v50 = vld [vmem:[#allocation2 + $0x116] sm:$0xff] }
 0xeea   : > { %v18031_v40 = vadd.f32 %v17995_v33, %v17918_v37  ;;  %v17808_v44 = vadd.f32 %v17772_v27, %v17729_v47  ;;  %v17885_v13 = vmul.f32 %v29914_v20, %v17844_v56  ;;  %v17998_v38 = vmul.f32 %v29930_v29, %v17957_v26  ;;  %v17161_v33 = vld [vmem:[#allocation2 + $0x100] sm:$0xff]  ;;  %v17846_v27 = vld [vmem:[#allocation2 + $0x115] sm:$0xff] }
 0xeeb   : > { %v17615_v8 = vadd.f32 %v17579_v46, %v17502_v4  ;;  %v17771_v25 = vmul.f32 %v29910_v49, %v17653_v5  ;;  %v17426_v9 = vadd.f32 %v17390_v3, %v17313_v45  ;;  %v17199_v2 = vmul.f32 %v29867_v10, %v17158_v36  ;;  %v17160_v47 = vld [vmem:[#allocation2 + $0xf8] sm:$0xff] }
 0xeec   : > { %v18117_v1 = vsel %vm454_vm4, %v18031_v40, 0.0  ;;  %v17921_v24 = vadd.f32 %v17885_v13, %v17808_v44  ;;  %v17884_v35 = vmul.f32 %v29914_v20, %v17843_v54  ;;  %v17276_v53 = vmul.f32 %v29874_v42, %v17235_v60  ;;  %v17237_v45 = vld [vmem:[#allocation2 + $0xf9] sm:$0xff]  ;;  %v17958_v44 = vld [vmem:[#allocation2 + $0x10e] sm:$0xff] }
 0xeed   : > { %18118 = vadd.xlane.f32.xlu0 %v18117_v1  ;;  %v17728_v32 = vadd.f32 %v17692_v23, %v17615_v8  ;;  %v17997_v11 = vmul.f32 %v29930_v29, %v17956_v28  ;;  %v17505_v39 = vadd.f32 %v17469_v52, %v17426_v9  ;;  %v17582_v7 = vmul.f32 %v29899_v17, %v17541_v0  ;;  %v17845_v23 = vld [vmem:[#allocation2 + $0x10d] sm:$0xff] }
 0xeee   : > { %v18034_v48 = vadd.f32 %v17998_v38, %v17921_v24  ;;  %v17312_v41 = vadd.f32 %v17276_v53, %v17199_v2  ;;  %v17389_v22 = vmul.f32 %v29881_v51, %v30066_v57  ;;  %v17468_v34 = vmul.f32 %v29885_v12, %v30098_v31  ;;  %v17543_v13 = vld [vmem:[#allocation2 + $0x113] sm:$0xff]  ;;  %v17352_v8 = vld [vmem:[#allocation2 + $0x10a] sm:$0xff] }
 0xeef   : > { %v17807_v43 = vadd.f32 %v17771_v25, %v17728_v32  ;;  %v17618_v16 = vadd.f32 %v17582_v7, %v17505_v39  ;;  %v17695_v58 = vmul.f32 %v29906_v55, %v30070_v63  ;;  %v17774_v62 = vmul.f32 %v29910_v49, %v30102_v6  ;;  %v17655_v63 = vld [vmem:[#allocation2 + $0x10c] sm:$0xff]  ;;  %v30132_v2 = vld [vmem:[#allocation2 + $0x124] sm:$0xff] }
 0xef0   : > { %v18126_v15 = vsel %vm454_vm4, %v18034_v48, 0.0  ;;  %v17425_v56 = vadd.f32 %v17389_v22, %v17312_v41  ;;  %v17202_v57 = vmul.f32 %v29867_v10, %v17161_v33  ;;  %v17279_v26 = vmul.f32 %v29874_v42, %v17238_v61  ;;  %v17239_v39 = vld [vmem:[#allocation2 + $0x109] sm:$0xff] }
 0xef1   : > { %18127 = vadd.xlane.f32.xlu1 %v18126_v15  ;;  %v17920_v14 = vadd.f32 %v17884_v35, %v17807_v43  ;;  %v17731_v21 = vadd.f32 %v17695_v58, %v17618_v16  ;;  %v17581_v19 = vmul.f32 %v29899_v17, %v17540_v59  ;;  %v17694_v37 = vmul.f32 %v29906_v55, %v17653_v5  ;;  %v17542_v41 = vld [vmem:[#allocation2 + $0x10b] sm:$0xff]  ;;  %v30144_v16 = vld [vmem:[#allocation2 + $0x11a] sm:$0xff] }
 0xef2   : > { %v17504_v46 = vadd.f32 %v17468_v34, %v17425_v56  ;;  %v17315_v36 = vadd.f32 %v17279_v26, %v17202_v57  ;;  %v17392_v4 = vmul.f32 %v29881_v51, %v30083_v30  ;;  %v17471_v54 = vmul.f32 %v29885_v12, %v30115_v18  ;;  %v17657_v26 = vld [vmem:[#allocation2 + $0x11c] sm:$0xff] }
 0xef3   : > { %v18033_v3 = vadd.f32 %v17997_v11, %v17920_v14  ;;  %v17810_v52 = vadd.f32 %v17774_v62, %v17731_v21  ;;  %v17887_v60 = vmul.f32 %v29914_v20, %v17846_v27  ;;  %v18000_v40 = vmul.f32 %v29930_v29, %v17959_v50  ;;  %v17162_v11 = vld [vmem:[#allocation2 + $0x108] sm:$0xff]  ;;  %v17163_v14 = vld [vmem:[#allocation2 + $0x110] sm:$0xff] }
 0xef4   : > { %v17617_v5 = vadd.f32 %v17581_v19, %v17504_v46  ;;  %v17773_v38 = vmul.f32 %v29910_v49, %v17655_v63  ;;  %v17428_v28 = vadd.f32 %v17392_v4, %v17315_v36  ;;  %v17201_v0 = vmul.f32 %v29867_v10, %v17160_v47  ;;  %v17848_v62 = vld [vmem:[#allocation2 + $0x125] sm:$0xff] }
 0xef5   : > { %v18123_v30 = vsel %vm454_vm4, %v18033_v3, 0.0  ;;  %v17923_v25 = vadd.f32 %v17887_v60, %v17810_v52  ;;  %v17886_v9 = vmul.f32 %v29914_v20, %v17845_v23  ;;  %v17278_v1 = vmul.f32 %v29874_v42, %v17237_v45  ;;  %v17961_v21 = vld [vmem:[#allocation2 + $0x126] sm:$0xff]  ;;  %v17240_v23 = vld [vmem:[#allocation2 + $0x111] sm:$0xff]  ;;  %v17544_v45 = vld [vmem:[#allocation2 + $0x11b] sm:$0xff] }
 0xef6   : > { %18124 = vadd.xlane.f32.xlu0 %v18123_v30  ;;  %v17730_v24 = vadd.f32 %v17694_v37, %v17617_v5  ;;  %v17999_v35 = vmul.f32 %v29930_v29, %v17958_v44  ;;  %v17507_v53 = vadd.f32 %v17471_v54, %v17428_v28  ;;  %v17584_v32 = vmul.f32 %v29899_v17, %v17543_v13  ;;  %v17960_v28 = vld [vmem:[#allocation2 + $0x11e] sm:$0xff] }
 0xef7   : > { %v18036_v7 = vadd.f32 %v18000_v40, %v17923_v25  ;;  %v17314_v33 = vadd.f32 %v17278_v1, %v17201_v0  ;;  %v17391_v61 = vmul.f32 %v29881_v51, %v30098_v31  ;;  %v17470_v48 = vmul.f32 %v29885_v12, %v17352_v8  ;;  %v17432_v40 = vld [vmem:[#allocation2 + $0x122] sm:$0xff]  ;;  %v17164_v1 = vld [vmem:[#allocation2 + $0x118] sm:$0xff] }
 0xef8   : > { %v17809_v22 = vadd.f32 %v17773_v38, %v17730_v24  ;;  %v17620_v34 = vadd.f32 %v17584_v32, %v17507_v53  ;;  %v17697_v59 = vmul.f32 %v29906_v55, %v30102_v6  ;;  %v17776_v43 = vmul.f32 %v29910_v49, %v30132_v2  ;;  %v17847_v38 = vld [vmem:[#allocation2 + $0x11d] sm:$0xff]  ;;  %v17659_v53 = vld [vmem:[#allocation2 + $0x12c] sm:$0xff] }
 0xef9   : > { %v18132_v58 = vsel %vm454_vm4, %v18036_v7, 0.0  ;;  %v17427_v15 = vadd.f32 %v17391_v61, %v17314_v33  ;;  %v17203_v27 = vmul.f32 %v29867_v10, %v17162_v11  ;;  %v17280_v31 = vmul.f32 %v29874_v42, %v17239_v39  ;;  %v17241_v24 = vld [vmem:[#allocation2 + $0x119] sm:$0xff]  ;;  %v17545_v7 = vld [vmem:[#allocation2 + $0x123] sm:$0xff] }
 0xefa   : > { %18133 = vadd.xlane.f32.xlu1 %v18132_v58  ;;  %v17922_v50 = vadd.f32 %v17886_v9, %v17809_v22  ;;  %v17733_v56 = vadd.f32 %v17697_v59, %v17620_v34  ;;  %v17583_v57 = vmul.f32 %v29899_v17, %v17542_v41  ;;  %v17696_v6 = vmul.f32 %v29906_v55, %v17655_v63  ;;  %v17433_v22 = vld [vmem:[#allocation2 + $0x12a] sm:$0xff] }
 0xefb   : > { %v17506_v19 = vadd.f32 %v17470_v48, %v17427_v15  ;;  %v17316_v37 = vadd.f32 %v17280_v31, %v17203_v27  ;;  %v17393_v47 = vmul.f32 %v29881_v51, %v17352_v8  ;;  %v17472_v46 = vmul.f32 %v29885_v12, %v30144_v16  ;;  %v17849_v59 = vld [vmem:[#allocation2 + $0x12d] sm:$0xff] }
 0xefc   : > { %v18035_v36 = vadd.f32 %v17999_v35, %v17922_v50  ;;  %v17812_v4 = vadd.f32 %v17776_v43, %v17733_v56  ;;  %v17889_v54 = vmul.f32 %v29914_v20, %v17848_v62  ;;  %v17775_v52 = vmul.f32 %v29910_v49, %v17657_v26  ;;  %v17737_v50 = vld [vmem:[#allocation2 + $0x134] sm:$0xff] }
 0xefd   : > { %v17619_v3 = vadd.f32 %v17583_v57, %v17506_v19  ;;  %v17429_v60 = vadd.f32 %v17393_v47, %v17316_v37  ;;  %v17204_v63 = vmul.f32 %v29867_v10, %v17163_v14  ;;  %v18002_v5 = vmul.f32 %v29930_v29, %v17961_v21  ;;  %v17962_v56 = vld [vmem:[#allocation2 + $0x12e] sm:$0xff] }
 0xefe   : > { %v18129_v44 = vsel %vm454_vm4, %v18035_v36, 0.0  ;;  %v17925_v13 = vadd.f32 %v17889_v54, %v17812_v4  ;;  %v17281_v0 = vmul.f32 %v29874_v42, %v17240_v23  ;;  %v17585_v25 = vmul.f32 %v29899_v17, %v17544_v45  ;;  %v17850_v19 = vld [vmem:[#allocation2 + $0x135] sm:$0xff]  ;;  %v17546_v37 = vld [vmem:[#allocation2 + $0x12b] sm:$0xff] }
 0xeff   : > { %18130 = vadd.xlane.f32.xlu0 %v18129_v44  ;;  %v17732_v8 = vadd.f32 %v17696_v6, %v17619_v3  ;;  %v17508_v30 = vadd.f32 %v17472_v46, %v17429_v60  ;;  %v17698_v9 = vmul.f32 %v29906_v55, %v17657_v26  ;;  %v17394_v11 = vmul.f32 %v29881_v51, %v30115_v18  ;;  %v17963_v36 = vld [vmem:[#allocation2 + $0x136] sm:$0xff] }
 0xf00   : > { %v18038_v35 = vadd.f32 %v18002_v5, %v17925_v13  ;;  %v17317_v32 = vadd.f32 %v17281_v0, %v17204_v63  ;;  %v17473_v39 = vmul.f32 %v29885_v12, %v17432_v40  ;;  %v17888_v61 = vmul.f32 %v29914_v20, %v17847_v38  ;;  %v17851_v40 = vld [vmem:[#allocation2 + $0x13d] sm:$0xff] }
 0xf01   : > { %v17811_v33 = vadd.f32 %v17775_v52, %v17732_v8  ;;  %v18001_v48 = vmul.f32 %v29930_v29, %v17960_v28  ;;  %v17621_v41 = vadd.f32 %v17585_v25, %v17508_v30  ;;  %v17205_v58 = vmul.f32 %v29867_v10, %v17164_v1  ;;  %v17964_v0 = vld [vmem:[#allocation2 + $0x13e] sm:$0xff] }
 0xf02   : > { %v18138_v34 = vsel %vm454_vm4, %v18038_v35, 0.0  ;;  %v17430_v43 = vadd.f32 %v17394_v11, %v17317_v32  ;;  %v17282_v62 = vmul.f32 %v29874_v42, %v17241_v24  ;;  %v17777_v27 = vmul.f32 %v29910_v49, %v17659_v53  ;;  %v18047_v11 = vpop.xlane.xlu1 %18046 }
 0xf03   : > { %18139 = vadd.xlane.f32.xlu1 %v18138_v34  ;;  %v17924_v18 = vadd.f32 %v17888_v61, %v17811_v33  ;;  %v17734_v15 = vadd.f32 %v17698_v9, %v17621_v41  ;;  %v17586_v31 = vmul.f32 %v29899_v17, %v17545_v7  ;;  %v17395_v6 = vmul.f32 %v29881_v51, %v30144_v16  ;;  %v25963_v41 = vld [vmem:[%s26674_s19 + $0x18] sm:$0xff] }
 0xf04   : > { %v17509_v57 = vadd.f32 %v17473_v39, %v17430_v43  ;;  %v17318_v26 = vadd.f32 %v17282_v62, %v17205_v58  ;;  %v17474_v14 = vmul.f32 %v29885_v12, %v17433_v22  ;;  %v17890_v42 = vmul.f32 %v29914_v20, %v17849_v59  ;;  %v17738_v12 = vld [vmem:[#allocation2 + $0x13c] sm:$0xff]  ;;  %v25964_v59 = vld [vmem:[%s26674_s19 + $0x8] sm:$0xff] }
 0xf05   : > { %v18037_v21 = vadd.f32 %v18001_v48, %v17924_v18  ;;  %v17813_v10 = vadd.f32 %v17777_v27, %v17734_v15  ;;  %v17699_v46 = vmul.f32 %v29906_v55, %v30132_v2  ;;  %v17778_v23 = vmul.f32 %v29910_v49, %v17737_v50  ;;  %v25965_v62 = vld [vmem:[%s26674_s19 + $0x28] sm:$0xff]  ;;  %v25966_v15 = vld [vmem:[%s26674_s19 + $0x20] sm:$0xff]  ;;  %v25967_v50 = vld [vmem:[%s26674_s19 + $0x38] sm:$0xff] }
 0xf06   : > { %v17622_v47 = vadd.f32 %v17586_v31, %v17509_v57  ;;  %v17431_v4 = vadd.f32 %v17395_v6, %v17318_v26  ;;  %v18003_v51 = vmul.f32 %v29930_v29, %v17962_v56  ;;  %v17891_v3 = vmul.f32 %v29914_v20, %v17850_v19  ;;  %v25968_v57 = vld [vmem:[%s26674_s19 + $0x30] sm:$0xff] }
 0xf07   : > { %v18135_v54 = vsel %vm454_vm4, %v18037_v21, 0.0  ;;  %v17926_v45 = vadd.f32 %v17890_v42, %v17813_v10  ;;  %v17587_v60 = vmul.f32 %v29899_v17, %v17546_v37  ;;  %v18004_v2 = vmul.f32 %v29930_v29, %v17963_v36  ;;  %v25969_v21 = vld [vmem:[%s26674_s19 + $0x48] sm:$0xff]  ;;  %v25970_v42 = vld [vmem:[%s26674_s19 + $0x40] sm:$0xff]  ;;  %v25971_v37 = vld [vmem:[%s26674_s19 + $0x50] sm:$0xff] }
 0xf08   : > { %18136 = vadd.xlane.f32.xlu0 %v18135_v54  ;;  %v17735_v16 = vadd.f32 %v17699_v46, %v17622_v47  ;;  %v17510_v52 = vadd.f32 %v17474_v14, %v17431_v4  ;;  %v17700_v5 = vmul.f32 %v29906_v55, %v17659_v53  ;;  %v17779_v38 = vmul.f32 %v29910_v49, %v17738_v12  ;;  %v18044_v55 = vpop.xlane.xlu0 %18043  ;;  %v25972_v36 = vld [vmem:[%s26674_s19 + $0x58] sm:$0xff]  ;;  %v25973_v54 = vld [vmem:[%s26674_s19 + $0x60] sm:$0xff]  ;;  %v25974_v12 = vld [vmem:[%s26674_s19 + $0x70] sm:$0xff] }
 0xf09   : > { %v18039_v63 = vadd.f32 %v18003_v51, %v17926_v45  ;;  %v17892_v25 = vmul.f32 %v29914_v20, %v17851_v40  ;;  %v18005_v1 = vmul.f32 %v29930_v29, %v17964_v0  ;;  %v25961_v20 = vld [vmem:[%s26674_s19] sm:$0xff]  ;;  %v25962_v29 = vld [vmem:[%s26674_s19 + $0x10] sm:$0xff]  ;;  %v18151_v43 = vadd.f32 %v25964_v59, %v18047_v11 }
 0xf0a   : > { %v17814_v44 = vadd.f32 %v17778_v23, %v17735_v16  ;;  %v17623_v13 = vadd.f32 %v17587_v60, %v17510_v52  ;;  %v18150_v7 = vadd.f32 %v25961_v20, %v18044_v55  ;;  %v25975_v52 = vld [vmem:[%s26674_s19 + $0x68] sm:$0xff] }
 0xf0b   : > { %v18141_v28 = vsel %vm454_vm4, %v18039_v63, 0.0 }
 0xf0c   : > { %18142 = vadd.xlane.f32.xlu0 %v18141_v28  ;;  %v17927_v8 = vadd.f32 %v17891_v3, %v17814_v44  ;;  %v17736_v30 = vadd.f32 %v17700_v5, %v17623_v13  ;;  %v18050_v32 = vpop.xlane.xlu0 %18049  ;;  %v18056_v33 = vpop.xlane.xlu1 %18055  ;;  %v25977_v13 = vld [vmem:[%s26674_s19 + $0x78] sm:$0xff]  ;;  %v25978_v28 = vld [vmem:[%s26674_s19 + $0x90] sm:$0xff] }
 0xf0d   : > { %v18152_v61 = vadd.f32 %v25962_v29, %v18050_v32  ;;  %v18154_v27 = vadd.f32 %v25966_v15, %v18056_v33  ;;  %v25984_v33 = vld [vmem:[%s26674_s19 + $0xc0] sm:$0xff] }
 0xf0e   : > { %v18040_v17 = vadd.f32 %v18004_v2, %v17927_v8  ;;  %v17815_v9 = vadd.f32 %v17779_v38, %v17736_v30  ;;  %v25976_v2 = vld [vmem:[%s26674_s19 + $0x80] sm:$0xff]  ;;  %v25979_v30 = vld [vmem:[%s26674_s19 + $0x88] sm:$0xff] }
 0xf0f   : > { %v25988_v15 = vld [vmem:[%s26674_s19 + $0xe0] sm:$0xff] }
 0xf10   : > { %v18144_v24 = vsel %vm454_vm4, %v18040_v17, 0.0  ;;  %v17928_v35 = vadd.f32 %v17892_v25, %v17815_v9  ;;  %v18053_v39 = vpop.xlane.xlu0 %18052  ;;  %v25980_v9 = vld [vmem:[%s26674_s19 + $0xa0] sm:$0xff] }
 0xf11   : > { %18145 = vadd.xlane.f32.xlu1 %v18144_v24  ;;  %v18153_v22 = vadd.f32 %v25963_v41, %v18053_v39  ;;  %v25983_v39 = vld [vmem:[%s26674_s19 + $0xa8] sm:$0xff] }
 0xf12   : > { %v18041_v49 = vadd.f32 %v18005_v1, %v17928_v35  ;;  %v25981_v35 = vld [vmem:[%s26674_s19 + $0x98] sm:$0xff] }
 0xf14   : > { %v18147_v53 = vsel %vm454_vm4, %v18041_v49, 0.0  ;;  %vm18330_vm4 = vcmask 7168  }
 0xf15   : > { %18148 = vadd.xlane.f32.xlu0 %v18147_v53  ;;  %v25982_v53 = vld [vmem:[%s26674_s19 + $0xb0] sm:$0xff] }
 0xf17   : > { %v18062_v34 = vpop.xlane.xlu1 %18061 }
 0xf18   : > { %v18156_v26 = vadd.f32 %v25968_v57, %v18062_v34  ;;  %v25986_v34 = vld [vmem:[%s26674_s19 + $0xd0] sm:$0xff] }
 0xf1b   : > { %v18059_v48 = vpop.xlane.xlu0 %18058 }
 0xf1c   : > { %v18155_v18 = vadd.f32 %v25965_v62, %v18059_v48  ;;  %v25985_v48 = vld [vmem:[%s26674_s19 + $0xb8] sm:$0xff] }
 0xf20   : > { %v18068_v31 = vpop.xlane.xlu1 %18067 }
 0xf21   : > { %v18158_v19 = vadd.f32 %v25970_v42, %v18068_v31 }
 0xf22   : > { %18222 = vrot.lane.b32.xlu1 %v18150_v7, %s26320_s27 }
 0xf24   : > { %v18065_v58 = vpop.xlane.xlu0 %18064 }
 0xf25   : > { %v18157_v56 = vadd.f32 %v25967_v50, %v18065_v58  ;;  %v25987_v58 = vld [vmem:[%s26674_s19 + $0xc8] sm:$0xff]  ;;  %v25989_v50 = vld [vmem:[%s26674_s19 + $0xd8] sm:$0xff] }
 0xf26   : > { %18226 = vrot.lane.b32.xlu1 %v18152_v61, %s26320_s27 }
 0xf2a   : > { %18228 = vrot.lane.b32.xlu1 %v18153_v22, %s26320_s27 }
 0xf2b   : > { %18224 = vrot.lane.b32.xlu0 %v18151_v43, %s26320_s27  ;;  %v18074_v14 = vpop.xlane.xlu1 %18073 }
 0xf2c   : > { %v18160_v47 = vadd.f32 %v25971_v37, %v18074_v14 }
 0xf2e   : > { %18232 = vrot.lane.b32.xlu1 %v18155_v18, %s26320_s27  ;;  %v18071_v6 = vpop.xlane.xlu0 %18070 }
 0xf2f   : > { %18230 = vrot.lane.b32.xlu0 %v18154_v27, %s26320_s27  ;;  %v18159_v10 = vadd.f32 %v25969_v21, %v18071_v6  ;;  %v25991_v21 = vld [vmem:[%s26674_s19 + $0xe8] sm:$0xff] }
 0xf32   : > { %18236 = vrot.lane.b32.xlu1 %v18157_v56, %s26320_s27 }
 0xf33   : > { %18234 = vrot.lane.b32.xlu0 %v18156_v26, %s26320_s27  ;;  %v25990_v26 = vld [vmem:[%s26674_s19 + $0xf0] sm:$0xff] }
 0xf34   : > { %v18080_v46 = vpop.xlane.xlu1 %18079 }
 0xf35   : > { %v18162_v45 = vadd.f32 %v25973_v54, %v18080_v46  ;;  %v25993_v46 = vld [vmem:[%s26674_s19 + $0xf8] sm:$0xff] }
 0xf36   : > { %18240 = vrot.lane.b32.xlu1 %v18159_v10, %s26320_s27 }
 0xf37   : > { %18238 = vrot.lane.b32.xlu0 %v18158_v19, %s26320_s27  ;;  %v18077_v23 = vpop.xlane.xlu0 %18076  ;;  %v25992_v19 = vld [vmem:[%s26674_s19 + $0x100] sm:$0xff] }
 0xf38   : > { %v18161_v4 = vadd.f32 %v25972_v36, %v18077_v23 }
 0xf3a   : > { %18244 = vrot.lane.b32.xlu1 %v18161_v4, %s26320_s27  ;;  %v25994_v4 = vld [vmem:[%s26674_s19 + $0x108] sm:$0xff] }
 0xf3b   : > { %18242 = vrot.lane.b32.xlu0 %v18160_v47, %s26320_s27 }
 0xf3d   : > { %v18086_v51 = vpop.xlane.xlu1 %18085 }
 0xf3e   : > { %v18164_v16 = vadd.f32 %v25974_v12, %v18086_v51  ;;  %v25995_v51 = vld [vmem:[%s26674_s19 + $0x110] sm:$0xff] }
 0xf3f   : > { %18246 = vrot.lane.b32.xlu0 %v18162_v45, %s26320_s27 }
 0xf42   : > { %v18083_v3 = vpop.xlane.xlu0 %18082 }
 0xf43   : > { %v18163_v60 = vadd.f32 %v25975_v52, %v18083_v3  ;;  %18250 = vrot.lane.b32.xlu0 %v18164_v16, %s26320_s27  ;;  %v25996_v52 = vld [vmem:[%s26674_s19 + $0x118] sm:$0xff] }
 0xf45   : > { %18248 = vrot.lane.b32.xlu1 %v18163_v60, %s26320_s27 }
 0xf47   : > { %v18092_v63 = vpop.xlane.xlu1 %18091 }
 0xf48   : > { %v18166_v40 = vadd.f32 %v25976_v2, %v18092_v63 }
 0xf4a   : > { %18254 = vrot.lane.b32.xlu0 %v18166_v40, %s26320_s27 }
 0xf4b   : > { %v18089_v44 = vpop.xlane.xlu0 %18088 }
 0xf4c   : > { %v18165_v5 = vadd.f32 %v25977_v13, %v18089_v44 }
 0xf4e   : > { %18252 = vrot.lane.b32.xlu1 %v18165_v5, %s26320_s27 }
 0xf51   : > { %v18098_v38 = vpop.xlane.xlu1 %18097 }
 0xf52   : > { %v18168_v0 = vadd.f32 %v25978_v28, %v18098_v38 }
 0xf54   : > { %18258 = vrot.lane.b32.xlu0 %v18168_v0, %s26320_s27 }
 0xf55   : > { %v18095_v8 = vpop.xlane.xlu0 %18094 }
 0xf56   : > { %v18167_v25 = vadd.f32 %v25979_v30, %v18095_v8 }
 0xf58   : > { %18256 = vrot.lane.b32.xlu1 %v18167_v25, %s26320_s27 }
 0xf5a   : > { %v18104_v17 = vpop.xlane.xlu1 %18103 }
 0xf5b   : > { %v18170_v1 = vadd.f32 %v25980_v9, %v18104_v17 }
 0xf5d   : > { %18262 = vrot.lane.b32.xlu0 %v18170_v1, %s26320_s27 }
 0xf5e   : > { %v18101_v24 = vpop.xlane.xlu0 %18100 }
 0xf5f   : > { %v18169_v55 = vadd.f32 %v25981_v35, %v18101_v24 }
 0xf61   : > { %18260 = vrot.lane.b32.xlu1 %v18169_v55, %s26320_s27 }
 0xf65   : > { %v18110_v49 = vpop.xlane.xlu1 %18109 }
 0xf66   : > { %v18172_v32 = vadd.f32 %v25982_v53, %v18110_v49 }
 0xf68   : > { %18266 = vrot.lane.b32.xlu0 %v18172_v32, %s26320_s27  ;;  %v18107_v11 = vpop.xlane.xlu0 %18106 }
 0xf69   : > { %v18171_v20 = vadd.f32 %v25983_v39, %v18107_v11 }
 0xf6b   : > { %18264 = vrot.lane.b32.xlu1 %v18171_v20, %s26320_s27 }
 0xf6d   : > { %v18116_v7 = vpop.xlane.xlu1 %18115 }
 0xf6e   : > { %v18174_v29 = vadd.f32 %v25984_v33, %v18116_v7 }
 0xf70   : > { %18270 = vrot.lane.b32.xlu0 %v18174_v29, %s26320_s27 }
 0xf71   : > { %v18113_v61 = vpop.xlane.xlu0 %18112 }
 0xf72   : > { %v18173_v41 = vadd.f32 %v25985_v48, %v18113_v61 }
 0xf74   : > { %18268 = vrot.lane.b32.xlu1 %v18173_v41, %s26320_s27 }
 0xf75   : > { %v18122_v22 = vpop.xlane.xlu1 %18121 }
 0xf76   : > { %v18176_v59 = vadd.f32 %v25986_v34, %v18122_v22 }
 0xf78   : > { %18274 = vrot.lane.b32.xlu0 %v18176_v59, %s26320_s27 }
 0xf7a   : > { %v18119_v43 = vpop.xlane.xlu0 %18118 }
 0xf7b   : > { %v18175_v62 = vadd.f32 %v25987_v58, %v18119_v43 }
 0xf7d   : > { %18272 = vrot.lane.b32.xlu1 %v18175_v62, %s26320_s27 }
 0xf7e   : > { %v18128_v18 = vpop.xlane.xlu1 %18127 }
 0xf7f   : > { %v18178_v27 = vadd.f32 %v25988_v15, %v18128_v18 }
 0xf81   : > { %18278 = vrot.lane.b32.xlu0 %v18178_v27, %s26320_s27 }
 0xf83   : > { %v18125_v31 = vpop.xlane.xlu0 %18124 }
 0xf84   : > { %v18177_v56 = vadd.f32 %v25989_v50, %v18125_v31 }
 0xf86   : > { %18276 = vrot.lane.b32.xlu1 %v18177_v56, %s26320_s27 }
 0xf87   : > { %v18134_v57 = vpop.xlane.xlu1 %18133 }
 0xf88   : > { %v18180_v6 = vadd.f32 %v25990_v26, %v18134_v57 }
 0xf8a   : > { %18282 = vrot.lane.b32.xlu0 %v18180_v6, %s26320_s27 }
 0xf8c   : > { %v18131_v14 = vpop.xlane.xlu0 %18130 }
 0xf8d   : > { %v18179_v10 = vadd.f32 %v25991_v21, %v18131_v14 }
 0xf8f   : > { %18280 = vrot.lane.b32.xlu1 %v18179_v10, %s26320_s27 }
 0xf90   : > { %v18140_v42 = vpop.xlane.xlu1 %18139 }
 0xf91   : > { %v18182_v37 = vadd.f32 %v25992_v19, %v18140_v42 }
 0xf93   : > { %18286 = vrot.lane.b32.xlu0 %v18182_v37, %s26320_s27 }
 0xf95   : > { %v18137_v47 = vpop.xlane.xlu0 %18136 }
 0xf96   : > { %v18181_v23 = vadd.f32 %v25993_v46, %v18137_v47 }
 0xf98   : > { %18284 = vrot.lane.b32.xlu1 %v18181_v23, %s26320_s27 }
 0xf99   : > { %v18143_v36 = vpop.xlane.xlu0 %18142 }
 0xf9a   : > { %v18183_v54 = vadd.f32 %v25994_v4, %v18143_v36 }
 0xf9c   : > { %18288 = vrot.lane.b32.xlu1 %v18183_v54, %s26320_s27 }
 0xf9e   : > { %v18146_v45 = vpop.xlane.xlu1 %18145 }
 0xf9f   : > { %v18184_v12 = vadd.f32 %v25995_v51, %v18146_v45 }
 0xfa1   : > { %18290 = vrot.lane.b32.xlu0 %v18184_v12, %s26320_s27 }
 0xfa2   : > { %v18149_v16 = vpop.xlane.xlu0 %18148  ;;  %v18223_v3 = vpop.permute.xlu1 %18222 }
 0xfa3   : > { %v18185_v60 = vadd.f32 %v25996_v52, %v18149_v16  ;;  %18331 = vst.msk [vmem:[%s30264_s26] sm:$0xff] %vm18330_vm4, %v18223_v3 }
 0xfa5   : > { %18292 = vrot.lane.b32.xlu1 %v18185_v60, %s26320_s27 }
 0xfa6   : > { %v18225_v63 = vpop.permute.xlu0 %18224  ;;  %v18227_v2 = vpop.permute.xlu1 %18226 }
 0xfa7   : > { %18332 = vst.msk [vmem:[%s30264_s26 + $0x8] sm:$0xff] %vm18330_vm4, %v18225_v63  ;;  %18333 = vst.msk [vmem:[%s30264_s26 + $0x10] sm:$0xff] %vm18330_vm4, %v18227_v2 }
 0xfaa   : > { %v18231_v40 = vpop.permute.xlu0 %18230  ;;  %v18229_v44 = vpop.permute.xlu1 %18228 }
 0xfab   : > { %18335 = vst.msk [vmem:[%s30264_s26 + $0x20] sm:$0xff] %vm18330_vm4, %v18231_v40  ;;  %18334 = vst.msk [vmem:[%s30264_s26 + $0x18] sm:$0xff] %vm18330_vm4, %v18229_v44 }
 0xfae   : > { %v18235_v13 = vpop.permute.xlu0 %18234  ;;  %v18233_v5 = vpop.permute.xlu1 %18232 }
 0xfaf   : > { %18337 = vst.msk [vmem:[%s30264_s26 + $0x30] sm:$0xff] %vm18330_vm4, %v18235_v13  ;;  %18336 = vst.msk [vmem:[%s30264_s26 + $0x28] sm:$0xff] %vm18330_vm4, %v18233_v5 }
 0xfb2   : > { %v18239_v38 = vpop.permute.xlu0 %18238  ;;  %v18237_v28 = vpop.permute.xlu1 %18236 }
 0xfb3   : > { %18339 = vst.msk [vmem:[%s30264_s26 + $0x40] sm:$0xff] %vm18330_vm4, %v18239_v38  ;;  %18338 = vst.msk [vmem:[%s30264_s26 + $0x38] sm:$0xff] %vm18330_vm4, %v18237_v28 }
 0xfb6   : > { %v18243_v0 = vpop.permute.xlu0 %18242  ;;  %v18241_v8 = vpop.permute.xlu1 %18240 }
 0xfb7   : > { %18341 = vst.msk [vmem:[%s30264_s26 + $0x50] sm:$0xff] %vm18330_vm4, %v18243_v0  ;;  %18340 = vst.msk [vmem:[%s30264_s26 + $0x48] sm:$0xff] %vm18330_vm4, %v18241_v8 }
 0xfba   : > { %v18247_v30 = vpop.permute.xlu0 %18246  ;;  %v18245_v25 = vpop.permute.xlu1 %18244 }
 0xfbb   : > { %18343 = vst.msk [vmem:[%s30264_s26 + $0x60] sm:$0xff] %vm18330_vm4, %v18247_v30  ;;  %18342 = vst.msk [vmem:[%s30264_s26 + $0x58] sm:$0xff] %vm18330_vm4, %v18245_v25 }
 0xfbe   : > { %v18251_v17 = vpop.permute.xlu0 %18250  ;;  %v18249_v9 = vpop.permute.xlu1 %18248 }
 0xfbf   : > { %18345 = vst.msk [vmem:[%s30264_s26 + $0x70] sm:$0xff] %vm18330_vm4, %v18251_v17  ;;  %18344 = vst.msk [vmem:[%s30264_s26 + $0x68] sm:$0xff] %vm18330_vm4, %v18249_v9 }
 0xfc2   : > { %v18255_v1 = vpop.permute.xlu0 %18254  ;;  %v18253_v24 = vpop.permute.xlu1 %18252 }
 0xfc3   : > { %18347 = vst.msk [vmem:[%s30264_s26 + $0x80] sm:$0xff] %vm18330_vm4, %v18255_v1  ;;  %18346 = vst.msk [vmem:[%s30264_s26 + $0x78] sm:$0xff] %vm18330_vm4, %v18253_v24 }
 0xfc6   : > { %v18259_v35 = vpop.permute.xlu0 %18258 }
 0xfc7   : > { %18349 = vst.msk [vmem:[%s30264_s26 + $0x90] sm:$0xff] %vm18330_vm4, %v18259_v35 }
 0xfca   : > { %v18257_v55 = vpop.permute.xlu1 %18256 }
 0xfcb   : > { %18348 = vst.msk [vmem:[%s30264_s26 + $0x88] sm:$0xff] %vm18330_vm4, %v18257_v55 }
 0xfcf   : > { %v18263_v49 = vpop.permute.xlu0 %18262 }
 0xfd0   : > { %18351 = vst.msk [vmem:[%s30264_s26 + $0xa0] sm:$0xff] %vm18330_vm4, %v18263_v49 }
 0xfd3   : > { %v18261_v53 = vpop.permute.xlu1 %18260 }
 0xfd4   : > { %18350 = vst.msk [vmem:[%s30264_s26 + $0x98] sm:$0xff] %vm18330_vm4, %v18261_v53 }
 0xfda   : > { %v18267_v32 = vpop.permute.xlu0 %18266 }
 0xfdb   : > { %18353 = vst.msk [vmem:[%s30264_s26 + $0xb0] sm:$0xff] %vm18330_vm4, %v18267_v32 }
 0xfdd   : > { %v18265_v11 = vpop.permute.xlu1 %18264 }
 0xfde   : > { %18352 = vst.msk [vmem:[%s30264_s26 + $0xa8] sm:$0xff] %vm18330_vm4, %v18265_v11 }
 0xfe2   : > { %v18271_v39 = vpop.permute.xlu0 %18270 }
 0xfe3   : > { %18355 = vst.msk [vmem:[%s30264_s26 + $0xc0] sm:$0xff] %vm18330_vm4, %v18271_v39 }
 0xfe6   : > { %v18269_v20 = vpop.permute.xlu1 %18268 }
 0xfe7   : > { %18354 = vst.msk [vmem:[%s30264_s26 + $0xb8] sm:$0xff] %vm18330_vm4, %v18269_v20 }
 0xfea   : > { %v18275_v7 = vpop.permute.xlu0 %18274 }
 0xfeb   : > { %18357 = vst.msk [vmem:[%s30264_s26 + $0xd0] sm:$0xff] %vm18330_vm4, %v18275_v7 }
 0xfef   : > { %v18273_v33 = vpop.permute.xlu1 %18272 }
 0xff0   : > { %18356 = vst.msk [vmem:[%s30264_s26 + $0xc8] sm:$0xff] %vm18330_vm4, %v18273_v33 }
 0xff3   : > { %v18279_v29 = vpop.permute.xlu0 %18278 }
 0xff4   : > { %18359 = vst.msk [vmem:[%s30264_s26 + $0xe0] sm:$0xff] %vm18330_vm4, %v18279_v29 }
 0xff8   : > { %v18277_v61 = vpop.permute.xlu1 %18276 }
 0xff9   : > { %18358 = vst.msk [vmem:[%s30264_s26 + $0xd8] sm:$0xff] %vm18330_vm4, %v18277_v61 }
 0xffc   : > { %v18283_v48 = vpop.permute.xlu0 %18282 }
 0xffd   : > { %18361 = vst.msk [vmem:[%s30264_s26 + $0xf0] sm:$0xff] %vm18330_vm4, %v18283_v48 }
0x1001   : > { %v18281_v41 = vpop.permute.xlu1 %18280 }
0x1002   : > { %18360 = vst.msk [vmem:[%s30264_s26 + $0xe8] sm:$0xff] %vm18330_vm4, %v18281_v41 }
0x1005   : > { %v18287_v22 = vpop.permute.xlu0 %18286 }
0x1006   : > { %18363 = vst.msk [vmem:[%s30264_s26 + $0x100] sm:$0xff] %vm18330_vm4, %v18287_v22 }
0x100a   : > { %v18285_v34 = vpop.permute.xlu1 %18284 }
0x100b   : > { %18362 = vst.msk [vmem:[%s30264_s26 + $0xf8] sm:$0xff] %vm18330_vm4, %v18285_v34 }
0x100e   : > { %v18289_v59 = vpop.permute.xlu1 %18288 }
0x100f   : > { %18364 = vst.msk [vmem:[%s30264_s26 + $0x108] sm:$0xff] %vm18330_vm4, %v18289_v59 }
0x1013   : > { %v18291_v43 = vpop.permute.xlu0 %18290 }
0x1014   : > { %18365 = vst.msk [vmem:[%s30264_s26 + $0x110] sm:$0xff] %vm18330_vm4, %v18291_v43 }
0x1017   : > { %v18293_v58 = vpop.permute.xlu1 %18292 }
0x1018   : > { %18366 = vst.msk [vmem:[%s30264_s26 + $0x118] sm:$0xff] %vm18330_vm4, %v18293_v58 }
0x1019   : > { %26236 = shalt.err (!%p26233_p10)
}
0x101a   : > { %s26237_s21 = scalar_lea.hbm %s30342_s20, 4608  ;;  %s26241_s27 = scalar_lea.hbm %s30399_s9, 9216 }
0x101b   : > { %p26238_p11 = scmp.ne.s32.totalorder %s30342_s20, %s26237_s21  ;;  %p26242_p9 = scmp.lt.u32.totalorder %s30342_s20, %s30399_s9 }
0x101c   : > { %p26243_p7 = scmp.lt.u32.totalorder %s26241_s27, %s26237_s21  ;;  %p26245_p12 = scmp.lt.u32.totalorder %s26237_s21, %s30342_s20 }
0x101d   : > { %p26239_p3 = pnand %p26238_p11, %p30537_p1 }
0x101e   : > { %p26244_p4 = por %p26243_p7, %p26242_p9 }
0x101f   : > { %p26240_p5 = pneg %p26239_p3 }
0x1020   : > { %p26246_p13 = por %p26245_p12, %p26244_p4 }
0x1022   : > { %p26247_p0 = pnand %p26246_p13, %p26240_p5 }
0x1024   : > { %26250 = shalt.err (!%p26247_p0)
}
0x1025   : > { %s26322_s29 = smov 128   ;;  %s26323_s10 = smov 8  }
0x1026   : > { %25855 = dma.vmem_to_hbm [thread:$0]  (%p30537_p1), %s30344_s1, 4608, %s30342_s20, %s18368_s2, %s26322_s29, %s26322_s29, %s26323_s10  }
0x1027 PF: > { %s18396_s8 = sand.u32 1, %s26293_s11   ;;  %p30538_p2 = scmp.ne.s32.totalorder %s30447_s30, 0 }
0x1028   : > { %p30539_p8 = scmp.ge.s32.totalorder %s26305_s14, 2  ;;  %s18397_s16 = scalar_lea.sflag [#allocation6], %s18396_s8 }
0x102a   : > { %p25884_p6 = pnand %p30539_p8, %p30538_p2 }
0x102c   : > { %26288 = dma.done.wait (!%p25884_p6), %s18397_s16, 4608  }
0x102d   : > { %26290 = vsyncadd (!%p25884_p6), %s18397_s16, 4294962688  ;;  %p27_p10 = scmp.ge.s32.totalorder %s26592_s28, 4   ;;  %s30540_s11 = smov %s26297_s12 }
0x102e   : > { %s30541_s12 = smov %s26301_s13  ;;  %s30542_s13 = smov %s26604_s23 }
0x102f   : > { %s30543_s14 = smov %s26592_s28  ;;  %29 = sbr.rel (!%p27_p10) target bundleno = 13 (0xd), region = 161 }
0x1036   :  { %18402 = vsyncpa [#allocation5], 1 }
0x1037   :  { %18404 = vsyncpa [#allocation5 + $0x1], 1 }
0x1038   :  { %18405 = vsyncpa [#allocation8], 1 }
0x1039   :  { %18406 = vsyncpa [#allocation11], 1 }
0x103a   :  { %18407 = vsyncpa [#allocation14], 1 }
0x103b   :  { %18408 = vsyncpa [#allocation17], 1 }
0x103c   :  { %18409 = vsyncpa [#allocation6], 1 }
0x103d   :  { %18411 = vsyncpa [#allocation6 + $0x1], 1 }

</bundles_post_ra>
